<compile_context>
chip_gen: v6e
topology: v6e:2x2x1
jax: 0.10.0
libtpu: 0.0.40
codegen_flags: <defaults>
</compile_context>

<pallas_src>
import jax
import jax.numpy as jnp
from jax.experimental import pallas as pl
from jax.experimental.pallas import tpu as pltpu  # noqa: F401  (kept for TPU-specific tuning)


def _round_up(n, m):
    return ((n + m - 1) // m) * m


# ----------------------------------------------------------------------------
# The fused STORN forward kernel (single invocation, everything resident in VMEM)
# ----------------------------------------------------------------------------

def _storn_kernel(
    # activations
    x_bt_ref,        # (Bp*Tp, X)   batch-major (row = b*Tp + t)
    xtm1_ref,        # (Tp*Bp, X)   time-major  (row = t*Bp + b), x_{t-1} with x_{-1}=0
    eps_bt_ref,      # (Bp*Tp, Z)   batch-major
    # inference weights
    w_x_g_ref, b_x_g_ref,                 # mlp_x_g
    wih_g_ref, whh_g_ref, b_g_ref,        # rnn_g  (W_ih: (dense,4H), W_hh: (H,4H), b = b_ih+b_hh)
    w_g_z_ref, b_g_z_ref,                 # mlp_g_z
    w_inf_ref, b_inf_ref,                 # [inf_mean | inf_logvar] fused, Dout = 2*Z
    # generation weights
    w_z_h_ref, b_z_h_ref,                 # mlp_z_h
    w_x_h_ref, b_x_h_ref,                 # mlp_xtm1_h
    wih_h_z_ref, wih_h_x_ref, whh_h_ref, b_h_ref,   # rnn_h (W_ih pre-split by input half)
    w_h_x_ref, b_h_x_ref,                 # mlp_h_x
    w_gen_ref, b_gen_ref,                 # gen_out
    # outputs
    y_ref,           # (Tp, Bp, X)
    zmean_ref,       # (Tp, Bp, Z)
    zlogvar_ref,     # (Tp, Bp, Z)
    z_ref,           # (Tp, Bp, Z)
):
    f32 = jnp.float32
    Tp, Bp, Z = z_ref.shape
    X = y_ref.shape[-1]
    Hg = whh_g_ref.shape[0]
    Hh = whh_h_ref.shape[0]

    def mm(a, b):
        return jnp.dot(a, b, preferred_element_type=f32)

    # ============================ inference ============================
    # mlp_x_g + hoisted rnn_g input projection as two big batched matmuls.
    x_bt = x_bt_ref[...]                                               # (Bp*Tp, X)
    a = jnp.tanh(mm(x_bt, w_x_g_ref[...]) + b_x_g_ref[...])            # (Bp*Tp, dense)
    gx_g = mm(a, wih_g_ref[...]) + b_g_ref[...]                        # (Bp*Tp, 4*Hg)

    whh_g = whh_g_ref[...]
    w_g_z = w_g_z_ref[...]
    b_g_z = b_g_z_ref[...]
    w_inf = w_inf_ref[...]
    b_inf = b_inf_ref[...]
    eps_bt = eps_bt_ref[...]                                           # (Bp*Tp, Z)

    # rnn_g: recurrence over the batch axis b (zero init per t is implicit because the
    # "batch" of this LSTM is the Tp time rows); state shape (Tp, Hg).
    h = jnp.zeros((Tp, Hg), f32)
    c = jnp.zeros((Tp, Hg), f32)
    ml_acc = jnp.zeros((Tp, Bp, 2 * Z), f32)                           # [mean | logvar]
    z_acc = jnp.zeros((Tp, Bp, Z), f32)
    b_iota = jax.lax.broadcasted_iota(jnp.int32, (1, Bp, 1), 1)

    for b in range(Bp):                                                # fully unrolled (Bp <= 8*k, tiny)
        gates = gx_g[b * Tp:(b + 1) * Tp, :] + mm(h, whh_g)            # (Tp, 4*Hg)
        i_g = jax.nn.sigmoid(gates[:, 0:Hg])
        f_g = jax.nn.sigmoid(gates[:, Hg:2 * Hg])
        g_g = jnp.tanh(gates[:, 2 * Hg:3 * Hg])
        o_g = jax.nn.sigmoid(gates[:, 3 * Hg:4 * Hg])
        c = f_g * c + i_g * g_g
        h = o_g * jnp.tanh(c)                                          # g[:, b, :]

        # fused inference head: mlp_g_z -> [inf_mean | inf_logvar] -> reparameterization
        g_z = jnp.tanh(mm(h, w_g_z) + b_g_z)                           # (Tp, dense)
        ml = mm(g_z, w_inf) + b_inf                                    # (Tp, 2*Z)
        z_b = ml[:, 0:Z] + eps_bt[b * Tp:(b + 1) * Tp, :] * jnp.exp(0.5 * ml[:, Z:2 * Z])

        sel = b_iota == b                                              # place column b (static index)
        ml_acc = jnp.where(sel, ml[:, None, :], ml_acc)
        z_acc = jnp.where(sel, z_b[:, None, :], z_acc)

    zmean_ref[...] = ml_acc[:, :, 0:Z]
    zlogvar_ref[...] = ml_acc[:, :, Z:2 * Z]
    z_ref[...] = z_acc

    # ============================ generation ============================
    # fused mlp_z_h + mlp_xtm1_h + hoisted rnn_h input projection; the zx_h concat is
    # replaced by split weights (mathematically identical).
    z_flat = z_acc.reshape(Tp * Bp, Z)                                 # time-major (Bp multiple of 8)
    x_tm1 = xtm1_ref[...]                                              # (Tp*Bp, X)
    z_h = jnp.tanh(mm(z_flat, w_z_h_ref[...]) + b_z_h_ref[...])
    x_h = jnp.tanh(mm(x_tm1, w_x_h_ref[...]) + b_x_h_ref[...])
    gx_h = (mm(z_h, wih_h_z_ref[...]) + mm(x_h, wih_h_x_ref[...])
            + b_h_ref[...])                                            # (Tp*Bp, 4*Hh)

    whh_h = whh_h_ref[...]
    h = jnp.zeros((Bp, Hh), f32)
    c = jnp.zeros((Bp, Hh), f32)
    h_rows = []
    for t in range(Tp):                                                # fully unrolled
        gates = gx_h[t * Bp:(t + 1) * Bp, :] + mm(h, whh_h)            # (Bp, 4*Hh)
        i_g = jax.nn.sigmoid(gates[:, 0:Hh])
        f_g = jax.nn.sigmoid(gates[:, Hh:2 * Hh])
        g_g = jnp.tanh(gates[:, 2 * Hh:3 * Hh])
        o_g = jax.nn.sigmoid(gates[:, 3 * Hh:4 * Hh])
        c = f_g * c + i_g * g_g
        h = o_g * jnp.tanh(c)
        h_rows.append(h)
    h_all = jnp.concatenate(h_rows, axis=0)                            # (Tp*Bp, Hh), time-major

    # fused generation head: mlp_h_x -> gen_out as batched matmuls
    h_x = jnp.tanh(mm(h_all, w_h_x_ref[...]) + b_h_x_ref[...])
    y = mm(h_x, w_gen_ref[...]) + b_gen_ref[...]                       # (Tp*Bp, X)
    y_ref[...] = y.reshape(Tp, Bp, X)


# ----------------------------------------------------------------------------
# Parameter initialization (PyTorch-like uniform ranges, kernel-friendly layout)
# ----------------------------------------------------------------------------

def init_params(key, x_dim, z_dim=16, dense_dim=128, dim_rnn_g=128, dim_rnn_h=128):
    """Weights in kernel layout: Linear (in, out); LSTM W_ih/W_hh as (in, 4H) with gate
    order i,f,g,o and the bias pre-summed (b_ih + b_hh); rnn_h's W_ih pre-split into the
    z_h half and the xtm1_h half; inf_mean/inf_logvar fused into one (dense, 2*z_dim)."""

    def linear(k, din, dout):
        k1, k2 = jax.random.split(k)
        bound = din ** -0.5
        w = jax.random.uniform(k1, (din, dout), jnp.float32, -bound, bound)
        b = jax.random.uniform(k2, (1, dout), jnp.float32, -bound, bound)
        return w, b

    def lstm_p(k, din, h):
        k1, k2, k3, k4 = jax.random.split(k, 4)
        bound = h ** -0.5
        wih = jax.random.uniform(k1, (din, 4 * h), jnp.float32, -bound, bound)
        whh = jax.random.uniform(k2, (h, 4 * h), jnp.float32, -bound, bound)
        bih = jax.random.uniform(k3, (1, 4 * h), jnp.float32, -bound, bound)
        bhh = jax.random.uniform(k4, (1, 4 * h), jnp.float32, -bound, bound)
        return wih, whh, bih + bhh

    ks = jax.random.split(key, 10)
    p = {}
    p["w_x_g"], p["b_x_g"] = linear(ks[0], x_dim, dense_dim)                     # mlp_x_g
    p["rnn_g_wih"], p["rnn_g_whh"], p["rnn_g_b"] = lstm_p(ks[1], dense_dim, dim_rnn_g)
    p["w_g_z"], p["b_g_z"] = linear(ks[2], dim_rnn_g, dense_dim)                 # mlp_g_z
    wm, bm = linear(ks[3], dense_dim, z_dim)                                     # inf_mean
    wl, bl = linear(ks[4], dense_dim, z_dim)                                     # inf_logvar
    p["w_inf"] = jnp.concatenate([wm, wl], axis=1)                               # (dense, 2*z_dim)
    p["b_inf"] = jnp.concatenate([bm, bl], axis=1)
    p["w_z_h"], p["b_z_h"] = linear(ks[5], z_dim, dense_dim)                     # mlp_z_h
    p["w_xtm1_h"], p["b_xtm1_h"] = linear(ks[6], x_dim, dense_dim)               # mlp_xtm1_h
    wih_h, p["rnn_h_whh"], p["rnn_h_b"] = lstm_p(ks[7], 2 * dense_dim, dim_rnn_h)
    p["rnn_h_wih_z"] = wih_h[:dense_dim, :]                                      # multiplies z_h
    p["rnn_h_wih_x"] = wih_h[dense_dim:, :]                                      # multiplies xtm1_h
    p["w_h_x"], p["b_h_x"] = linear(ks[8], dim_rnn_h, dense_dim)                 # mlp_h_x
    p["w_gen"], p["b_gen"] = linear(ks[9], dense_dim, x_dim)                     # gen_out
    return p


# ----------------------------------------------------------------------------
# STORN forward: thin wrapper (padding + layout) around the single fused kernel
# ----------------------------------------------------------------------------

def storn_forward(params, x, eps):
    T, B, X = x.shape
    Z = eps.shape[-1]
    Tp = _round_up(T, 8)
    Bp = _round_up(B, 8)

    # pad seq/batch to sublane multiples (padded rows/steps are causal-trailing, so the
    # real outputs are bit-identical; they are sliced off below).
    x_p = jnp.pad(x.astype(jnp.float32), ((0, Tp - T), (0, Bp - B), (0, 0)))
    eps_p = jnp.pad(eps.astype(jnp.float32), ((0, Tp - T), (0, Bp - B), (0, 0)))

    # x_{t-1} (time-major) and batch-major views for the rnn_g path.  These are tiny
    # one-time input reshapes fused into the surrounding jit.
    x_tm1 = jnp.concatenate([jnp.zeros((1, Bp, X), jnp.float32), x_p[:-1]], axis=0)
    x_bt = jnp.transpose(x_p, (1, 0, 2)).reshape(Bp * Tp, X)
    eps_bt = jnp.transpose(eps_p, (1, 0, 2)).reshape(Bp * Tp, Z)
    xtm1_flat = x_tm1.reshape(Tp * Bp, X)

    out_shape = (
        jax.ShapeDtypeStruct((Tp, Bp, X), jnp.float32),   # y
        jax.ShapeDtypeStruct((Tp, Bp, Z), jnp.float32),   # z_mean
        jax.ShapeDtypeStruct((Tp, Bp, Z), jnp.float32),   # z_logvar
        jax.ShapeDtypeStruct((Tp, Bp, Z), jnp.float32),   # z
    )

    y_p, zmean_pad, zlogvar_pad, z_pad = pl.pallas_call(
        _storn_kernel,
        out_shape=out_shape,
    )(
        x_bt, xtm1_flat, eps_bt,
        params["w_x_g"], params["b_x_g"],
        params["rnn_g_wih"], params["rnn_g_whh"], params["rnn_g_b"],
        params["w_g_z"], params["b_g_z"],
        params["w_inf"], params["b_inf"],
        params["w_z_h"], params["b_z_h"],
        params["w_xtm1_h"], params["b_xtm1_h"],
        params["rnn_h_wih_z"], params["rnn_h_wih_x"], params["rnn_h_whh"], params["rnn_h_b"],
        params["w_h_x"], params["b_h_x"],
        params["w_gen"], params["b_gen"],
    )

    y = y_p[:T, :B]
    z_mean = zmean_pad[:T, :B]
    z_logvar = zlogvar_pad[:T, :B]
    z = z_pad[:T, :B]
    z_mean_prior = jnp.zeros_like(z_mean)
    z_logvar_prior = jnp.zeros_like(z_logvar)
    return y, z_mean, z_logvar, z_mean_prior, z_logvar_prior, z


# ----------------------------------------------------------------------------
# Pure-JAX reference (no Pallas) for numerical validation
# ----------------------------------------------------------------------------

def _storn_forward_ref(params, x, eps):
    def mm(a, b):
        return jnp.dot(a, b, precision=jax.lax.Precision.HIGHEST)

    T, B, X = x.shape
    Z = eps.shape[-1]

    def lstm_ref(x_seq, wih, whh, bias):
        # x_seq: (L, N, Din) -> (L, N, H), zero init
        L, N, _ = x_seq.shape
        H = whh.shape[0]

        def step(carry, x_t):
            h, c = carry
            gates = mm(x_t, wih) + mm(h, whh) + bias
            i = jax.nn.sigmoid(gates[:, :H])
            f = jax.nn.sigmoid(gates[:, H:2 * H])
            g = jnp.tanh(gates[:, 2 * H:3 * H])
            o = jax.nn.sigmoid(gates[:, 3 * H:])
            c = f * c + i * g
            h = o * jnp.tanh(c)
            return (h, c), h

        init = (jnp.zeros((N, H), jnp.float32), jnp.zeros((N, H), jnp.float32))
        _, hs = jax.lax.scan(step, init, x_seq)
        return hs

    # inference
    x_g = jnp.tanh(mm(x.reshape(T * B, X), params["w_x_g"]) + params["b_x_g"]).reshape(T, B, -1)
    g = lstm_ref(jnp.transpose(x_g, (1, 0, 2)),
                 params["rnn_g_wih"], params["rnn_g_whh"], params["rnn_g_b"])      # (B, T, H)
    g = jnp.transpose(g, (1, 0, 2)).reshape(T * B, -1)
    g_z = jnp.tanh(mm(g, params["w_g_z"]) + params["b_g_z"])
    ml = mm(g_z, params["w_inf"]) + params["b_inf"]
    z_mean = ml[:, :Z]
    z_logvar = ml[:, Z:]
    z = z_mean + eps.reshape(T * B, Z) * jnp.exp(0.5 * z_logvar)

    # generation
    x_tm1 = jnp.concatenate([jnp.zeros((1, B, X), jnp.float32), x[:-1]], axis=0).reshape(T * B, X)
    z_h = jnp.tanh(mm(z, params["w_z_h"]) + params["b_z_h"])
    x_h = jnp.tanh(mm(x_tm1, params["w_xtm1_h"]) + params["b_xtm1_h"])
    zx = jnp.concatenate([z_h, x_h], axis=-1).reshape(T, B, -1)
    wih_h = jnp.concatenate([params["rnn_h_wih_z"], params["rnn_h_wih_x"]], axis=0)
    h = lstm_ref(zx, wih_h, params["rnn_h_whh"], params["rnn_h_b"]).reshape(T * B, -1)
    h_x = jnp.tanh(mm(h, params["w_h_x"]) + params["b_h_x"])
    y = (mm(h_x, params["w_gen"]) + params["b_gen"]).reshape(T, B, X)
    return y, z_mean.reshape(T, B, Z), z_logvar.reshape(T, B, Z), z.reshape(T, B, Z)


# ----------------------------------------------------------------------------

if __name__ == "__main__":
    T, B, X_DIM, Z_DIM = 8, 4, 16, 16

    key = jax.random.PRNGKey(0)
    k_params, k_x, k_eps = jax.random.split(key, 3)

    params = init_params(k_params, x_dim=X_DIM, z_dim=Z_DIM)
    x = jax.random.uniform(k_x, (T, B, X_DIM), jnp.float32, 0.1, 1.0)
    eps = jax.random.normal(k_eps, (T, B, Z_DIM), jnp.float32)

    outs = jax.jit(storn_forward)(params, x, eps)
    outs = jax.block_until_ready(outs)

    y, z_mean, z_logvar, z_mean_p, z_logvar_p, z = outs
    assert y.shape == (T, B, X_DIM)
    assert z_mean.shape == (T, B, Z_DIM)
    assert z_logvar.shape == (T, B, Z_DIM)
    assert z.shape == (T, B, Z_DIM)
    assert bool(jnp.all(z_mean_p == 0)) and bool(jnp.all(z_logvar_p == 0))
    assert all(bool(jnp.all(jnp.isfinite(o))) for o in outs)

    # numerical check against the plain-JAX reference
    y_r, zm_r, zl_r, z_r = _storn_forward_ref(params, x, eps)
    for got, want in ((y, y_r), (z_mean, zm_r), (z_logvar, zl_r), (z, z_r)):
        err = float(jnp.max(jnp.abs(got - want)))
        assert bool(jnp.allclose(got, want, atol=1e-2, rtol=1e-2)), f"max abs err {err}"

    print("KERNEL_OK")
</pallas_src>

<mosaic_0001>
module attributes {stable_mosaic.version = 11 : i64} {
  func.func @_storn_kernel(%arg0: memref<64x16xf32, #tpu.memory_space<vmem>>, %arg1: memref<64x16xf32, #tpu.memory_space<vmem>>, %arg2: memref<64x16xf32, #tpu.memory_space<vmem>>, %arg3: memref<16x128xf32, #tpu.memory_space<vmem>>, %arg4: memref<1x128xf32, #tpu.memory_space<vmem>>, %arg5: memref<128x512xf32, #tpu.memory_space<vmem>>, %arg6: memref<128x512xf32, #tpu.memory_space<vmem>>, %arg7: memref<1x512xf32, #tpu.memory_space<vmem>>, %arg8: memref<128x128xf32, #tpu.memory_space<vmem>>, %arg9: memref<1x128xf32, #tpu.memory_space<vmem>>, %arg10: memref<128x32xf32, #tpu.memory_space<vmem>>, %arg11: memref<1x32xf32, #tpu.memory_space<vmem>>, %arg12: memref<16x128xf32, #tpu.memory_space<vmem>>, %arg13: memref<1x128xf32, #tpu.memory_space<vmem>>, %arg14: memref<16x128xf32, #tpu.memory_space<vmem>>, %arg15: memref<1x128xf32, #tpu.memory_space<vmem>>, %arg16: memref<128x512xf32, #tpu.memory_space<vmem>>, %arg17: memref<128x512xf32, #tpu.memory_space<vmem>>, %arg18: memref<128x512xf32, #tpu.memory_space<vmem>>, %arg19: memref<1x512xf32, #tpu.memory_space<vmem>>, %arg20: memref<128x128xf32, #tpu.memory_space<vmem>>, %arg21: memref<1x128xf32, #tpu.memory_space<vmem>>, %arg22: memref<128x16xf32, #tpu.memory_space<vmem>>, %arg23: memref<1x16xf32, #tpu.memory_space<vmem>>, %arg24: memref<8x8x16xf32, #tpu.memory_space<vmem>>, %arg25: memref<8x8x16xf32, #tpu.memory_space<vmem>>, %arg26: memref<8x8x16xf32, #tpu.memory_space<vmem>>, %arg27: memref<8x8x16xf32, #tpu.memory_space<vmem>>) attributes {dimension_semantics = [], scalar_prefetch = 0 : i64, scratch_operands = 0 : i64, tpu.core_type = #tpu.core_type<tc>} {
    %c0 = arith.constant 0 : index
    %c0_0 = arith.constant 0 : index
    %0 = vector.load %arg0[%c0, %c0_0] : memref<64x16xf32, #tpu.memory_space<vmem>>, vector<64x16xf32>
    %c0_1 = arith.constant 0 : index
    %c0_2 = arith.constant 0 : index
    %1 = vector.load %arg3[%c0_1, %c0_2] : memref<16x128xf32, #tpu.memory_space<vmem>>, vector<16x128xf32>
    %cst = arith.constant dense<0.000000e+00> : vector<64x128xf32>
    %2 = tpu.matmul %0, %1, %cst {dimension_numbers = #tpu.dot_dimension_numbers<[1], [0], [0], [1], [0, 0, 1, 1], [], []>} : vector<64x16xf32>, vector<16x128xf32>, vector<64x128xf32> -> vector<64x128xf32>
    %c0_3 = arith.constant 0 : index
    %c0_4 = arith.constant 0 : index
    %3 = vector.load %arg4[%c0_3, %c0_4] : memref<1x128xf32, #tpu.memory_space<vmem>>, vector<1x128xf32>
    %4 = vector.broadcast %3 : vector<1x128xf32> to vector<64x128xf32>
    %5 = arith.addf %2, %4 : vector<64x128xf32>
    %6 = math.tanh %5 : vector<64x128xf32>
    %c0_5 = arith.constant 0 : index
    %c0_6 = arith.constant 0 : index
    %7 = vector.load %arg5[%c0_5, %c0_6] : memref<128x512xf32, #tpu.memory_space<vmem>>, vector<128x512xf32>
    %cst_7 = arith.constant dense<0.000000e+00> : vector<64x512xf32>
    %8 = tpu.matmul %6, %7, %cst_7 {dimension_numbers = #tpu.dot_dimension_numbers<[1], [0], [0], [1], [0, 0, 1, 1], [], []>} : vector<64x128xf32>, vector<128x512xf32>, vector<64x512xf32> -> vector<64x512xf32>
    %c0_8 = arith.constant 0 : index
    %c0_9 = arith.constant 0 : index
    %9 = vector.load %arg7[%c0_8, %c0_9] : memref<1x512xf32, #tpu.memory_space<vmem>>, vector<1x512xf32>
    %10 = vector.broadcast %9 : vector<1x512xf32> to vector<64x512xf32>
    %11 = arith.addf %8, %10 : vector<64x512xf32>
    %c0_10 = arith.constant 0 : index
    %c0_11 = arith.constant 0 : index
    %12 = vector.load %arg6[%c0_10, %c0_11] : memref<128x512xf32, #tpu.memory_space<vmem>>, vector<128x512xf32>
    %c0_12 = arith.constant 0 : index
    %c0_13 = arith.constant 0 : index
    %13 = vector.load %arg8[%c0_12, %c0_13] : memref<128x128xf32, #tpu.memory_space<vmem>>, vector<128x128xf32>
    %c0_14 = arith.constant 0 : index
    %c0_15 = arith.constant 0 : index
    %14 = vector.load %arg9[%c0_14, %c0_15] : memref<1x128xf32, #tpu.memory_space<vmem>>, vector<1x128xf32>
    %c0_16 = arith.constant 0 : index
    %c0_17 = arith.constant 0 : index
    %15 = vector.load %arg10[%c0_16, %c0_17] : memref<128x32xf32, #tpu.memory_space<vmem>>, vector<128x32xf32>
    %c0_18 = arith.constant 0 : index
    %c0_19 = arith.constant 0 : index
    %16 = vector.load %arg11[%c0_18, %c0_19] : memref<1x32xf32, #tpu.memory_space<vmem>>, vector<1x32xf32>
    %c0_20 = arith.constant 0 : index
    %c0_21 = arith.constant 0 : index
    %17 = vector.load %arg2[%c0_20, %c0_21] : memref<64x16xf32, #tpu.memory_space<vmem>>, vector<64x16xf32>
    %cst_22 = arith.constant 0.000000e+00 : f32
    %18 = vector.broadcast %cst_22 : f32 to vector<8x128xf32>
    %cst_23 = arith.constant 0.000000e+00 : f32
    %19 = vector.broadcast %cst_23 : f32 to vector<8x128xf32>
    %cst_24 = arith.constant 0.000000e+00 : f32
    %20 = vector.broadcast %cst_24 : f32 to vector<8x8x32xf32>
    %cst_25 = arith.constant 0.000000e+00 : f32
    %21 = vector.broadcast %cst_25 : f32 to vector<8x8x16xf32>
    %22 = tpu.iota {dimensions = array<i32: 1>} : vector<1x8x1xi32>
    %23 = vector.extract_strided_slice %11 {offsets = [0, 0], sizes = [8, 512], strides = [1, 1]} : vector<64x512xf32> to vector<8x512xf32>
    %cst_26 = arith.constant dense<0.000000e+00> : vector<8x512xf32>
    %24 = tpu.matmul %18, %12, %cst_26 {dimension_numbers = #tpu.dot_dimension_numbers<[1], [0], [0], [1], [0, 0, 1, 1], [], []>} : vector<8x128xf32>, vector<128x512xf32>, vector<8x512xf32> -> vector<8x512xf32>
    %25 = arith.addf %23, %24 : vector<8x512xf32>
    %26 = vector.extract_strided_slice %25 {offsets = [0, 0], sizes = [8, 128], strides = [1, 1]} : vector<8x512xf32> to vector<8x128xf32>
    %27 = arith.negf %26 : vector<8x128xf32>
    %28 = math.exp %27 : vector<8x128xf32>
    %cst_27 = arith.constant 1.000000e+00 : f32
    %29 = vector.broadcast %cst_27 : f32 to vector<8x128xf32>
    %30 = arith.addf %29, %28 : vector<8x128xf32>
    %31 = arith.divf %29, %30 : vector<8x128xf32>
    %32 = vector.extract_strided_slice %25 {offsets = [0, 128], sizes = [8, 128], strides = [1, 1]} : vector<8x512xf32> to vector<8x128xf32>
    %33 = arith.negf %32 : vector<8x128xf32>
    %34 = math.exp %33 : vector<8x128xf32>
    %cst_28 = arith.constant 1.000000e+00 : f32
    %35 = vector.broadcast %cst_28 : f32 to vector<8x128xf32>
    %36 = arith.addf %35, %34 : vector<8x128xf32>
    %37 = arith.divf %35, %36 : vector<8x128xf32>
    %38 = vector.extract_strided_slice %25 {offsets = [0, 256], sizes = [8, 128], strides = [1, 1]} : vector<8x512xf32> to vector<8x128xf32>
    %39 = math.tanh %38 : vector<8x128xf32>
    %40 = vector.extract_strided_slice %25 {offsets = [0, 384], sizes = [8, 128], strides = [1, 1]} : vector<8x512xf32> to vector<8x128xf32>
    %41 = arith.negf %40 : vector<8x128xf32>
    %42 = math.exp %41 : vector<8x128xf32>
    %cst_29 = arith.constant 1.000000e+00 : f32
    %43 = vector.broadcast %cst_29 : f32 to vector<8x128xf32>
    %44 = arith.addf %43, %42 : vector<8x128xf32>
    %45 = arith.divf %43, %44 : vector<8x128xf32>
    %46 = arith.mulf %37, %19 : vector<8x128xf32>
    %47 = arith.mulf %31, %39 : vector<8x128xf32>
    %48 = arith.addf %46, %47 : vector<8x128xf32>
    %49 = math.tanh %48 : vector<8x128xf32>
    %50 = arith.mulf %45, %49 : vector<8x128xf32>
    %cst_30 = arith.constant dense<0.000000e+00> : vector<8x128xf32>
    %51 = tpu.matmul %50, %13, %cst_30 {dimension_numbers = #tpu.dot_dimension_numbers<[1], [0], [0], [1], [0, 0, 1, 1], [], []>} : vector<8x128xf32>, vector<128x128xf32>, vector<8x128xf32> -> vector<8x128xf32>
    %52 = vector.broadcast %14 : vector<1x128xf32> to vector<8x128xf32>
    %53 = arith.addf %51, %52 : vector<8x128xf32>
    %54 = math.tanh %53 : vector<8x128xf32>
    %cst_31 = arith.constant dense<0.000000e+00> : vector<8x32xf32>
    %55 = tpu.matmul %54, %15, %cst_31 {dimension_numbers = #tpu.dot_dimension_numbers<[1], [0], [0], [1], [0, 0, 1, 1], [], []>} : vector<8x128xf32>, vector<128x32xf32>, vector<8x32xf32> -> vector<8x32xf32>
    %56 = vector.broadcast %16 : vector<1x32xf32> to vector<8x32xf32>
    %57 = arith.addf %55, %56 : vector<8x32xf32>
    %58 = vector.extract_strided_slice %57 {offsets = [0, 0], sizes = [8, 16], strides = [1, 1]} : vector<8x32xf32> to vector<8x16xf32>
    %59 = vector.extract_strided_slice %17 {offsets = [0, 0], sizes = [8, 16], strides = [1, 1]} : vector<64x16xf32> to vector<8x16xf32>
    %60 = vector.extract_strided_slice %57 {offsets = [0, 16], sizes = [8, 16], strides = [1, 1]} : vector<8x32xf32> to vector<8x16xf32>
    %cst_32 = arith.constant 5.000000e-01 : f32
    %61 = vector.broadcast %cst_32 : f32 to vector<8x16xf32>
    %62 = arith.mulf %61, %60 : vector<8x16xf32>
    %63 = math.exp %62 : vector<8x16xf32>
    %64 = arith.mulf %59, %63 : vector<8x16xf32>
    %65 = arith.addf %58, %64 : vector<8x16xf32>
    %c0_i32 = arith.constant 0 : i32
    %66 = vector.broadcast %c0_i32 : i32 to vector<1x8x1xi32>
    %67 = arith.cmpi eq, %22, %66 : vector<1x8x1xi32>
    %68 = vector.shape_cast %57 : vector<8x32xf32> to vector<8x1x32xf32>
    %69 = vector.shape_cast %67 : vector<1x8x1xi1> to vector<1x8x1xi1>
    %70 = vector.broadcast %69 : vector<1x8x1xi1> to vector<8x8x32xi1>
    %71 = vector.shape_cast %68 : vector<8x1x32xf32> to vector<8x1x32xf32>
    %72 = vector.broadcast %71 : vector<8x1x32xf32> to vector<8x8x32xf32>
    %73 = arith.select %70, %72, %20 : vector<8x8x32xi1>, vector<8x8x32xf32>
    %74 = vector.shape_cast %65 : vector<8x16xf32> to vector<8x1x16xf32>
    %75 = vector.shape_cast %67 : vector<1x8x1xi1> to vector<1x8x1xi1>
    %76 = vector.broadcast %75 : vector<1x8x1xi1> to vector<8x8x16xi1>
    %77 = vector.shape_cast %74 : vector<8x1x16xf32> to vector<8x1x16xf32>
    %78 = vector.broadcast %77 : vector<8x1x16xf32> to vector<8x8x16xf32>
    %79 = arith.select %76, %78, %21 : vector<8x8x16xi1>, vector<8x8x16xf32>
    %80 = vector.extract_strided_slice %11 {offsets = [8, 0], sizes = [8, 512], strides = [1, 1]} : vector<64x512xf32> to vector<8x512xf32>
    %cst_33 = arith.constant dense<0.000000e+00> : vector<8x512xf32>
    %81 = tpu.matmul %50, %12, %cst_33 {dimension_numbers = #tpu.dot_dimension_numbers<[1], [0], [0], [1], [0, 0, 1, 1], [], []>} : vector<8x128xf32>, vector<128x512xf32>, vector<8x512xf32> -> vector<8x512xf32>
    %82 = arith.addf %80, %81 : vector<8x512xf32>
    %83 = vector.extract_strided_slice %82 {offsets = [0, 0], sizes = [8, 128], strides = [1, 1]} : vector<8x512xf32> to vector<8x128xf32>
    %84 = arith.negf %83 : vector<8x128xf32>
    %85 = math.exp %84 : vector<8x128xf32>
    %cst_34 = arith.constant 1.000000e+00 : f32
    %86 = vector.broadcast %cst_34 : f32 to vector<8x128xf32>
    %87 = arith.addf %86, %85 : vector<8x128xf32>
    %88 = arith.divf %86, %87 : vector<8x128xf32>
    %89 = vector.extract_strided_slice %82 {offsets = [0, 128], sizes = [8, 128], strides = [1, 1]} : vector<8x512xf32> to vector<8x128xf32>
    %90 = arith.negf %89 : vector<8x128xf32>
    %91 = math.exp %90 : vector<8x128xf32>
    %cst_35 = arith.constant 1.000000e+00 : f32
    %92 = vector.broadcast %cst_35 : f32 to vector<8x128xf32>
    %93 = arith.addf %92, %91 : vector<8x128xf32>
    %94 = arith.divf %92, %93 : vector<8x128xf32>
    %95 = vector.extract_strided_slice %82 {offsets = [0, 256], sizes = [8, 128], strides = [1, 1]} : vector<8x512xf32> to vector<8x128xf32>
    %96 = math.tanh %95 : vector<8x128xf32>
    %97 = vector.extract_strided_slice %82 {offsets = [0, 384], sizes = [8, 128], strides = [1, 1]} : vector<8x512xf32> to vector<8x128xf32>
    %98 = arith.negf %97 : vector<8x128xf32>
    %99 = math.exp %98 : vector<8x128xf32>
    %cst_36 = arith.constant 1.000000e+00 : f32
    %100 = vector.broadcast %cst_36 : f32 to vector<8x128xf32>
    %101 = arith.addf %100, %99 : vector<8x128xf32>
    %102 = arith.divf %100, %101 : vector<8x128xf32>
    %103 = arith.mulf %94, %48 : vector<8x128xf32>
    %104 = arith.mulf %88, %96 : vector<8x128xf32>
    %105 = arith.addf %103, %104 : vector<8x128xf32>
    %106 = math.tanh %105 : vector<8x128xf32>
    %107 = arith.mulf %102, %106 : vector<8x128xf32>
    %cst_37 = arith.constant dense<0.000000e+00> : vector<8x128xf32>
    %108 = tpu.matmul %107, %13, %cst_37 {dimension_numbers = #tpu.dot_dimension_numbers<[1], [0], [0], [1], [0, 0, 1, 1], [], []>} : vector<8x128xf32>, vector<128x128xf32>, vector<8x128xf32> -> vector<8x128xf32>
    %109 = vector.broadcast %14 : vector<1x128xf32> to vector<8x128xf32>
    %110 = arith.addf %108, %109 : vector<8x128xf32>
    %111 = math.tanh %110 : vector<8x128xf32>
    %cst_38 = arith.constant dense<0.000000e+00> : vector<8x32xf32>
    %112 = tpu.matmul %111, %15, %cst_38 {dimension_numbers = #tpu.dot_dimension_numbers<[1], [0], [0], [1], [0, 0, 1, 1], [], []>} : vector<8x128xf32>, vector<128x32xf32>, vector<8x32xf32> -> vector<8x32xf32>
    %113 = vector.broadcast %16 : vector<1x32xf32> to vector<8x32xf32>
    %114 = arith.addf %112, %113 : vector<8x32xf32>
    %115 = vector.extract_strided_slice %114 {offsets = [0, 0], sizes = [8, 16], strides = [1, 1]} : vector<8x32xf32> to vector<8x16xf32>
    %116 = vector.extract_strided_slice %17 {offsets = [8, 0], sizes = [8, 16], strides = [1, 1]} : vector<64x16xf32> to vector<8x16xf32>
    %117 = vector.extract_strided_slice %114 {offsets = [0, 16], sizes = [8, 16], strides = [1, 1]} : vector<8x32xf32> to vector<8x16xf32>
    %cst_39 = arith.constant 5.000000e-01 : f32
    %118 = vector.broadcast %cst_39 : f32 to vector<8x16xf32>
    %119 = arith.mulf %118, %117 : vector<8x16xf32>
    %120 = math.exp %119 : vector<8x16xf32>
    %121 = arith.mulf %116, %120 : vector<8x16xf32>
    %122 = arith.addf %115, %121 : vector<8x16xf32>
    %c1_i32 = arith.constant 1 : i32
    %123 = vector.broadcast %c1_i32 : i32 to vector<1x8x1xi32>
    %124 = arith.cmpi eq, %22, %123 : vector<1x8x1xi32>
    %125 = vector.shape_cast %114 : vector<8x32xf32> to vector<8x1x32xf32>
    %126 = vector.shape_cast %124 : vector<1x8x1xi1> to vector<1x8x1xi1>
    %127 = vector.broadcast %126 : vector<1x8x1xi1> to vector<8x8x32xi1>
    %128 = vector.shape_cast %125 : vector<8x1x32xf32> to vector<8x1x32xf32>
    %129 = vector.broadcast %128 : vector<8x1x32xf32> to vector<8x8x32xf32>
    %130 = arith.select %127, %129, %73 : vector<8x8x32xi1>, vector<8x8x32xf32>
    %131 = vector.shape_cast %122 : vector<8x16xf32> to vector<8x1x16xf32>
    %132 = vector.shape_cast %124 : vector<1x8x1xi1> to vector<1x8x1xi1>
    %133 = vector.broadcast %132 : vector<1x8x1xi1> to vector<8x8x16xi1>
    %134 = vector.shape_cast %131 : vector<8x1x16xf32> to vector<8x1x16xf32>
    %135 = vector.broadcast %134 : vector<8x1x16xf32> to vector<8x8x16xf32>
    %136 = arith.select %133, %135, %79 : vector<8x8x16xi1>, vector<8x8x16xf32>
    %137 = vector.extract_strided_slice %11 {offsets = [16, 0], sizes = [8, 512], strides = [1, 1]} : vector<64x512xf32> to vector<8x512xf32>
    %cst_40 = arith.constant dense<0.000000e+00> : vector<8x512xf32>
    %138 = tpu.matmul %107, %12, %cst_40 {dimension_numbers = #tpu.dot_dimension_numbers<[1], [0], [0], [1], [0, 0, 1, 1], [], []>} : vector<8x128xf32>, vector<128x512xf32>, vector<8x512xf32> -> vector<8x512xf32>
    %139 = arith.addf %137, %138 : vector<8x512xf32>
    %140 = vector.extract_strided_slice %139 {offsets = [0, 0], sizes = [8, 128], strides = [1, 1]} : vector<8x512xf32> to vector<8x128xf32>
    %141 = arith.negf %140 : vector<8x128xf32>
    %142 = math.exp %141 : vector<8x128xf32>
    %cst_41 = arith.constant 1.000000e+00 : f32
    %143 = vector.broadcast %cst_41 : f32 to vector<8x128xf32>
    %144 = arith.addf %143, %142 : vector<8x128xf32>
    %145 = arith.divf %143, %144 : vector<8x128xf32>
    %146 = vector.extract_strided_slice %139 {offsets = [0, 128], sizes = [8, 128], strides = [1, 1]} : vector<8x512xf32> to vector<8x128xf32>
    %147 = arith.negf %146 : vector<8x128xf32>
    %148 = math.exp %147 : vector<8x128xf32>
    %cst_42 = arith.constant 1.000000e+00 : f32
    %149 = vector.broadcast %cst_42 : f32 to vector<8x128xf32>
    %150 = arith.addf %149, %148 : vector<8x128xf32>
    %151 = arith.divf %149, %150 : vector<8x128xf32>
    %152 = vector.extract_strided_slice %139 {offsets = [0, 256], sizes = [8, 128], strides = [1, 1]} : vector<8x512xf32> to vector<8x128xf32>
    %153 = math.tanh %152 : vector<8x128xf32>
    %154 = vector.extract_strided_slice %139 {offsets = [0, 384], sizes = [8, 128], strides = [1, 1]} : vector<8x512xf32> to vector<8x128xf32>
    %155 = arith.negf %154 : vector<8x128xf32>
    %156 = math.exp %155 : vector<8x128xf32>
    %cst_43 = arith.constant 1.000000e+00 : f32
    %157 = vector.broadcast %cst_43 : f32 to vector<8x128xf32>
    %158 = arith.addf %157, %156 : vector<8x128xf32>
    %159 = arith.divf %157, %158 : vector<8x128xf32>
    %160 = arith.mulf %151, %105 : vector<8x128xf32>
    %161 = arith.mulf %145, %153 : vector<8x128xf32>
    %162 = arith.addf %160, %161 : vector<8x128xf32>
    %163 = math.tanh %162 : vector<8x128xf32>
    %164 = arith.mulf %159, %163 : vector<8x128xf32>
    %cst_44 = arith.constant dense<0.000000e+00> : vector<8x128xf32>
    %165 = tpu.matmul %164, %13, %cst_44 {dimension_numbers = #tpu.dot_dimension_numbers<[1], [0], [0], [1], [0, 0, 1, 1], [], []>} : vector<8x128xf32>, vector<128x128xf32>, vector<8x128xf32> -> vector<8x128xf32>
    %166 = vector.broadcast %14 : vector<1x128xf32> to vector<8x128xf32>
    %167 = arith.addf %165, %166 : vector<8x128xf32>
    %168 = math.tanh %167 : vector<8x128xf32>
    %cst_45 = arith.constant dense<0.000000e+00> : vector<8x32xf32>
    %169 = tpu.matmul %168, %15, %cst_45 {dimension_numbers = #tpu.dot_dimension_numbers<[1], [0], [0], [1], [0, 0, 1, 1], [], []>} : vector<8x128xf32>, vector<128x32xf32>, vector<8x32xf32> -> vector<8x32xf32>
    %170 = vector.broadcast %16 : vector<1x32xf32> to vector<8x32xf32>
    %171 = arith.addf %169, %170 : vector<8x32xf32>
    %172 = vector.extract_strided_slice %171 {offsets = [0, 0], sizes = [8, 16], strides = [1, 1]} : vector<8x32xf32> to vector<8x16xf32>
    %173 = vector.extract_strided_slice %17 {offsets = [16, 0], sizes = [8, 16], strides = [1, 1]} : vector<64x16xf32> to vector<8x16xf32>
    %174 = vector.extract_strided_slice %171 {offsets = [0, 16], sizes = [8, 16], strides = [1, 1]} : vector<8x32xf32> to vector<8x16xf32>
    %cst_46 = arith.constant 5.000000e-01 : f32
    %175 = vector.broadcast %cst_46 : f32 to vector<8x16xf32>
    %176 = arith.mulf %175, %174 : vector<8x16xf32>
    %177 = math.exp %176 : vector<8x16xf32>
    %178 = arith.mulf %173, %177 : vector<8x16xf32>
    %179 = arith.addf %172, %178 : vector<8x16xf32>
    %c2_i32 = arith.constant 2 : i32
    %180 = vector.broadcast %c2_i32 : i32 to vector<1x8x1xi32>
    %181 = arith.cmpi eq, %22, %180 : vector<1x8x1xi32>
    %182 = vector.shape_cast %171 : vector<8x32xf32> to vector<8x1x32xf32>
    %183 = vector.shape_cast %181 : vector<1x8x1xi1> to vector<1x8x1xi1>
    %184 = vector.broadcast %183 : vector<1x8x1xi1> to vector<8x8x32xi1>
    %185 = vector.shape_cast %182 : vector<8x1x32xf32> to vector<8x1x32xf32>
    %186 = vector.broadcast %185 : vector<8x1x32xf32> to vector<8x8x32xf32>
    %187 = arith.select %184, %186, %130 : vector<8x8x32xi1>, vector<8x8x32xf32>
    %188 = vector.shape_cast %179 : vector<8x16xf32> to vector<8x1x16xf32>
    %189 = vector.shape_cast %181 : vector<1x8x1xi1> to vector<1x8x1xi1>
    %190 = vector.broadcast %189 : vector<1x8x1xi1> to vector<8x8x16xi1>
    %191 = vector.shape_cast %188 : vector<8x1x16xf32> to vector<8x1x16xf32>
    %192 = vector.broadcast %191 : vector<8x1x16xf32> to vector<8x8x16xf32>
    %193 = arith.select %190, %192, %136 : vector<8x8x16xi1>, vector<8x8x16xf32>
    %194 = vector.extract_strided_slice %11 {offsets = [24, 0], sizes = [8, 512], strides = [1, 1]} : vector<64x512xf32> to vector<8x512xf32>
    %cst_47 = arith.constant dense<0.000000e+00> : vector<8x512xf32>
    %195 = tpu.matmul %164, %12, %cst_47 {dimension_numbers = #tpu.dot_dimension_numbers<[1], [0], [0], [1], [0, 0, 1, 1], [], []>} : vector<8x128xf32>, vector<128x512xf32>, vector<8x512xf32> -> vector<8x512xf32>
    %196 = arith.addf %194, %195 : vector<8x512xf32>
    %197 = vector.extract_strided_slice %196 {offsets = [0, 0], sizes = [8, 128], strides = [1, 1]} : vector<8x512xf32> to vector<8x128xf32>
    %198 = arith.negf %197 : vector<8x128xf32>
    %199 = math.exp %198 : vector<8x128xf32>
    %cst_48 = arith.constant 1.000000e+00 : f32
    %200 = vector.broadcast %cst_48 : f32 to vector<8x128xf32>
    %201 = arith.addf %200, %199 : vector<8x128xf32>
    %202 = arith.divf %200, %201 : vector<8x128xf32>
    %203 = vector.extract_strided_slice %196 {offsets = [0, 128], sizes = [8, 128], strides = [1, 1]} : vector<8x512xf32> to vector<8x128xf32>
    %204 = arith.negf %203 : vector<8x128xf32>
    %205 = math.exp %204 : vector<8x128xf32>
    %cst_49 = arith.constant 1.000000e+00 : f32
    %206 = vector.broadcast %cst_49 : f32 to vector<8x128xf32>
    %207 = arith.addf %206, %205 : vector<8x128xf32>
    %208 = arith.divf %206, %207 : vector<8x128xf32>
    %209 = vector.extract_strided_slice %196 {offsets = [0, 256], sizes = [8, 128], strides = [1, 1]} : vector<8x512xf32> to vector<8x128xf32>
    %210 = math.tanh %209 : vector<8x128xf32>
    %211 = vector.extract_strided_slice %196 {offsets = [0, 384], sizes = [8, 128], strides = [1, 1]} : vector<8x512xf32> to vector<8x128xf32>
    %212 = arith.negf %211 : vector<8x128xf32>
    %213 = math.exp %212 : vector<8x128xf32>
    %cst_50 = arith.constant 1.000000e+00 : f32
    %214 = vector.broadcast %cst_50 : f32 to vector<8x128xf32>
    %215 = arith.addf %214, %213 : vector<8x128xf32>
    %216 = arith.divf %214, %215 : vector<8x128xf32>
    %217 = arith.mulf %208, %162 : vector<8x128xf32>
    %218 = arith.mulf %202, %210 : vector<8x128xf32>
    %219 = arith.addf %217, %218 : vector<8x128xf32>
    %220 = math.tanh %219 : vector<8x128xf32>
    %221 = arith.mulf %216, %220 : vector<8x128xf32>
    %cst_51 = arith.constant dense<0.000000e+00> : vector<8x128xf32>
    %222 = tpu.matmul %221, %13, %cst_51 {dimension_numbers = #tpu.dot_dimension_numbers<[1], [0], [0], [1], [0, 0, 1, 1], [], []>} : vector<8x128xf32>, vector<128x128xf32>, vector<8x128xf32> -> vector<8x128xf32>
    %223 = vector.broadcast %14 : vector<1x128xf32> to vector<8x128xf32>
    %224 = arith.addf %222, %223 : vector<8x128xf32>
    %225 = math.tanh %224 : vector<8x128xf32>
    %cst_52 = arith.constant dense<0.000000e+00> : vector<8x32xf32>
    %226 = tpu.matmul %225, %15, %cst_52 {dimension_numbers = #tpu.dot_dimension_numbers<[1], [0], [0], [1], [0, 0, 1, 1], [], []>} : vector<8x128xf32>, vector<128x32xf32>, vector<8x32xf32> -> vector<8x32xf32>
    %227 = vector.broadcast %16 : vector<1x32xf32> to vector<8x32xf32>
    %228 = arith.addf %226, %227 : vector<8x32xf32>
    %229 = vector.extract_strided_slice %228 {offsets = [0, 0], sizes = [8, 16], strides = [1, 1]} : vector<8x32xf32> to vector<8x16xf32>
    %230 = vector.extract_strided_slice %17 {offsets = [24, 0], sizes = [8, 16], strides = [1, 1]} : vector<64x16xf32> to vector<8x16xf32>
    %231 = vector.extract_strided_slice %228 {offsets = [0, 16], sizes = [8, 16], strides = [1, 1]} : vector<8x32xf32> to vector<8x16xf32>
    %cst_53 = arith.constant 5.000000e-01 : f32
    %232 = vector.broadcast %cst_53 : f32 to vector<8x16xf32>
    %233 = arith.mulf %232, %231 : vector<8x16xf32>
    %234 = math.exp %233 : vector<8x16xf32>
    %235 = arith.mulf %230, %234 : vector<8x16xf32>
    %236 = arith.addf %229, %235 : vector<8x16xf32>
    %c3_i32 = arith.constant 3 : i32
    %237 = vector.broadcast %c3_i32 : i32 to vector<1x8x1xi32>
    %238 = arith.cmpi eq, %22, %237 : vector<1x8x1xi32>
    %239 = vector.shape_cast %228 : vector<8x32xf32> to vector<8x1x32xf32>
    %240 = vector.shape_cast %238 : vector<1x8x1xi1> to vector<1x8x1xi1>
    %241 = vector.broadcast %240 : vector<1x8x1xi1> to vector<8x8x32xi1>
    %242 = vector.shape_cast %239 : vector<8x1x32xf32> to vector<8x1x32xf32>
    %243 = vector.broadcast %242 : vector<8x1x32xf32> to vector<8x8x32xf32>
    %244 = arith.select %241, %243, %187 : vector<8x8x32xi1>, vector<8x8x32xf32>
    %245 = vector.shape_cast %236 : vector<8x16xf32> to vector<8x1x16xf32>
    %246 = vector.shape_cast %238 : vector<1x8x1xi1> to vector<1x8x1xi1>
    %247 = vector.broadcast %246 : vector<1x8x1xi1> to vector<8x8x16xi1>
    %248 = vector.shape_cast %245 : vector<8x1x16xf32> to vector<8x1x16xf32>
    %249 = vector.broadcast %248 : vector<8x1x16xf32> to vector<8x8x16xf32>
    %250 = arith.select %247, %249, %193 : vector<8x8x16xi1>, vector<8x8x16xf32>
    %251 = vector.extract_strided_slice %11 {offsets = [32, 0], sizes = [8, 512], strides = [1, 1]} : vector<64x512xf32> to vector<8x512xf32>
    %cst_54 = arith.constant dense<0.000000e+00> : vector<8x512xf32>
    %252 = tpu.matmul %221, %12, %cst_54 {dimension_numbers = #tpu.dot_dimension_numbers<[1], [0], [0], [1], [0, 0, 1, 1], [], []>} : vector<8x128xf32>, vector<128x512xf32>, vector<8x512xf32> -> vector<8x512xf32>
    %253 = arith.addf %251, %252 : vector<8x512xf32>
    %254 = vector.extract_strided_slice %253 {offsets = [0, 0], sizes = [8, 128], strides = [1, 1]} : vector<8x512xf32> to vector<8x128xf32>
    %255 = arith.negf %254 : vector<8x128xf32>
    %256 = math.exp %255 : vector<8x128xf32>
    %cst_55 = arith.constant 1.000000e+00 : f32
    %257 = vector.broadcast %cst_55 : f32 to vector<8x128xf32>
    %258 = arith.addf %257, %256 : vector<8x128xf32>
    %259 = arith.divf %257, %258 : vector<8x128xf32>
    %260 = vector.extract_strided_slice %253 {offsets = [0, 128], sizes = [8, 128], strides = [1, 1]} : vector<8x512xf32> to vector<8x128xf32>
    %261 = arith.negf %260 : vector<8x128xf32>
    %262 = math.exp %261 : vector<8x128xf32>
    %cst_56 = arith.constant 1.000000e+00 : f32
    %263 = vector.broadcast %cst_56 : f32 to vector<8x128xf32>
    %264 = arith.addf %263, %262 : vector<8x128xf32>
    %265 = arith.divf %263, %264 : vector<8x128xf32>
    %266 = vector.extract_strided_slice %253 {offsets = [0, 256], sizes = [8, 128], strides = [1, 1]} : vector<8x512xf32> to vector<8x128xf32>
    %267 = math.tanh %266 : vector<8x128xf32>
    %268 = vector.extract_strided_slice %253 {offsets = [0, 384], sizes = [8, 128], strides = [1, 1]} : vector<8x512xf32> to vector<8x128xf32>
    %269 = arith.negf %268 : vector<8x128xf32>
    %270 = math.exp %269 : vector<8x128xf32>
    %cst_57 = arith.constant 1.000000e+00 : f32
    %271 = vector.broadcast %cst_57 : f32 to vector<8x128xf32>
    %272 = arith.addf %271, %270 : vector<8x128xf32>
    %273 = arith.divf %271, %272 : vector<8x128xf32>
    %274 = arith.mulf %265, %219 : vector<8x128xf32>
    %275 = arith.mulf %259, %267 : vector<8x128xf32>
    %276 = arith.addf %274, %275 : vector<8x128xf32>
    %277 = math.tanh %276 : vector<8x128xf32>
    %278 = arith.mulf %273, %277 : vector<8x128xf32>
    %cst_58 = arith.constant dense<0.000000e+00> : vector<8x128xf32>
    %279 = tpu.matmul %278, %13, %cst_58 {dimension_numbers = #tpu.dot_dimension_numbers<[1], [0], [0], [1], [0, 0, 1, 1], [], []>} : vector<8x128xf32>, vector<128x128xf32>, vector<8x128xf32> -> vector<8x128xf32>
    %280 = vector.broadcast %14 : vector<1x128xf32> to vector<8x128xf32>
    %281 = arith.addf %279, %280 : vector<8x128xf32>
    %282 = math.tanh %281 : vector<8x128xf32>
    %cst_59 = arith.constant dense<0.000000e+00> : vector<8x32xf32>
    %283 = tpu.matmul %282, %15, %cst_59 {dimension_numbers = #tpu.dot_dimension_numbers<[1], [0], [0], [1], [0, 0, 1, 1], [], []>} : vector<8x128xf32>, vector<128x32xf32>, vector<8x32xf32> -> vector<8x32xf32>
    %284 = vector.broadcast %16 : vector<1x32xf32> to vector<8x32xf32>
    %285 = arith.addf %283, %284 : vector<8x32xf32>
    %286 = vector.extract_strided_slice %285 {offsets = [0, 0], sizes = [8, 16], strides = [1, 1]} : vector<8x32xf32> to vector<8x16xf32>
    %287 = vector.extract_strided_slice %17 {offsets = [32, 0], sizes = [8, 16], strides = [1, 1]} : vector<64x16xf32> to vector<8x16xf32>
    %288 = vector.extract_strided_slice %285 {offsets = [0, 16], sizes = [8, 16], strides = [1, 1]} : vector<8x32xf32> to vector<8x16xf32>
    %cst_60 = arith.constant 5.000000e-01 : f32
    %289 = vector.broadcast %cst_60 : f32 to vector<8x16xf32>
    %290 = arith.mulf %289, %288 : vector<8x16xf32>
    %291 = math.exp %290 : vector<8x16xf32>
    %292 = arith.mulf %287, %291 : vector<8x16xf32>
    %293 = arith.addf %286, %292 : vector<8x16xf32>
    %c4_i32 = arith.constant 4 : i32
    %294 = vector.broadcast %c4_i32 : i32 to vector<1x8x1xi32>
    %295 = arith.cmpi eq, %22, %294 : vector<1x8x1xi32>
    %296 = vector.shape_cast %285 : vector<8x32xf32> to vector<8x1x32xf32>
    %297 = vector.shape_cast %295 : vector<1x8x1xi1> to vector<1x8x1xi1>
    %298 = vector.broadcast %297 : vector<1x8x1xi1> to vector<8x8x32xi1>
    %299 = vector.shape_cast %296 : vector<8x1x32xf32> to vector<8x1x32xf32>
    %300 = vector.broadcast %299 : vector<8x1x32xf32> to vector<8x8x32xf32>
    %301 = arith.select %298, %300, %244 : vector<8x8x32xi1>, vector<8x8x32xf32>
    %302 = vector.shape_cast %293 : vector<8x16xf32> to vector<8x1x16xf32>
    %303 = vector.shape_cast %295 : vector<1x8x1xi1> to vector<1x8x1xi1>
    %304 = vector.broadcast %303 : vector<1x8x1xi1> to vector<8x8x16xi1>
    %305 = vector.shape_cast %302 : vector<8x1x16xf32> to vector<8x1x16xf32>
    %306 = vector.broadcast %305 : vector<8x1x16xf32> to vector<8x8x16xf32>
    %307 = arith.select %304, %306, %250 : vector<8x8x16xi1>, vector<8x8x16xf32>
    %308 = vector.extract_strided_slice %11 {offsets = [40, 0], sizes = [8, 512], strides = [1, 1]} : vector<64x512xf32> to vector<8x512xf32>
    %cst_61 = arith.constant dense<0.000000e+00> : vector<8x512xf32>
    %309 = tpu.matmul %278, %12, %cst_61 {dimension_numbers = #tpu.dot_dimension_numbers<[1], [0], [0], [1], [0, 0, 1, 1], [], []>} : vector<8x128xf32>, vector<128x512xf32>, vector<8x512xf32> -> vector<8x512xf32>
    %310 = arith.addf %308, %309 : vector<8x512xf32>
    %311 = vector.extract_strided_slice %310 {offsets = [0, 0], sizes = [8, 128], strides = [1, 1]} : vector<8x512xf32> to vector<8x128xf32>
    %312 = arith.negf %311 : vector<8x128xf32>
    %313 = math.exp %312 : vector<8x128xf32>
    %cst_62 = arith.constant 1.000000e+00 : f32
    %314 = vector.broadcast %cst_62 : f32 to vector<8x128xf32>
    %315 = arith.addf %314, %313 : vector<8x128xf32>
    %316 = arith.divf %314, %315 : vector<8x128xf32>
    %317 = vector.extract_strided_slice %310 {offsets = [0, 128], sizes = [8, 128], strides = [1, 1]} : vector<8x512xf32> to vector<8x128xf32>
    %318 = arith.negf %317 : vector<8x128xf32>
    %319 = math.exp %318 : vector<8x128xf32>
    %cst_63 = arith.constant 1.000000e+00 : f32
    %320 = vector.broadcast %cst_63 : f32 to vector<8x128xf32>
    %321 = arith.addf %320, %319 : vector<8x128xf32>
    %322 = arith.divf %320, %321 : vector<8x128xf32>
    %323 = vector.extract_strided_slice %310 {offsets = [0, 256], sizes = [8, 128], strides = [1, 1]} : vector<8x512xf32> to vector<8x128xf32>
    %324 = math.tanh %323 : vector<8x128xf32>
    %325 = vector.extract_strided_slice %310 {offsets = [0, 384], sizes = [8, 128], strides = [1, 1]} : vector<8x512xf32> to vector<8x128xf32>
    %326 = arith.negf %325 : vector<8x128xf32>
    %327 = math.exp %326 : vector<8x128xf32>
    %cst_64 = arith.constant 1.000000e+00 : f32
    %328 = vector.broadcast %cst_64 : f32 to vector<8x128xf32>
    %329 = arith.addf %328, %327 : vector<8x128xf32>
    %330 = arith.divf %328, %329 : vector<8x128xf32>
    %331 = arith.mulf %322, %276 : vector<8x128xf32>
    %332 = arith.mulf %316, %324 : vector<8x128xf32>
    %333 = arith.addf %331, %332 : vector<8x128xf32>
    %334 = math.tanh %333 : vector<8x128xf32>
    %335 = arith.mulf %330, %334 : vector<8x128xf32>
    %cst_65 = arith.constant dense<0.000000e+00> : vector<8x128xf32>
    %336 = tpu.matmul %335, %13, %cst_65 {dimension_numbers = #tpu.dot_dimension_numbers<[1], [0], [0], [1], [0, 0, 1, 1], [], []>} : vector<8x128xf32>, vector<128x128xf32>, vector<8x128xf32> -> vector<8x128xf32>
    %337 = vector.broadcast %14 : vector<1x128xf32> to vector<8x128xf32>
    %338 = arith.addf %336, %337 : vector<8x128xf32>
    %339 = math.tanh %338 : vector<8x128xf32>
    %cst_66 = arith.constant dense<0.000000e+00> : vector<8x32xf32>
    %340 = tpu.matmul %339, %15, %cst_66 {dimension_numbers = #tpu.dot_dimension_numbers<[1], [0], [0], [1], [0, 0, 1, 1], [], []>} : vector<8x128xf32>, vector<128x32xf32>, vector<8x32xf32> -> vector<8x32xf32>
    %341 = vector.broadcast %16 : vector<1x32xf32> to vector<8x32xf32>
    %342 = arith.addf %340, %341 : vector<8x32xf32>
    %343 = vector.extract_strided_slice %342 {offsets = [0, 0], sizes = [8, 16], strides = [1, 1]} : vector<8x32xf32> to vector<8x16xf32>
    %344 = vector.extract_strided_slice %17 {offsets = [40, 0], sizes = [8, 16], strides = [1, 1]} : vector<64x16xf32> to vector<8x16xf32>
    %345 = vector.extract_strided_slice %342 {offsets = [0, 16], sizes = [8, 16], strides = [1, 1]} : vector<8x32xf32> to vector<8x16xf32>
    %cst_67 = arith.constant 5.000000e-01 : f32
    %346 = vector.broadcast %cst_67 : f32 to vector<8x16xf32>
    %347 = arith.mulf %346, %345 : vector<8x16xf32>
    %348 = math.exp %347 : vector<8x16xf32>
    %349 = arith.mulf %344, %348 : vector<8x16xf32>
    %350 = arith.addf %343, %349 : vector<8x16xf32>
    %c5_i32 = arith.constant 5 : i32
    %351 = vector.broadcast %c5_i32 : i32 to vector<1x8x1xi32>
    %352 = arith.cmpi eq, %22, %351 : vector<1x8x1xi32>
    %353 = vector.shape_cast %342 : vector<8x32xf32> to vector<8x1x32xf32>
    %354 = vector.shape_cast %352 : vector<1x8x1xi1> to vector<1x8x1xi1>
    %355 = vector.broadcast %354 : vector<1x8x1xi1> to vector<8x8x32xi1>
    %356 = vector.shape_cast %353 : vector<8x1x32xf32> to vector<8x1x32xf32>
    %357 = vector.broadcast %356 : vector<8x1x32xf32> to vector<8x8x32xf32>
    %358 = arith.select %355, %357, %301 : vector<8x8x32xi1>, vector<8x8x32xf32>
    %359 = vector.shape_cast %350 : vector<8x16xf32> to vector<8x1x16xf32>
    %360 = vector.shape_cast %352 : vector<1x8x1xi1> to vector<1x8x1xi1>
    %361 = vector.broadcast %360 : vector<1x8x1xi1> to vector<8x8x16xi1>
    %362 = vector.shape_cast %359 : vector<8x1x16xf32> to vector<8x1x16xf32>
    %363 = vector.broadcast %362 : vector<8x1x16xf32> to vector<8x8x16xf32>
    %364 = arith.select %361, %363, %307 : vector<8x8x16xi1>, vector<8x8x16xf32>
    %365 = vector.extract_strided_slice %11 {offsets = [48, 0], sizes = [8, 512], strides = [1, 1]} : vector<64x512xf32> to vector<8x512xf32>
    %cst_68 = arith.constant dense<0.000000e+00> : vector<8x512xf32>
    %366 = tpu.matmul %335, %12, %cst_68 {dimension_numbers = #tpu.dot_dimension_numbers<[1], [0], [0], [1], [0, 0, 1, 1], [], []>} : vector<8x128xf32>, vector<128x512xf32>, vector<8x512xf32> -> vector<8x512xf32>
    %367 = arith.addf %365, %366 : vector<8x512xf32>
    %368 = vector.extract_strided_slice %367 {offsets = [0, 0], sizes = [8, 128], strides = [1, 1]} : vector<8x512xf32> to vector<8x128xf32>
    %369 = arith.negf %368 : vector<8x128xf32>
    %370 = math.exp %369 : vector<8x128xf32>
    %cst_69 = arith.constant 1.000000e+00 : f32
    %371 = vector.broadcast %cst_69 : f32 to vector<8x128xf32>
    %372 = arith.addf %371, %370 : vector<8x128xf32>
    %373 = arith.divf %371, %372 : vector<8x128xf32>
    %374 = vector.extract_strided_slice %367 {offsets = [0, 128], sizes = [8, 128], strides = [1, 1]} : vector<8x512xf32> to vector<8x128xf32>
    %375 = arith.negf %374 : vector<8x128xf32>
    %376 = math.exp %375 : vector<8x128xf32>
    %cst_70 = arith.constant 1.000000e+00 : f32
    %377 = vector.broadcast %cst_70 : f32 to vector<8x128xf32>
    %378 = arith.addf %377, %376 : vector<8x128xf32>
    %379 = arith.divf %377, %378 : vector<8x128xf32>
    %380 = vector.extract_strided_slice %367 {offsets = [0, 256], sizes = [8, 128], strides = [1, 1]} : vector<8x512xf32> to vector<8x128xf32>
    %381 = math.tanh %380 : vector<8x128xf32>
    %382 = vector.extract_strided_slice %367 {offsets = [0, 384], sizes = [8, 128], strides = [1, 1]} : vector<8x512xf32> to vector<8x128xf32>
    %383 = arith.negf %382 : vector<8x128xf32>
    %384 = math.exp %383 : vector<8x128xf32>
    %cst_71 = arith.constant 1.000000e+00 : f32
    %385 = vector.broadcast %cst_71 : f32 to vector<8x128xf32>
    %386 = arith.addf %385, %384 : vector<8x128xf32>
    %387 = arith.divf %385, %386 : vector<8x128xf32>
    %388 = arith.mulf %379, %333 : vector<8x128xf32>
    %389 = arith.mulf %373, %381 : vector<8x128xf32>
    %390 = arith.addf %388, %389 : vector<8x128xf32>
    %391 = math.tanh %390 : vector<8x128xf32>
    %392 = arith.mulf %387, %391 : vector<8x128xf32>
    %cst_72 = arith.constant dense<0.000000e+00> : vector<8x128xf32>
    %393 = tpu.matmul %392, %13, %cst_72 {dimension_numbers = #tpu.dot_dimension_numbers<[1], [0], [0], [1], [0, 0, 1, 1], [], []>} : vector<8x128xf32>, vector<128x128xf32>, vector<8x128xf32> -> vector<8x128xf32>
    %394 = vector.broadcast %14 : vector<1x128xf32> to vector<8x128xf32>
    %395 = arith.addf %393, %394 : vector<8x128xf32>
    %396 = math.tanh %395 : vector<8x128xf32>
    %cst_73 = arith.constant dense<0.000000e+00> : vector<8x32xf32>
    %397 = tpu.matmul %396, %15, %cst_73 {dimension_numbers = #tpu.dot_dimension_numbers<[1], [0], [0], [1], [0, 0, 1, 1], [], []>} : vector<8x128xf32>, vector<128x32xf32>, vector<8x32xf32> -> vector<8x32xf32>
    %398 = vector.broadcast %16 : vector<1x32xf32> to vector<8x32xf32>
    %399 = arith.addf %397, %398 : vector<8x32xf32>
    %400 = vector.extract_strided_slice %399 {offsets = [0, 0], sizes = [8, 16], strides = [1, 1]} : vector<8x32xf32> to vector<8x16xf32>
    %401 = vector.extract_strided_slice %17 {offsets = [48, 0], sizes = [8, 16], strides = [1, 1]} : vector<64x16xf32> to vector<8x16xf32>
    %402 = vector.extract_strided_slice %399 {offsets = [0, 16], sizes = [8, 16], strides = [1, 1]} : vector<8x32xf32> to vector<8x16xf32>
    %cst_74 = arith.constant 5.000000e-01 : f32
    %403 = vector.broadcast %cst_74 : f32 to vector<8x16xf32>
    %404 = arith.mulf %403, %402 : vector<8x16xf32>
    %405 = math.exp %404 : vector<8x16xf32>
    %406 = arith.mulf %401, %405 : vector<8x16xf32>
    %407 = arith.addf %400, %406 : vector<8x16xf32>
    %c6_i32 = arith.constant 6 : i32
    %408 = vector.broadcast %c6_i32 : i32 to vector<1x8x1xi32>
    %409 = arith.cmpi eq, %22, %408 : vector<1x8x1xi32>
    %410 = vector.shape_cast %399 : vector<8x32xf32> to vector<8x1x32xf32>
    %411 = vector.shape_cast %409 : vector<1x8x1xi1> to vector<1x8x1xi1>
    %412 = vector.broadcast %411 : vector<1x8x1xi1> to vector<8x8x32xi1>
    %413 = vector.shape_cast %410 : vector<8x1x32xf32> to vector<8x1x32xf32>
    %414 = vector.broadcast %413 : vector<8x1x32xf32> to vector<8x8x32xf32>
    %415 = arith.select %412, %414, %358 : vector<8x8x32xi1>, vector<8x8x32xf32>
    %416 = vector.shape_cast %407 : vector<8x16xf32> to vector<8x1x16xf32>
    %417 = vector.shape_cast %409 : vector<1x8x1xi1> to vector<1x8x1xi1>
    %418 = vector.broadcast %417 : vector<1x8x1xi1> to vector<8x8x16xi1>
    %419 = vector.shape_cast %416 : vector<8x1x16xf32> to vector<8x1x16xf32>
    %420 = vector.broadcast %419 : vector<8x1x16xf32> to vector<8x8x16xf32>
    %421 = arith.select %418, %420, %364 : vector<8x8x16xi1>, vector<8x8x16xf32>
    %422 = vector.extract_strided_slice %11 {offsets = [56, 0], sizes = [8, 512], strides = [1, 1]} : vector<64x512xf32> to vector<8x512xf32>
    %cst_75 = arith.constant dense<0.000000e+00> : vector<8x512xf32>
    %423 = tpu.matmul %392, %12, %cst_75 {dimension_numbers = #tpu.dot_dimension_numbers<[1], [0], [0], [1], [0, 0, 1, 1], [], []>} : vector<8x128xf32>, vector<128x512xf32>, vector<8x512xf32> -> vector<8x512xf32>
    %424 = arith.addf %422, %423 : vector<8x512xf32>
    %425 = vector.extract_strided_slice %424 {offsets = [0, 0], sizes = [8, 128], strides = [1, 1]} : vector<8x512xf32> to vector<8x128xf32>
    %426 = arith.negf %425 : vector<8x128xf32>
    %427 = math.exp %426 : vector<8x128xf32>
    %cst_76 = arith.constant 1.000000e+00 : f32
    %428 = vector.broadcast %cst_76 : f32 to vector<8x128xf32>
    %429 = arith.addf %428, %427 : vector<8x128xf32>
    %430 = arith.divf %428, %429 : vector<8x128xf32>
    %431 = vector.extract_strided_slice %424 {offsets = [0, 128], sizes = [8, 128], strides = [1, 1]} : vector<8x512xf32> to vector<8x128xf32>
    %432 = arith.negf %431 : vector<8x128xf32>
    %433 = math.exp %432 : vector<8x128xf32>
    %cst_77 = arith.constant 1.000000e+00 : f32
    %434 = vector.broadcast %cst_77 : f32 to vector<8x128xf32>
    %435 = arith.addf %434, %433 : vector<8x128xf32>
    %436 = arith.divf %434, %435 : vector<8x128xf32>
    %437 = vector.extract_strided_slice %424 {offsets = [0, 256], sizes = [8, 128], strides = [1, 1]} : vector<8x512xf32> to vector<8x128xf32>
    %438 = math.tanh %437 : vector<8x128xf32>
    %439 = vector.extract_strided_slice %424 {offsets = [0, 384], sizes = [8, 128], strides = [1, 1]} : vector<8x512xf32> to vector<8x128xf32>
    %440 = arith.negf %439 : vector<8x128xf32>
    %441 = math.exp %440 : vector<8x128xf32>
    %cst_78 = arith.constant 1.000000e+00 : f32
    %442 = vector.broadcast %cst_78 : f32 to vector<8x128xf32>
    %443 = arith.addf %442, %441 : vector<8x128xf32>
    %444 = arith.divf %442, %443 : vector<8x128xf32>
    %445 = arith.mulf %436, %390 : vector<8x128xf32>
    %446 = arith.mulf %430, %438 : vector<8x128xf32>
    %447 = arith.addf %445, %446 : vector<8x128xf32>
    %448 = math.tanh %447 : vector<8x128xf32>
    %449 = arith.mulf %444, %448 : vector<8x128xf32>
    %cst_79 = arith.constant dense<0.000000e+00> : vector<8x128xf32>
    %450 = tpu.matmul %449, %13, %cst_79 {dimension_numbers = #tpu.dot_dimension_numbers<[1], [0], [0], [1], [0, 0, 1, 1], [], []>} : vector<8x128xf32>, vector<128x128xf32>, vector<8x128xf32> -> vector<8x128xf32>
    %451 = vector.broadcast %14 : vector<1x128xf32> to vector<8x128xf32>
    %452 = arith.addf %450, %451 : vector<8x128xf32>
    %453 = math.tanh %452 : vector<8x128xf32>
    %cst_80 = arith.constant dense<0.000000e+00> : vector<8x32xf32>
    %454 = tpu.matmul %453, %15, %cst_80 {dimension_numbers = #tpu.dot_dimension_numbers<[1], [0], [0], [1], [0, 0, 1, 1], [], []>} : vector<8x128xf32>, vector<128x32xf32>, vector<8x32xf32> -> vector<8x32xf32>
    %455 = vector.broadcast %16 : vector<1x32xf32> to vector<8x32xf32>
    %456 = arith.addf %454, %455 : vector<8x32xf32>
    %457 = vector.extract_strided_slice %456 {offsets = [0, 0], sizes = [8, 16], strides = [1, 1]} : vector<8x32xf32> to vector<8x16xf32>
    %458 = vector.extract_strided_slice %17 {offsets = [56, 0], sizes = [8, 16], strides = [1, 1]} : vector<64x16xf32> to vector<8x16xf32>
    %459 = vector.extract_strided_slice %456 {offsets = [0, 16], sizes = [8, 16], strides = [1, 1]} : vector<8x32xf32> to vector<8x16xf32>
    %cst_81 = arith.constant 5.000000e-01 : f32
    %460 = vector.broadcast %cst_81 : f32 to vector<8x16xf32>
    %461 = arith.mulf %460, %459 : vector<8x16xf32>
    %462 = math.exp %461 : vector<8x16xf32>
    %463 = arith.mulf %458, %462 : vector<8x16xf32>
    %464 = arith.addf %457, %463 : vector<8x16xf32>
    %c7_i32 = arith.constant 7 : i32
    %465 = vector.broadcast %c7_i32 : i32 to vector<1x8x1xi32>
    %466 = arith.cmpi eq, %22, %465 : vector<1x8x1xi32>
    %467 = vector.shape_cast %456 : vector<8x32xf32> to vector<8x1x32xf32>
    %468 = vector.shape_cast %466 : vector<1x8x1xi1> to vector<1x8x1xi1>
    %469 = vector.broadcast %468 : vector<1x8x1xi1> to vector<8x8x32xi1>
    %470 = vector.shape_cast %467 : vector<8x1x32xf32> to vector<8x1x32xf32>
    %471 = vector.broadcast %470 : vector<8x1x32xf32> to vector<8x8x32xf32>
    %472 = arith.select %469, %471, %415 : vector<8x8x32xi1>, vector<8x8x32xf32>
    %473 = vector.shape_cast %464 : vector<8x16xf32> to vector<8x1x16xf32>
    %474 = vector.shape_cast %466 : vector<1x8x1xi1> to vector<1x8x1xi1>
    %475 = vector.broadcast %474 : vector<1x8x1xi1> to vector<8x8x16xi1>
    %476 = vector.shape_cast %473 : vector<8x1x16xf32> to vector<8x1x16xf32>
    %477 = vector.broadcast %476 : vector<8x1x16xf32> to vector<8x8x16xf32>
    %478 = arith.select %475, %477, %421 : vector<8x8x16xi1>, vector<8x8x16xf32>
    %479 = vector.extract_strided_slice %472 {offsets = [0, 0, 0], sizes = [8, 8, 16], strides = [1, 1, 1]} : vector<8x8x32xf32> to vector<8x8x16xf32>
    %c0_82 = arith.constant 0 : index
    %c0_83 = arith.constant 0 : index
    %c0_84 = arith.constant 0 : index
    %480 = vector.load %arg25[%c0_82, %c0_83, %c0_84] : memref<8x8x16xf32, #tpu.memory_space<vmem>>, vector<8x8x16xf32>
    tpu.vector_store %arg25[%c0_82, %c0_83, %c0_84], %479 {strides = array<i32>} : memref<8x8x16xf32, #tpu.memory_space<vmem>>, vector<8x8x16xf32>,
    %481 = vector.extract_strided_slice %472 {offsets = [0, 0, 16], sizes = [8, 8, 16], strides = [1, 1, 1]} : vector<8x8x32xf32> to vector<8x8x16xf32>
    %c0_85 = arith.constant 0 : index
    %c0_86 = arith.constant 0 : index
    %c0_87 = arith.constant 0 : index
    %482 = vector.load %arg26[%c0_85, %c0_86, %c0_87] : memref<8x8x16xf32, #tpu.memory_space<vmem>>, vector<8x8x16xf32>
    tpu.vector_store %arg26[%c0_85, %c0_86, %c0_87], %481 {strides = array<i32>} : memref<8x8x16xf32, #tpu.memory_space<vmem>>, vector<8x8x16xf32>,
    %c0_88 = arith.constant 0 : index
    %c0_89 = arith.constant 0 : index
    %c0_90 = arith.constant 0 : index
    %483 = vector.load %arg27[%c0_88, %c0_89, %c0_90] : memref<8x8x16xf32, #tpu.memory_space<vmem>>, vector<8x8x16xf32>
    tpu.vector_store %arg27[%c0_88, %c0_89, %c0_90], %478 {strides = array<i32>} : memref<8x8x16xf32, #tpu.memory_space<vmem>>, vector<8x8x16xf32>,
    %484 = vector.shape_cast %478 : vector<8x8x16xf32> to vector<64x16xf32>
    %c0_91 = arith.constant 0 : index
    %c0_92 = arith.constant 0 : index
    %485 = vector.load %arg1[%c0_91, %c0_92] : memref<64x16xf32, #tpu.memory_space<vmem>>, vector<64x16xf32>
    %c0_93 = arith.constant 0 : index
    %c0_94 = arith.constant 0 : index
    %486 = vector.load %arg12[%c0_93, %c0_94] : memref<16x128xf32, #tpu.memory_space<vmem>>, vector<16x128xf32>
    %cst_95 = arith.constant dense<0.000000e+00> : vector<64x128xf32>
    %487 = tpu.matmul %484, %486, %cst_95 {dimension_numbers = #tpu.dot_dimension_numbers<[1], [0], [0], [1], [0, 0, 1, 1], [], []>} : vector<64x16xf32>, vector<16x128xf32>, vector<64x128xf32> -> vector<64x128xf32>
    %c0_96 = arith.constant 0 : index
    %c0_97 = arith.constant 0 : index
    %488 = vector.load %arg13[%c0_96, %c0_97] : memref<1x128xf32, #tpu.memory_space<vmem>>, vector<1x128xf32>
    %489 = vector.broadcast %488 : vector<1x128xf32> to vector<64x128xf32>
    %490 = arith.addf %487, %489 : vector<64x128xf32>
    %491 = math.tanh %490 : vector<64x128xf32>
    %c0_98 = arith.constant 0 : index
    %c0_99 = arith.constant 0 : index
    %492 = vector.load %arg14[%c0_98, %c0_99] : memref<16x128xf32, #tpu.memory_space<vmem>>, vector<16x128xf32>
    %cst_100 = arith.constant dense<0.000000e+00> : vector<64x128xf32>
    %493 = tpu.matmul %485, %492, %cst_100 {dimension_numbers = #tpu.dot_dimension_numbers<[1], [0], [0], [1], [0, 0, 1, 1], [], []>} : vector<64x16xf32>, vector<16x128xf32>, vector<64x128xf32> -> vector<64x128xf32>
    %c0_101 = arith.constant 0 : index
    %c0_102 = arith.constant 0 : index
    %494 = vector.load %arg15[%c0_101, %c0_102] : memref<1x128xf32, #tpu.memory_space<vmem>>, vector<1x128xf32>
    %495 = vector.broadcast %494 : vector<1x128xf32> to vector<64x128xf32>
    %496 = arith.addf %493, %495 : vector<64x128xf32>
    %497 = math.tanh %496 : vector<64x128xf32>
    %c0_103 = arith.constant 0 : index
    %c0_104 = arith.constant 0 : index
    %498 = vector.load %arg16[%c0_103, %c0_104] : memref<128x512xf32, #tpu.memory_space<vmem>>, vector<128x512xf32>
    %cst_105 = arith.constant dense<0.000000e+00> : vector<64x512xf32>
    %499 = tpu.matmul %491, %498, %cst_105 {dimension_numbers = #tpu.dot_dimension_numbers<[1], [0], [0], [1], [0, 0, 1, 1], [], []>} : vector<64x128xf32>, vector<128x512xf32>, vector<64x512xf32> -> vector<64x512xf32>
    %c0_106 = arith.constant 0 : index
    %c0_107 = arith.constant 0 : index
    %500 = vector.load %arg17[%c0_106, %c0_107] : memref<128x512xf32, #tpu.memory_space<vmem>>, vector<128x512xf32>
    %cst_108 = arith.constant dense<0.000000e+00> : vector<64x512xf32>
    %501 = tpu.matmul %497, %500, %cst_108 {dimension_numbers = #tpu.dot_dimension_numbers<[1], [0], [0], [1], [0, 0, 1, 1], [], []>} : vector<64x128xf32>, vector<128x512xf32>, vector<64x512xf32> -> vector<64x512xf32>
    %502 = arith.addf %499, %501 : vector<64x512xf32>
    %c0_109 = arith.constant 0 : index
    %c0_110 = arith.constant 0 : index
    %503 = vector.load %arg19[%c0_109, %c0_110] : memref<1x512xf32, #tpu.memory_space<vmem>>, vector<1x512xf32>
    %504 = vector.broadcast %503 : vector<1x512xf32> to vector<64x512xf32>
    %505 = arith.addf %502, %504 : vector<64x512xf32>
    %c0_111 = arith.constant 0 : index
    %c0_112 = arith.constant 0 : index
    %506 = vector.load %arg18[%c0_111, %c0_112] : memref<128x512xf32, #tpu.memory_space<vmem>>, vector<128x512xf32>
    %cst_113 = arith.constant 0.000000e+00 : f32
    %507 = vector.broadcast %cst_113 : f32 to vector<8x128xf32>
    %cst_114 = arith.constant 0.000000e+00 : f32
    %508 = vector.broadcast %cst_114 : f32 to vector<8x128xf32>
    %509 = vector.extract_strided_slice %505 {offsets = [0, 0], sizes = [8, 512], strides = [1, 1]} : vector<64x512xf32> to vector<8x512xf32>
    %cst_115 = arith.constant dense<0.000000e+00> : vector<8x512xf32>
    %510 = tpu.matmul %507, %506, %cst_115 {dimension_numbers = #tpu.dot_dimension_numbers<[1], [0], [0], [1], [0, 0, 1, 1], [], []>} : vector<8x128xf32>, vector<128x512xf32>, vector<8x512xf32> -> vector<8x512xf32>
    %511 = arith.addf %509, %510 : vector<8x512xf32>
    %512 = vector.extract_strided_slice %511 {offsets = [0, 0], sizes = [8, 128], strides = [1, 1]} : vector<8x512xf32> to vector<8x128xf32>
    %513 = arith.negf %512 : vector<8x128xf32>
    %514 = math.exp %513 : vector<8x128xf32>
    %cst_116 = arith.constant 1.000000e+00 : f32
    %515 = vector.broadcast %cst_116 : f32 to vector<8x128xf32>
    %516 = arith.addf %515, %514 : vector<8x128xf32>
    %517 = arith.divf %515, %516 : vector<8x128xf32>
    %518 = vector.extract_strided_slice %511 {offsets = [0, 128], sizes = [8, 128], strides = [1, 1]} : vector<8x512xf32> to vector<8x128xf32>
    %519 = arith.negf %518 : vector<8x128xf32>
    %520 = math.exp %519 : vector<8x128xf32>
    %cst_117 = arith.constant 1.000000e+00 : f32
    %521 = vector.broadcast %cst_117 : f32 to vector<8x128xf32>
    %522 = arith.addf %521, %520 : vector<8x128xf32>
    %523 = arith.divf %521, %522 : vector<8x128xf32>
    %524 = vector.extract_strided_slice %511 {offsets = [0, 256], sizes = [8, 128], strides = [1, 1]} : vector<8x512xf32> to vector<8x128xf32>
    %525 = math.tanh %524 : vector<8x128xf32>
    %526 = vector.extract_strided_slice %511 {offsets = [0, 384], sizes = [8, 128], strides = [1, 1]} : vector<8x512xf32> to vector<8x128xf32>
    %527 = arith.negf %526 : vector<8x128xf32>
    %528 = math.exp %527 : vector<8x128xf32>
    %cst_118 = arith.constant 1.000000e+00 : f32
    %529 = vector.broadcast %cst_118 : f32 to vector<8x128xf32>
    %530 = arith.addf %529, %528 : vector<8x128xf32>
    %531 = arith.divf %529, %530 : vector<8x128xf32>
    %532 = arith.mulf %523, %508 : vector<8x128xf32>
    %533 = arith.mulf %517, %525 : vector<8x128xf32>
    %534 = arith.addf %532, %533 : vector<8x128xf32>
    %535 = math.tanh %534 : vector<8x128xf32>
    %536 = arith.mulf %531, %535 : vector<8x128xf32>
    %537 = vector.extract_strided_slice %505 {offsets = [8, 0], sizes = [8, 512], strides = [1, 1]} : vector<64x512xf32> to vector<8x512xf32>
    %cst_119 = arith.constant dense<0.000000e+00> : vector<8x512xf32>
    %538 = tpu.matmul %536, %506, %cst_119 {dimension_numbers = #tpu.dot_dimension_numbers<[1], [0], [0], [1], [0, 0, 1, 1], [], []>} : vector<8x128xf32>, vector<128x512xf32>, vector<8x512xf32> -> vector<8x512xf32>
    %539 = arith.addf %537, %538 : vector<8x512xf32>
    %540 = vector.extract_strided_slice %539 {offsets = [0, 0], sizes = [8, 128], strides = [1, 1]} : vector<8x512xf32> to vector<8x128xf32>
    %541 = arith.negf %540 : vector<8x128xf32>
    %542 = math.exp %541 : vector<8x128xf32>
    %cst_120 = arith.constant 1.000000e+00 : f32
    %543 = vector.broadcast %cst_120 : f32 to vector<8x128xf32>
    %544 = arith.addf %543, %542 : vector<8x128xf32>
    %545 = arith.divf %543, %544 : vector<8x128xf32>
    %546 = vector.extract_strided_slice %539 {offsets = [0, 128], sizes = [8, 128], strides = [1, 1]} : vector<8x512xf32> to vector<8x128xf32>
    %547 = arith.negf %546 : vector<8x128xf32>
    %548 = math.exp %547 : vector<8x128xf32>
    %cst_121 = arith.constant 1.000000e+00 : f32
    %549 = vector.broadcast %cst_121 : f32 to vector<8x128xf32>
    %550 = arith.addf %549, %548 : vector<8x128xf32>
    %551 = arith.divf %549, %550 : vector<8x128xf32>
    %552 = vector.extract_strided_slice %539 {offsets = [0, 256], sizes = [8, 128], strides = [1, 1]} : vector<8x512xf32> to vector<8x128xf32>
    %553 = math.tanh %552 : vector<8x128xf32>
    %554 = vector.extract_strided_slice %539 {offsets = [0, 384], sizes = [8, 128], strides = [1, 1]} : vector<8x512xf32> to vector<8x128xf32>
    %555 = arith.negf %554 : vector<8x128xf32>
    %556 = math.exp %555 : vector<8x128xf32>
    %cst_122 = arith.constant 1.000000e+00 : f32
    %557 = vector.broadcast %cst_122 : f32 to vector<8x128xf32>
    %558 = arith.addf %557, %556 : vector<8x128xf32>
    %559 = arith.divf %557, %558 : vector<8x128xf32>
    %560 = arith.mulf %551, %534 : vector<8x128xf32>
    %561 = arith.mulf %545, %553 : vector<8x128xf32>
    %562 = arith.addf %560, %561 : vector<8x128xf32>
    %563 = math.tanh %562 : vector<8x128xf32>
    %564 = arith.mulf %559, %563 : vector<8x128xf32>
    %565 = vector.extract_strided_slice %505 {offsets = [16, 0], sizes = [8, 512], strides = [1, 1]} : vector<64x512xf32> to vector<8x512xf32>
    %cst_123 = arith.constant dense<0.000000e+00> : vector<8x512xf32>
    %566 = tpu.matmul %564, %506, %cst_123 {dimension_numbers = #tpu.dot_dimension_numbers<[1], [0], [0], [1], [0, 0, 1, 1], [], []>} : vector<8x128xf32>, vector<128x512xf32>, vector<8x512xf32> -> vector<8x512xf32>
    %567 = arith.addf %565, %566 : vector<8x512xf32>
    %568 = vector.extract_strided_slice %567 {offsets = [0, 0], sizes = [8, 128], strides = [1, 1]} : vector<8x512xf32> to vector<8x128xf32>
    %569 = arith.negf %568 : vector<8x128xf32>
    %570 = math.exp %569 : vector<8x128xf32>
    %cst_124 = arith.constant 1.000000e+00 : f32
    %571 = vector.broadcast %cst_124 : f32 to vector<8x128xf32>
    %572 = arith.addf %571, %570 : vector<8x128xf32>
    %573 = arith.divf %571, %572 : vector<8x128xf32>
    %574 = vector.extract_strided_slice %567 {offsets = [0, 128], sizes = [8, 128], strides = [1, 1]} : vector<8x512xf32> to vector<8x128xf32>
    %575 = arith.negf %574 : vector<8x128xf32>
    %576 = math.exp %575 : vector<8x128xf32>
    %cst_125 = arith.constant 1.000000e+00 : f32
    %577 = vector.broadcast %cst_125 : f32 to vector<8x128xf32>
    %578 = arith.addf %577, %576 : vector<8x128xf32>
    %579 = arith.divf %577, %578 : vector<8x128xf32>
    %580 = vector.extract_strided_slice %567 {offsets = [0, 256], sizes = [8, 128], strides = [1, 1]} : vector<8x512xf32> to vector<8x128xf32>
    %581 = math.tanh %580 : vector<8x128xf32>
    %582 = vector.extract_strided_slice %567 {offsets = [0, 384], sizes = [8, 128], strides = [1, 1]} : vector<8x512xf32> to vector<8x128xf32>
    %583 = arith.negf %582 : vector<8x128xf32>
    %584 = math.exp %583 : vector<8x128xf32>
    %cst_126 = arith.constant 1.000000e+00 : f32
    %585 = vector.broadcast %cst_126 : f32 to vector<8x128xf32>
    %586 = arith.addf %585, %584 : vector<8x128xf32>
    %587 = arith.divf %585, %586 : vector<8x128xf32>
    %588 = arith.mulf %579, %562 : vector<8x128xf32>
    %589 = arith.mulf %573, %581 : vector<8x128xf32>
    %590 = arith.addf %588, %589 : vector<8x128xf32>
    %591 = math.tanh %590 : vector<8x128xf32>
    %592 = arith.mulf %587, %591 : vector<8x128xf32>
    %593 = vector.extract_strided_slice %505 {offsets = [24, 0], sizes = [8, 512], strides = [1, 1]} : vector<64x512xf32> to vector<8x512xf32>
    %cst_127 = arith.constant dense<0.000000e+00> : vector<8x512xf32>
    %594 = tpu.matmul %592, %506, %cst_127 {dimension_numbers = #tpu.dot_dimension_numbers<[1], [0], [0], [1], [0, 0, 1, 1], [], []>} : vector<8x128xf32>, vector<128x512xf32>, vector<8x512xf32> -> vector<8x512xf32>
    %595 = arith.addf %593, %594 : vector<8x512xf32>
    %596 = vector.extract_strided_slice %595 {offsets = [0, 0], sizes = [8, 128], strides = [1, 1]} : vector<8x512xf32> to vector<8x128xf32>
    %597 = arith.negf %596 : vector<8x128xf32>
    %598 = math.exp %597 : vector<8x128xf32>
    %cst_128 = arith.constant 1.000000e+00 : f32
    %599 = vector.broadcast %cst_128 : f32 to vector<8x128xf32>
    %600 = arith.addf %599, %598 : vector<8x128xf32>
    %601 = arith.divf %599, %600 : vector<8x128xf32>
    %602 = vector.extract_strided_slice %595 {offsets = [0, 128], sizes = [8, 128], strides = [1, 1]} : vector<8x512xf32> to vector<8x128xf32>
    %603 = arith.negf %602 : vector<8x128xf32>
    %604 = math.exp %603 : vector<8x128xf32>
    %cst_129 = arith.constant 1.000000e+00 : f32
    %605 = vector.broadcast %cst_129 : f32 to vector<8x128xf32>
    %606 = arith.addf %605, %604 : vector<8x128xf32>
    %607 = arith.divf %605, %606 : vector<8x128xf32>
    %608 = vector.extract_strided_slice %595 {offsets = [0, 256], sizes = [8, 128], strides = [1, 1]} : vector<8x512xf32> to vector<8x128xf32>
    %609 = math.tanh %608 : vector<8x128xf32>
    %610 = vector.extract_strided_slice %595 {offsets = [0, 384], sizes = [8, 128], strides = [1, 1]} : vector<8x512xf32> to vector<8x128xf32>
    %611 = arith.negf %610 : vector<8x128xf32>
    %612 = math.exp %611 : vector<8x128xf32>
    %cst_130 = arith.constant 1.000000e+00 : f32
    %613 = vector.broadcast %cst_130 : f32 to vector<8x128xf32>
    %614 = arith.addf %613, %612 : vector<8x128xf32>
    %615 = arith.divf %613, %614 : vector<8x128xf32>
    %616 = arith.mulf %607, %590 : vector<8x128xf32>
    %617 = arith.mulf %601, %609 : vector<8x128xf32>
    %618 = arith.addf %616, %617 : vector<8x128xf32>
    %619 = math.tanh %618 : vector<8x128xf32>
    %620 = arith.mulf %615, %619 : vector<8x128xf32>
    %621 = vector.extract_strided_slice %505 {offsets = [32, 0], sizes = [8, 512], strides = [1, 1]} : vector<64x512xf32> to vector<8x512xf32>
    %cst_131 = arith.constant dense<0.000000e+00> : vector<8x512xf32>
    %622 = tpu.matmul %620, %506, %cst_131 {dimension_numbers = #tpu.dot_dimension_numbers<[1], [0], [0], [1], [0, 0, 1, 1], [], []>} : vector<8x128xf32>, vector<128x512xf32>, vector<8x512xf32> -> vector<8x512xf32>
    %623 = arith.addf %621, %622 : vector<8x512xf32>
    %624 = vector.extract_strided_slice %623 {offsets = [0, 0], sizes = [8, 128], strides = [1, 1]} : vector<8x512xf32> to vector<8x128xf32>
    %625 = arith.negf %624 : vector<8x128xf32>
    %626 = math.exp %625 : vector<8x128xf32>
    %cst_132 = arith.constant 1.000000e+00 : f32
    %627 = vector.broadcast %cst_132 : f32 to vector<8x128xf32>
    %628 = arith.addf %627, %626 : vector<8x128xf32>
    %629 = arith.divf %627, %628 : vector<8x128xf32>
    %630 = vector.extract_strided_slice %623 {offsets = [0, 128], sizes = [8, 128], strides = [1, 1]} : vector<8x512xf32> to vector<8x128xf32>
    %631 = arith.negf %630 : vector<8x128xf32>
    %632 = math.exp %631 : vector<8x128xf32>
    %cst_133 = arith.constant 1.000000e+00 : f32
    %633 = vector.broadcast %cst_133 : f32 to vector<8x128xf32>
    %634 = arith.addf %633, %632 : vector<8x128xf32>
    %635 = arith.divf %633, %634 : vector<8x128xf32>
    %636 = vector.extract_strided_slice %623 {offsets = [0, 256], sizes = [8, 128], strides = [1, 1]} : vector<8x512xf32> to vector<8x128xf32>
    %637 = math.tanh %636 : vector<8x128xf32>
    %638 = vector.extract_strided_slice %623 {offsets = [0, 384], sizes = [8, 128], strides = [1, 1]} : vector<8x512xf32> to vector<8x128xf32>
    %639 = arith.negf %638 : vector<8x128xf32>
    %640 = math.exp %639 : vector<8x128xf32>
    %cst_134 = arith.constant 1.000000e+00 : f32
    %641 = vector.broadcast %cst_134 : f32 to vector<8x128xf32>
    %642 = arith.addf %641, %640 : vector<8x128xf32>
    %643 = arith.divf %641, %642 : vector<8x128xf32>
    %644 = arith.mulf %635, %618 : vector<8x128xf32>
    %645 = arith.mulf %629, %637 : vector<8x128xf32>
    %646 = arith.addf %644, %645 : vector<8x128xf32>
    %647 = math.tanh %646 : vector<8x128xf32>
    %648 = arith.mulf %643, %647 : vector<8x128xf32>
    %649 = vector.extract_strided_slice %505 {offsets = [40, 0], sizes = [8, 512], strides = [1, 1]} : vector<64x512xf32> to vector<8x512xf32>
    %cst_135 = arith.constant dense<0.000000e+00> : vector<8x512xf32>
    %650 = tpu.matmul %648, %506, %cst_135 {dimension_numbers = #tpu.dot_dimension_numbers<[1], [0], [0], [1], [0, 0, 1, 1], [], []>} : vector<8x128xf32>, vector<128x512xf32>, vector<8x512xf32> -> vector<8x512xf32>
    %651 = arith.addf %649, %650 : vector<8x512xf32>
    %652 = vector.extract_strided_slice %651 {offsets = [0, 0], sizes = [8, 128], strides = [1, 1]} : vector<8x512xf32> to vector<8x128xf32>
    %653 = arith.negf %652 : vector<8x128xf32>
    %654 = math.exp %653 : vector<8x128xf32>
    %cst_136 = arith.constant 1.000000e+00 : f32
    %655 = vector.broadcast %cst_136 : f32 to vector<8x128xf32>
    %656 = arith.addf %655, %654 : vector<8x128xf32>
    %657 = arith.divf %655, %656 : vector<8x128xf32>
    %658 = vector.extract_strided_slice %651 {offsets = [0, 128], sizes = [8, 128], strides = [1, 1]} : vector<8x512xf32> to vector<8x128xf32>
    %659 = arith.negf %658 : vector<8x128xf32>
    %660 = math.exp %659 : vector<8x128xf32>
    %cst_137 = arith.constant 1.000000e+00 : f32
    %661 = vector.broadcast %cst_137 : f32 to vector<8x128xf32>
    %662 = arith.addf %661, %660 : vector<8x128xf32>
    %663 = arith.divf %661, %662 : vector<8x128xf32>
    %664 = vector.extract_strided_slice %651 {offsets = [0, 256], sizes = [8, 128], strides = [1, 1]} : vector<8x512xf32> to vector<8x128xf32>
    %665 = math.tanh %664 : vector<8x128xf32>
    %666 = vector.extract_strided_slice %651 {offsets = [0, 384], sizes = [8, 128], strides = [1, 1]} : vector<8x512xf32> to vector<8x128xf32>
    %667 = arith.negf %666 : vector<8x128xf32>
    %668 = math.exp %667 : vector<8x128xf32>
    %cst_138 = arith.constant 1.000000e+00 : f32
    %669 = vector.broadcast %cst_138 : f32 to vector<8x128xf32>
    %670 = arith.addf %669, %668 : vector<8x128xf32>
    %671 = arith.divf %669, %670 : vector<8x128xf32>
    %672 = arith.mulf %663, %646 : vector<8x128xf32>
    %673 = arith.mulf %657, %665 : vector<8x128xf32>
    %674 = arith.addf %672, %673 : vector<8x128xf32>
    %675 = math.tanh %674 : vector<8x128xf32>
    %676 = arith.mulf %671, %675 : vector<8x128xf32>
    %677 = vector.extract_strided_slice %505 {offsets = [48, 0], sizes = [8, 512], strides = [1, 1]} : vector<64x512xf32> to vector<8x512xf32>
    %cst_139 = arith.constant dense<0.000000e+00> : vector<8x512xf32>
    %678 = tpu.matmul %676, %506, %cst_139 {dimension_numbers = #tpu.dot_dimension_numbers<[1], [0], [0], [1], [0, 0, 1, 1], [], []>} : vector<8x128xf32>, vector<128x512xf32>, vector<8x512xf32> -> vector<8x512xf32>
    %679 = arith.addf %677, %678 : vector<8x512xf32>
    %680 = vector.extract_strided_slice %679 {offsets = [0, 0], sizes = [8, 128], strides = [1, 1]} : vector<8x512xf32> to vector<8x128xf32>
    %681 = arith.negf %680 : vector<8x128xf32>
    %682 = math.exp %681 : vector<8x128xf32>
    %cst_140 = arith.constant 1.000000e+00 : f32
    %683 = vector.broadcast %cst_140 : f32 to vector<8x128xf32>
    %684 = arith.addf %683, %682 : vector<8x128xf32>
    %685 = arith.divf %683, %684 : vector<8x128xf32>
    %686 = vector.extract_strided_slice %679 {offsets = [0, 128], sizes = [8, 128], strides = [1, 1]} : vector<8x512xf32> to vector<8x128xf32>
    %687 = arith.negf %686 : vector<8x128xf32>
    %688 = math.exp %687 : vector<8x128xf32>
    %cst_141 = arith.constant 1.000000e+00 : f32
    %689 = vector.broadcast %cst_141 : f32 to vector<8x128xf32>
    %690 = arith.addf %689, %688 : vector<8x128xf32>
    %691 = arith.divf %689, %690 : vector<8x128xf32>
    %692 = vector.extract_strided_slice %679 {offsets = [0, 256], sizes = [8, 128], strides = [1, 1]} : vector<8x512xf32> to vector<8x128xf32>
    %693 = math.tanh %692 : vector<8x128xf32>
    %694 = vector.extract_strided_slice %679 {offsets = [0, 384], sizes = [8, 128], strides = [1, 1]} : vector<8x512xf32> to vector<8x128xf32>
    %695 = arith.negf %694 : vector<8x128xf32>
    %696 = math.exp %695 : vector<8x128xf32>
    %cst_142 = arith.constant 1.000000e+00 : f32
    %697 = vector.broadcast %cst_142 : f32 to vector<8x128xf32>
    %698 = arith.addf %697, %696 : vector<8x128xf32>
    %699 = arith.divf %697, %698 : vector<8x128xf32>
    %700 = arith.mulf %691, %674 : vector<8x128xf32>
    %701 = arith.mulf %685, %693 : vector<8x128xf32>
    %702 = arith.addf %700, %701 : vector<8x128xf32>
    %703 = math.tanh %702 : vector<8x128xf32>
    %704 = arith.mulf %699, %703 : vector<8x128xf32>
    %705 = vector.extract_strided_slice %505 {offsets = [56, 0], sizes = [8, 512], strides = [1, 1]} : vector<64x512xf32> to vector<8x512xf32>
    %cst_143 = arith.constant dense<0.000000e+00> : vector<8x512xf32>
    %706 = tpu.matmul %704, %506, %cst_143 {dimension_numbers = #tpu.dot_dimension_numbers<[1], [0], [0], [1], [0, 0, 1, 1], [], []>} : vector<8x128xf32>, vector<128x512xf32>, vector<8x512xf32> -> vector<8x512xf32>
    %707 = arith.addf %705, %706 : vector<8x512xf32>
    %708 = vector.extract_strided_slice %707 {offsets = [0, 0], sizes = [8, 128], strides = [1, 1]} : vector<8x512xf32> to vector<8x128xf32>
    %709 = arith.negf %708 : vector<8x128xf32>
    %710 = math.exp %709 : vector<8x128xf32>
    %cst_144 = arith.constant 1.000000e+00 : f32
    %711 = vector.broadcast %cst_144 : f32 to vector<8x128xf32>
    %712 = arith.addf %711, %710 : vector<8x128xf32>
    %713 = arith.divf %711, %712 : vector<8x128xf32>
    %714 = vector.extract_strided_slice %707 {offsets = [0, 128], sizes = [8, 128], strides = [1, 1]} : vector<8x512xf32> to vector<8x128xf32>
    %715 = arith.negf %714 : vector<8x128xf32>
    %716 = math.exp %715 : vector<8x128xf32>
    %cst_145 = arith.constant 1.000000e+00 : f32
    %717 = vector.broadcast %cst_145 : f32 to vector<8x128xf32>
    %718 = arith.addf %717, %716 : vector<8x128xf32>
    %719 = arith.divf %717, %718 : vector<8x128xf32>
    %720 = vector.extract_strided_slice %707 {offsets = [0, 256], sizes = [8, 128], strides = [1, 1]} : vector<8x512xf32> to vector<8x128xf32>
    %721 = math.tanh %720 : vector<8x128xf32>
    %722 = vector.extract_strided_slice %707 {offsets = [0, 384], sizes = [8, 128], strides = [1, 1]} : vector<8x512xf32> to vector<8x128xf32>
    %723 = arith.negf %722 : vector<8x128xf32>
    %724 = math.exp %723 : vector<8x128xf32>
    %cst_146 = arith.constant 1.000000e+00 : f32
    %725 = vector.broadcast %cst_146 : f32 to vector<8x128xf32>
    %726 = arith.addf %725, %724 : vector<8x128xf32>
    %727 = arith.divf %725, %726 : vector<8x128xf32>
    %728 = arith.mulf %719, %702 : vector<8x128xf32>
    %729 = arith.mulf %713, %721 : vector<8x128xf32>
    %730 = arith.addf %728, %729 : vector<8x128xf32>
    %731 = math.tanh %730 : vector<8x128xf32>
    %732 = arith.mulf %727, %731 : vector<8x128xf32>
    %733 = tpu.concatenate %536, %564, %592, %620, %648, %676, %704, %732 in 0 : vector<8x128xf32>, vector<8x128xf32>, vector<8x128xf32>, vector<8x128xf32>, vector<8x128xf32>, vector<8x128xf32>, vector<8x128xf32>, vector<8x128xf32> -> vector<64x128xf32>
    %c0_147 = arith.constant 0 : index
    %c0_148 = arith.constant 0 : index
    %734 = vector.load %arg20[%c0_147, %c0_148] : memref<128x128xf32, #tpu.memory_space<vmem>>, vector<128x128xf32>
    %cst_149 = arith.constant dense<0.000000e+00> : vector<64x128xf32>
    %735 = tpu.matmul %733, %734, %cst_149 {dimension_numbers = #tpu.dot_dimension_numbers<[1], [0], [0], [1], [0, 0, 1, 1], [], []>} : vector<64x128xf32>, vector<128x128xf32>, vector<64x128xf32> -> vector<64x128xf32>
    %c0_150 = arith.constant 0 : index
    %c0_151 = arith.constant 0 : index
    %736 = vector.load %arg21[%c0_150, %c0_151] : memref<1x128xf32, #tpu.memory_space<vmem>>, vector<1x128xf32>
    %737 = vector.broadcast %736 : vector<1x128xf32> to vector<64x128xf32>
    %738 = arith.addf %735, %737 : vector<64x128xf32>
    %739 = math.tanh %738 : vector<64x128xf32>
    %c0_152 = arith.constant 0 : index
    %c0_153 = arith.constant 0 : index
    %740 = vector.load %arg22[%c0_152, %c0_153] : memref<128x16xf32, #tpu.memory_space<vmem>>, vector<128x16xf32>
    %cst_154 = arith.constant dense<0.000000e+00> : vector<64x16xf32>
    %741 = tpu.matmul %739, %740, %cst_154 {dimension_numbers = #tpu.dot_dimension_numbers<[1], [0], [0], [1], [0, 0, 1, 1], [], []>} : vector<64x128xf32>, vector<128x16xf32>, vector<64x16xf32> -> vector<64x16xf32>
    %c0_155 = arith.constant 0 : index
    %c0_156 = arith.constant 0 : index
    %742 = vector.load %arg23[%c0_155, %c0_156] : memref<1x16xf32, #tpu.memory_space<vmem>>, vector<1x16xf32>
    %743 = vector.broadcast %742 : vector<1x16xf32> to vector<64x16xf32>
    %744 = arith.addf %741, %743 : vector<64x16xf32>
    %745 = vector.shape_cast %744 : vector<64x16xf32> to vector<8x8x16xf32>
    %c0_157 = arith.constant 0 : index
    %c0_158 = arith.constant 0 : index
    %c0_159 = arith.constant 0 : index
    %746 = vector.load %arg24[%c0_157, %c0_158, %c0_159] : memref<8x8x16xf32, #tpu.memory_space<vmem>>, vector<8x8x16xf32>
    tpu.vector_store %arg24[%c0_157, %c0_158, %c0_159], %745 {strides = array<i32>} : memref<8x8x16xf32, #tpu.memory_space<vmem>>, vector<8x8x16xf32>,
    return
  }
}

</mosaic_0001>

<bundles_post_ra>
// kernel: storn_forward.1
= control target key start
LH: loop header
LB: loop body
LE: loop exit
PB: predicated region body
PF: predicated region fallthrough
CT: control target
= control target key end

     0   :  { %s14047_s0 = inlined_call_operand.vmem [shape: f32[64,16], index: 0, kind: input, shape index: {}]   ;;  %s14048_s1 = inlined_call_operand.vmem [shape: f32[64,16], index: 1, kind: input, shape index: {}]   ;;  %s14049_s2 = inlined_call_operand.vmem [shape: f32[64,16], index: 2, kind: input, shape index: {}]   ;;  %s14050_s3 = inlined_call_operand.vmem [shape: f32[16,128], index: 3, kind: input, shape index: {}]   ;;  %s14051_s4 = inlined_call_operand.vmem [shape: f32[1,128], index: 4, kind: input, shape index: {}]   ;;  %s14052_s5 = inlined_call_operand.vmem [shape: f32[128,512], index: 5, kind: input, shape index: {}]   ;;  %s14053_s6 = inlined_call_operand.hbm [shape: f32[128,512], index: 6, kind: input, shape index: {}]   ;;  %s14054_s7 = inlined_call_operand.vmem [shape: f32[1,512], index: 7, kind: input, shape index: {}]   ;;  %s14055_s8 = inlined_call_operand.vmem [shape: f32[128,128], index: 8, kind: input, shape index: {}]   ;;  %s14056_s9 = inlined_call_operand.vmem [shape: f32[1,128], index: 9, kind: input, shape index: {}]   ;;  %s14057_s10 = inlined_call_operand.vmem [shape: f32[128,32], index: 10, kind: input, shape index: {}]   ;;  %s14058_s11 = inlined_call_operand.vmem [shape: f32[1,32], index: 11, kind: input, shape index: {}]   ;;  %s14059_s12 = inlined_call_operand.vmem [shape: f32[16,128], index: 12, kind: input, shape index: {}]   ;;  %s14060_s13 = inlined_call_operand.vmem [shape: f32[1,128], index: 13, kind: input, shape index: {}]   ;;  %s14061_s14 = inlined_call_operand.vmem [shape: f32[16,128], index: 14, kind: input, shape index: {}]   ;;  %s14062_s15 = inlined_call_operand.vmem [shape: f32[1,128], index: 15, kind: input, shape index: {}]   ;;  %s14063_s16 = inlined_call_operand.hbm [shape: f32[128,512], index: 16, kind: input, shape index: {}]   ;;  %s14064_s17 = inlined_call_operand.hbm [shape: f32[128,512], index: 17, kind: input, shape index: {}]   ;;  %s14065_s18 = inlined_call_operand.hbm [shape: f32[128,512], index: 18, kind: input, shape index: {}]   ;;  %s14066_s19 = inlined_call_operand.vmem [shape: f32[1,512], index: 19, kind: input, shape index: {}]   ;;  %s14067_s20 = inlined_call_operand.vmem [shape: f32[128,128], index: 20, kind: input, shape index: {}]   ;;  %s14068_s21 = inlined_call_operand.vmem [shape: f32[1,128], index: 21, kind: input, shape index: {}]   ;;  %s14069_s22 = inlined_call_operand.vmem [shape: f32[128,16], index: 22, kind: input, shape index: {}]   ;;  %s14070_s23 = inlined_call_operand.vmem [shape: f32[1,16], index: 23, kind: input, shape index: {}]   ;;  %s14071_s24 = inlined_call_operand.vmem [shape: f32[8,8,16], index: 24, kind: output, shape index: {0}]   ;;  %s14072_s25 = inlined_call_operand.vmem [shape: f32[8,8,16], index: 25, kind: output, shape index: {1}]   ;;  %s14073_s26 = inlined_call_operand.vmem [shape: f32[8,8,16], index: 26, kind: output, shape index: {2}]   ;;  %s14074_s27 = inlined_call_operand.vmem [shape: f32[8,8,16], index: 27, kind: output, shape index: {3}]  }
   0x1   :  { %14475 = sst [smem:[#allocation91_spill]] %s14047_s0 }
   0x2   :  { %14476 = sst [smem:[#allocation92_spill]] %s14048_s1 }
   0x3   :  { %14477 = sst [smem:[#allocation93_spill]] %s14049_s2 }
   0x4   :  { %14478 = sst [smem:[#allocation94_spill]] %s14050_s3 }
   0x5   :  { %14479 = sst [smem:[#allocation95_spill]] %s14051_s4 }
   0x6   :  { %14480 = sst [smem:[#allocation96_spill]] %s14052_s5 }
   0x7   :  { %14481 = sst [smem:[#allocation97_spill]] %s14053_s6 }
   0x8   :  { %14482 = sst [smem:[#allocation98_spill]] %s14054_s7 }
   0x9   :  { %14483 = sst [smem:[#allocation99_spill]] %s14055_s8 }
   0xa   :  { %14484 = sst [smem:[#allocation100_spill]] %s14056_s9 }
   0xb   :  { %14485 = sst [smem:[#allocation101_spill]] %s14057_s10 }
   0xc   :  { %14486 = sst [smem:[#allocation102_spill]] %s14058_s11 }
   0xd   :  { %33 = vsyncpa [#allocation3], 0 }
   0xe   :  { %34 = vsyncpa [#allocation5], 0 }
   0xf   :  { %35 = vsyncpa [#allocation8], 0  ;;  %s9413_s7 = smov [#allocation4]   ;;  %s9414_s8 = smov [#allocation2]  }
  0x10   :  { %s83_s4 = sshll.u32 %s9413_s7, 4  ;;  %s53_s30 = sshll.u32 %s9414_s8, 4  ;;  %s84_s4 = int_to_ptr.vmem [resolvable:$true] %s83_s4  ;;  %s54_s30 = int_to_ptr.vmem [resolvable:$true] %s53_s30 }
  0x11   :  { %s9335_s9 = scalar_lea.vmem %s84_s4, 8192  ;;  %p9340_p1 = scmp.lt.s32.totalorder %s84_s4, %s84_s4 }
  0x12   :  { %p9336_p0 = scmp.ne.s32.totalorder %s84_s4, %s9335_s9  ;;  %p9341_p2 = scmp.lt.s32.totalorder %s9335_s9, %s9335_s9 }
  0x14   :  { %p9342_p3 = por %p9341_p2, %p9340_p1 }
  0x16   :  { %p9343_p4 = pnand %p9342_p3, %p9336_p0 }
  0x18   :  { %9346 = shalt.err (!%p9343_p4)
}
  0x19   :  { %s9415_s5 = smov 512   ;;  %s9416_s28 = smov 32  }
  0x1a   :  { %89 = dma.hbm_to_vmem [thread:$0]  %s14063_s16, 8192, %s84_s4, [#allocation5], %s9415_s5, %s9415_s5, %s9416_s28  }
  0x1b   :  { %s9355_s29 = scalar_lea.vmem %s54_s30, 8192  ;;  %p9360_p6 = scmp.lt.s32.totalorder %s54_s30, %s54_s30 }
  0x1c   :  { %p9356_p5 = scmp.ne.s32.totalorder %s54_s30, %s9355_s29  ;;  %p9361_p7 = scmp.lt.s32.totalorder %s9355_s29, %s9355_s29 }
  0x1e   :  { %p9362_p8 = por %p9361_p7, %p9360_p6 }
  0x20   :  { %p9363_p9 = pnand %p9362_p8, %p9356_p5 }
  0x22   :  { %9366 = shalt.err (!%p9363_p9)
}
  0x23   :  { %s14487_s11 = sld [smem:[#allocation97_spill]]  ;;  %s9417_s2 = smov [#allocation6]  }
  0x24   :  { %s95_s3 = sshll.u32 %s9417_s2, 4  ;;  %s9418_s7 = smov [#allocation7]   ;;  %s96_s3 = int_to_ptr.vmem [resolvable:$true] %s95_s3 }
  0x25   :  { %s107_s8 = sshll.u32 %s9418_s7, 4  ;;  %s9375_s16 = scalar_lea.vmem %s96_s3, 8192  ;;  %s108_s8 = int_to_ptr.vmem [resolvable:$true] %s107_s8 }
  0x26   :  { %p9376_p10 = scmp.ne.s32.totalorder %s96_s3, %s9375_s16  ;;  %p9380_p11 = scmp.lt.s32.totalorder %s96_s3, %s96_s3 }
  0x27   :  { %p9381_p12 = scmp.lt.s32.totalorder %s9375_s16, %s9375_s16 }
  0x29   :  { %59 = dma.hbm_to_vmem [thread:$0]  %s14487_s11, 8192, %s54_s30, [#allocation3], %s9415_s5, %s9415_s5, %s9416_s28  }
  0x2a   :  { %p9382_p13 = por %p9381_p12, %p9380_p11 }
  0x2c   :  { %p9383_p0 = pnand %p9382_p13, %p9376_p10 }
  0x2e   :  { %9386 = shalt.err (!%p9383_p0)
}
  0x2f   :  { %101 = dma.hbm_to_vmem [thread:$0]  %s14064_s17, 8192, %s96_s3, [#allocation5], %s9415_s5, %s9415_s5, %s9416_s28  }
  0x30   :  { %s9395_s30 = scalar_lea.vmem %s108_s8, 8192  ;;  %p9400_p2 = scmp.lt.s32.totalorder %s108_s8, %s108_s8 }
  0x31   :  { %p9396_p1 = scmp.ne.s32.totalorder %s108_s8, %s9395_s30  ;;  %p9401_p3 = scmp.lt.s32.totalorder %s9395_s30, %s9395_s30 }
  0x33   :  { %p9402_p4 = por %p9401_p3, %p9400_p2 }
  0x35   :  { %p9403_p5 = pnand %p9402_p4, %p9396_p1 }
  0x37   :  { %9406 = shalt.err (!%p9403_p5)
}
  0x38   :  { %113 = dma.hbm_to_vmem [thread:$0]  %s14065_s18, 8192, %s108_s8, [#allocation8], %s9415_s5, %s9415_s5, %s9416_s28  }
  0x39   :  { %9407 = dma.done.wait [#allocation3], 8192  }
  0x3a   :  { %9408 = vsyncadd [#allocation3], 4294959104 }
  0x3b   :  { %9409 = dma.done.wait [#allocation5], 16384  }
  0x3c   :  { %9410 = vsyncadd [#allocation5], 4294950912 }
  0x3d   :  { %9411 = dma.done.wait [#allocation8], 8192  }
  0x3e   :  { %9412 = vsyncadd [#allocation8], 4294959104  ;;  %vm153_vm0 = vcmask 130048   ;;  %s14488_s1 = sld [smem:[#allocation94_spill]]  ;;  %vm9420_vm1 = vmmov 0   ;;  %s9421_s8 = smov 112  }
  0x3f   :  { %s14489_s7 = sld [smem:[#allocation91_spill]] }
  0x40   :  { %s14490_s9 = sld [smem:[#allocation96_spill]] }
  0x41   :  { %s14493_s29 = sld [smem:[#allocation95_spill]] }
  0x42   :  { %s14526_s6 = sld [smem:[#allocation99_spill]] }
  0x43   :  { %s14539_s2 = sld [smem:[#allocation101_spill]] }
  0x44   :  { %v145_v0 = vld [vmem:[%s14488_s1 + $0x8] sm:$0xff]  ;;  %v144_v1 = vld [vmem:[%s14488_s1] sm:$0xff]  ;;  %s14535_s1 = sld [smem:[#allocation98_spill]] }
  0x45   :  { %v136_v2 = vld [vmem:[%s14489_s7] sm:$0xff]  ;;  %8009 = vmatprep.subr.mxu0 %v145_v0  ;;  %v137_v3 = vld [vmem:[%s14489_s7 + $0x8] sm:$0xff]  ;;  %v138_v4 = vld [vmem:[%s14489_s7 + $0x10] sm:$0xff]  ;;  %s14589_s3 = sld [smem:[#allocation100_spill]] }
  0x46   :  { %8013 = vmatprep.mubr.msk.f32.mxu0 %vm153_vm0, %v136_v2  ;;  %8010 = vmatpush3.msra.mxu0 %v145_v0  ;;  %v352_v5 = vld [vmem:[%s14490_s9 + $0x1e8] sm:$0xff]  ;;  %v351_v6 = vld [vmem:[%s14490_s9 + $0x1e0] sm:$0xff]  ;;  %v354_v7 = vld [vmem:[%s14490_s9 + $0x1f8] sm:$0xff]  ;;  %s14630_s28 = sld [smem:[#allocation102_spill]] }
  0x47   :  { %8011 = vmatprep.subr.mxu0 %v144_v1  ;;  %377 = vmatprep.subr.mxu1 %v352_v5  ;;  %v348_v8 = vld [vmem:[%s14490_s9 + $0x1c8] sm:$0xff]  ;;  %v353_v9 = vld [vmem:[%s14490_s9 + $0x1f0] sm:$0xff]  ;;  %v347_v10 = vld [vmem:[%s14490_s9 + $0x1c0] sm:$0xff]  ;;  %s14887_s17 = sld [smem:[#allocation92_spill]] }
  0x48   :  { %8012 = vmatpush3.msra.mxu0 %v144_v1  ;;  %378 = vmatpush1.msra.mxu1 %v351_v6  ;;  %v350_v11 = vld [vmem:[%s14490_s9 + $0x1d8] sm:$0xff]  ;;  %v344_v13 = vld [vmem:[%s14490_s9 + $0x1a8] sm:$0xff]  ;;  %v140_v14 = vld [vmem:[%s14489_s7 + $0x20] sm:$0xff] }
  0x49   :  { %8014 = vmatmul.mubr.msk.f32.vlgmr.msra.gmra.mxu0 %vm153_vm0, %v137_v3  ;;  %v139_v12 = vld [vmem:[%s14489_s7 + $0x18] sm:$0xff]  ;;  %490 = vmatprep.subr.mxu0 %v354_v7  ;;  %v349_v15 = vld [vmem:[%s14490_s9 + $0x1d0] sm:$0xff]  ;;  %v343_v16 = vld [vmem:[%s14490_s9 + $0x1a0] sm:$0xff] }
  0x4a   :  { %8016 = vmatprep.mubr.msk.f32.mxu0 %vm153_vm0, %v138_v4  ;;  %379 = vmatprep.subr.mxu1 %v348_v8  ;;  %v346_v17 = vld [vmem:[%s14490_s9 + $0x1b8] sm:$0xff]  ;;  %v340_v18 = vld [vmem:[%s14490_s9 + $0x188] sm:$0xff]  ;;  %v345_v19 = vld [vmem:[%s14490_s9 + $0x1b0] sm:$0xff] }
  0x4b   :  { %491 = vmatpush1.msra.mxu0 %v353_v9  ;;  %380 = vmatpush1.msra.mxu1 %v347_v10  ;;  %v141_v20 = vld [vmem:[%s14489_s7 + $0x28] sm:$0xff]  ;;  %v339_v21 = vld [vmem:[%s14490_s9 + $0x180] sm:$0xff]  ;;  %v142_v22 = vld [vmem:[%s14489_s7 + $0x30] sm:$0xff] }
  0x4c   :  { %492 = vmatprep.subr.mxu0 %v350_v11  ;;  %381 = vmatprep.subr.mxu1 %v344_v13  ;;  %v342_v23 = vld [vmem:[%s14490_s9 + $0x198] sm:$0xff]  ;;  %v336_v24 = vld [vmem:[%s14490_s9 + $0x168] sm:$0xff]  ;;  %v341_v25 = vld [vmem:[%s14490_s9 + $0x190] sm:$0xff]  ;;  %v14085_v11 = vmov 0.0  }
  0x4d   :  { %8017 = vmatmul.mubr.msk.f32.gmra.mxu0 %vm153_vm0, %v139_v12  ;;  %382 = vmatpush1.msra.mxu1 %v343_v16  ;;  %v335_v26 = vld [vmem:[%s14490_s9 + $0x160] sm:$0xff]  ;;  %v338_v27 = vld [vmem:[%s14490_s9 + $0x178] sm:$0xff]  ;;  %v332_v29 = vld [vmem:[%s14490_s9 + $0x148] sm:$0xff] }
  0x4e   :  { %8019 = vmatprep.mubr.msk.f32.mxu0 %vm153_vm0, %v140_v14  ;;  %493 = vmatpush1.msra.mxu0 %v349_v15  ;;  %v143_v28 = vld [vmem:[%s14489_s7 + $0x38] sm:$0xff]  ;;  %v337_v30 = vld [vmem:[%s14490_s9 + $0x170] sm:$0xff]  ;;  %v331_v31 = vld [vmem:[%s14490_s9 + $0x140] sm:$0xff] }
  0x4f   :  { %494 = vmatprep.subr.mxu0 %v346_v17  ;;  %383 = vmatprep.subr.mxu1 %v340_v18  ;;  %v334_v32 = vld [vmem:[%s14490_s9 + $0x158] sm:$0xff]  ;;  %v328_v33 = vld [vmem:[%s14490_s9 + $0x128] sm:$0xff]  ;;  %v333_v34 = vld [vmem:[%s14490_s9 + $0x150] sm:$0xff] }
  0x50   :  { %495 = vmatpush1.msra.mxu0 %v345_v19  ;;  %384 = vmatpush1.msra.mxu1 %v339_v21  ;;  %v327_v35 = vld [vmem:[%s14490_s9 + $0x120] sm:$0xff]  ;;  %v330_v36 = vld [vmem:[%s14490_s9 + $0x138] sm:$0xff]  ;;  %v329_v37 = vld [vmem:[%s14490_s9 + $0x130] sm:$0xff] }
  0x51   :  { %8020 = vmatmul.mubr.msk.f32.gmra.mxu0 %vm153_vm0, %v141_v20  ;;  %496 = vmatprep.subr.mxu0 %v342_v23  ;;  %v324_v38 = vld [vmem:[%s14490_s9 + $0x108] sm:$0xff]  ;;  %v326_v39 = vld [vmem:[%s14490_s9 + $0x118] sm:$0xff]  ;;  %v323_v40 = vld [vmem:[%s14490_s9 + $0x100] sm:$0xff] }
  0x52   :  { %8022 = vmatprep.mubr.msk.f32.mxu0 %vm153_vm0, %v142_v22  ;;  %385 = vmatprep.subr.mxu1 %v336_v24  ;;  %v325_v41 = vld [vmem:[%s14490_s9 + $0x110] sm:$0xff]  ;;  %v320_v42 = vld [vmem:[%s14490_s9 + $0xe8] sm:$0xff]  ;;  %v322_v43 = vld [vmem:[%s14490_s9 + $0xf8] sm:$0xff] }
  0x53   :  { %497 = vmatpush1.msra.mxu0 %v341_v25  ;;  %386 = vmatpush1.msra.mxu1 %v335_v26  ;;  %v319_v44 = vld [vmem:[%s14490_s9 + $0xe0] sm:$0xff]  ;;  %v321_v45 = vld [vmem:[%s14490_s9 + $0xf0] sm:$0xff]  ;;  %v316_v46 = vld [vmem:[%s14490_s9 + $0xc8] sm:$0xff] }
  0x54   :  { %498 = vmatprep.subr.mxu0 %v338_v27  ;;  %387 = vmatprep.subr.mxu1 %v332_v29  ;;  %v318_v47 = vld [vmem:[%s14490_s9 + $0xd8] sm:$0xff]  ;;  %v315_v48 = vld [vmem:[%s14490_s9 + $0xc0] sm:$0xff]  ;;  %v317_v49 = vld [vmem:[%s14490_s9 + $0xd0] sm:$0xff] }
  0x55   :  { %8023 = vmatmul.mubr.msk.f32.gmra.mxu0 %vm153_vm0, %v143_v28  ;;  %388 = vmatpush1.msra.mxu1 %v331_v31  ;;  %v312_v50 = vld [vmem:[%s14490_s9 + $0xa8] sm:$0xff]  ;;  %v314_v51 = vld [vmem:[%s14490_s9 + $0xb8] sm:$0xff]  ;;  %v311_v52 = vld [vmem:[%s14490_s9 + $0xa0] sm:$0xff] }
  0x56   :  { %499 = vmatpush1.msra.mxu0 %v337_v30  ;;  %389 = vmatprep.subr.mxu1 %v328_v33  ;;  %v313_v53 = vld [vmem:[%s14490_s9 + $0xb0] sm:$0xff]  ;;  %v308_v54 = vld [vmem:[%s14490_s9 + $0x88] sm:$0xff]  ;;  %v310_v55 = vld [vmem:[%s14490_s9 + $0x98] sm:$0xff] }
  0x57   :  { %500 = vmatprep.subr.mxu0 %v334_v32  ;;  %390 = vmatpush1.msra.mxu1 %v327_v35  ;;  %v307_v56 = vld [vmem:[%s14490_s9 + $0x80] sm:$0xff]  ;;  %v304_v57 = vld [vmem:[%s14490_s9 + $0x68] sm:$0xff]  ;;  %v309_v58 = vld [vmem:[%s14490_s9 + $0x90] sm:$0xff] }
  0x58   :  { %501 = vmatpush1.msra.mxu0 %v333_v34  ;;  %391 = vmatprep.subr.mxu1 %v324_v38  ;;  %v303_v59 = vld [vmem:[%s14490_s9 + $0x60] sm:$0xff]  ;;  %v306_v60 = vld [vmem:[%s14490_s9 + $0x78] sm:$0xff]  ;;  %v300_v61 = vld [vmem:[%s14490_s9 + $0x48] sm:$0xff] }
  0x59   :  { %502 = vmatprep.subr.mxu0 %v330_v36  ;;  %392 = vmatpush1.msra.mxu1 %v323_v40  ;;  %v305_v62 = vld [vmem:[%s14490_s9 + $0x70] sm:$0xff]  ;;  %v299_v63 = vld [vmem:[%s14490_s9 + $0x40] sm:$0xff]  ;;  %v302_v0 = vld [vmem:[%s14490_s9 + $0x58] sm:$0xff] }
  0x5a   :  { %503 = vmatpush1.msra.mxu0 %v329_v37  ;;  %393 = vmatprep.subr.mxu1 %v320_v42  ;;  %v296_v1 = vld [vmem:[%s14490_s9 + $0x28] sm:$0xff]  ;;  %v301_v2 = vld [vmem:[%s14490_s9 + $0x50] sm:$0xff]  ;;  %v295_v3 = vld [vmem:[%s14490_s9 + $0x20] sm:$0xff] }
  0x5b   :  { %504 = vmatprep.subr.mxu0 %v326_v39  ;;  %394 = vmatpush1.msra.mxu1 %v319_v44  ;;  %v298_v4 = vld [vmem:[%s14490_s9 + $0x38] sm:$0xff]  ;;  %v297_v5 = vld [vmem:[%s14490_s9 + $0x30] sm:$0xff]  ;;  %v292_v6 = vld [vmem:[%s14490_s9 + $0x8] sm:$0xff] }
  0x5c   :  { %505 = vmatpush1.msra.mxu0 %v325_v41  ;;  %395 = vmatprep.subr.mxu1 %v316_v46  ;;  %v294_v7 = vld [vmem:[%s14490_s9 + $0x18] sm:$0xff]  ;;  %v291_v8 = vld [vmem:[%s14490_s9] sm:$0xff]  ;;  %v293_v9 = vld [vmem:[%s14490_s9 + $0x10] sm:$0xff] }
  0x5d   :  { %506 = vmatprep.subr.mxu0 %v322_v43  ;;  %396 = vmatpush1.msra.mxu1 %v315_v48  ;;  %v9817_v10 = vld [vmem:[#allocation2 + $0x1e8] sm:$0xff]  ;;  %v9820_v12 = vld [vmem:[#allocation2 + $0x1f8] sm:$0xff]  ;;  %v9828_v14 = vld [vmem:[%s14493_s29] ss:$0 sm:$0xff] }
  0x5e   :  { %507 = vmatpush1.msra.mxu0 %v321_v45  ;;  %397 = vmatprep.subr.mxu1 %v312_v50  ;;  %14491 = vst [vmem:[#allocation12_spill] sm:$0xff] %v9817_v10  ;;  %14492 = vst [vmem:[#allocation13_spill] sm:$0xff] %v9820_v12  ;;  %v9833_v22 = vld [vmem:[#allocation2 + $0x1e0] sm:$0xff]  ;;  %v9835_v23 = vld [vmem:[#allocation2 + $0x1f0] sm:$0xff] }
  0x5f   :  { %508 = vmatprep.subr.mxu0 %v318_v47  ;;  %398 = vmatpush1.msra.mxu1 %v311_v52  ;;  %14494 = vst [vmem:[#allocation14_spill] sm:$0xff] %v9835_v23  ;;  %v9838_v26 = vld [vmem:[#allocation2 + $0x1c8] sm:$0xff]  ;;  %v9840_v27 = vld [vmem:[#allocation2 + $0x1d8] sm:$0xff]  ;;  %v9842_v28 = vld [vmem:[#allocation2 + $0x1c0] sm:$0xff] }
  0x60   :  { %509 = vmatpush1.msra.mxu0 %v317_v49  ;;  %399 = vmatprep.subr.mxu1 %v308_v54  ;;  %14495 = vst [vmem:[#allocation15_spill] sm:$0xff] %v9840_v27  ;;  %v9846_v29 = vld [vmem:[#allocation2 + $0x1a8] sm:$0xff]  ;;  %v9850_v31 = vld [vmem:[#allocation2 + $0x1d0] sm:$0xff]  ;;  %v9854_v32 = vld [vmem:[#allocation2 + $0x1a0] sm:$0xff] }
  0x61   :  { %510 = vmatprep.subr.mxu0 %v314_v51  ;;  %400 = vmatpush1.msra.mxu1 %v307_v56  ;;  %14496 = vst [vmem:[#allocation16_spill] sm:$0xff] %v9850_v31  ;;  %v9858_v34 = vld [vmem:[#allocation2 + $0x1b8] sm:$0xff]  ;;  %v9860_v35 = vld [vmem:[#allocation2 + $0x188] sm:$0xff]  ;;  %v9864_v37 = vld [vmem:[#allocation2 + $0x1b0] sm:$0xff] }
  0x62   :  { %511 = vmatpush1.msra.mxu0 %v313_v53  ;;  %401 = vmatprep.subr.mxu1 %v304_v57  ;;  %14497 = vst [vmem:[#allocation17_spill] sm:$0xff] %v9858_v34  ;;  %14498 = vst [vmem:[#allocation18_spill] sm:$0xff] %v9864_v37  ;;  %v9866_v38 = vld [vmem:[#allocation2 + $0x180] sm:$0xff]  ;;  %v9869_v39 = vld [vmem:[#allocation2 + $0x198] sm:$0xff] }
  0x63   :  { %512 = vmatprep.subr.mxu0 %v310_v55  ;;  %402 = vmatpush1.msra.mxu1 %v303_v59  ;;  %14499 = vst [vmem:[#allocation19_spill] sm:$0xff] %v9869_v39  ;;  %v9873_v40 = vld [vmem:[#allocation2 + $0x168] sm:$0xff]  ;;  %v9877_v41 = vld [vmem:[#allocation2 + $0x190] sm:$0xff]  ;;  %v9881_v42 = vld [vmem:[#allocation2 + $0x160] sm:$0xff] }
  0x64   :  { %513 = vmatpush1.msra.mxu0 %v309_v58  ;;  %403 = vmatprep.subr.mxu1 %v300_v61  ;;  %14500 = vst [vmem:[#allocation20_spill] sm:$0xff] %v9877_v41  ;;  %v9885_v45 = vld [vmem:[#allocation2 + $0x178] sm:$0xff]  ;;  %v9887_v46 = vld [vmem:[#allocation2 + $0x148] sm:$0xff]  ;;  %v9891_v48 = vld [vmem:[#allocation2 + $0x170] sm:$0xff] }
  0x65   :  { %514 = vmatprep.subr.mxu0 %v306_v60  ;;  %404 = vmatpush1.msra.mxu1 %v299_v63  ;;  %14501 = vst [vmem:[#allocation21_spill] sm:$0xff] %v9885_v45  ;;  %14502 = vst [vmem:[#allocation22_spill] sm:$0xff] %v9891_v48  ;;  %v9893_v49 = vld [vmem:[#allocation2 + $0x140] sm:$0xff]  ;;  %v9896_v50 = vld [vmem:[#allocation2 + $0x158] sm:$0xff] }
  0x66   :  { %515 = vmatpush1.msra.mxu0 %v305_v62  ;;  %405 = vmatprep.subr.mxu1 %v296_v1  ;;  %14503 = vst [vmem:[#allocation23_spill] sm:$0xff] %v9896_v50  ;;  %v9900_v51 = vld [vmem:[#allocation2 + $0x128] sm:$0xff]  ;;  %v9904_v53 = vld [vmem:[#allocation2 + $0x150] sm:$0xff]  ;;  %v9908_v54 = vld [vmem:[#allocation2 + $0x120] sm:$0xff] }
  0x67   :  { %516 = vmatprep.subr.mxu0 %v302_v0  ;;  %406 = vmatpush1.msra.mxu1 %v295_v3  ;;  %14504 = vst [vmem:[#allocation24_spill] sm:$0xff] %v9904_v53  ;;  %v9912_v56 = vld [vmem:[#allocation2 + $0x138] sm:$0xff]  ;;  %v9914_v57 = vld [vmem:[#allocation2 + $0x108] sm:$0xff]  ;;  %v9918_v59 = vld [vmem:[#allocation2 + $0x130] sm:$0xff] }
  0x68   :  { %517 = vmatpush1.msra.mxu0 %v301_v2  ;;  %407 = vmatprep.subr.mxu1 %v292_v6  ;;  %14505 = vst [vmem:[#allocation25_spill] sm:$0xff] %v9912_v56  ;;  %14506 = vst [vmem:[#allocation26_spill] sm:$0xff] %v9918_v59  ;;  %v9920_v60 = vld [vmem:[#allocation2 + $0x100] sm:$0xff]  ;;  %v9923_v61 = vld [vmem:[#allocation2 + $0x118] sm:$0xff] }
  0x69   :  { %518 = vmatprep.subr.mxu0 %v298_v4  ;;  %408 = vmatpush1.msra.mxu1 %v291_v8  ;;  %14507 = vst [vmem:[#allocation27_spill] sm:$0xff] %v9923_v61  ;;  %v9927_v62 = vld [vmem:[#allocation2 + $0xe8] sm:$0xff]  ;;  %v9931_v63 = vld [vmem:[#allocation2 + $0x110] sm:$0xff]  ;;  %v9935_v0 = vld [vmem:[#allocation2 + $0xe0] sm:$0xff] }
  0x6a   :  { %519 = vmatpush1.msra.mxu0 %v297_v5  ;;  %441 = vmatprep.mubr.f32.mxu1 %v14085_v11  ;;  %14508 = vst [vmem:[#allocation28_spill] sm:$0xff] %v9931_v63  ;;  %v9939_v2 = vld [vmem:[#allocation2 + $0xf8] sm:$0xff]  ;;  %v9941_v3 = vld [vmem:[#allocation2 + $0xc8] sm:$0xff]  ;;  %v9945_v5 = vld [vmem:[#allocation2 + $0xf0] sm:$0xff] }
  0x6b   :  { %520 = vmatprep.subr.mxu0 %v294_v7  ;;  %554 = vmatprep.mubr.f32.mxu0 %v14085_v11  ;;  %14509 = vst [vmem:[#allocation29_spill] sm:$0xff] %v9939_v2  ;;  %14510 = vst [vmem:[#allocation30_spill] sm:$0xff] %v9945_v5  ;;  %v9947_v6 = vld [vmem:[#allocation2 + $0xc0] sm:$0xff]  ;;  %v9950_v7 = vld [vmem:[#allocation2 + $0xd8] sm:$0xff] }
  0x6c   :  { %521 = vmatpush1.msra.mxu0 %v293_v9  ;;  %711 = vmatprep.subr.mxu1 %v9817_v10  ;;  %14511 = vst [vmem:[#allocation31_spill] sm:$0xff] %v9950_v7  ;;  %v9954_v8 = vld [vmem:[#allocation2 + $0xa8] sm:$0xff]  ;;  %v9958_v9 = vld [vmem:[#allocation2 + $0xd0] sm:$0xff] }
  0x6d   :  { %782 = vmatprep.subr.mxu0 %v9820_v12  ;;  %14512 = vst [vmem:[#allocation32_spill] sm:$0xff] %v9958_v9 }
 0x109   :  { %v8015_v13 = vpop.f32.mrf.mxu0 }
 0x10a   :  { %v250_v18 = vadd.f32 %v8015_v13, %v9828_v14  ;;  %v9962_v13 = vld [vmem:[#allocation2 + $0xa0] sm:$0xff] }
 0x10b   :  { %v244_v15 = vpop.f32.mrf.mxu0 }
 0x10c   :  { %v245_v16 = vadd.f32 %v9828_v14, %v244_v15  ;;  %v9966_v15 = vld [vmem:[#allocation2 + $0xb8] sm:$0xff] }
 0x10d   :  { %v8018_v17 = vpop.f32.mrf.mxu0  ;;  %14513 = vst [vmem:[#allocation33_spill] sm:$0xff] %v9966_v15 }
 0x10e   :  { %8715 = vtanh.f32 %v245_v16  ;;  %v260_v25 = vadd.f32 %v8018_v17, %v9828_v14  ;;  %v9968_v16 = vld [vmem:[#allocation2 + $0x88] sm:$0xff]  ;;  %v9971_v17 = vld [vmem:[#allocation2 + $0xb0] sm:$0xff] }
 0x10f   :  { %v254_v19 = vpop.f32.mrf.mxu0  ;;  %8717 = vtanh.f32 %v250_v18  ;;  %14514 = vst [vmem:[#allocation34_spill] sm:$0xff] %v9971_v17  ;;  %v9973_v18 = vld [vmem:[#allocation2 + $0x80] sm:$0xff] }
 0x110   :  { %v255_v20 = vadd.f32 %v9828_v14, %v254_v19  ;;  %v9976_v19 = vld [vmem:[#allocation2 + $0x98] sm:$0xff] }
 0x111   :  { %v8021_v21 = vpop.f32.mrf.mxu0  ;;  %14515 = vst [vmem:[#allocation35_spill] sm:$0xff] %v9976_v19 }
 0x112   :  { %8719 = vtanh.f32 %v255_v20  ;;  %v270_v47 = vadd.f32 %v8021_v21, %v9828_v14  ;;  %v9980_v20 = vld [vmem:[#allocation2 + $0x68] sm:$0xff]  ;;  %v9984_v21 = vld [vmem:[#allocation2 + $0x90] sm:$0xff] }
 0x113   :  { %v264_v30 = vpop.f32.mrf.mxu0  ;;  %8721 = vtanh.f32 %v260_v25  ;;  %14516 = vst [vmem:[#allocation36_spill] sm:$0xff] %v9984_v21 }
 0x114   :  { %v265_v36 = vadd.f32 %v9828_v14, %v264_v30  ;;  %v9992_v30 = vld [vmem:[#allocation2 + $0x78] sm:$0xff] }
 0x115   :  { %v8024_v44 = vpop.f32.mrf.mxu0  ;;  %14517 = vst [vmem:[#allocation37_spill] sm:$0xff] %v9992_v30 }
 0x116   :  { %8723 = vtanh.f32 %v265_v36  ;;  %v280_v4 = vadd.f32 %v8024_v44, %v9828_v14  ;;  %v9997_v36 = vld [vmem:[#allocation2 + $0x70] sm:$0xff]  ;;  %v10002_v44 = vld [vmem:[#allocation2 + $0x58] sm:$0xff] }
 0x117   :  { %v274_v52 = vpop.f32.mrf.mxu0  ;;  %8725 = vtanh.f32 %v270_v47  ;;  %14518 = vst [vmem:[#allocation38_spill] sm:$0xff] %v9997_v36  ;;  %14519 = vst [vmem:[#allocation39_spill] sm:$0xff] %v10002_v44  ;;  %v10006_v47 = vld [vmem:[#allocation2 + $0x28] sm:$0xff] }
 0x118   :  { %v275_v58 = vadd.f32 %v9828_v14, %v274_v52  ;;  %v10010_v52 = vld [vmem:[#allocation2 + $0x50] sm:$0xff] }
 0x119   :  { %14520 = vst [vmem:[#allocation40_spill] sm:$0xff] %v10010_v52 }
 0x11a   :  { %8727 = vtanh.f32 %v275_v58 }
 0x11b   :  { %v8716_v24 = vpop.eup %8715  ;;  %8729 = vtanh.f32 %v280_v4  ;;  %v10020_v4 = vld [vmem:[#allocation2 + $0x8] sm:$0xff] }
 0x11c   :  { %442 = vmatmul.mubr.f32.vlgmr.msra.gmra.mxu1 %v8716_v24  ;;  %555 = vmatmul.mubr.f32.vlgmr.msra.gmra.mxu0 %v8716_v24  ;;  %v8718_v33 = vpop.eup %8717  ;;  %v9988_v24 = vld [vmem:[#allocation2 + $0x60] sm:$0xff] }
 0x11d   :  { %712 = vmatpush1.msra.mxu1 %v9833_v22  ;;  %783 = vmatpush1.msra.mxu0 %v9835_v23 }
 0x11e   :  { %713 = vmatprep.subr.mxu1 %v9838_v26  ;;  %784 = vmatprep.subr.mxu0 %v9840_v27 }
 0x11f   :  { %714 = vmatpush1.msra.mxu1 %v9842_v28  ;;  %447 = vmatprep.mubr.f32.mxu1 %v14085_v11  ;;  %v8720_v43 = vpop.eup %8719 }
 0x120   :  { %560 = vmatprep.mubr.f32.mxu0 %v14085_v11  ;;  %715 = vmatprep.subr.mxu1 %v9846_v29  ;;  %v8722_v55 = vpop.eup %8721 }
 0x121   :  { %785 = vmatpush1.msra.mxu0 %v9850_v31  ;;  %448 = vmatmul.mubr.f32.gmra.mxu1 %v8718_v33 }
 0x122   :  { %561 = vmatmul.mubr.f32.gmra.mxu0 %v8718_v33  ;;  %716 = vmatpush1.msra.mxu1 %v9854_v32  ;;  %v9994_v33 = vld [vmem:[#allocation2 + $0x48] sm:$0xff] }
 0x123   :  { %786 = vmatprep.subr.mxu0 %v9858_v34  ;;  %717 = vmatprep.subr.mxu1 %v9860_v35  ;;  %v8724_v1 = vpop.eup %8723 }
 0x124   :  { %787 = vmatpush1.msra.mxu0 %v9864_v37  ;;  %718 = vmatpush1.msra.mxu1 %v9866_v38  ;;  %v8726_v14 = vpop.eup %8725 }
 0x125   :  { %788 = vmatprep.subr.mxu0 %v9869_v39  ;;  %453 = vmatprep.mubr.f32.mxu1 %v14085_v11 }
 0x126   :  { %566 = vmatprep.mubr.f32.mxu0 %v14085_v11  ;;  %719 = vmatprep.subr.mxu1 %v9873_v40 }
 0x127   :  { %789 = vmatpush1.msra.mxu0 %v9877_v41  ;;  %454 = vmatmul.mubr.f32.gmra.mxu1 %v8720_v43  ;;  %v8728_v25 = vpop.eup %8727 }
 0x128   :  { %567 = vmatmul.mubr.f32.gmra.mxu0 %v8720_v43  ;;  %720 = vmatpush1.msra.mxu1 %v9881_v42  ;;  %v9999_v43 = vld [vmem:[#allocation2 + $0x40] sm:$0xff]  ;;  %v8730_v58 = vpop.eup %8729 }
 0x129   :  { %790 = vmatprep.subr.mxu0 %v9885_v45  ;;  %721 = vmatprep.subr.mxu1 %v9887_v46 }
 0x12a   :  { %791 = vmatpush1.msra.mxu0 %v9891_v48  ;;  %722 = vmatpush1.msra.mxu1 %v9893_v49  ;;  %v355_v48 = vld [vmem:[%s14535_s1] sm:$0xf] }
 0x12b   :  { %792 = vmatprep.subr.mxu0 %v9896_v50  ;;  %459 = vmatprep.mubr.f32.mxu1 %v14085_v11 }
 0x12c   :  { %572 = vmatprep.mubr.f32.mxu0 %v14085_v11  ;;  %723 = vmatprep.subr.mxu1 %v9900_v51 }
 0x12d   :  { %793 = vmatpush1.msra.mxu0 %v9904_v53  ;;  %460 = vmatmul.mubr.f32.gmra.mxu1 %v8722_v55 }
 0x12e   :  { %573 = vmatmul.mubr.f32.gmra.mxu0 %v8722_v55  ;;  %724 = vmatpush1.msra.mxu1 %v9908_v54  ;;  %v10014_v55 = vld [vmem:[#allocation2 + $0x20] sm:$0xff] }
 0x12f   :  { %794 = vmatprep.subr.mxu0 %v9912_v56  ;;  %725 = vmatprep.subr.mxu1 %v9914_v57 }
 0x130   :  { %795 = vmatpush1.msra.mxu0 %v9918_v59  ;;  %726 = vmatpush1.msra.mxu1 %v9920_v60 }
 0x131   :  { %796 = vmatprep.subr.mxu0 %v9923_v61  ;;  %465 = vmatprep.mubr.f32.mxu1 %v14085_v11  ;;  %v357_v61 = vlaneseq }
 0x132   :  { %578 = vmatprep.mubr.f32.mxu0 %v14085_v11  ;;  %727 = vmatprep.subr.mxu1 %v9927_v62 }
 0x133   :  { %797 = vmatpush1.msra.mxu0 %v9931_v63  ;;  %466 = vmatmul.mubr.f32.gmra.mxu1 %v8724_v1  ;;  %v10154_v63 = vld [vmem:[%s14526_s6] sm:$0xff]  ;;  %v10160_v59 = vshrl.u32 %v357_v61, 7 }
 0x134   :  { %579 = vmatmul.mubr.f32.gmra.mxu0 %v8724_v1  ;;  %728 = vmatpush1.msra.mxu1 %v9935_v0  ;;  %v10018_v1 = vld [vmem:[#allocation2 + $0x38] sm:$0xff]  ;;  %14532 = vst [vmem:[#allocation50_spill] sm:$0xff] %v10154_v63 }
 0x135   :  { %798 = vmatprep.subr.mxu0 %v9939_v2  ;;  %729 = vmatprep.subr.mxu1 %v9941_v3  ;;  %14521 = vst [vmem:[#allocation41_spill] sm:$0xff] %v10018_v1  ;;  %v10147_v2 = vld [vmem:[%s14526_s6 + $0x8] sm:$0xff]  ;;  %14533 = vst [vmem:[#allocation51_spill] sm:$0xff] %v10160_v59  ;;  %v10163_v56 = vsub.s32 0, %v10160_v59  ;;  %v14126_v45 = vsub.s32 2, %v10160_v59  ;;  %v14129_v41 = vsub.s32 1, %v10160_v59 }
 0x136   :  { %799 = vmatpush1.msra.mxu0 %v9945_v5  ;;  %730 = vmatpush1.msra.mxu1 %v9947_v6  ;;  %v10140_v5 = vld [vmem:[%s14526_s6 + $0x10] sm:$0xff]  ;;  %14531 = vst [vmem:[#allocation49_spill] sm:$0xff] %v10147_v2  ;;  %v14130_v61 = vsub.s32 3, %v10160_v59 }
 0x137   :  { %800 = vmatprep.subr.mxu0 %v9950_v7  ;;  %471 = vmatprep.mubr.f32.mxu1 %v14085_v11  ;;  %v10133_v7 = vld [vmem:[%s14526_s6 + $0x18] sm:$0xff]  ;;  %14530 = vst [vmem:[#allocation48_spill] sm:$0xff] %v10140_v5  ;;  %14534 = vst [vmem:[#allocation52_spill] sm:$0xff] %v10163_v56  ;;  %v10180_v34 = vrot.slane %v355_v48, %v10163_v56  ;;  %v10184_v31 = vrot.slane %v355_v48, %v14126_v45 }
 0x138   :  { %584 = vmatprep.mubr.f32.mxu0 %v14085_v11  ;;  %731 = vmatprep.subr.mxu1 %v9954_v8  ;;  %14529 = vst [vmem:[#allocation47_spill] sm:$0xff] %v10133_v7  ;;  %v10188_v23 = vrot.slane %v355_v48, %v14129_v41  ;;  %v10206_v41 = vld [vmem:[%s14539_s2 + $0x78] sm:$0xff] }
 0x139   :  { %801 = vmatpush1.msra.mxu0 %v9958_v9  ;;  %472 = vmatmul.mubr.f32.gmra.mxu1 %v8726_v14  ;;  %v10126_v9 = vld [vmem:[%s14526_s6 + $0x20] sm:$0xff]  ;;  %14540 = vst [vmem:[#allocation56_spill] sm:$0xff] %v10206_v41 }
 0x13a   :  { %585 = vmatmul.mubr.f32.gmra.mxu0 %v8726_v14  ;;  %732 = vmatpush1.msra.mxu1 %v9962_v13  ;;  %v10023_v14 = vld [vmem:[#allocation2 + $0x30] sm:$0xff]  ;;  %14528 = vst [vmem:[#allocation46_spill] sm:$0xff] %v10126_v9 }
 0x13b   :  { %802 = vmatprep.subr.mxu0 %v9966_v15  ;;  %733 = vmatprep.subr.mxu1 %v9968_v16  ;;  %14522 = vst [vmem:[#allocation42_spill] sm:$0xff] %v10023_v14  ;;  %v10117_v15 = vld [vmem:[%s14526_s6 + $0x28] sm:$0xff] }
 0x13c   :  { %803 = vmatpush1.msra.mxu0 %v9971_v17  ;;  %734 = vmatpush1.msra.mxu1 %v9973_v18  ;;  %v10108_v17 = vld [vmem:[%s14526_s6 + $0x30] sm:$0xff]  ;;  %14527 = vst [vmem:[#allocation45_spill] sm:$0xff] %v10117_v15 }
 0x13d   :  { %804 = vmatprep.subr.mxu0 %v9976_v19  ;;  %477 = vmatprep.mubr.f32.mxu1 %v14085_v11  ;;  %v10103_v19 = vld [vmem:[%s14526_s6 + $0x38] sm:$0xff] }
 0x13e   :  { %590 = vmatprep.mubr.f32.mxu0 %v14085_v11  ;;  %735 = vmatprep.subr.mxu1 %v9980_v20 }
 0x13f   :  { %805 = vmatpush1.msra.mxu0 %v9984_v21  ;;  %478 = vmatmul.mubr.f32.gmra.mxu1 %v8728_v25  ;;  %v10096_v21 = vld [vmem:[%s14526_s6 + $0x40] sm:$0xff] }
 0x140   :  { %591 = vmatmul.mubr.f32.gmra.mxu0 %v8728_v25  ;;  %736 = vmatpush1.msra.mxu1 %v9988_v24  ;;  %v10025_v25 = vld [vmem:[#allocation2] sm:$0xff] }
 0x141   :  { %806 = vmatprep.subr.mxu0 %v9992_v30  ;;  %737 = vmatprep.subr.mxu1 %v9994_v33  ;;  %v10089_v30 = vld [vmem:[%s14526_s6 + $0x48] sm:$0xff] }
 0x142   :  { %807 = vmatpush1.msra.mxu0 %v9997_v36  ;;  %738 = vmatpush1.msra.mxu1 %v9999_v43  ;;  %v10082_v36 = vld [vmem:[%s14526_s6 + $0x50] sm:$0xff] }
 0x143   :  { %808 = vmatprep.subr.mxu0 %v10002_v44  ;;  %483 = vmatprep.mubr.f32.mxu1 %v14085_v11  ;;  %v10028_v44 = vld [vmem:[#allocation2 + $0x18] sm:$0xff] }
 0x144   :  { %596 = vmatprep.mubr.f32.mxu0 %v14085_v11  ;;  %739 = vmatprep.subr.mxu1 %v10006_v47  ;;  %14523 = vst [vmem:[#allocation43_spill] sm:$0xff] %v10028_v44  ;;  %v10032_v11 = vld [vmem:[#allocation2 + $0x10] sm:$0xff] }
 0x145   :  { %809 = vmatpush1.msra.mxu0 %v10010_v52  ;;  %484 = vmatmul.mubr.f32.gmra.mxu1 %v8730_v58  ;;  %14524 = vst [vmem:[#allocation44_spill] sm:$0xff] %v10032_v11  ;;  %v14525_v52 = vmov 0.0  }
 0x146   :  { %597 = vmatmul.mubr.f32.gmra.mxu0 %v8730_v58  ;;  %740 = vmatpush1.msra.mxu1 %v10014_v55  ;;  %v10047_v58 = vld [vmem:[%s14526_s6 + $0x78] sm:$0xff] }
 0x147   :  { %810 = vmatprep.subr.mxu0 %v10018_v1  ;;  %741 = vmatprep.subr.mxu1 %v10020_v4  ;;  %v10075_v1 = vld [vmem:[%s14526_s6 + $0x58] sm:$0xff] }
 0x148   :  { %811 = vmatpush1.msra.mxu0 %v10023_v14  ;;  %742 = vmatpush1.msra.mxu1 %v10025_v25  ;;  %v10068_v14 = vld [vmem:[%s14526_s6 + $0x60] sm:$0xff] }
 0x149   :  { %812 = vmatprep.subr.mxu0 %v10028_v44  ;;  %775 = vmatprep.mubr.f32.mxu1 %v14525_v52  ;;  %v10061_v44 = vld [vmem:[%s14526_s6 + $0x68] sm:$0xff] }
 0x14a   :  { %813 = vmatpush1.msra.mxu0 %v10032_v11  ;;  %846 = vmatprep.mubr.f32.mxu0 %v14525_v52  ;;  %v10054_v11 = vld [vmem:[%s14526_s6 + $0x70] sm:$0xff] }
 0x14b   :  { %776 = vmatmul.mubr.f32.vlgmr.msra.gmra.mxu1 %v14525_v52  ;;  %847 = vmatmul.mubr.f32.vlgmr.msra.gmra.mxu0 %v14525_v52 }
 0x14c   :  { %8025 = vmatprep.subr.mxu1 %v14525_v52  ;;  %8060 = vmatprep.subr.mxu0 %v14525_v52 }
 0x14d   :  { %8026 = vmatpush3.msra.mxu1 %v10047_v58  ;;  %8057 = vmatprep.mubr.msk.f32.mxu1 %vm9420_vm1, %v14525_v52 }
 0x14e   :  { %8027 = vmatprep.subr.mxu1 %v14525_v52  ;;  %8092 = vmatprep.mubr.msk.f32.mxu0 %vm9420_vm1, %v14525_v52 }
 0x14f   :  { %8028 = vmatpush3.msra.mxu1 %v10054_v11  ;;  %8061 = vmatpush3.msra.mxu0 %v10206_v41 }
 0x150   :  { %8029 = vmatprep.subr.mxu1 %v14525_v52  ;;  %8062 = vmatprep.subr.mxu0 %v14525_v52 }
 0x151   :  { %8030 = vmatpush3.msra.mxu1 %v10061_v44 }
 0x152   :  { %8031 = vmatprep.subr.mxu1 %v14525_v52 }
 0x153   :  { %8032 = vmatpush3.msra.mxu1 %v10068_v14 }
 0x154   :  { %8033 = vmatprep.subr.mxu1 %v14525_v52 }
 0x155   :  { %8034 = vmatpush3.msra.mxu1 %v10075_v1 }
 0x156   :  { %8035 = vmatprep.subr.mxu1 %v14525_v52 }
 0x157   :  { %8036 = vmatpush3.msra.mxu1 %v10082_v36 }
 0x158   :  { %8037 = vmatprep.subr.mxu1 %v14525_v52 }
 0x159   :  { %8038 = vmatpush3.msra.mxu1 %v10089_v30 }
 0x15a   :  { %8039 = vmatprep.subr.mxu1 %v14525_v52 }
 0x15b   :  { %8040 = vmatpush3.msra.mxu1 %v10096_v21 }
 0x15c   :  { %8041 = vmatprep.subr.mxu1 %v14525_v52 }
 0x15d   :  { %8042 = vmatpush3.msra.mxu1 %v10103_v19 }
 0x15e   :  { %8043 = vmatprep.subr.mxu1 %v14525_v52 }
 0x15f   :  { %8044 = vmatpush3.msra.mxu1 %v10108_v17 }
 0x160   :  { %8045 = vmatprep.subr.mxu1 %v14525_v52 }
 0x161   :  { %8046 = vmatpush3.msra.mxu1 %v10117_v15 }
 0x162   :  { %8047 = vmatprep.subr.mxu1 %v14525_v52 }
 0x163   :  { %8048 = vmatpush3.msra.mxu1 %v10126_v9 }
 0x164   :  { %8049 = vmatprep.subr.mxu1 %v14525_v52 }
 0x165   :  { %8050 = vmatpush3.msra.mxu1 %v10133_v7 }
 0x166   :  { %8051 = vmatprep.subr.mxu1 %v14525_v52 }
 0x167   :  { %8052 = vmatpush3.msra.mxu1 %v10140_v5 }
 0x168   :  { %8053 = vmatprep.subr.mxu1 %v14525_v52 }
 0x169   :  { %8054 = vmatpush3.msra.mxu1 %v10147_v2 }
 0x16a   :  { %8055 = vmatprep.subr.mxu1 %v14525_v52 }
 0x16b   :  { %8056 = vmatpush3.msra.mxu1 %v10154_v63  ;;  %v10195_v63 = vrot.slane %v355_v48, %v14130_v61 }
 0x16c   :  { %1242 = vmatprep.subr.mxu1 %v9817_v10 }
 0x1dc   :  { %v10165_v53 = vpop.f32.mrf.mxu1  ;;  %v10167_v50 = vpop.f32.mrf.mxu0 }
 0x1de   :  { %v10174_v39 = vpop.f32.mrf.mxu1  ;;  %v10176_v37 = vpop.f32.mrf.mxu0 }
 0x1e1   :  { %v449_v27 = vpop.f32.mrf.mxu1 }
 0x1e2   :  { %v10191_v12 = vadd.f32 %v449_v27, %v10180_v34  ;;  %v562_v10 = vpop.f32.mrf.mxu0  ;;  %v10211_v27 = vld [vmem:[%s14539_s2 + $0x70] sm:$0xff] }
 0x1e3   :  { %v10198_v56 = vadd.f32 %v562_v10, %v10184_v31  ;;  %v451_v2 = vpop.f32.mrf.mxu1  ;;  %14541 = vst [vmem:[#allocation57_spill] sm:$0xff] %v10211_v27  ;;  %v10221_v10 = vld [vmem:[%s14539_s2 + $0x68] sm:$0xff]  ;;  %8063 = vmatpush3.msra.mxu0 %v10211_v27 }
 0x1e4   :  { %14536 = vst [vmem:[#allocation53_spill] sm:$0xff] %v10191_v12  ;;  %v10201_v45 = vadd.f32 %v451_v2, %v10188_v23  ;;  %v564_v5 = vpop.f32.mrf.mxu0  ;;  %14543 = vst [vmem:[#allocation59_spill] sm:$0xff] %v10221_v10  ;;  %8064 = vmatprep.subr.mxu0 %v14525_v52 }
 0x1e5   :  { %14537 = vst [vmem:[#allocation54_spill] sm:$0xff] %v10198_v56  ;;  %v10214_v48 = vadd.f32 %v564_v5, %v10195_v63  ;;  %v10231_v5 = vld [vmem:[%s14539_s2 + $0x60] sm:$0xff]  ;;  %8065 = vmatpush3.msra.mxu0 %v10221_v10 }
 0x1e6   :  { %14538 = vst [vmem:[#allocation55_spill] sm:$0xff] %v10201_v45  ;;  %14545 = vst [vmem:[#allocation61_spill] sm:$0xff] %v10231_v5  ;;  %8066 = vmatprep.subr.mxu0 %v14525_v52 }
 0x1e7   :  { %14542 = vst [vmem:[#allocation58_spill] sm:$0xff] %v10214_v48  ;;  %v455_v2 = vpop.f32.mrf.mxu1  ;;  %8067 = vmatpush3.msra.mxu0 %v10231_v5 }
 0x1e8   :  { %v10225_v61 = vadd.f32 %v455_v2, %v10180_v34  ;;  %v568_v59 = vpop.f32.mrf.mxu0  ;;  %v10244_v2 = vld [vmem:[%s14539_s2 + $0x58] sm:$0xff]  ;;  %8068 = vmatprep.subr.mxu0 %v14525_v52 }
 0x1e9   :  { %v10234_v48 = vadd.f32 %v568_v59, %v10184_v31  ;;  %v457_v56 = vpop.f32.mrf.mxu1  ;;  %14548 = vst [vmem:[#allocation64_spill] sm:$0xff] %v10244_v2  ;;  %8069 = vmatpush3.msra.mxu0 %v10244_v2 }
 0x1ea   :  { %14544 = vst [vmem:[#allocation60_spill] sm:$0xff] %v10225_v61  ;;  %v10238_v12 = vadd.f32 %v457_v56, %v10188_v23  ;;  %v570_v45 = vpop.f32.mrf.mxu0  ;;  %v10254_v56 = vld [vmem:[%s14539_s2 + $0x50] sm:$0xff]  ;;  %8070 = vmatprep.subr.mxu0 %v14525_v52 }
 0x1eb   :  { %14546 = vst [vmem:[#allocation62_spill] sm:$0xff] %v10234_v48  ;;  %v10247_v61 = vadd.f32 %v570_v45, %v10195_v63  ;;  %14550 = vst [vmem:[#allocation66_spill] sm:$0xff] %v10254_v56  ;;  %v10264_v45 = vld [vmem:[%s14539_s2 + $0x48] sm:$0xff]  ;;  %8071 = vmatpush3.msra.mxu0 %v10254_v56 }
 0x1ec   :  { %14547 = vst [vmem:[#allocation63_spill] sm:$0xff] %v10238_v12  ;;  %14552 = vst [vmem:[#allocation68_spill] sm:$0xff] %v10264_v45  ;;  %8072 = vmatprep.subr.mxu0 %v14525_v52 }
 0x1ed   :  { %14549 = vst [vmem:[#allocation65_spill] sm:$0xff] %v10247_v61  ;;  %v461_v59 = vpop.f32.mrf.mxu1  ;;  %8073 = vmatpush3.msra.mxu0 %v10264_v45 }
 0x1ee   :  { %v10258_v48 = vadd.f32 %v461_v59, %v10180_v34  ;;  %v574_v12 = vpop.f32.mrf.mxu0  ;;  %v10277_v59 = vld [vmem:[%s14539_s2 + $0x40] sm:$0xff]  ;;  %8074 = vmatprep.subr.mxu0 %v14525_v52 }
 0x1ef   :  { %v10267_v61 = vadd.f32 %v574_v12, %v10184_v31  ;;  %v463_v5 = vpop.f32.mrf.mxu1  ;;  %14555 = vst [vmem:[#allocation71_spill] sm:$0xff] %v10277_v59  ;;  %8075 = vmatpush3.msra.mxu0 %v10277_v59 }
 0x1f0   :  { %14551 = vst [vmem:[#allocation67_spill] sm:$0xff] %v10258_v48  ;;  %v10271_v10 = vadd.f32 %v463_v5, %v10188_v23  ;;  %v576_v2 = vpop.f32.mrf.mxu0  ;;  %8076 = vmatprep.subr.mxu0 %v14525_v52 }
 0x1f1   :  { %14553 = vst [vmem:[#allocation69_spill] sm:$0xff] %v10267_v61  ;;  %v10280_v48 = vadd.f32 %v576_v2, %v10195_v63 }
 0x1f2   :  { %14554 = vst [vmem:[#allocation70_spill] sm:$0xff] %v10271_v10 }
 0x1f3   :  { %14556 = vst [vmem:[#allocation72_spill] sm:$0xff] %v10280_v48  ;;  %v467_v12 = vpop.f32.mrf.mxu1 }
 0x1f4   :  { %v10286_v5 = vadd.f32 %v467_v12, %v10180_v34  ;;  %v580_v61 = vpop.f32.mrf.mxu0 }
 0x1f5   :  { %v10290_v10 = vadd.f32 %v580_v61, %v10184_v31  ;;  %v469_v56 = vpop.f32.mrf.mxu1 }
 0x1f6   :  { %14557 = vst [vmem:[#allocation73_spill] sm:$0xff] %v10286_v5  ;;  %v10293_v2 = vadd.f32 %v469_v56, %v10188_v23  ;;  %v582_v48 = vpop.f32.mrf.mxu0 }
 0x1f7   :  { %14558 = vst [vmem:[#allocation74_spill] sm:$0xff] %v10290_v10  ;;  %v10296_v45 = vadd.f32 %v582_v48, %v10195_v63 }
 0x1f8   :  { %14559 = vst [vmem:[#allocation75_spill] sm:$0xff] %v10293_v2 }
 0x1f9   :  { %14560 = vst [vmem:[#allocation76_spill] sm:$0xff] %v10296_v45  ;;  %v473_v27 = vpop.f32.mrf.mxu1 }
 0x1fa   :  { %v10299_v59 = vadd.f32 %v473_v27, %v10180_v34  ;;  %v586_v12 = vpop.f32.mrf.mxu0 }
 0x1fb   :  { %v10302_v5 = vadd.f32 %v586_v12, %v10184_v31  ;;  %v475_v41 = vpop.f32.mrf.mxu1 }
 0x1fc   :  { %14561 = vst [vmem:[#allocation77_spill] sm:$0xff] %v10299_v59  ;;  %v10305_v61 = vadd.f32 %v475_v41, %v10188_v23  ;;  %v588_v10 = vpop.f32.mrf.mxu0 }
 0x1fd   :  { %14562 = vst [vmem:[#allocation78_spill] sm:$0xff] %v10302_v5  ;;  %v10308_v56 = vadd.f32 %v588_v10, %v10195_v63 }
 0x1fe   :  { %14563 = vst [vmem:[#allocation79_spill] sm:$0xff] %v10305_v61 }
 0x1ff   :  { %14564 = vst [vmem:[#allocation80_spill] sm:$0xff] %v10308_v56  ;;  %v479_v2 = vpop.f32.mrf.mxu1 }
 0x200   :  { %v10311_v48 = vadd.f32 %v479_v2, %v10180_v34  ;;  %v592_v45 = vpop.f32.mrf.mxu0 }
 0x201   :  { %v10314_v27 = vadd.f32 %v592_v45, %v10184_v31  ;;  %v481_v59 = vpop.f32.mrf.mxu1 }
 0x202   :  { %14565 = vst [vmem:[#allocation81_spill] sm:$0xff] %v10311_v48  ;;  %v10317_v12 = vadd.f32 %v481_v59, %v10188_v23  ;;  %v594_v5 = vpop.f32.mrf.mxu0 }
 0x203   :  { %14566 = vst [vmem:[#allocation82_spill] sm:$0xff] %v10314_v27  ;;  %v10320_v41 = vadd.f32 %v594_v5, %v10195_v63  ;;  %v444_v5 = vadd.f32 %v10165_v53, %v10180_v34 }
 0x204   :  { %14567 = vst [vmem:[#allocation83_spill] sm:$0xff] %v10317_v12 }
 0x205   :  { %14568 = vst [vmem:[#allocation84_spill] sm:$0xff] %v10320_v41  ;;  %v485_v61 = vpop.f32.mrf.mxu1 }
 0x206   :  { %v10323_v10 = vadd.f32 %v485_v61, %v10180_v34  ;;  %v598_v56 = vpop.f32.mrf.mxu0  ;;  %v446_v61 = vadd.f32 %v10174_v39, %v10188_v23  ;;  %v557_v34 = vadd.f32 %v10167_v50, %v10184_v31 }
 0x207   :  { %v10326_v2 = vadd.f32 %v598_v56, %v10184_v31  ;;  %v487_v48 = vpop.f32.mrf.mxu1 }
 0x208   :  { %14569 = vst [vmem:[#allocation85_spill] sm:$0xff] %v10323_v10  ;;  %v10329_v45 = vadd.f32 %v487_v48, %v10188_v23  ;;  %v600_v27 = vpop.f32.mrf.mxu0 }
 0x209   :  { %14570 = vst [vmem:[#allocation86_spill] sm:$0xff] %v10326_v2  ;;  %v10332_v59 = vadd.f32 %v600_v27, %v10195_v63  ;;  %v559_v27 = vadd.f32 %v10176_v37, %v10195_v63 }
 0x20a   :  { %14571 = vst [vmem:[#allocation87_spill] sm:$0xff] %v10329_v45 }
 0x20b   :  { %14572 = vst [vmem:[#allocation88_spill] sm:$0xff] %v10332_v59  ;;  %v777_v41 = vpop.f32.mrf.mxu1  ;;  %v848_v2 = vpop.f32.mrf.mxu0 }
 0x20c   :  { %v853_v10 = vadd.f32 %v777_v41, %v444_v5  ;;  %v855_v15 = vadd.f32 %v848_v2, %v557_v34  ;;  %v14590_v34 = vld [vmem:[#allocation14_spill] sm:$0xff] }
 0x20d   :  { %v779_v12 = vpop.f32.mrf.mxu1  ;;  %v850_v48 = vpop.f32.mrf.mxu0 }
 0x20e   :  { %v7589_v7 = vmul.f32 -1.442695, %v853_v10  ;;  %v854_v56 = vadd.f32 %v779_v12, %v446_v61  ;;  %v856_v59 = vadd.f32 %v850_v48, %v559_v27 }
 0x210   :  { %8731 = vpow2.f32 %v7589_v7  ;;  %v7590_v9 = vmul.f32 -1.442695, %v854_v56  ;;  %v7591_v53 = vmul.f32 -1.442695, %v856_v59 }
 0x212   :  { %8733 = vpow2.f32 %v7590_v9 }
 0x213   :  { %8735 = vpow2.f32 %v7591_v53  ;;  %v14591_v53 = vld [vmem:[#allocation15_spill] sm:$0xff] }
 0x21d   :  { %v8732_v45 = vpop.eup %8731 }
 0x21e   :  { %v860_v23 = vadd.f32 1.0, %v8732_v45  ;;  %v10475_v45 = vld [vmem:[%s14589_s3] ss:$0 sm:$0xff] }
 0x21f   :  { %v8734_v39 = vpop.eup %8733 }
 0x220   :  { %8737 = vrcp.f32 %v860_v23  ;;  %v866_v12 = vadd.f32 1.0, %v8734_v39  ;;  %v8736_v7 = vpop.eup %8735  ;;  %v14592_v23 = vld [vmem:[#allocation16_spill] sm:$0xff]  ;;  %v14593_v39 = vld [vmem:[#allocation17_spill] sm:$0xff] }
 0x221   :  { %8739 = vtanh.f32 %v855_v15  ;;  %v873_v5 = vadd.f32 1.0, %v8736_v7  ;;  %v14588_v15 = vld [vmem:[#allocation13_spill] sm:$0xff]  ;;  %v14595_v7 = vld [vmem:[#allocation19_spill] sm:$0xff] }
 0x222   :  { %8741 = vrcp.f32 %v866_v12  ;;  %v14594_v12 = vld [vmem:[#allocation18_spill] sm:$0xff] }
 0x223   :  { %8743 = vrcp.f32 %v873_v5  ;;  %v14599_v5 = vld [vmem:[#allocation23_spill] sm:$0xff] }
 0x22d   :  { %v8738_v9 = vpop.eup %8737 }
 0x22e   :  { %v8740_v41 = vpop.eup %8739 }
 0x22f   :  { %v8742_v10 = vpop.eup %8741  ;;  %v877_v63 = vmul.f32 %v8740_v41, %v8738_v9  ;;  %v14596_v9 = vld [vmem:[#allocation20_spill] sm:$0xff]  ;;  %v14597_v41 = vld [vmem:[#allocation21_spill] sm:$0xff] }
 0x230   :  { %v876_v37 = vmul.f32 0.0, %v8742_v10  ;;  %v8744_v31 = vpop.eup %8743  ;;  %v14598_v10 = vld [vmem:[#allocation22_spill] sm:$0xff] }
 0x232   :  { %v10342_v61 = vadd.f32 %v877_v63, %v876_v37  ;;  %v14600_v37 = vld [vmem:[#allocation24_spill] sm:$0xff]  ;;  %v14601_v63 = vld [vmem:[#allocation25_spill] sm:$0xff] }
 0x234   :  { %8745 = vtanh.f32 %v10342_v61 }
 0x241   :  { %v8746_v50 = vpop.eup %8745 }
 0x242   :  { %v10345_v2 = vmul.f32 %v8746_v50, %v8744_v31  ;;  %v14602_v31 = vld [vmem:[#allocation26_spill] sm:$0xff]  ;;  %v14603_v50 = vld [vmem:[#allocation27_spill] sm:$0xff] }
 0x244   :  { %8058 = vmatmul.mubr.f32.vlgmr.msra.gmra.mxu1 %v10345_v2 }
 0x245   :  { %1243 = vmatpush1.msra.mxu1 %v9833_v22  ;;  %1306 = vmatprep.mubr.f32.mxu1 %v14525_v52  ;;  %v14573_v22 = vld [vmem:[#allocation45_spill] sm:$0xff] }
 0x246   :  { %1244 = vmatprep.subr.mxu1 %v9838_v26  ;;  %v14574_v26 = vld [vmem:[#allocation46_spill] sm:$0xff] }
 0x247   :  { %1245 = vmatpush1.msra.mxu1 %v9842_v28  ;;  %v14575_v28 = vld [vmem:[#allocation47_spill] sm:$0xff] }
 0x248   :  { %1246 = vmatprep.subr.mxu1 %v9846_v29  ;;  %v14576_v29 = vld [vmem:[#allocation48_spill] sm:$0xff] }
 0x249   :  { %1247 = vmatpush1.msra.mxu1 %v9854_v32  ;;  %v14577_v32 = vld [vmem:[#allocation49_spill] sm:$0xff] }
 0x24a   :  { %1248 = vmatprep.subr.mxu1 %v9860_v35  ;;  %v14578_v35 = vld [vmem:[#allocation50_spill] sm:$0xff] }
 0x24b   :  { %1249 = vmatpush1.msra.mxu1 %v9866_v38  ;;  %v14579_v38 = vld [vmem:[#allocation12_spill] sm:$0xff] }
 0x24c   :  { %1250 = vmatprep.subr.mxu1 %v9873_v40  ;;  %v10419_v40 = vld [vmem:[%s14539_s2 + $0x38] sm:$0xff] }
 0x24d   :  { %1251 = vmatpush1.msra.mxu1 %v9881_v42  ;;  %14580 = vst [vmem:[#allocation45_spill] sm:$0xff] %v10419_v40  ;;  %8077 = vmatpush3.msra.mxu0 %v10419_v40  ;;  %v10426_v42 = vld [vmem:[%s14539_s2 + $0x30] sm:$0xff] }
 0x24e   :  { %1252 = vmatprep.subr.mxu1 %v9887_v46  ;;  %8078 = vmatprep.subr.mxu0 %v14525_v52  ;;  %14581 = vst [vmem:[#allocation46_spill] sm:$0xff] %v10426_v42  ;;  %v10431_v46 = vld [vmem:[%s14539_s2 + $0x28] sm:$0xff] }
 0x24f   :  { %1253 = vmatpush1.msra.mxu1 %v9893_v49  ;;  %14582 = vst [vmem:[#allocation47_spill] sm:$0xff] %v10431_v46  ;;  %8079 = vmatpush3.msra.mxu0 %v10426_v42  ;;  %v10438_v49 = vld [vmem:[%s14539_s2 + $0x20] sm:$0xff] }
 0x250   :  { %1254 = vmatprep.subr.mxu1 %v9900_v51  ;;  %8080 = vmatprep.subr.mxu0 %v14525_v52  ;;  %14583 = vst [vmem:[#allocation48_spill] sm:$0xff] %v10438_v49  ;;  %v10445_v51 = vld [vmem:[%s14539_s2 + $0x18] sm:$0xff] }
 0x251   :  { %1255 = vmatpush1.msra.mxu1 %v9908_v54  ;;  %8081 = vmatpush3.msra.mxu0 %v10431_v46  ;;  %14584 = vst [vmem:[#allocation49_spill] sm:$0xff] %v10445_v51  ;;  %v10452_v54 = vld [vmem:[%s14539_s2 + $0x10] sm:$0xff] }
 0x252   :  { %1256 = vmatprep.subr.mxu1 %v9914_v57  ;;  %8082 = vmatprep.subr.mxu0 %v14525_v52  ;;  %14585 = vst [vmem:[#allocation50_spill] sm:$0xff] %v10452_v54  ;;  %v10459_v57 = vld [vmem:[%s14539_s2 + $0x8] sm:$0xff] }
 0x253   :  { %1257 = vmatpush1.msra.mxu1 %v9920_v60  ;;  %8083 = vmatpush3.msra.mxu0 %v10438_v49  ;;  %14586 = vst [vmem:[#allocation12_spill] sm:$0xff] %v10459_v57  ;;  %v10466_v60 = vld [vmem:[%s14539_s2] sm:$0xff] }
 0x254   :  { %1258 = vmatprep.subr.mxu1 %v9927_v62  ;;  %8084 = vmatprep.subr.mxu0 %v14525_v52  ;;  %14587 = vst [vmem:[#allocation89_spill] sm:$0xff] %v10466_v60 }
 0x255   :  { %1259 = vmatpush1.msra.mxu1 %v9935_v0  ;;  %8085 = vmatpush3.msra.mxu0 %v10445_v51 }
 0x256   :  { %1260 = vmatprep.subr.mxu1 %v9941_v3  ;;  %8086 = vmatprep.subr.mxu0 %v14525_v52 }
 0x257   :  { %1261 = vmatpush1.msra.mxu1 %v9947_v6  ;;  %8087 = vmatpush3.msra.mxu0 %v10452_v54 }
 0x258   :  { %1262 = vmatprep.subr.mxu1 %v9954_v8  ;;  %8088 = vmatprep.subr.mxu0 %v14525_v52 }
 0x259   :  { %1263 = vmatpush1.msra.mxu1 %v9962_v13  ;;  %8089 = vmatpush3.msra.mxu0 %v10459_v57 }
 0x25a   :  { %1264 = vmatprep.subr.mxu1 %v9968_v16  ;;  %8090 = vmatprep.subr.mxu0 %v14525_v52 }
 0x25b   :  { %1265 = vmatpush1.msra.mxu1 %v9973_v18  ;;  %8091 = vmatpush3.msra.mxu0 %v10466_v60 }
 0x25c   :  { %1266 = vmatprep.subr.mxu1 %v9980_v20  ;;  %1313 = vmatprep.subr.mxu0 %v14588_v15  ;;  %v14605_v15 = vld [vmem:[#allocation29_spill] sm:$0xff] }
 0x25d   :  { %1267 = vmatpush1.msra.mxu1 %v9988_v24 }
 0x25e   :  { %1268 = vmatprep.subr.mxu1 %v9994_v33 }
 0x25f   :  { %1269 = vmatpush1.msra.mxu1 %v9999_v43 }
 0x260   :  { %1270 = vmatprep.subr.mxu1 %v10006_v47 }
 0x261   :  { %1271 = vmatpush1.msra.mxu1 %v10014_v55 }
 0x262   :  { %1272 = vmatprep.subr.mxu1 %v10020_v4 }
 0x263   :  { %1273 = vmatpush1.msra.mxu1 %v10025_v25 }
 0x264   :  { %1307 = vmatmul.mubr.f32.vlgmr.msra.gmra.mxu1 %v10345_v2  ;;  %8095 = vmatprep.subr.mxu1 %v14525_v52 }
 0x265   :  { %8096 = vmatpush3.msra.mxu1 %v10047_v58  ;;  %8127 = vmatprep.mubr.msk.f32.mxu1 %vm9420_vm1, %v14525_v52 }
 0x266   :  { %8097 = vmatprep.subr.mxu1 %v14525_v52 }
 0x267   :  { %8098 = vmatpush3.msra.mxu1 %v10054_v11 }
 0x268   :  { %8099 = vmatprep.subr.mxu1 %v14525_v52 }
 0x269   :  { %8100 = vmatpush3.msra.mxu1 %v10061_v44 }
 0x26a   :  { %8101 = vmatprep.subr.mxu1 %v14525_v52 }
 0x26b   :  { %8102 = vmatpush3.msra.mxu1 %v10068_v14 }
 0x26c   :  { %8103 = vmatprep.subr.mxu1 %v14525_v52 }
 0x26d   :  { %8104 = vmatpush3.msra.mxu1 %v10075_v1 }
 0x26e   :  { %8105 = vmatprep.subr.mxu1 %v14525_v52 }
 0x26f   :  { %8106 = vmatpush3.msra.mxu1 %v10082_v36 }
 0x270   :  { %8107 = vmatprep.subr.mxu1 %v14525_v52 }
 0x271   :  { %8108 = vmatpush3.msra.mxu1 %v10089_v30 }
 0x272   :  { %8109 = vmatprep.subr.mxu1 %v14525_v52 }
 0x273   :  { %8110 = vmatpush3.msra.mxu1 %v10096_v21 }
 0x274   :  { %8111 = vmatprep.subr.mxu1 %v14525_v52 }
 0x275   :  { %8112 = vmatpush3.msra.mxu1 %v10103_v19 }
 0x276   :  { %8113 = vmatprep.subr.mxu1 %v14525_v52 }
 0x277   :  { %8114 = vmatpush3.msra.mxu1 %v10108_v17 }
 0x278   :  { %8115 = vmatprep.subr.mxu1 %v14525_v52 }
 0x279   :  { %8116 = vmatpush3.msra.mxu1 %v14573_v22 }
 0x27a   :  { %8117 = vmatprep.subr.mxu1 %v14525_v52 }
 0x27b   :  { %8118 = vmatpush3.msra.mxu1 %v14574_v26 }
 0x27c   :  { %8119 = vmatprep.subr.mxu1 %v14525_v52 }
 0x27d   :  { %8120 = vmatpush3.msra.mxu1 %v14575_v28 }
 0x27e   :  { %8121 = vmatprep.subr.mxu1 %v14525_v52 }
 0x27f   :  { %8122 = vmatpush3.msra.mxu1 %v14576_v29 }
 0x280   :  { %8123 = vmatprep.subr.mxu1 %v14525_v52 }
 0x281   :  { %8124 = vmatpush3.msra.mxu1 %v14577_v32 }
 0x282   :  { %8125 = vmatprep.subr.mxu1 %v14525_v52 }
 0x283   :  { %8126 = vmatpush3.msra.mxu1 %v14578_v35 }
 0x284   :  { %1761 = vmatprep.subr.mxu1 %v14579_v38  ;;  %v14604_v38 = vld [vmem:[#allocation28_spill] sm:$0xff] }
 0x304   :  { %v953_v59 = vpop.f32.mrf.mxu1 }
 0x305   :  { %v954_v56 = vadd.f32 %v10475_v45, %v953_v59  ;;  %v14606_v59 = vld [vmem:[#allocation30_spill] sm:$0xff] }
 0x306   :  { %v8059_v48 = vpop.f32.mrf.mxu1 }
 0x307   :  { %8747 = vtanh.f32 %v954_v56  ;;  %v14607_v56 = vld [vmem:[#allocation31_spill] sm:$0xff]  ;;  %v14608_v48 = vld [vmem:[#allocation32_spill] sm:$0xff] }
 0x314   :  { %v8748_v27 = vpop.eup %8747 }
 0x315   :  { %8093 = vmatmul.mubr.f32.vlgmr.msra.gmra.mxu0 %v8748_v27  ;;  %v14609_v27 = vld [vmem:[#allocation33_spill] sm:$0xff] }
 0x316   :  { %1314 = vmatpush1.msra.mxu0 %v14590_v34  ;;  %1377 = vmatprep.mubr.f32.mxu0 %v14525_v52  ;;  %v14610_v34 = vld [vmem:[#allocation34_spill] sm:$0xff] }
 0x317   :  { %1315 = vmatprep.subr.mxu0 %v14591_v53  ;;  %v14611_v53 = vld [vmem:[#allocation35_spill] sm:$0xff] }
 0x318   :  { %1316 = vmatpush1.msra.mxu0 %v14592_v23  ;;  %v14612_v23 = vld [vmem:[#allocation36_spill] sm:$0xff] }
 0x319   :  { %1317 = vmatprep.subr.mxu0 %v14593_v39  ;;  %v14613_v39 = vld [vmem:[#allocation37_spill] sm:$0xff] }
 0x31a   :  { %1318 = vmatpush1.msra.mxu0 %v14594_v12  ;;  %v14614_v12 = vld [vmem:[#allocation38_spill] sm:$0xff] }
 0x31b   :  { %1319 = vmatprep.subr.mxu0 %v14595_v7  ;;  %v14615_v7 = vld [vmem:[#allocation39_spill] sm:$0xff] }
 0x31c   :  { %1320 = vmatpush1.msra.mxu0 %v14596_v9  ;;  %v14616_v9 = vld [vmem:[#allocation40_spill] sm:$0xff] }
 0x31d   :  { %1321 = vmatprep.subr.mxu0 %v14597_v41  ;;  %v14617_v41 = vld [vmem:[#allocation41_spill] sm:$0xff] }
 0x31e   :  { %1322 = vmatpush1.msra.mxu0 %v14598_v10  ;;  %v14618_v10 = vld [vmem:[#allocation42_spill] sm:$0xff] }
 0x31f   :  { %1323 = vmatprep.subr.mxu0 %v14599_v5  ;;  %v14619_v5 = vld [vmem:[#allocation43_spill] sm:$0xff] }
 0x320   :  { %1324 = vmatpush1.msra.mxu0 %v14600_v37  ;;  %v14620_v37 = vld [vmem:[#allocation44_spill] sm:$0xff] }
 0x321   :  { %1325 = vmatprep.subr.mxu0 %v14601_v63  ;;  %v14621_v63 = vld [vmem:[#allocation56_spill] sm:$0xff] }
 0x322   :  { %1326 = vmatpush1.msra.mxu0 %v14602_v31  ;;  %v14622_v31 = vld [vmem:[#allocation57_spill] sm:$0xff] }
 0x323   :  { %1327 = vmatprep.subr.mxu0 %v14603_v50  ;;  %v14623_v50 = vld [vmem:[#allocation59_spill] sm:$0xff] }
 0x324   :  { %1328 = vmatpush1.msra.mxu0 %v14604_v38  ;;  %v14624_v38 = vld [vmem:[#allocation61_spill] sm:$0xff] }
 0x325   :  { %1329 = vmatprep.subr.mxu0 %v14605_v15  ;;  %v14626_v15 = vld [vmem:[#allocation66_spill] sm:$0xff] }
 0x326   :  { %1330 = vmatpush1.msra.mxu0 %v14606_v59  ;;  %v14627_v59 = vld [vmem:[#allocation68_spill] sm:$0xff] }
 0x327   :  { %1331 = vmatprep.subr.mxu0 %v14607_v56  ;;  %v14628_v56 = vld [vmem:[#allocation71_spill] sm:$0xff] }
 0x328   :  { %1332 = vmatpush1.msra.mxu0 %v14608_v48  ;;  %v10545_v48 = vld [vmem:[#allocation2 + $0x1f8] sm:$0xff] }
 0x329   :  { %1333 = vmatprep.subr.mxu0 %v14609_v27  ;;  %14629 = vst [vmem:[#allocation13_spill] sm:$0xff] %v10545_v48  ;;  %v1308_v27 = vpop.f32.mrf.mxu1 }
 0x32a   :  { %1334 = vmatpush1.msra.mxu0 %v14610_v34  ;;  %v10551_v34 = vld [vmem:[%s14630_s28] ss:$0 sm:$0xff] }
 0x32b   :  { %1335 = vmatprep.subr.mxu0 %v14611_v53  ;;  %14631 = vst [vmem:[#allocation14_spill] sm:$0xff] %v10551_v34 }
 0x32c   :  { %1336 = vmatpush1.msra.mxu0 %v14612_v23 }
 0x32d   :  { %1337 = vmatprep.subr.mxu0 %v14613_v39  ;;  %v1310_v39 = vpop.f32.mrf.mxu1 }
 0x32e   :  { %1338 = vmatpush1.msra.mxu0 %v14614_v12 }
 0x32f   :  { %1339 = vmatprep.subr.mxu0 %v14615_v7 }
 0x330   :  { %1340 = vmatpush1.msra.mxu0 %v14616_v9  ;;  %v14633_v9 = vld [vmem:[#allocation55_spill] sm:$0xff] }
 0x331   :  { %1341 = vmatprep.subr.mxu0 %v14617_v41  ;;  %v1385_v41 = vadd.f32 %v1310_v39, %v14633_v9 }
 0x332   :  { %1342 = vmatpush1.msra.mxu0 %v14618_v10 }
 0x333   :  { %1343 = vmatprep.subr.mxu0 %v14619_v5  ;;  %v14634_v5 = vld [vmem:[#allocation53_spill] sm:$0xff] }
 0x334   :  { %1344 = vmatpush1.msra.mxu0 %v14620_v37 }
 0x335   :  { %1378 = vmatmul.mubr.f32.vlgmr.msra.gmra.mxu0 %v10345_v2  ;;  %8130 = vmatprep.subr.mxu0 %v14525_v52  ;;  %v14625_v2 = vld [vmem:[#allocation64_spill] sm:$0xff] }
 0x336   :  { %8131 = vmatpush3.msra.mxu0 %v14621_v63  ;;  %8162 = vmatprep.mubr.msk.f32.mxu0 %vm9420_vm1, %v14525_v52 }
 0x337   :  { %8132 = vmatprep.subr.mxu0 %v14525_v52 }
 0x338   :  { %8133 = vmatpush3.msra.mxu0 %v14622_v31 }
 0x339   :  { %8134 = vmatprep.subr.mxu0 %v14525_v52 }
 0x33a   :  { %8135 = vmatpush3.msra.mxu0 %v14623_v50 }
 0x33b   :  { %8136 = vmatprep.subr.mxu0 %v14525_v52 }
 0x33c   :  { %8137 = vmatpush3.msra.mxu0 %v14624_v38 }
 0x33d   :  { %8138 = vmatprep.subr.mxu0 %v14525_v52 }
 0x33e   :  { %8139 = vmatpush3.msra.mxu0 %v14625_v2 }
 0x33f   :  { %8140 = vmatprep.subr.mxu0 %v14525_v52 }
 0x340   :  { %8141 = vmatpush3.msra.mxu0 %v14626_v15 }
 0x341   :  { %8142 = vmatprep.subr.mxu0 %v14525_v52 }
 0x342   :  { %8143 = vmatpush3.msra.mxu0 %v14627_v59 }
 0x343   :  { %8144 = vmatprep.subr.mxu0 %v14525_v52 }
 0x344   :  { %8145 = vmatpush3.msra.mxu0 %v14628_v56 }
 0x345   :  { %8146 = vmatprep.subr.mxu0 %v14525_v52 }
 0x346   :  { %8147 = vmatpush3.msra.mxu0 %v10419_v40 }
 0x347   :  { %8148 = vmatprep.subr.mxu0 %v14525_v52 }
 0x348   :  { %8149 = vmatpush3.msra.mxu0 %v10426_v42 }
 0x349   :  { %8150 = vmatprep.subr.mxu0 %v14525_v52 }
 0x34a   :  { %8151 = vmatpush3.msra.mxu0 %v10431_v46 }
 0x34b   :  { %8152 = vmatprep.subr.mxu0 %v14525_v52 }
 0x34c   :  { %8153 = vmatpush3.msra.mxu0 %v10438_v49 }
 0x34d   :  { %8154 = vmatprep.subr.mxu0 %v14525_v52 }
 0x34e   :  { %8155 = vmatpush3.msra.mxu0 %v10445_v51 }
 0x34f   :  { %8156 = vmatprep.subr.mxu0 %v14525_v52 }
 0x350   :  { %8157 = vmatpush3.msra.mxu0 %v10452_v54 }
 0x351   :  { %8158 = vmatprep.subr.mxu0 %v14525_v52 }
 0x352   :  { %8159 = vmatpush3.msra.mxu0 %v10459_v57 }
 0x353   :  { %8160 = vmatprep.subr.mxu0 %v14525_v52 }
 0x354   :  { %8161 = vmatpush3.msra.mxu0 %v10466_v60  ;;  %v1384_v60 = vadd.f32 %v1308_v27, %v14634_v5  ;;  %v14636_v27 = vld [vmem:[#allocation58_spill] sm:$0xff] }
 0x355   :  { %1832 = vmatprep.subr.mxu0 %v10545_v48  ;;  %v7595_v48 = vmul.f32 -1.442695, %v1385_v41 }
 0x356   :  { %v7594_v57 = vmul.f32 -1.442695, %v1384_v60 }
 0x3d5   :  { %v1030_v53 = vpop.f32.mrf.mxu0 }
 0x3d6   :  { %v10554_v23 = vadd.f32 %v10551_v34, %v1030_v53 }
 0x3d7   :  { %v8094_v12 = vpop.f32.mrf.mxu0 }
 0x3d8   :  { %14632 = vst [vmem:[#allocation15_spill] sm:$0xff] %v10554_v23  ;;  %v1034_v7 = vmul.f32 0.5, %v10554_v23  ;;  %v14635_v23 = vld [vmem:[#allocation54_spill] sm:$0xff] }
 0x3da   :  { %v1035_v10 = vmul.f32 1.442695, %v1034_v7 }
 0x3dc   :  { %8749 = vpow2.f32 %v1035_v10 }
 0x3dd   :  { %8751 = vpow2.f32 %v7595_v48 }
 0x3de   :  { %8753 = vpow2.f32 %v7594_v57 }
 0x3e9   :  { %v8750_v54 = vpop.eup %8749 }
 0x3ea   :  { %1038 = vrot.lane.b32.xlu0 %v8750_v54, %s9421_s8  ;;  %v8752_v53 = vpop.eup %8751 }
 0x3eb   :  { %v8754_v34 = vpop.eup %8753  ;;  %v1397_v51 = vadd.f32 1.0, %v8752_v53 }
 0x3ec   :  { %v1391_v12 = vadd.f32 1.0, %v8754_v34 }
 0x3ed   :  { %8755 = vrcp.f32 %v1397_v51 }
 0x3ee   :  { %8757 = vrcp.f32 %v1391_v12  ;;  %v10569_v12 = vld [vmem:[#allocation2 + $0x1e0] sm:$0xff] }
 0x3f5   :  { %v1379_v49 = vpop.f32.mrf.mxu0 }
 0x3f6   :  { %v1386_v39 = vadd.f32 %v1379_v49, %v14635_v23 }
 0x3f7   :  { %v1381_v7 = vpop.f32.mrf.mxu0 }
 0x3f8   :  { %8759 = vtanh.f32 %v1386_v39  ;;  %v1387_v9 = vadd.f32 %v1381_v7, %v14636_v27  ;;  %v10576_v39 = vld [vmem:[#allocation2 + $0x1c0] sm:$0xff]  ;;  %v10579_v7 = vld [vmem:[#allocation2 + $0x1a8] sm:$0xff] }
 0x3f9   :  { %v10582_v27 = vld [vmem:[#allocation2 + $0x1a0] sm:$0xff] }
 0x3fa   :  { %v7596_v60 = vmul.f32 -1.442695, %v1387_v9  ;;  %v8756_v57 = vpop.eup %8755  ;;  %v10585_v9 = vld [vmem:[#allocation2 + $0x188] sm:$0xff] }
 0x3fb   :  { %v8758_v48 = vpop.eup %8757  ;;  %v1407_v54 = vmul.f32 %v8756_v57, %v10342_v61  ;;  %v10573_v61 = vld [vmem:[#allocation2 + $0x1c8] sm:$0xff] }
 0x3fc   :  { %8761 = vpow2.f32 %v7596_v60  ;;  %v10588_v60 = vld [vmem:[#allocation2 + $0x180] sm:$0xff]  ;;  %v10591_v57 = vld [vmem:[#allocation2 + $0x168] sm:$0xff] }
 0x405   :  { %v8760_v41 = vpop.eup %8759 }
 0x406   :  { %v1408_v10 = vmul.f32 %v8760_v41, %v8758_v48  ;;  %v10594_v48 = vld [vmem:[#allocation2 + $0x160] sm:$0xff]  ;;  %v10597_v41 = vld [vmem:[#allocation2 + $0x148] sm:$0xff] }
 0x408   :  { %v10563_v5 = vadd.f32 %v1408_v10, %v1407_v54  ;;  %v10600_v54 = vld [vmem:[#allocation2 + $0x140] sm:$0xff]  ;;  %v10603_v10 = vld [vmem:[#allocation2 + $0x128] sm:$0xff] }
 0x409   :  { %v8762_v34 = vpop.eup %8761 }
 0x40a   :  { %v1404_v53 = vadd.f32 1.0, %v8762_v34  ;;  %8763 = vtanh.f32 %v10563_v5  ;;  %v10606_v34 = vld [vmem:[#allocation2 + $0x120] sm:$0xff] }
 0x40c   :  { %8765 = vrcp.f32 %v1404_v53  ;;  %v10609_v53 = vld [vmem:[#allocation2 + $0x108] sm:$0xff] }
 0x417   :  { %v8764_v49 = vpop.eup %8763 }
 0x419   :  { %v8766_v51 = vpop.eup %8765 }
 0x41a   :  { %v10566_v23 = vmul.f32 %v8766_v51, %v8764_v49  ;;  %v10612_v49 = vld [vmem:[#allocation2 + $0x100] sm:$0xff]  ;;  %v10752_v51 = vld [vmem:[#allocation2 + $0x38] sm:$0xff] }
 0x41b   :  { %14649 = vst [vmem:[#allocation28_spill] sm:$0xff] %v10752_v51 }
 0x41c   :  { %8128 = vmatmul.mubr.f32.vlgmr.msra.gmra.mxu1 %v10566_v23 }
 0x41d   :  { %1762 = vmatpush1.msra.mxu1 %v10569_v12  ;;  %1825 = vmatprep.mubr.f32.mxu1 %v14525_v52 }
 0x41e   :  { %1763 = vmatprep.subr.mxu1 %v10573_v61 }
 0x41f   :  { %1764 = vmatpush1.msra.mxu1 %v10576_v39 }
 0x420   :  { %1765 = vmatprep.subr.mxu1 %v10579_v7 }
 0x421   :  { %1766 = vmatpush1.msra.mxu1 %v10582_v27 }
 0x422   :  { %1767 = vmatprep.subr.mxu1 %v10585_v9 }
 0x423   :  { %1768 = vmatpush1.msra.mxu1 %v10588_v60 }
 0x424   :  { %1769 = vmatprep.subr.mxu1 %v10591_v57 }
 0x425   :  { %1770 = vmatpush1.msra.mxu1 %v10594_v48 }
 0x426   :  { %1771 = vmatprep.subr.mxu1 %v10597_v41 }
 0x427   :  { %1772 = vmatpush1.msra.mxu1 %v10600_v54 }
 0x428   :  { %1773 = vmatprep.subr.mxu1 %v10603_v10 }
 0x429   :  { %1774 = vmatpush1.msra.mxu1 %v10606_v34 }
 0x42a   :  { %1775 = vmatprep.subr.mxu1 %v10609_v53 }
 0x42b   :  { %1776 = vmatpush1.msra.mxu1 %v10612_v49 }
 0x42c   :  { %1777 = vmatprep.subr.mxu1 %v9927_v62 }
 0x42d   :  { %1778 = vmatpush1.msra.mxu1 %v9935_v0 }
 0x42e   :  { %1779 = vmatprep.subr.mxu1 %v9941_v3 }
 0x42f   :  { %1780 = vmatpush1.msra.mxu1 %v9947_v6 }
 0x430   :  { %1781 = vmatprep.subr.mxu1 %v9954_v8  ;;  %v10670_v8 = vld [vmem:[#allocation2 + $0x1f0] sm:$0xff] }
 0x431   :  { %1782 = vmatpush1.msra.mxu1 %v9962_v13  ;;  %v10674_v13 = vld [vmem:[#allocation2 + $0x1d8] sm:$0xff] }
 0x432   :  { %1783 = vmatprep.subr.mxu1 %v9968_v16  ;;  %v10677_v16 = vld [vmem:[#allocation2 + $0x1d0] sm:$0xff] }
 0x433   :  { %1784 = vmatpush1.msra.mxu1 %v9973_v18  ;;  %v10683_v18 = vld [vmem:[#allocation2 + $0x1b0] sm:$0xff] }
 0x434   :  { %1785 = vmatprep.subr.mxu1 %v9980_v20  ;;  %v10689_v20 = vld [vmem:[#allocation2 + $0x190] sm:$0xff] }
 0x435   :  { %1786 = vmatpush1.msra.mxu1 %v9988_v24  ;;  %v10695_v24 = vld [vmem:[#allocation2 + $0x170] sm:$0xff] }
 0x436   :  { %1787 = vmatprep.subr.mxu1 %v9994_v33  ;;  %v10701_v33 = vld [vmem:[#allocation2 + $0x150] sm:$0xff] }
 0x437   :  { %1788 = vmatpush1.msra.mxu1 %v9999_v43  ;;  %v10707_v43 = vld [vmem:[#allocation2 + $0x130] sm:$0xff] }
 0x438   :  { %1789 = vmatprep.subr.mxu1 %v10006_v47  ;;  %v10713_v47 = vld [vmem:[#allocation2 + $0x110] sm:$0xff] }
 0x439   :  { %1790 = vmatpush1.msra.mxu1 %v10014_v55  ;;  %v10716_v55 = vld [vmem:[#allocation2 + $0xf8] sm:$0xff] }
 0x43a   :  { %1791 = vmatprep.subr.mxu1 %v10020_v4  ;;  %14637 = vst [vmem:[#allocation16_spill] sm:$0xff] %v10716_v55  ;;  %v10722_v4 = vld [vmem:[#allocation2 + $0xd8] sm:$0xff] }
 0x43b   :  { %1792 = vmatpush1.msra.mxu1 %v10025_v25  ;;  %14639 = vst [vmem:[#allocation18_spill] sm:$0xff] %v10722_v4  ;;  %v10728_v25 = vld [vmem:[#allocation2 + $0xb8] sm:$0xff] }
 0x43c   :  { %1826 = vmatmul.mubr.f32.vlgmr.msra.gmra.mxu1 %v10566_v23  ;;  %8165 = vmatprep.subr.mxu1 %v14525_v52  ;;  %14641 = vst [vmem:[#allocation20_spill] sm:$0xff] %v10728_v25 }
 0x43d   :  { %8166 = vmatpush3.msra.mxu1 %v10047_v58  ;;  %8197 = vmatprep.mubr.msk.f32.mxu1 %vm9420_vm1, %v14525_v52  ;;  %v10731_v58 = vld [vmem:[#allocation2 + $0xb0] sm:$0xff] }
 0x43e   :  { %8167 = vmatprep.subr.mxu1 %v14525_v52  ;;  %14642 = vst [vmem:[#allocation21_spill] sm:$0xff] %v10731_v58 }
 0x43f   :  { %8168 = vmatpush3.msra.mxu1 %v10054_v11  ;;  %v10666_v11 = vld [vmem:[#allocation2 + $0x1e8] sm:$0xff] }
 0x440   :  { %8169 = vmatprep.subr.mxu1 %v14525_v52 }
 0x441   :  { %8170 = vmatpush3.msra.mxu1 %v10061_v44  ;;  %v10710_v44 = vld [vmem:[#allocation2 + $0x118] sm:$0xff] }
 0x442   :  { %8171 = vmatprep.subr.mxu1 %v14525_v52 }
 0x443   :  { %8172 = vmatpush3.msra.mxu1 %v10068_v14  ;;  %v10725_v14 = vld [vmem:[#allocation2 + $0xd0] sm:$0xff] }
 0x444   :  { %8173 = vmatprep.subr.mxu1 %v14525_v52  ;;  %14640 = vst [vmem:[#allocation19_spill] sm:$0xff] %v10725_v14 }
 0x445   :  { %8174 = vmatpush3.msra.mxu1 %v10075_v1  ;;  %v10719_v1 = vld [vmem:[#allocation2 + $0xf0] sm:$0xff] }
 0x446   :  { %8175 = vmatprep.subr.mxu1 %v14525_v52  ;;  %14638 = vst [vmem:[#allocation17_spill] sm:$0xff] %v10719_v1 }
 0x447   :  { %8176 = vmatpush3.msra.mxu1 %v10082_v36  ;;  %v10704_v36 = vld [vmem:[#allocation2 + $0x138] sm:$0xff] }
 0x448   :  { %8177 = vmatprep.subr.mxu1 %v14525_v52 }
 0x449   :  { %8178 = vmatpush3.msra.mxu1 %v10089_v30  ;;  %v10698_v30 = vld [vmem:[#allocation2 + $0x158] sm:$0xff] }
 0x44a   :  { %8179 = vmatprep.subr.mxu1 %v14525_v52 }
 0x44b   :  { %8180 = vmatpush3.msra.mxu1 %v10096_v21  ;;  %v10692_v21 = vld [vmem:[#allocation2 + $0x178] sm:$0xff] }
 0x44c   :  { %8181 = vmatprep.subr.mxu1 %v14525_v52 }
 0x44d   :  { %8182 = vmatpush3.msra.mxu1 %v10103_v19  ;;  %v10686_v19 = vld [vmem:[#allocation2 + $0x198] sm:$0xff] }
 0x44e   :  { %8183 = vmatprep.subr.mxu1 %v14525_v52 }
 0x44f   :  { %8184 = vmatpush3.msra.mxu1 %v10108_v17  ;;  %v10680_v17 = vld [vmem:[#allocation2 + $0x1b8] sm:$0xff] }
 0x450   :  { %8185 = vmatprep.subr.mxu1 %v14525_v52 }
 0x451   :  { %8186 = vmatpush3.msra.mxu1 %v14573_v22  ;;  %v10734_v22 = vld [vmem:[#allocation2 + $0x98] sm:$0xff] }
 0x452   :  { %8187 = vmatprep.subr.mxu1 %v14525_v52  ;;  %14643 = vst [vmem:[#allocation22_spill] sm:$0xff] %v10734_v22 }
 0x453   :  { %8188 = vmatpush3.msra.mxu1 %v14574_v26  ;;  %v10737_v26 = vld [vmem:[#allocation2 + $0x90] sm:$0xff] }
 0x454   :  { %8189 = vmatprep.subr.mxu1 %v14525_v52  ;;  %14644 = vst [vmem:[#allocation23_spill] sm:$0xff] %v10737_v26 }
 0x455   :  { %8190 = vmatpush3.msra.mxu1 %v14575_v28  ;;  %v10740_v28 = vld [vmem:[#allocation2 + $0x78] sm:$0xff] }
 0x456   :  { %8191 = vmatprep.subr.mxu1 %v14525_v52  ;;  %14645 = vst [vmem:[#allocation24_spill] sm:$0xff] %v10740_v28 }
 0x457   :  { %8192 = vmatpush3.msra.mxu1 %v14576_v29  ;;  %v10743_v29 = vld [vmem:[#allocation2 + $0x70] sm:$0xff] }
 0x458   :  { %8193 = vmatprep.subr.mxu1 %v14525_v52  ;;  %14646 = vst [vmem:[#allocation25_spill] sm:$0xff] %v10743_v29 }
 0x459   :  { %8194 = vmatpush3.msra.mxu1 %v14577_v32  ;;  %v10746_v32 = vld [vmem:[#allocation2 + $0x58] sm:$0xff] }
 0x45a   :  { %8195 = vmatprep.subr.mxu1 %v14525_v52  ;;  %14647 = vst [vmem:[#allocation26_spill] sm:$0xff] %v10746_v32 }
 0x45b   :  { %8196 = vmatpush3.msra.mxu1 %v14578_v35  ;;  %v10749_v35 = vld [vmem:[#allocation2 + $0x50] sm:$0xff] }
 0x45c   :  { %2280 = vmatprep.subr.mxu1 %v10666_v11  ;;  %14648 = vst [vmem:[#allocation27_spill] sm:$0xff] %v10749_v35 }
 0x4dc   :  { %v1478_v62 = vpop.f32.mrf.mxu1 }
 0x4dd   :  { %v1479_v0 = vadd.f32 %v10475_v45, %v1478_v62  ;;  %v10755_v62 = vld [vmem:[#allocation2 + $0x30] sm:$0xff] }
 0x4de   :  { %v8129_v3 = vpop.f32.mrf.mxu1  ;;  %14650 = vst [vmem:[#allocation29_spill] sm:$0xff] %v10755_v62 }
 0x4df   :  { %8767 = vtanh.f32 %v1479_v0  ;;  %v10758_v0 = vld [vmem:[#allocation2 + $0x18] sm:$0xff] }
 0x4e0   :  { %14651 = vst [vmem:[#allocation30_spill] sm:$0xff] %v10758_v0 }
 0x4ec   :  { %v8768_v6 = vpop.eup %8767 }
 0x4ed   :  { %8163 = vmatmul.mubr.f32.vlgmr.msra.gmra.mxu0 %v8768_v6 }
 0x4ee   :  { %1833 = vmatpush1.msra.mxu0 %v10670_v8  ;;  %1896 = vmatprep.mubr.f32.mxu0 %v14525_v52 }
 0x4ef   :  { %1834 = vmatprep.subr.mxu0 %v10674_v13 }
 0x4f0   :  { %1835 = vmatpush1.msra.mxu0 %v10677_v16 }
 0x4f1   :  { %1836 = vmatprep.subr.mxu0 %v10680_v17 }
 0x4f2   :  { %1837 = vmatpush1.msra.mxu0 %v10683_v18 }
 0x4f3   :  { %1838 = vmatprep.subr.mxu0 %v10686_v19 }
 0x4f4   :  { %1839 = vmatpush1.msra.mxu0 %v10689_v20 }
 0x4f5   :  { %1840 = vmatprep.subr.mxu0 %v10692_v21 }
 0x4f6   :  { %1841 = vmatpush1.msra.mxu0 %v10695_v24 }
 0x4f7   :  { %1842 = vmatprep.subr.mxu0 %v10698_v30 }
 0x4f8   :  { %1843 = vmatpush1.msra.mxu0 %v10701_v33 }
 0x4f9   :  { %1844 = vmatprep.subr.mxu0 %v10704_v36 }
 0x4fa   :  { %1845 = vmatpush1.msra.mxu0 %v10707_v43 }
 0x4fb   :  { %1846 = vmatprep.subr.mxu0 %v10710_v44 }
 0x4fc   :  { %1847 = vmatpush1.msra.mxu0 %v10713_v47 }
 0x4fd   :  { %1848 = vmatprep.subr.mxu0 %v10716_v55 }
 0x4fe   :  { %1849 = vmatpush1.msra.mxu0 %v10719_v1 }
 0x4ff   :  { %1850 = vmatprep.subr.mxu0 %v10722_v4 }
 0x500   :  { %1851 = vmatpush1.msra.mxu0 %v10725_v14 }
 0x501   :  { %1852 = vmatprep.subr.mxu0 %v10728_v25 }
 0x502   :  { %1853 = vmatpush1.msra.mxu0 %v10731_v58 }
 0x503   :  { %1854 = vmatprep.subr.mxu0 %v10734_v22 }
 0x504   :  { %1855 = vmatpush1.msra.mxu0 %v10737_v26 }
 0x505   :  { %1856 = vmatprep.subr.mxu0 %v10740_v28 }
 0x506   :  { %1857 = vmatpush1.msra.mxu0 %v10743_v29 }
 0x507   :  { %1858 = vmatprep.subr.mxu0 %v10746_v32 }
 0x508   :  { %1859 = vmatpush1.msra.mxu0 %v10749_v35 }
 0x509   :  { %1860 = vmatprep.subr.mxu0 %v10752_v51 }
 0x50a   :  { %1861 = vmatpush1.msra.mxu0 %v10755_v62 }
 0x50b   :  { %1862 = vmatprep.subr.mxu0 %v10758_v0 }
 0x50c   :  { %1863 = vmatpush1.msra.mxu0 %v14620_v37  ;;  %v14652_v37 = vld [vmem:[#allocation48_spill] sm:$0xff] }
 0x50d   :  { %1897 = vmatmul.mubr.f32.vlgmr.msra.gmra.mxu0 %v10566_v23  ;;  %8200 = vmatprep.subr.mxu0 %v14525_v52 }
 0x50e   :  { %8201 = vmatpush3.msra.mxu0 %v14621_v63  ;;  %8232 = vmatprep.mubr.msk.f32.mxu0 %vm9420_vm1, %v14525_v52  ;;  %v14653_v63 = vld [vmem:[#allocation49_spill] sm:$0xff] }
 0x50f   :  { %8202 = vmatprep.subr.mxu0 %v14525_v52 }
 0x510   :  { %8203 = vmatpush3.msra.mxu0 %v14622_v31  ;;  %v14654_v31 = vld [vmem:[#allocation50_spill] sm:$0xff] }
 0x511   :  { %8204 = vmatprep.subr.mxu0 %v14525_v52 }
 0x512   :  { %8205 = vmatpush3.msra.mxu0 %v14623_v50  ;;  %v14655_v50 = vld [vmem:[#allocation12_spill] sm:$0xff] }
 0x513   :  { %8206 = vmatprep.subr.mxu0 %v14525_v52 }
 0x514   :  { %8207 = vmatpush3.msra.mxu0 %v14624_v38  ;;  %v14656_v38 = vld [vmem:[#allocation89_spill] sm:$0xff] }
 0x515   :  { %8208 = vmatprep.subr.mxu0 %v14525_v52 }
 0x516   :  { %8209 = vmatpush3.msra.mxu0 %v14625_v2  ;;  %v14657_v2 = vld [vmem:[#allocation13_spill] sm:$0xff] }
 0x517   :  { %8210 = vmatprep.subr.mxu0 %v14525_v52 }
 0x518   :  { %8211 = vmatpush3.msra.mxu0 %v14626_v15  ;;  %v1827_v15 = vpop.f32.mrf.mxu1 }
 0x519   :  { %8212 = vmatprep.subr.mxu0 %v14525_v52 }
 0x51a   :  { %8213 = vmatpush3.msra.mxu0 %v14627_v59  ;;  %v1829_v3 = vpop.f32.mrf.mxu1 }
 0x51b   :  { %8214 = vmatprep.subr.mxu0 %v14525_v52 }
 0x51c   :  { %8215 = vmatpush3.msra.mxu0 %v14628_v56  ;;  %v14658_v56 = vld [vmem:[#allocation14_spill] sm:$0xff] }
 0x51d   :  { %8216 = vmatprep.subr.mxu0 %v14525_v52 }
 0x51e   :  { %8217 = vmatpush3.msra.mxu0 %v10419_v40 }
 0x51f   :  { %8218 = vmatprep.subr.mxu0 %v14525_v52 }
 0x520   :  { %8219 = vmatpush3.msra.mxu0 %v10426_v42  ;;  %v14661_v42 = vld [vmem:[#allocation60_spill] sm:$0xff] }
 0x521   :  { %8220 = vmatprep.subr.mxu0 %v14525_v52 }
 0x522   :  { %8221 = vmatpush3.msra.mxu0 %v10431_v46 }
 0x523   :  { %8222 = vmatprep.subr.mxu0 %v14525_v52 }
 0x524   :  { %8223 = vmatpush3.msra.mxu0 %v14652_v37 }
 0x525   :  { %8224 = vmatprep.subr.mxu0 %v14525_v52 }
 0x526   :  { %8225 = vmatpush3.msra.mxu0 %v14653_v63 }
 0x527   :  { %8226 = vmatprep.subr.mxu0 %v14525_v52 }
 0x528   :  { %8227 = vmatpush3.msra.mxu0 %v14654_v31  ;;  %v14660_v31 = vld [vmem:[#allocation63_spill] sm:$0xff] }
 0x529   :  { %8228 = vmatprep.subr.mxu0 %v14525_v52  ;;  %v1904_v37 = vadd.f32 %v1829_v3, %v14660_v31 }
 0x52a   :  { %8229 = vmatpush3.msra.mxu0 %v14655_v50  ;;  %v1903_v50 = vadd.f32 %v1827_v15, %v14661_v42  ;;  %v14663_v42 = vld [vmem:[#allocation65_spill] sm:$0xff] }
 0x52b   :  { %8230 = vmatprep.subr.mxu0 %v14525_v52  ;;  %v7598_v40 = vmul.f32 -1.442695, %v1904_v37 }
 0x52c   :  { %8231 = vmatpush3.msra.mxu0 %v14656_v38  ;;  %v7597_v0 = vmul.f32 -1.442695, %v1903_v50 }
 0x52d   :  { %2351 = vmatprep.subr.mxu0 %v14657_v2 }
 0x5ad   :  { %v1549_v59 = vpop.f32.mrf.mxu0 }
 0x5ae   :  { %v10799_v23 = vadd.f32 %v14658_v56, %v1549_v59 }
 0x5af   :  { %v8164_v6 = vpop.f32.mrf.mxu0 }
 0x5b0   :  { %14659 = vst [vmem:[#allocation31_spill] sm:$0xff] %v10799_v23  ;;  %v1553_v63 = vmul.f32 0.5, %v10799_v23  ;;  %v14662_v23 = vld [vmem:[#allocation62_spill] sm:$0xff] }
 0x5b2   :  { %v1554_v46 = vmul.f32 1.442695, %v1553_v63 }
 0x5b4   :  { %8769 = vpow2.f32 %v1554_v46 }
 0x5b5   :  { %8771 = vpow2.f32 %v7598_v40 }
 0x5b6   :  { %8773 = vpow2.f32 %v7597_v0 }
 0x5c1   :  { %v8770_v2 = vpop.eup %8769 }
 0x5c2   :  { %1557 = vrot.lane.b32.xlu0 %v8770_v2, %s9421_s8  ;;  %v8772_v38 = vpop.eup %8771 }
 0x5c3   :  { %v8774_v59 = vpop.eup %8773  ;;  %v1916_v56 = vadd.f32 1.0, %v8772_v38 }
 0x5c4   :  { %v1910_v62 = vadd.f32 1.0, %v8774_v59  ;;  %v10836_v59 = vld [vmem:[#allocation2 + $0xc8] sm:$0xff] }
 0x5c5   :  { %8775 = vrcp.f32 %v1916_v56 }
 0x5c6   :  { %8777 = vrcp.f32 %v1910_v62 }
 0x5cd   :  { %v1898_v6 = vpop.f32.mrf.mxu0 }
 0x5ce   :  { %v1905_v51 = vadd.f32 %v1898_v6, %v14662_v23  ;;  %v10833_v23 = vld [vmem:[#allocation2 + $0xe0] sm:$0xff] }
 0x5cf   :  { %v1900_v63 = vpop.f32.mrf.mxu0  ;;  %v10839_v6 = vld [vmem:[#allocation2 + $0xc0] sm:$0xff] }
 0x5d0   :  { %8779 = vtanh.f32 %v1905_v51  ;;  %v1906_v46 = vadd.f32 %v1900_v63, %v14663_v42  ;;  %v10842_v63 = vld [vmem:[#allocation2 + $0xa8] sm:$0xff]  ;;  %v10845_v42 = vld [vmem:[#allocation2 + $0xa0] sm:$0xff] }
 0x5d2   :  { %v7599_v37 = vmul.f32 -1.442695, %v1906_v46  ;;  %v8776_v40 = vpop.eup %8775  ;;  %v10848_v46 = vld [vmem:[#allocation2 + $0x88] sm:$0xff] }
 0x5d3   :  { %v8778_v0 = vpop.eup %8777  ;;  %v1926_v50 = vmul.f32 %v8776_v40, %v10563_v5  ;;  %v10830_v5 = vld [vmem:[#allocation2 + $0xe8] sm:$0xff] }
 0x5d4   :  { %8781 = vpow2.f32 %v7599_v37  ;;  %v10851_v37 = vld [vmem:[#allocation2 + $0x80] sm:$0xff]  ;;  %v10854_v40 = vld [vmem:[#allocation2 + $0x68] sm:$0xff] }
 0x5dd   :  { %v8780_v31 = vpop.eup %8779 }
 0x5de   :  { %v1927_v2 = vmul.f32 %v8780_v31, %v8778_v0  ;;  %v10857_v0 = vld [vmem:[#allocation2 + $0x60] sm:$0xff]  ;;  %v10860_v31 = vld [vmem:[#allocation2 + $0x48] sm:$0xff] }
 0x5e0   :  { %v10808_v15 = vadd.f32 %v1927_v2, %v1926_v50  ;;  %v10863_v50 = vld [vmem:[#allocation2 + $0x40] sm:$0xff]  ;;  %v10866_v2 = vld [vmem:[#allocation2 + $0x28] sm:$0xff] }
 0x5e1   :  { %v8782_v38 = vpop.eup %8781  ;;  %14664 = vst [vmem:[#allocation32_spill] sm:$0xff] %v10863_v50  ;;  %14665 = vst [vmem:[#allocation33_spill] sm:$0xff] %v10866_v2 }
 0x5e2   :  { %v1923_v3 = vadd.f32 1.0, %v8782_v38  ;;  %8783 = vtanh.f32 %v10808_v15  ;;  %v10869_v38 = vld [vmem:[#allocation2 + $0x20] sm:$0xff] }
 0x5e3   :  { %14666 = vst [vmem:[#allocation34_spill] sm:$0xff] %v10869_v38 }
 0x5e4   :  { %8785 = vrcp.f32 %v1923_v3  ;;  %v10872_v3 = vld [vmem:[#allocation2 + $0x8] sm:$0xff] }
 0x5e5   :  { %14667 = vst [vmem:[#allocation35_spill] sm:$0xff] %v10872_v3 }
 0x5ef   :  { %v8784_v62 = vpop.eup %8783 }
 0x5f1   :  { %v8786_v56 = vpop.eup %8785 }
 0x5f2   :  { %v10811_v51 = vmul.f32 %v8786_v56, %v8784_v62  ;;  %v10875_v62 = vld [vmem:[#allocation2] sm:$0xff]  ;;  %v10883_v56 = vld [vmem:[%s14526_s6 + $0x78] sm:$0xff] }
 0x5f3   :  { %14668 = vst [vmem:[#allocation36_spill] sm:$0xff] %v10875_v62  ;;  %14669 = vst [vmem:[#allocation37_spill] sm:$0xff] %v10883_v56 }
 0x5f4   :  { %8198 = vmatmul.mubr.f32.vlgmr.msra.gmra.mxu1 %v10811_v51 }
 0x5f5   :  { %2281 = vmatpush1.msra.mxu1 %v10569_v12  ;;  %2344 = vmatprep.mubr.f32.mxu1 %v14525_v52 }
 0x5f6   :  { %2282 = vmatprep.subr.mxu1 %v10573_v61 }
 0x5f7   :  { %2283 = vmatpush1.msra.mxu1 %v10576_v39 }
 0x5f8   :  { %2284 = vmatprep.subr.mxu1 %v10579_v7 }
 0x5f9   :  { %2285 = vmatpush1.msra.mxu1 %v10582_v27 }
 0x5fa   :  { %2286 = vmatprep.subr.mxu1 %v10585_v9 }
 0x5fb   :  { %2287 = vmatpush1.msra.mxu1 %v10588_v60 }
 0x5fc   :  { %2288 = vmatprep.subr.mxu1 %v10591_v57 }
 0x5fd   :  { %2289 = vmatpush1.msra.mxu1 %v10594_v48 }
 0x5fe   :  { %2290 = vmatprep.subr.mxu1 %v10597_v41 }
 0x5ff   :  { %2291 = vmatpush1.msra.mxu1 %v10600_v54 }
 0x600   :  { %2292 = vmatprep.subr.mxu1 %v10603_v10 }
 0x601   :  { %2293 = vmatpush1.msra.mxu1 %v10606_v34 }
 0x602   :  { %2294 = vmatprep.subr.mxu1 %v10609_v53 }
 0x603   :  { %2295 = vmatpush1.msra.mxu1 %v10612_v49 }
 0x604   :  { %2296 = vmatprep.subr.mxu1 %v10830_v5 }
 0x605   :  { %2297 = vmatpush1.msra.mxu1 %v10833_v23 }
 0x606   :  { %2298 = vmatprep.subr.mxu1 %v10836_v59 }
 0x607   :  { %2299 = vmatpush1.msra.mxu1 %v10839_v6 }
 0x608   :  { %2300 = vmatprep.subr.mxu1 %v10842_v63 }
 0x609   :  { %2301 = vmatpush1.msra.mxu1 %v10845_v42 }
 0x60a   :  { %2302 = vmatprep.subr.mxu1 %v10848_v46 }
 0x60b   :  { %2303 = vmatpush1.msra.mxu1 %v10851_v37 }
 0x60c   :  { %2304 = vmatprep.subr.mxu1 %v10854_v40 }
 0x60d   :  { %2305 = vmatpush1.msra.mxu1 %v10857_v0 }
 0x60e   :  { %2306 = vmatprep.subr.mxu1 %v10860_v31 }
 0x60f   :  { %2307 = vmatpush1.msra.mxu1 %v10863_v50 }
 0x610   :  { %2308 = vmatprep.subr.mxu1 %v10866_v2 }
 0x611   :  { %2309 = vmatpush1.msra.mxu1 %v10869_v38 }
 0x612   :  { %2310 = vmatprep.subr.mxu1 %v10872_v3  ;;  %v10899_v3 = vld [vmem:[%s14526_s6 + $0x68] sm:$0xff] }
 0x613   :  { %2311 = vmatpush1.msra.mxu1 %v10875_v62  ;;  %v10892_v62 = vld [vmem:[%s14526_s6 + $0x70] sm:$0xff]  ;;  %14671 = vst [vmem:[#allocation39_spill] sm:$0xff] %v10899_v3 }
 0x614   :  { %2345 = vmatmul.mubr.f32.vlgmr.msra.gmra.mxu1 %v10811_v51  ;;  %8235 = vmatprep.subr.mxu1 %v14525_v52  ;;  %14670 = vst [vmem:[#allocation38_spill] sm:$0xff] %v10892_v62 }
 0x615   :  { %8236 = vmatpush3.msra.mxu1 %v10883_v56  ;;  %8267 = vmatprep.mubr.msk.f32.mxu1 %vm9420_vm1, %v14525_v52  ;;  %v10906_v56 = vld [vmem:[%s14526_s6 + $0x60] sm:$0xff] }
 0x616   :  { %8237 = vmatprep.subr.mxu1 %v14525_v52  ;;  %14672 = vst [vmem:[#allocation40_spill] sm:$0xff] %v10906_v56 }
 0x617   :  { %8238 = vmatpush3.msra.mxu1 %v10892_v62  ;;  %v10913_v62 = vld [vmem:[%s14526_s6 + $0x58] sm:$0xff] }
 0x618   :  { %8239 = vmatprep.subr.mxu1 %v14525_v52  ;;  %14673 = vst [vmem:[#allocation41_spill] sm:$0xff] %v10913_v62 }
 0x619   :  { %8240 = vmatpush3.msra.mxu1 %v10899_v3  ;;  %v10920_v3 = vld [vmem:[%s14526_s6 + $0x50] sm:$0xff] }
 0x61a   :  { %8241 = vmatprep.subr.mxu1 %v14525_v52  ;;  %14674 = vst [vmem:[#allocation42_spill] sm:$0xff] %v10920_v3 }
 0x61b   :  { %8242 = vmatpush3.msra.mxu1 %v10906_v56  ;;  %v10927_v56 = vld [vmem:[%s14526_s6 + $0x48] sm:$0xff] }
 0x61c   :  { %8243 = vmatprep.subr.mxu1 %v14525_v52  ;;  %14675 = vst [vmem:[#allocation43_spill] sm:$0xff] %v10927_v56 }
 0x61d   :  { %8244 = vmatpush3.msra.mxu1 %v10913_v62  ;;  %v10934_v62 = vld [vmem:[%s14526_s6 + $0x40] sm:$0xff] }
 0x61e   :  { %8245 = vmatprep.subr.mxu1 %v14525_v52  ;;  %14676 = vst [vmem:[#allocation44_spill] sm:$0xff] %v10934_v62 }
 0x61f   :  { %8246 = vmatpush3.msra.mxu1 %v10920_v3  ;;  %v10941_v3 = vld [vmem:[%s14526_s6 + $0x38] sm:$0xff] }
 0x620   :  { %8247 = vmatprep.subr.mxu1 %v14525_v52  ;;  %14677 = vst [vmem:[#allocation56_spill] sm:$0xff] %v10941_v3 }
 0x621   :  { %8248 = vmatpush3.msra.mxu1 %v10927_v56  ;;  %v10948_v56 = vld [vmem:[%s14526_s6 + $0x30] sm:$0xff] }
 0x622   :  { %8249 = vmatprep.subr.mxu1 %v14525_v52  ;;  %14678 = vst [vmem:[#allocation57_spill] sm:$0xff] %v10948_v56 }
 0x623   :  { %8250 = vmatpush3.msra.mxu1 %v10934_v62  ;;  %v10955_v62 = vld [vmem:[%s14526_s6 + $0x28] sm:$0xff] }
 0x624   :  { %8251 = vmatprep.subr.mxu1 %v14525_v52  ;;  %14679 = vst [vmem:[#allocation59_spill] sm:$0xff] %v10955_v62 }
 0x625   :  { %8252 = vmatpush3.msra.mxu1 %v10941_v3  ;;  %v10962_v3 = vld [vmem:[%s14526_s6 + $0x20] sm:$0xff] }
 0x626   :  { %8253 = vmatprep.subr.mxu1 %v14525_v52  ;;  %14680 = vst [vmem:[#allocation61_spill] sm:$0xff] %v10962_v3 }
 0x627   :  { %8254 = vmatpush3.msra.mxu1 %v10948_v56  ;;  %v10969_v56 = vld [vmem:[%s14526_s6 + $0x18] sm:$0xff] }
 0x628   :  { %8255 = vmatprep.subr.mxu1 %v14525_v52  ;;  %14681 = vst [vmem:[#allocation64_spill] sm:$0xff] %v10969_v56 }
 0x629   :  { %8256 = vmatpush3.msra.mxu1 %v10955_v62  ;;  %v10976_v62 = vld [vmem:[%s14526_s6 + $0x10] sm:$0xff] }
 0x62a   :  { %8257 = vmatprep.subr.mxu1 %v14525_v52  ;;  %14682 = vst [vmem:[#allocation66_spill] sm:$0xff] %v10976_v62 }
 0x62b   :  { %8258 = vmatpush3.msra.mxu1 %v10962_v3  ;;  %v10983_v3 = vld [vmem:[%s14526_s6 + $0x8] sm:$0xff] }
 0x62c   :  { %8259 = vmatprep.subr.mxu1 %v14525_v52 }
 0x62d   :  { %8260 = vmatpush3.msra.mxu1 %v10969_v56  ;;  %v10990_v56 = vld [vmem:[%s14526_s6] sm:$0xff] }
 0x62e   :  { %8261 = vmatprep.subr.mxu1 %v14525_v52 }
 0x62f   :  { %8262 = vmatpush3.msra.mxu1 %v10976_v62 }
 0x630   :  { %8263 = vmatprep.subr.mxu1 %v14525_v52 }
 0x631   :  { %8264 = vmatpush3.msra.mxu1 %v10983_v3 }
 0x632   :  { %8265 = vmatprep.subr.mxu1 %v14525_v52 }
 0x633   :  { %8266 = vmatpush3.msra.mxu1 %v10990_v56 }
 0x634   :  { %2799 = vmatprep.subr.mxu1 %v10666_v11 }
 0x6b4   :  { %v1997_v62 = vpop.f32.mrf.mxu1 }
 0x6b5   :  { %v1998_v38 = vadd.f32 %v10475_v45, %v1997_v62  ;;  %v14683_v45 = vld [vmem:[#allocation28_spill] sm:$0xff]  ;;  %v11034_v62 = vld [vmem:[%s14539_s2 + $0x78] sm:$0xff] }
 0x6b6   :  { %v8199_v2 = vpop.f32.mrf.mxu1  ;;  %14687 = vst [vmem:[#allocation71_spill] sm:$0xff] %v11034_v62 }
 0x6b7   :  { %8787 = vtanh.f32 %v1998_v38  ;;  %v14685_v2 = vld [vmem:[#allocation30_spill] sm:$0xff] }
 0x6b8   :  { %v11026_v38 = vld [vmem:[#allocation2 + $0x10] sm:$0xff] }
 0x6b9   :  { %14686 = vst [vmem:[#allocation68_spill] sm:$0xff] %v11026_v38 }
 0x6c4   :  { %v8788_v50 = vpop.eup %8787 }
 0x6c5   :  { %8233 = vmatmul.mubr.f32.vlgmr.msra.gmra.mxu0 %v8788_v50  ;;  %v14684_v50 = vld [vmem:[#allocation29_spill] sm:$0xff] }
 0x6c6   :  { %2352 = vmatpush1.msra.mxu0 %v10670_v8  ;;  %2415 = vmatprep.mubr.f32.mxu0 %v14525_v52 }
 0x6c7   :  { %2353 = vmatprep.subr.mxu0 %v10674_v13 }
 0x6c8   :  { %2354 = vmatpush1.msra.mxu0 %v10677_v16 }
 0x6c9   :  { %2355 = vmatprep.subr.mxu0 %v10680_v17 }
 0x6ca   :  { %2356 = vmatpush1.msra.mxu0 %v10683_v18 }
 0x6cb   :  { %2357 = vmatprep.subr.mxu0 %v10686_v19 }
 0x6cc   :  { %2358 = vmatpush1.msra.mxu0 %v10689_v20 }
 0x6cd   :  { %2359 = vmatprep.subr.mxu0 %v10692_v21 }
 0x6ce   :  { %2360 = vmatpush1.msra.mxu0 %v10695_v24 }
 0x6cf   :  { %2361 = vmatprep.subr.mxu0 %v10698_v30 }
 0x6d0   :  { %2362 = vmatpush1.msra.mxu0 %v10701_v33 }
 0x6d1   :  { %2363 = vmatprep.subr.mxu0 %v10704_v36 }
 0x6d2   :  { %2364 = vmatpush1.msra.mxu0 %v10707_v43 }
 0x6d3   :  { %2365 = vmatprep.subr.mxu0 %v10710_v44 }
 0x6d4   :  { %2366 = vmatpush1.msra.mxu0 %v10713_v47 }
 0x6d5   :  { %2367 = vmatprep.subr.mxu0 %v10716_v55 }
 0x6d6   :  { %2368 = vmatpush1.msra.mxu0 %v10719_v1 }
 0x6d7   :  { %2369 = vmatprep.subr.mxu0 %v10722_v4 }
 0x6d8   :  { %2370 = vmatpush1.msra.mxu0 %v10725_v14 }
 0x6d9   :  { %2371 = vmatprep.subr.mxu0 %v10728_v25  ;;  %v14707_v25 = vld [vmem:[#allocation67_spill] sm:$0xff] }
 0x6da   :  { %2372 = vmatpush1.msra.mxu0 %v10731_v58 }
 0x6db   :  { %2373 = vmatprep.subr.mxu0 %v10734_v22 }
 0x6dc   :  { %2374 = vmatpush1.msra.mxu0 %v10737_v26 }
 0x6dd   :  { %2375 = vmatprep.subr.mxu0 %v10740_v28 }
 0x6de   :  { %2376 = vmatpush1.msra.mxu0 %v10743_v29 }
 0x6df   :  { %2377 = vmatprep.subr.mxu0 %v10746_v32  ;;  %v14704_v32 = vld [vmem:[#allocation14_spill] sm:$0xff] }
 0x6e0   :  { %2378 = vmatpush1.msra.mxu0 %v10749_v35  ;;  %v2346_v35 = vpop.f32.mrf.mxu1 }
 0x6e1   :  { %2379 = vmatprep.subr.mxu0 %v14683_v45  ;;  %v14699_v45 = vld [vmem:[#allocation49_spill] sm:$0xff] }
 0x6e2   :  { %2380 = vmatpush1.msra.mxu0 %v14684_v50  ;;  %v14698_v50 = vld [vmem:[#allocation48_spill] sm:$0xff] }
 0x6e3   :  { %2381 = vmatprep.subr.mxu0 %v14685_v2  ;;  %v14696_v2 = vld [vmem:[#allocation46_spill] sm:$0xff] }
 0x6e4   :  { %2382 = vmatpush1.msra.mxu0 %v11026_v38  ;;  %v11043_v38 = vld [vmem:[%s14539_s2 + $0x70] sm:$0xff] }
 0x6e5   :  { %2416 = vmatmul.mubr.f32.vlgmr.msra.gmra.mxu0 %v10811_v51  ;;  %8270 = vmatprep.subr.mxu0 %v14525_v52  ;;  %14688 = vst [vmem:[#allocation55_spill] sm:$0xff] %v11043_v38  ;;  %v11050_v51 = vld [vmem:[%s14539_s2 + $0x68] sm:$0xff] }
 0x6e6   :  { %8271 = vmatpush3.msra.mxu0 %v11034_v62  ;;  %8302 = vmatprep.mubr.msk.f32.mxu0 %vm9420_vm1, %v14525_v52  ;;  %14689 = vst [vmem:[#allocation53_spill] sm:$0xff] %v11050_v51  ;;  %v11057_v62 = vld [vmem:[%s14539_s2 + $0x60] sm:$0xff] }
 0x6e7   :  { %8272 = vmatprep.subr.mxu0 %v14525_v52  ;;  %14690 = vst [vmem:[#allocation54_spill] sm:$0xff] %v11057_v62 }
 0x6e8   :  { %8273 = vmatpush3.msra.mxu0 %v11043_v38  ;;  %v11064_v38 = vld [vmem:[%s14539_s2 + $0x58] sm:$0xff] }
 0x6e9   :  { %8274 = vmatprep.subr.mxu0 %v14525_v52  ;;  %14691 = vst [vmem:[#allocation58_spill] sm:$0xff] %v11064_v38 }
 0x6ea   :  { %8275 = vmatpush3.msra.mxu0 %v11050_v51  ;;  %v11071_v51 = vld [vmem:[%s14539_s2 + $0x50] sm:$0xff] }
 0x6eb   :  { %8276 = vmatprep.subr.mxu0 %v14525_v52  ;;  %14692 = vst [vmem:[#allocation63_spill] sm:$0xff] %v11071_v51 }
 0x6ec   :  { %8277 = vmatpush3.msra.mxu0 %v11057_v62  ;;  %v11078_v62 = vld [vmem:[%s14539_s2 + $0x48] sm:$0xff] }
 0x6ed   :  { %8278 = vmatprep.subr.mxu0 %v14525_v52  ;;  %14693 = vst [vmem:[#allocation60_spill] sm:$0xff] %v11078_v62 }
 0x6ee   :  { %8279 = vmatpush3.msra.mxu0 %v11064_v38  ;;  %v11085_v38 = vld [vmem:[%s14539_s2 + $0x40] sm:$0xff] }
 0x6ef   :  { %8280 = vmatprep.subr.mxu0 %v14525_v52  ;;  %14694 = vst [vmem:[#allocation62_spill] sm:$0xff] %v11085_v38 }
 0x6f0   :  { %8281 = vmatpush3.msra.mxu0 %v11071_v51  ;;  %v14695_v51 = vld [vmem:[#allocation45_spill] sm:$0xff] }
 0x6f1   :  { %8282 = vmatprep.subr.mxu0 %v14525_v52 }
 0x6f2   :  { %8283 = vmatpush3.msra.mxu0 %v11078_v62  ;;  %v14697_v62 = vld [vmem:[#allocation47_spill] sm:$0xff] }
 0x6f3   :  { %8284 = vmatprep.subr.mxu0 %v14525_v52 }
 0x6f4   :  { %8285 = vmatpush3.msra.mxu0 %v11085_v38  ;;  %v14700_v38 = vld [vmem:[#allocation50_spill] sm:$0xff] }
 0x6f5   :  { %8286 = vmatprep.subr.mxu0 %v14525_v52 }
 0x6f6   :  { %8287 = vmatpush3.msra.mxu0 %v14695_v51  ;;  %v14701_v51 = vld [vmem:[#allocation12_spill] sm:$0xff] }
 0x6f7   :  { %8288 = vmatprep.subr.mxu0 %v14525_v52 }
 0x6f8   :  { %8289 = vmatpush3.msra.mxu0 %v14696_v2  ;;  %v14702_v2 = vld [vmem:[#allocation89_spill] sm:$0xff] }
 0x6f9   :  { %8290 = vmatprep.subr.mxu0 %v14525_v52 }
 0x6fa   :  { %8291 = vmatpush3.msra.mxu0 %v14697_v62  ;;  %v14703_v62 = vld [vmem:[#allocation13_spill] sm:$0xff] }
 0x6fb   :  { %8292 = vmatprep.subr.mxu0 %v14525_v52 }
 0x6fc   :  { %8293 = vmatpush3.msra.mxu0 %v14698_v50 }
 0x6fd   :  { %8294 = vmatprep.subr.mxu0 %v14525_v52 }
 0x6fe   :  { %8295 = vmatpush3.msra.mxu0 %v14699_v45  ;;  %v2348_v45 = vpop.f32.mrf.mxu1 }
 0x6ff   :  { %8296 = vmatprep.subr.mxu0 %v14525_v52 }
 0x700   :  { %8297 = vmatpush3.msra.mxu0 %v14700_v38  ;;  %v14706_v38 = vld [vmem:[#allocation70_spill] sm:$0xff] }
 0x701   :  { %8298 = vmatprep.subr.mxu0 %v14525_v52  ;;  %v2423_v22 = vadd.f32 %v2348_v45, %v14706_v38 }
 0x702   :  { %8299 = vmatpush3.msra.mxu0 %v14701_v51  ;;  %v2422_v51 = vadd.f32 %v2346_v35, %v14707_v25  ;;  %v14709_v25 = vld [vmem:[#allocation72_spill] sm:$0xff] }
 0x703   :  { %8300 = vmatprep.subr.mxu0 %v14525_v52  ;;  %v7601_v14 = vmul.f32 -1.442695, %v2423_v22 }
 0x704   :  { %8301 = vmatpush3.msra.mxu0 %v14702_v2  ;;  %v7600_v4 = vmul.f32 -1.442695, %v2422_v51 }
 0x705   :  { %2870 = vmatprep.subr.mxu0 %v14703_v62 }
 0x785   :  { %v2068_v50 = vpop.f32.mrf.mxu0 }
 0x786   :  { %v11106_v29 = vadd.f32 %v14704_v32, %v2068_v50 }
 0x787   :  { %v8234_v28 = vpop.f32.mrf.mxu0 }
 0x788   :  { %14705 = vst [vmem:[#allocation65_spill] sm:$0xff] %v11106_v29  ;;  %v2072_v26 = vmul.f32 0.5, %v11106_v29  ;;  %v14708_v29 = vld [vmem:[#allocation69_spill] sm:$0xff] }
 0x78a   :  { %v2073_v58 = vmul.f32 1.442695, %v2072_v26 }
 0x78c   :  { %8789 = vpow2.f32 %v2073_v58 }
 0x78d   :  { %8791 = vpow2.f32 %v7601_v14 }
 0x78e   :  { %8793 = vpow2.f32 %v7600_v4 }
 0x799   :  { %v8790_v2 = vpop.eup %8789 }
 0x79a   :  { %2076 = vrot.lane.b32.xlu1 %v8790_v2, %s9421_s8  ;;  %v8792_v62 = vpop.eup %8791 }
 0x79b   :  { %v8794_v32 = vpop.eup %8793  ;;  %v2435_v50 = vadd.f32 1.0, %v8792_v62 }
 0x79c   :  { %v2429_v1 = vadd.f32 1.0, %v8794_v32  ;;  %v14726_v32 = vld [vmem:[#allocation61_spill] sm:$0xff] }
 0x79d   :  { %8795 = vrcp.f32 %v2435_v50  ;;  %v14727_v50 = vld [vmem:[#allocation64_spill] sm:$0xff] }
 0x79e   :  { %8797 = vrcp.f32 %v2429_v1 }
 0x7a5   :  { %v2417_v28 = vpop.f32.mrf.mxu0 }
 0x7a6   :  { %v2424_v55 = vadd.f32 %v2417_v28, %v14708_v29  ;;  %v14728_v28 = vld [vmem:[#allocation66_spill] sm:$0xff] }
 0x7a7   :  { %v2419_v26 = vpop.f32.mrf.mxu0 }
 0x7a8   :  { %8799 = vtanh.f32 %v2424_v55  ;;  %v2425_v58 = vadd.f32 %v2419_v26, %v14709_v25  ;;  %v11192_v25 = vld [vmem:[%s14589_s3] ss:$0 sm:$0xff] }
 0x7aa   :  { %v7602_v22 = vmul.f32 -1.442695, %v2425_v58  ;;  %v8796_v14 = vpop.eup %8795 }
 0x7ab   :  { %v8798_v4 = vpop.eup %8797  ;;  %v2445_v45 = vmul.f32 %v8796_v14, %v10808_v15  ;;  %v14725_v15 = vld [vmem:[#allocation59_spill] sm:$0xff] }
 0x7ac   :  { %8801 = vpow2.f32 %v7602_v22 }
 0x7b5   :  { %v8800_v35 = vpop.eup %8799 }
 0x7b6   :  { %v2446_v38 = vmul.f32 %v8800_v35, %v8798_v4  ;;  %v14745_v4 = vld [vmem:[#allocation71_spill] sm:$0xff] }
 0x7b7   :  { %v14746_v35 = vld [vmem:[#allocation55_spill] sm:$0xff] }
 0x7b8   :  { %v11115_v51 = vadd.f32 %v2446_v38, %v2445_v45  ;;  %v14747_v45 = vld [vmem:[#allocation53_spill] sm:$0xff]  ;;  %v14748_v38 = vld [vmem:[#allocation54_spill] sm:$0xff] }
 0x7b9   :  { %v8802_v2 = vpop.eup %8801 }
 0x7ba   :  { %v2442_v62 = vadd.f32 1.0, %v8802_v2  ;;  %8803 = vtanh.f32 %v11115_v51  ;;  %v14749_v2 = vld [vmem:[#allocation58_spill] sm:$0xff] }
 0x7bc   :  { %8805 = vrcp.f32 %v2442_v62  ;;  %v14750_v62 = vld [vmem:[#allocation63_spill] sm:$0xff] }
 0x7c7   :  { %v8804_v1 = vpop.eup %8803 }
 0x7c9   :  { %v8806_v29 = vpop.eup %8805 }
 0x7ca   :  { %v11118_v55 = vmul.f32 %v8806_v29, %v8804_v1  ;;  %v14751_v1 = vld [vmem:[#allocation60_spill] sm:$0xff]  ;;  %v14752_v29 = vld [vmem:[#allocation62_spill] sm:$0xff] }
 0x7cc   :  { %8268 = vmatmul.mubr.f32.vlgmr.msra.gmra.mxu1 %v11118_v55 }
 0x7cd   :  { %2800 = vmatpush1.msra.mxu1 %v10569_v12  ;;  %2863 = vmatprep.mubr.f32.mxu1 %v14525_v52  ;;  %v14710_v12 = vld [vmem:[#allocation32_spill] sm:$0xff] }
 0x7ce   :  { %2801 = vmatprep.subr.mxu1 %v10573_v61  ;;  %v14711_v61 = vld [vmem:[#allocation33_spill] sm:$0xff] }
 0x7cf   :  { %2802 = vmatpush1.msra.mxu1 %v10576_v39  ;;  %v14712_v39 = vld [vmem:[#allocation34_spill] sm:$0xff] }
 0x7d0   :  { %2803 = vmatprep.subr.mxu1 %v10579_v7  ;;  %v14713_v7 = vld [vmem:[#allocation35_spill] sm:$0xff] }
 0x7d1   :  { %2804 = vmatpush1.msra.mxu1 %v10582_v27  ;;  %v14714_v27 = vld [vmem:[#allocation36_spill] sm:$0xff] }
 0x7d2   :  { %2805 = vmatprep.subr.mxu1 %v10585_v9  ;;  %v14715_v9 = vld [vmem:[#allocation37_spill] sm:$0xff] }
 0x7d3   :  { %2806 = vmatpush1.msra.mxu1 %v10588_v60  ;;  %v14716_v60 = vld [vmem:[#allocation38_spill] sm:$0xff] }
 0x7d4   :  { %2807 = vmatprep.subr.mxu1 %v10591_v57  ;;  %v14717_v57 = vld [vmem:[#allocation39_spill] sm:$0xff] }
 0x7d5   :  { %2808 = vmatpush1.msra.mxu1 %v10594_v48  ;;  %v14718_v48 = vld [vmem:[#allocation40_spill] sm:$0xff] }
 0x7d6   :  { %2809 = vmatprep.subr.mxu1 %v10597_v41  ;;  %v14719_v41 = vld [vmem:[#allocation41_spill] sm:$0xff] }
 0x7d7   :  { %2810 = vmatpush1.msra.mxu1 %v10600_v54  ;;  %v14720_v54 = vld [vmem:[#allocation42_spill] sm:$0xff] }
 0x7d8   :  { %2811 = vmatprep.subr.mxu1 %v10603_v10  ;;  %v14721_v10 = vld [vmem:[#allocation43_spill] sm:$0xff] }
 0x7d9   :  { %2812 = vmatpush1.msra.mxu1 %v10606_v34  ;;  %v14722_v34 = vld [vmem:[#allocation44_spill] sm:$0xff] }
 0x7da   :  { %2813 = vmatprep.subr.mxu1 %v10609_v53  ;;  %v14723_v53 = vld [vmem:[#allocation56_spill] sm:$0xff] }
 0x7db   :  { %2814 = vmatpush1.msra.mxu1 %v10612_v49  ;;  %v14724_v49 = vld [vmem:[#allocation57_spill] sm:$0xff] }
 0x7dc   :  { %2815 = vmatprep.subr.mxu1 %v10830_v5 }
 0x7dd   :  { %2816 = vmatpush1.msra.mxu1 %v10833_v23 }
 0x7de   :  { %2817 = vmatprep.subr.mxu1 %v10836_v59 }
 0x7df   :  { %2818 = vmatpush1.msra.mxu1 %v10839_v6 }
 0x7e0   :  { %2819 = vmatprep.subr.mxu1 %v10842_v63 }
 0x7e1   :  { %2820 = vmatpush1.msra.mxu1 %v10845_v42 }
 0x7e2   :  { %2821 = vmatprep.subr.mxu1 %v10848_v46 }
 0x7e3   :  { %2822 = vmatpush1.msra.mxu1 %v10851_v37 }
 0x7e4   :  { %2823 = vmatprep.subr.mxu1 %v10854_v40 }
 0x7e5   :  { %2824 = vmatpush1.msra.mxu1 %v10857_v0 }
 0x7e6   :  { %2825 = vmatprep.subr.mxu1 %v10860_v31 }
 0x7e7   :  { %2826 = vmatpush1.msra.mxu1 %v14710_v12 }
 0x7e8   :  { %2827 = vmatprep.subr.mxu1 %v14711_v61 }
 0x7e9   :  { %2828 = vmatpush1.msra.mxu1 %v14712_v39 }
 0x7ea   :  { %2829 = vmatprep.subr.mxu1 %v14713_v7 }
 0x7eb   :  { %2830 = vmatpush1.msra.mxu1 %v14714_v27 }
 0x7ec   :  { %2864 = vmatmul.mubr.f32.vlgmr.msra.gmra.mxu1 %v11118_v55  ;;  %8305 = vmatprep.subr.mxu1 %v14525_v52 }
 0x7ed   :  { %8306 = vmatpush3.msra.mxu1 %v14715_v9  ;;  %8337 = vmatprep.mubr.msk.f32.mxu1 %vm9420_vm1, %v14525_v52 }
 0x7ee   :  { %8307 = vmatprep.subr.mxu1 %v14525_v52 }
 0x7ef   :  { %8308 = vmatpush3.msra.mxu1 %v14716_v60 }
 0x7f0   :  { %8309 = vmatprep.subr.mxu1 %v14525_v52 }
 0x7f1   :  { %8310 = vmatpush3.msra.mxu1 %v14717_v57 }
 0x7f2   :  { %8311 = vmatprep.subr.mxu1 %v14525_v52 }
 0x7f3   :  { %8312 = vmatpush3.msra.mxu1 %v14718_v48 }
 0x7f4   :  { %8313 = vmatprep.subr.mxu1 %v14525_v52 }
 0x7f5   :  { %8314 = vmatpush3.msra.mxu1 %v14719_v41 }
 0x7f6   :  { %8315 = vmatprep.subr.mxu1 %v14525_v52 }
 0x7f7   :  { %8316 = vmatpush3.msra.mxu1 %v14720_v54 }
 0x7f8   :  { %8317 = vmatprep.subr.mxu1 %v14525_v52 }
 0x7f9   :  { %8318 = vmatpush3.msra.mxu1 %v14721_v10 }
 0x7fa   :  { %8319 = vmatprep.subr.mxu1 %v14525_v52 }
 0x7fb   :  { %8320 = vmatpush3.msra.mxu1 %v14722_v34 }
 0x7fc   :  { %8321 = vmatprep.subr.mxu1 %v14525_v52 }
 0x7fd   :  { %8322 = vmatpush3.msra.mxu1 %v14723_v53 }
 0x7fe   :  { %8323 = vmatprep.subr.mxu1 %v14525_v52 }
 0x7ff   :  { %8324 = vmatpush3.msra.mxu1 %v14724_v49 }
 0x800   :  { %8325 = vmatprep.subr.mxu1 %v14525_v52 }
 0x801   :  { %8326 = vmatpush3.msra.mxu1 %v14725_v15 }
 0x802   :  { %8327 = vmatprep.subr.mxu1 %v14525_v52 }
 0x803   :  { %8328 = vmatpush3.msra.mxu1 %v14726_v32 }
 0x804   :  { %8329 = vmatprep.subr.mxu1 %v14525_v52 }
 0x805   :  { %8330 = vmatpush3.msra.mxu1 %v14727_v50 }
 0x806   :  { %8331 = vmatprep.subr.mxu1 %v14525_v52 }
 0x807   :  { %8332 = vmatpush3.msra.mxu1 %v14728_v28 }
 0x808   :  { %8333 = vmatprep.subr.mxu1 %v14525_v52 }
 0x809   :  { %8334 = vmatpush3.msra.mxu1 %v10983_v3 }
 0x80a   :  { %8335 = vmatprep.subr.mxu1 %v14525_v52 }
 0x80b   :  { %8336 = vmatpush3.msra.mxu1 %v10990_v56 }
 0x80c   :  { %3318 = vmatprep.subr.mxu1 %v10666_v11  ;;  %v14729_v11 = vld [vmem:[#allocation16_spill] sm:$0xff] }
 0x88c   :  { %v2516_v26 = vpop.f32.mrf.mxu1 }
 0x88d   :  { %v2517_v58 = vadd.f32 %v11192_v25, %v2516_v26  ;;  %v11257_v26 = vld [vmem:[%s14539_s2 + $0x30] sm:$0xff] }
 0x88e   :  { %v8269_v22 = vpop.f32.mrf.mxu1  ;;  %14754 = vst [vmem:[#allocation46_spill] sm:$0xff] %v11257_v26 }
 0x88f   :  { %8807 = vtanh.f32 %v2517_v58  ;;  %v11264_v58 = vld [vmem:[%s14539_s2 + $0x28] sm:$0xff]  ;;  %v11271_v22 = vld [vmem:[%s14539_s2 + $0x20] sm:$0xff] }
 0x890   :  { %14755 = vst [vmem:[#allocation47_spill] sm:$0xff] %v11264_v58  ;;  %14756 = vst [vmem:[#allocation48_spill] sm:$0xff] %v11271_v22 }
 0x89c   :  { %v8808_v14 = vpop.eup %8807 }
 0x89d   :  { %8303 = vmatmul.mubr.f32.vlgmr.msra.gmra.mxu0 %v8808_v14  ;;  %v11278_v14 = vld [vmem:[%s14539_s2 + $0x18] sm:$0xff] }
 0x89e   :  { %2871 = vmatpush1.msra.mxu0 %v10670_v8  ;;  %2934 = vmatprep.mubr.f32.mxu0 %v14525_v52  ;;  %v14730_v8 = vld [vmem:[#allocation17_spill] sm:$0xff]  ;;  %14757 = vst [vmem:[#allocation49_spill] sm:$0xff] %v11278_v14 }
 0x89f   :  { %2872 = vmatprep.subr.mxu0 %v10674_v13  ;;  %v14731_v13 = vld [vmem:[#allocation18_spill] sm:$0xff] }
 0x8a0   :  { %2873 = vmatpush1.msra.mxu0 %v10677_v16  ;;  %v14732_v16 = vld [vmem:[#allocation19_spill] sm:$0xff] }
 0x8a1   :  { %2874 = vmatprep.subr.mxu0 %v10680_v17  ;;  %v14733_v17 = vld [vmem:[#allocation20_spill] sm:$0xff] }
 0x8a2   :  { %2875 = vmatpush1.msra.mxu0 %v10683_v18  ;;  %v14734_v18 = vld [vmem:[#allocation21_spill] sm:$0xff] }
 0x8a3   :  { %2876 = vmatprep.subr.mxu0 %v10686_v19  ;;  %v14735_v19 = vld [vmem:[#allocation22_spill] sm:$0xff] }
 0x8a4   :  { %2877 = vmatpush1.msra.mxu0 %v10689_v20  ;;  %v14736_v20 = vld [vmem:[#allocation23_spill] sm:$0xff] }
 0x8a5   :  { %2878 = vmatprep.subr.mxu0 %v10692_v21  ;;  %v14737_v21 = vld [vmem:[#allocation24_spill] sm:$0xff] }
 0x8a6   :  { %2879 = vmatpush1.msra.mxu0 %v10695_v24  ;;  %v14738_v24 = vld [vmem:[#allocation25_spill] sm:$0xff] }
 0x8a7   :  { %2880 = vmatprep.subr.mxu0 %v10698_v30  ;;  %v14739_v30 = vld [vmem:[#allocation26_spill] sm:$0xff] }
 0x8a8   :  { %2881 = vmatpush1.msra.mxu0 %v10701_v33  ;;  %v14740_v33 = vld [vmem:[#allocation27_spill] sm:$0xff] }
 0x8a9   :  { %2882 = vmatprep.subr.mxu0 %v10704_v36  ;;  %v14741_v36 = vld [vmem:[#allocation28_spill] sm:$0xff] }
 0x8aa   :  { %2883 = vmatpush1.msra.mxu0 %v10707_v43  ;;  %v14742_v43 = vld [vmem:[#allocation29_spill] sm:$0xff] }
 0x8ab   :  { %2884 = vmatprep.subr.mxu0 %v10710_v44  ;;  %v14743_v44 = vld [vmem:[#allocation30_spill] sm:$0xff] }
 0x8ac   :  { %2885 = vmatpush1.msra.mxu0 %v10713_v47  ;;  %v14744_v47 = vld [vmem:[#allocation68_spill] sm:$0xff] }
 0x8ad   :  { %2886 = vmatprep.subr.mxu0 %v14729_v11  ;;  %v11285_v11 = vld [vmem:[%s14539_s2 + $0x10] sm:$0xff] }
 0x8ae   :  { %2887 = vmatpush1.msra.mxu0 %v14730_v8  ;;  %14758 = vst [vmem:[#allocation50_spill] sm:$0xff] %v11285_v11  ;;  %v11292_v8 = vld [vmem:[%s14539_s2 + $0x8] sm:$0xff] }
 0x8af   :  { %2888 = vmatprep.subr.mxu0 %v14731_v13  ;;  %14759 = vst [vmem:[#allocation12_spill] sm:$0xff] %v11292_v8  ;;  %v11299_v13 = vld [vmem:[%s14539_s2] sm:$0xff] }
 0x8b0   :  { %2889 = vmatpush1.msra.mxu0 %v14732_v16  ;;  %14760 = vst [vmem:[#allocation89_spill] sm:$0xff] %v11299_v13  ;;  %v11302_v16 = vld [vmem:[#allocation2 + $0x1f8] sm:$0xff] }
 0x8b1   :  { %2890 = vmatprep.subr.mxu0 %v14733_v17  ;;  %14761 = vst [vmem:[#allocation13_spill] sm:$0xff] %v11302_v16  ;;  %v2865_v17 = vpop.f32.mrf.mxu1 }
 0x8b2   :  { %2891 = vmatpush1.msra.mxu0 %v14734_v18 }
 0x8b3   :  { %2892 = vmatprep.subr.mxu0 %v14735_v19  ;;  %v11308_v19 = vld [vmem:[%s14630_s28] ss:$0 sm:$0xff] }
 0x8b4   :  { %2893 = vmatpush1.msra.mxu0 %v14736_v20  ;;  %14762 = vst [vmem:[#allocation14_spill] sm:$0xff] %v11308_v19 }
 0x8b5   :  { %2894 = vmatprep.subr.mxu0 %v14737_v21  ;;  %v2867_v21 = vpop.f32.mrf.mxu1 }
 0x8b6   :  { %2895 = vmatpush1.msra.mxu0 %v14738_v24 }
 0x8b7   :  { %2896 = vmatprep.subr.mxu0 %v14739_v30 }
 0x8b8   :  { %2897 = vmatpush1.msra.mxu0 %v14740_v33  ;;  %v14764_v33 = vld [vmem:[#allocation75_spill] sm:$0xff] }
 0x8b9   :  { %2898 = vmatprep.subr.mxu0 %v14741_v36  ;;  %v2942_v36 = vadd.f32 %v2867_v21, %v14764_v33 }
 0x8ba   :  { %2899 = vmatpush1.msra.mxu0 %v14742_v43 }
 0x8bb   :  { %2900 = vmatprep.subr.mxu0 %v14743_v44  ;;  %v14765_v44 = vld [vmem:[#allocation73_spill] sm:$0xff] }
 0x8bc   :  { %2901 = vmatpush1.msra.mxu0 %v14744_v47 }
 0x8bd   :  { %2935 = vmatmul.mubr.f32.vlgmr.msra.gmra.mxu0 %v11118_v55  ;;  %8340 = vmatprep.subr.mxu0 %v14525_v52  ;;  %v11250_v55 = vld [vmem:[%s14539_s2 + $0x38] sm:$0xff] }
 0x8be   :  { %8341 = vmatpush3.msra.mxu0 %v14745_v4  ;;  %8372 = vmatprep.mubr.msk.f32.mxu0 %vm9420_vm1, %v14525_v52  ;;  %14753 = vst [vmem:[#allocation45_spill] sm:$0xff] %v11250_v55 }
 0x8bf   :  { %8342 = vmatprep.subr.mxu0 %v14525_v52 }
 0x8c0   :  { %8343 = vmatpush3.msra.mxu0 %v14746_v35 }
 0x8c1   :  { %8344 = vmatprep.subr.mxu0 %v14525_v52 }
 0x8c2   :  { %8345 = vmatpush3.msra.mxu0 %v14747_v45 }
 0x8c3   :  { %8346 = vmatprep.subr.mxu0 %v14525_v52 }
 0x8c4   :  { %8347 = vmatpush3.msra.mxu0 %v14748_v38 }
 0x8c5   :  { %8348 = vmatprep.subr.mxu0 %v14525_v52 }
 0x8c6   :  { %8349 = vmatpush3.msra.mxu0 %v14749_v2 }
 0x8c7   :  { %8350 = vmatprep.subr.mxu0 %v14525_v52 }
 0x8c8   :  { %8351 = vmatpush3.msra.mxu0 %v14750_v62 }
 0x8c9   :  { %8352 = vmatprep.subr.mxu0 %v14525_v52 }
 0x8ca   :  { %8353 = vmatpush3.msra.mxu0 %v14751_v1 }
 0x8cb   :  { %8354 = vmatprep.subr.mxu0 %v14525_v52 }
 0x8cc   :  { %8355 = vmatpush3.msra.mxu0 %v14752_v29 }
 0x8cd   :  { %8356 = vmatprep.subr.mxu0 %v14525_v52 }
 0x8ce   :  { %8357 = vmatpush3.msra.mxu0 %v11250_v55 }
 0x8cf   :  { %8358 = vmatprep.subr.mxu0 %v14525_v52 }
 0x8d0   :  { %8359 = vmatpush3.msra.mxu0 %v11257_v26 }
 0x8d1   :  { %8360 = vmatprep.subr.mxu0 %v14525_v52 }
 0x8d2   :  { %8361 = vmatpush3.msra.mxu0 %v11264_v58 }
 0x8d3   :  { %8362 = vmatprep.subr.mxu0 %v14525_v52 }
 0x8d4   :  { %8363 = vmatpush3.msra.mxu0 %v11271_v22 }
 0x8d5   :  { %8364 = vmatprep.subr.mxu0 %v14525_v52 }
 0x8d6   :  { %8365 = vmatpush3.msra.mxu0 %v11278_v14 }
 0x8d7   :  { %8366 = vmatprep.subr.mxu0 %v14525_v52 }
 0x8d8   :  { %8367 = vmatpush3.msra.mxu0 %v11285_v11 }
 0x8d9   :  { %8368 = vmatprep.subr.mxu0 %v14525_v52 }
 0x8da   :  { %8369 = vmatpush3.msra.mxu0 %v11292_v8 }
 0x8db   :  { %8370 = vmatprep.subr.mxu0 %v14525_v52 }
 0x8dc   :  { %8371 = vmatpush3.msra.mxu0 %v11299_v13  ;;  %v2941_v13 = vadd.f32 %v2865_v17, %v14765_v44  ;;  %v14767_v17 = vld [vmem:[#allocation76_spill] sm:$0xff] }
 0x8dd   :  { %3389 = vmatprep.subr.mxu0 %v11302_v16  ;;  %v7604_v16 = vmul.f32 -1.442695, %v2942_v36 }
 0x8de   :  { %v7603_v8 = vmul.f32 -1.442695, %v2941_v13 }
 0x95d   :  { %v2587_v18 = vpop.f32.mrf.mxu0 }
 0x95e   :  { %v11311_v20 = vadd.f32 %v11308_v19, %v2587_v18 }
 0x95f   :  { %v8304_v24 = vpop.f32.mrf.mxu0 }
 0x960   :  { %14763 = vst [vmem:[#allocation70_spill] sm:$0xff] %v11311_v20  ;;  %v2591_v30 = vmul.f32 0.5, %v11311_v20  ;;  %v14766_v20 = vld [vmem:[#allocation74_spill] sm:$0xff] }
 0x962   :  { %v2592_v43 = vmul.f32 1.442695, %v2591_v30 }
 0x964   :  { %8809 = vpow2.f32 %v2592_v43 }
 0x965   :  { %8811 = vpow2.f32 %v7604_v16 }
 0x966   :  { %8813 = vpow2.f32 %v7603_v8 }
 0x971   :  { %v8810_v11 = vpop.eup %8809 }
 0x972   :  { %2595 = vrot.lane.b32.xlu1 %v8810_v11, %s9421_s8  ;;  %v8812_v14 = vpop.eup %8811 }
 0x973   :  { %v8814_v18 = vpop.eup %8813  ;;  %v2954_v19 = vadd.f32 1.0, %v8812_v14 }
 0x974   :  { %v2948_v22 = vadd.f32 1.0, %v8814_v18  ;;  %v11333_v18 = vld [vmem:[#allocation2 + $0x1c0] sm:$0xff] }
 0x975   :  { %8815 = vrcp.f32 %v2954_v19 }
 0x976   :  { %8817 = vrcp.f32 %v2948_v22 }
 0x97d   :  { %v2936_v24 = vpop.f32.mrf.mxu0 }
 0x97e   :  { %v2943_v58 = vadd.f32 %v2936_v24, %v14766_v20  ;;  %v11326_v20 = vld [vmem:[#allocation2 + $0x1e0] sm:$0xff]  ;;  %v11336_v24 = vld [vmem:[#allocation2 + $0x1a8] sm:$0xff] }
 0x97f   :  { %v2938_v21 = vpop.f32.mrf.mxu0 }
 0x980   :  { %8819 = vtanh.f32 %v2943_v58  ;;  %v2944_v30 = vadd.f32 %v2938_v21, %v14767_v17  ;;  %v11339_v21 = vld [vmem:[#allocation2 + $0x1a0] sm:$0xff]  ;;  %v11342_v17 = vld [vmem:[#allocation2 + $0x188] sm:$0xff] }
 0x982   :  { %v7605_v33 = vmul.f32 -1.442695, %v2944_v30  ;;  %v8816_v13 = vpop.eup %8815  ;;  %v11345_v30 = vld [vmem:[#allocation2 + $0x180] sm:$0xff] }
 0x983   :  { %v8818_v8 = vpop.eup %8817  ;;  %v2964_v11 = vmul.f32 %v8816_v13, %v11115_v51  ;;  %v11330_v51 = vld [vmem:[#allocation2 + $0x1c8] sm:$0xff]  ;;  %v11351_v13 = vld [vmem:[#allocation2 + $0x160] sm:$0xff] }
 0x984   :  { %8821 = vpow2.f32 %v7605_v33  ;;  %v11348_v33 = vld [vmem:[#allocation2 + $0x168] sm:$0xff] }
 0x98d   :  { %v8820_v16 = vpop.eup %8819 }
 0x98e   :  { %v2965_v36 = vmul.f32 %v8820_v16, %v8818_v8  ;;  %v11354_v8 = vld [vmem:[#allocation2 + $0x148] sm:$0xff]  ;;  %v11357_v16 = vld [vmem:[#allocation2 + $0x140] sm:$0xff] }
 0x990   :  { %v11320_v43 = vadd.f32 %v2965_v36, %v2964_v11  ;;  %v11360_v11 = vld [vmem:[#allocation2 + $0x128] sm:$0xff]  ;;  %v11363_v36 = vld [vmem:[#allocation2 + $0x120] sm:$0xff] }
 0x991   :  { %v8822_v14 = vpop.eup %8821 }
 0x992   :  { %v2961_v44 = vadd.f32 1.0, %v8822_v14  ;;  %8823 = vtanh.f32 %v11320_v43  ;;  %v11366_v14 = vld [vmem:[#allocation2 + $0x108] sm:$0xff] }
 0x994   :  { %8825 = vrcp.f32 %v2961_v44  ;;  %v11369_v44 = vld [vmem:[#allocation2 + $0x100] sm:$0xff] }
 0x99f   :  { %v8824_v22 = vpop.eup %8823 }
 0x9a1   :  { %v8826_v19 = vpop.eup %8825 }
 0x9a2   :  { %v11323_v58 = vmul.f32 %v8826_v19, %v8824_v22  ;;  %v11509_v22 = vld [vmem:[#allocation2 + $0x38] sm:$0xff]  ;;  %v11512_v19 = vld [vmem:[#allocation2 + $0x30] sm:$0xff] }
 0x9a3   :  { %14779 = vst [vmem:[#allocation40_spill] sm:$0xff] %v11509_v22  ;;  %14780 = vst [vmem:[#allocation41_spill] sm:$0xff] %v11512_v19 }
 0x9a4   :  { %8338 = vmatmul.mubr.f32.vlgmr.msra.gmra.mxu1 %v11323_v58 }
 0x9a5   :  { %3319 = vmatpush1.msra.mxu1 %v11326_v20  ;;  %3382 = vmatprep.mubr.f32.mxu1 %v14525_v52 }
 0x9a6   :  { %3320 = vmatprep.subr.mxu1 %v11330_v51 }
 0x9a7   :  { %3321 = vmatpush1.msra.mxu1 %v11333_v18 }
 0x9a8   :  { %3322 = vmatprep.subr.mxu1 %v11336_v24 }
 0x9a9   :  { %3323 = vmatpush1.msra.mxu1 %v11339_v21 }
 0x9aa   :  { %3324 = vmatprep.subr.mxu1 %v11342_v17 }
 0x9ab   :  { %3325 = vmatpush1.msra.mxu1 %v11345_v30 }
 0x9ac   :  { %3326 = vmatprep.subr.mxu1 %v11348_v33 }
 0x9ad   :  { %3327 = vmatpush1.msra.mxu1 %v11351_v13 }
 0x9ae   :  { %3328 = vmatprep.subr.mxu1 %v11354_v8 }
 0x9af   :  { %3329 = vmatpush1.msra.mxu1 %v11357_v16 }
 0x9b0   :  { %3330 = vmatprep.subr.mxu1 %v11360_v11 }
 0x9b1   :  { %3331 = vmatpush1.msra.mxu1 %v11363_v36 }
 0x9b2   :  { %3332 = vmatprep.subr.mxu1 %v11366_v14 }
 0x9b3   :  { %3333 = vmatpush1.msra.mxu1 %v11369_v44 }
 0x9b4   :  { %3334 = vmatprep.subr.mxu1 %v10830_v5  ;;  %v11423_v5 = vld [vmem:[#allocation2 + $0x1e8] sm:$0xff] }
 0x9b5   :  { %3335 = vmatpush1.msra.mxu1 %v10833_v23 }
 0x9b6   :  { %3336 = vmatprep.subr.mxu1 %v10836_v59 }
 0x9b7   :  { %3337 = vmatpush1.msra.mxu1 %v10839_v6 }
 0x9b8   :  { %3338 = vmatprep.subr.mxu1 %v10842_v63 }
 0x9b9   :  { %3339 = vmatpush1.msra.mxu1 %v10845_v42  ;;  %v11427_v42 = vld [vmem:[#allocation2 + $0x1f0] sm:$0xff] }
 0x9ba   :  { %3340 = vmatprep.subr.mxu1 %v10848_v46  ;;  %v11431_v46 = vld [vmem:[#allocation2 + $0x1d8] sm:$0xff] }
 0x9bb   :  { %3341 = vmatpush1.msra.mxu1 %v10851_v37  ;;  %v11434_v37 = vld [vmem:[#allocation2 + $0x1d0] sm:$0xff] }
 0x9bc   :  { %3342 = vmatprep.subr.mxu1 %v10854_v40  ;;  %v11437_v40 = vld [vmem:[#allocation2 + $0x1b8] sm:$0xff] }
 0x9bd   :  { %3343 = vmatpush1.msra.mxu1 %v10857_v0  ;;  %v11440_v0 = vld [vmem:[#allocation2 + $0x1b0] sm:$0xff] }
 0x9be   :  { %3344 = vmatprep.subr.mxu1 %v10860_v31  ;;  %v11443_v31 = vld [vmem:[#allocation2 + $0x198] sm:$0xff] }
 0x9bf   :  { %3345 = vmatpush1.msra.mxu1 %v14710_v12  ;;  %v11452_v12 = vld [vmem:[#allocation2 + $0x170] sm:$0xff] }
 0x9c0   :  { %3346 = vmatprep.subr.mxu1 %v14711_v61  ;;  %v11455_v61 = vld [vmem:[#allocation2 + $0x158] sm:$0xff] }
 0x9c1   :  { %3347 = vmatpush1.msra.mxu1 %v14712_v39  ;;  %v11458_v39 = vld [vmem:[#allocation2 + $0x150] sm:$0xff] }
 0x9c2   :  { %3348 = vmatprep.subr.mxu1 %v14713_v7  ;;  %v11461_v7 = vld [vmem:[#allocation2 + $0x138] sm:$0xff] }
 0x9c3   :  { %3349 = vmatpush1.msra.mxu1 %v14714_v27  ;;  %v11464_v27 = vld [vmem:[#allocation2 + $0x130] sm:$0xff] }
 0x9c4   :  { %3383 = vmatmul.mubr.f32.vlgmr.msra.gmra.mxu1 %v11323_v58  ;;  %8375 = vmatprep.subr.mxu1 %v14525_v52 }
 0x9c5   :  { %8376 = vmatpush3.msra.mxu1 %v14715_v9  ;;  %8407 = vmatprep.mubr.msk.f32.mxu1 %vm9420_vm1, %v14525_v52  ;;  %v11467_v9 = vld [vmem:[#allocation2 + $0x118] sm:$0xff] }
 0x9c6   :  { %8377 = vmatprep.subr.mxu1 %v14525_v52 }
 0x9c7   :  { %8378 = vmatpush3.msra.mxu1 %v14716_v60  ;;  %v11470_v60 = vld [vmem:[#allocation2 + $0x110] sm:$0xff] }
 0x9c8   :  { %8379 = vmatprep.subr.mxu1 %v14525_v52 }
 0x9c9   :  { %8380 = vmatpush3.msra.mxu1 %v14717_v57  ;;  %v11473_v57 = vld [vmem:[#allocation2 + $0xf8] sm:$0xff] }
 0x9ca   :  { %8381 = vmatprep.subr.mxu1 %v14525_v52 }
 0x9cb   :  { %8382 = vmatpush3.msra.mxu1 %v14718_v48  ;;  %v11476_v48 = vld [vmem:[#allocation2 + $0xf0] sm:$0xff] }
 0x9cc   :  { %8383 = vmatprep.subr.mxu1 %v14525_v52  ;;  %14768 = vst [vmem:[#allocation67_spill] sm:$0xff] %v11476_v48 }
 0x9cd   :  { %8384 = vmatpush3.msra.mxu1 %v14719_v41  ;;  %v11479_v41 = vld [vmem:[#allocation2 + $0xd8] sm:$0xff] }
 0x9ce   :  { %8385 = vmatprep.subr.mxu1 %v14525_v52  ;;  %14769 = vst [vmem:[#allocation69_spill] sm:$0xff] %v11479_v41 }
 0x9cf   :  { %8386 = vmatpush3.msra.mxu1 %v14720_v54  ;;  %v11482_v54 = vld [vmem:[#allocation2 + $0xd0] sm:$0xff] }
 0x9d0   :  { %8387 = vmatprep.subr.mxu1 %v14525_v52  ;;  %14770 = vst [vmem:[#allocation72_spill] sm:$0xff] %v11482_v54 }
 0x9d1   :  { %8388 = vmatpush3.msra.mxu1 %v14721_v10  ;;  %v11485_v10 = vld [vmem:[#allocation2 + $0xb8] sm:$0xff] }
 0x9d2   :  { %8389 = vmatprep.subr.mxu1 %v14525_v52  ;;  %14771 = vst [vmem:[#allocation32_spill] sm:$0xff] %v11485_v10 }
 0x9d3   :  { %8390 = vmatpush3.msra.mxu1 %v14722_v34  ;;  %v11488_v34 = vld [vmem:[#allocation2 + $0xb0] sm:$0xff] }
 0x9d4   :  { %8391 = vmatprep.subr.mxu1 %v14525_v52  ;;  %14772 = vst [vmem:[#allocation33_spill] sm:$0xff] %v11488_v34 }
 0x9d5   :  { %8392 = vmatpush3.msra.mxu1 %v14723_v53  ;;  %v11491_v53 = vld [vmem:[#allocation2 + $0x98] sm:$0xff] }
 0x9d6   :  { %8393 = vmatprep.subr.mxu1 %v14525_v52  ;;  %14773 = vst [vmem:[#allocation34_spill] sm:$0xff] %v11491_v53 }
 0x9d7   :  { %8394 = vmatpush3.msra.mxu1 %v14724_v49  ;;  %v11494_v49 = vld [vmem:[#allocation2 + $0x90] sm:$0xff] }
 0x9d8   :  { %8395 = vmatprep.subr.mxu1 %v14525_v52  ;;  %14774 = vst [vmem:[#allocation35_spill] sm:$0xff] %v11494_v49 }
 0x9d9   :  { %8396 = vmatpush3.msra.mxu1 %v14725_v15  ;;  %v11497_v15 = vld [vmem:[#allocation2 + $0x78] sm:$0xff] }
 0x9da   :  { %8397 = vmatprep.subr.mxu1 %v14525_v52  ;;  %14775 = vst [vmem:[#allocation36_spill] sm:$0xff] %v11497_v15 }
 0x9db   :  { %8398 = vmatpush3.msra.mxu1 %v14726_v32  ;;  %v11500_v32 = vld [vmem:[#allocation2 + $0x70] sm:$0xff] }
 0x9dc   :  { %8399 = vmatprep.subr.mxu1 %v14525_v52  ;;  %14776 = vst [vmem:[#allocation37_spill] sm:$0xff] %v11500_v32 }
 0x9dd   :  { %8400 = vmatpush3.msra.mxu1 %v14727_v50  ;;  %v11503_v50 = vld [vmem:[#allocation2 + $0x58] sm:$0xff] }
 0x9de   :  { %8401 = vmatprep.subr.mxu1 %v14525_v52  ;;  %14777 = vst [vmem:[#allocation38_spill] sm:$0xff] %v11503_v50 }
 0x9df   :  { %8402 = vmatpush3.msra.mxu1 %v14728_v28  ;;  %v11506_v28 = vld [vmem:[#allocation2 + $0x50] sm:$0xff] }
 0x9e0   :  { %8403 = vmatprep.subr.mxu1 %v14525_v52  ;;  %14778 = vst [vmem:[#allocation39_spill] sm:$0xff] %v11506_v28 }
 0x9e1   :  { %8404 = vmatpush3.msra.mxu1 %v10983_v3  ;;  %v11446_v3 = vld [vmem:[#allocation2 + $0x190] sm:$0xff] }
 0x9e2   :  { %8405 = vmatprep.subr.mxu1 %v14525_v52 }
 0x9e3   :  { %8406 = vmatpush3.msra.mxu1 %v10990_v56  ;;  %v11449_v56 = vld [vmem:[#allocation2 + $0x178] sm:$0xff] }
 0x9e4   :  { %3837 = vmatprep.subr.mxu1 %v11423_v5 }
 0xa64   :  { %v3035_v23 = vpop.f32.mrf.mxu1 }
 0xa65   :  { %v3036_v59 = vadd.f32 %v11192_v25, %v3035_v23  ;;  %v11515_v23 = vld [vmem:[#allocation2 + $0x18] sm:$0xff] }
 0xa66   :  { %v8339_v6 = vpop.f32.mrf.mxu1  ;;  %14781 = vst [vmem:[#allocation42_spill] sm:$0xff] %v11515_v23 }
 0xa67   :  { %8827 = vtanh.f32 %v3036_v59 }
 0xa74   :  { %v8828_v63 = vpop.eup %8827 }
 0xa75   :  { %8373 = vmatmul.mubr.f32.vlgmr.msra.gmra.mxu0 %v8828_v63 }
 0xa76   :  { %3390 = vmatpush1.msra.mxu0 %v11427_v42  ;;  %3453 = vmatprep.mubr.f32.mxu0 %v14525_v52 }
 0xa77   :  { %3391 = vmatprep.subr.mxu0 %v11431_v46 }
 0xa78   :  { %3392 = vmatpush1.msra.mxu0 %v11434_v37 }
 0xa79   :  { %3393 = vmatprep.subr.mxu0 %v11437_v40 }
 0xa7a   :  { %3394 = vmatpush1.msra.mxu0 %v11440_v0 }
 0xa7b   :  { %3395 = vmatprep.subr.mxu0 %v11443_v31 }
 0xa7c   :  { %3396 = vmatpush1.msra.mxu0 %v11446_v3 }
 0xa7d   :  { %3397 = vmatprep.subr.mxu0 %v11449_v56 }
 0xa7e   :  { %3398 = vmatpush1.msra.mxu0 %v11452_v12 }
 0xa7f   :  { %3399 = vmatprep.subr.mxu0 %v11455_v61 }
 0xa80   :  { %3400 = vmatpush1.msra.mxu0 %v11458_v39 }
 0xa81   :  { %3401 = vmatprep.subr.mxu0 %v11461_v7 }
 0xa82   :  { %3402 = vmatpush1.msra.mxu0 %v11464_v27 }
 0xa83   :  { %3403 = vmatprep.subr.mxu0 %v11467_v9 }
 0xa84   :  { %3404 = vmatpush1.msra.mxu0 %v11470_v60 }
 0xa85   :  { %3405 = vmatprep.subr.mxu0 %v11473_v57 }
 0xa86   :  { %3406 = vmatpush1.msra.mxu0 %v11476_v48 }
 0xa87   :  { %3407 = vmatprep.subr.mxu0 %v11479_v41 }
 0xa88   :  { %3408 = vmatpush1.msra.mxu0 %v11482_v54 }
 0xa89   :  { %3409 = vmatprep.subr.mxu0 %v11485_v10 }
 0xa8a   :  { %3410 = vmatpush1.msra.mxu0 %v11488_v34 }
 0xa8b   :  { %3411 = vmatprep.subr.mxu0 %v11491_v53 }
 0xa8c   :  { %3412 = vmatpush1.msra.mxu0 %v11494_v49 }
 0xa8d   :  { %3413 = vmatprep.subr.mxu0 %v11497_v15 }
 0xa8e   :  { %3414 = vmatpush1.msra.mxu0 %v11500_v32 }
 0xa8f   :  { %3415 = vmatprep.subr.mxu0 %v11503_v50 }
 0xa90   :  { %3416 = vmatpush1.msra.mxu0 %v11506_v28 }
 0xa91   :  { %3417 = vmatprep.subr.mxu0 %v11509_v22 }
 0xa92   :  { %3418 = vmatpush1.msra.mxu0 %v11512_v19 }
 0xa93   :  { %3419 = vmatprep.subr.mxu0 %v11515_v23 }
 0xa94   :  { %3420 = vmatpush1.msra.mxu0 %v14744_v47  ;;  %v14782_v47 = vld [vmem:[#allocation47_spill] sm:$0xff] }
 0xa95   :  { %3454 = vmatmul.mubr.f32.vlgmr.msra.gmra.mxu0 %v11323_v58  ;;  %8410 = vmatprep.subr.mxu0 %v14525_v52  ;;  %v14789_v58 = vld [vmem:[#allocation14_spill] sm:$0xff] }
 0xa96   :  { %8411 = vmatpush3.msra.mxu0 %v14745_v4  ;;  %8442 = vmatprep.mubr.msk.f32.mxu0 %vm9420_vm1, %v14525_v52  ;;  %v14783_v4 = vld [vmem:[#allocation48_spill] sm:$0xff] }
 0xa97   :  { %8412 = vmatprep.subr.mxu0 %v14525_v52 }
 0xa98   :  { %8413 = vmatpush3.msra.mxu0 %v14746_v35  ;;  %v14784_v35 = vld [vmem:[#allocation49_spill] sm:$0xff] }
 0xa99   :  { %8414 = vmatprep.subr.mxu0 %v14525_v52 }
 0xa9a   :  { %8415 = vmatpush3.msra.mxu0 %v14747_v45  ;;  %v14785_v45 = vld [vmem:[#allocation50_spill] sm:$0xff] }
 0xa9b   :  { %8416 = vmatprep.subr.mxu0 %v14525_v52 }
 0xa9c   :  { %8417 = vmatpush3.msra.mxu0 %v14748_v38  ;;  %v14786_v38 = vld [vmem:[#allocation12_spill] sm:$0xff] }
 0xa9d   :  { %8418 = vmatprep.subr.mxu0 %v14525_v52 }
 0xa9e   :  { %8419 = vmatpush3.msra.mxu0 %v14749_v2  ;;  %v14787_v2 = vld [vmem:[#allocation89_spill] sm:$0xff] }
 0xa9f   :  { %8420 = vmatprep.subr.mxu0 %v14525_v52 }
 0xaa0   :  { %8421 = vmatpush3.msra.mxu0 %v14750_v62  ;;  %v14788_v62 = vld [vmem:[#allocation13_spill] sm:$0xff] }
 0xaa1   :  { %8422 = vmatprep.subr.mxu0 %v14525_v52 }
 0xaa2   :  { %8423 = vmatpush3.msra.mxu0 %v14751_v1  ;;  %v3384_v1 = vpop.f32.mrf.mxu1 }
 0xaa3   :  { %8424 = vmatprep.subr.mxu0 %v14525_v52 }
 0xaa4   :  { %8425 = vmatpush3.msra.mxu0 %v14752_v29  ;;  %v3386_v6 = vpop.f32.mrf.mxu1 }
 0xaa5   :  { %8426 = vmatprep.subr.mxu0 %v14525_v52 }
 0xaa6   :  { %8427 = vmatpush3.msra.mxu0 %v11250_v55 }
 0xaa7   :  { %8428 = vmatprep.subr.mxu0 %v14525_v52 }
 0xaa8   :  { %8429 = vmatpush3.msra.mxu0 %v11257_v26  ;;  %v14792_v26 = vld [vmem:[#allocation77_spill] sm:$0xff] }
 0xaa9   :  { %8430 = vmatprep.subr.mxu0 %v14525_v52 }
 0xaaa   :  { %8431 = vmatpush3.msra.mxu0 %v14782_v47 }
 0xaab   :  { %8432 = vmatprep.subr.mxu0 %v14525_v52 }
 0xaac   :  { %8433 = vmatpush3.msra.mxu0 %v14783_v4 }
 0xaad   :  { %8434 = vmatprep.subr.mxu0 %v14525_v52 }
 0xaae   :  { %8435 = vmatpush3.msra.mxu0 %v14784_v35 }
 0xaaf   :  { %8436 = vmatprep.subr.mxu0 %v14525_v52 }
 0xab0   :  { %8437 = vmatpush3.msra.mxu0 %v14785_v45  ;;  %v14791_v45 = vld [vmem:[#allocation79_spill] sm:$0xff] }
 0xab1   :  { %8438 = vmatprep.subr.mxu0 %v14525_v52  ;;  %v3461_v4 = vadd.f32 %v3386_v6, %v14791_v45 }
 0xab2   :  { %8439 = vmatpush3.msra.mxu0 %v14786_v38  ;;  %v3460_v38 = vadd.f32 %v3384_v1, %v14792_v26  ;;  %v14794_v26 = vld [vmem:[#allocation80_spill] sm:$0xff] }
 0xab3   :  { %8440 = vmatprep.subr.mxu0 %v14525_v52  ;;  %v7607_v55 = vmul.f32 -1.442695, %v3461_v4 }
 0xab4   :  { %8441 = vmatpush3.msra.mxu0 %v14787_v2  ;;  %v7606_v23 = vmul.f32 -1.442695, %v3460_v38 }
 0xab5   :  { %3908 = vmatprep.subr.mxu0 %v14788_v62 }
 0xb35   :  { %v3106_v29 = vpop.f32.mrf.mxu0 }
 0xb36   :  { %v11556_v59 = vadd.f32 %v14789_v58, %v3106_v29 }
 0xb37   :  { %v8374_v63 = vpop.f32.mrf.mxu0 }
 0xb38   :  { %14790 = vst [vmem:[#allocation43_spill] sm:$0xff] %v11556_v59  ;;  %v3110_v35 = vmul.f32 0.5, %v11556_v59  ;;  %v14793_v59 = vld [vmem:[#allocation78_spill] sm:$0xff] }
 0xb3a   :  { %v3111_v47 = vmul.f32 1.442695, %v3110_v35 }
 0xb3c   :  { %8829 = vpow2.f32 %v3111_v47 }
 0xb3d   :  { %8831 = vpow2.f32 %v7607_v55 }
 0xb3e   :  { %8833 = vpow2.f32 %v7606_v23 }
 0xb49   :  { %v8830_v62 = vpop.eup %8829 }
 0xb4a   :  { %3114 = vrot.lane.b32.xlu0 %v8830_v62, %s9421_s8  ;;  %v8832_v2 = vpop.eup %8831 }
 0xb4b   :  { %v8834_v29 = vpop.eup %8833  ;;  %v3473_v58 = vadd.f32 1.0, %v8832_v2 }
 0xb4c   :  { %v3467_v19 = vadd.f32 1.0, %v8834_v29  ;;  %v11593_v29 = vld [vmem:[#allocation2 + $0xc8] sm:$0xff] }
 0xb4d   :  { %8835 = vrcp.f32 %v3473_v58 }
 0xb4e   :  { %8837 = vrcp.f32 %v3467_v19 }
 0xb55   :  { %v3455_v63 = vpop.f32.mrf.mxu0 }
 0xb56   :  { %v3462_v22 = vadd.f32 %v3455_v63, %v14793_v59  ;;  %v11590_v59 = vld [vmem:[#allocation2 + $0xe0] sm:$0xff] }
 0xb57   :  { %v3457_v35 = vpop.f32.mrf.mxu0  ;;  %v11596_v63 = vld [vmem:[#allocation2 + $0xc0] sm:$0xff] }
 0xb58   :  { %8839 = vtanh.f32 %v3462_v22  ;;  %v3463_v47 = vadd.f32 %v3457_v35, %v14794_v26  ;;  %v11599_v35 = vld [vmem:[#allocation2 + $0xa8] sm:$0xff]  ;;  %v11602_v26 = vld [vmem:[#allocation2 + $0xa0] sm:$0xff] }
 0xb5a   :  { %v7608_v4 = vmul.f32 -1.442695, %v3463_v47  ;;  %v8836_v55 = vpop.eup %8835  ;;  %v11605_v47 = vld [vmem:[#allocation2 + $0x88] sm:$0xff] }
 0xb5b   :  { %v8838_v23 = vpop.eup %8837  ;;  %v3483_v38 = vmul.f32 %v8836_v55, %v11320_v43  ;;  %v11587_v43 = vld [vmem:[#allocation2 + $0xe8] sm:$0xff] }
 0xb5c   :  { %8841 = vpow2.f32 %v7608_v4  ;;  %v11608_v4 = vld [vmem:[#allocation2 + $0x80] sm:$0xff]  ;;  %v11611_v55 = vld [vmem:[#allocation2 + $0x68] sm:$0xff] }
 0xb65   :  { %v8840_v45 = vpop.eup %8839 }
 0xb66   :  { %v3484_v62 = vmul.f32 %v8840_v45, %v8838_v23  ;;  %v11614_v23 = vld [vmem:[#allocation2 + $0x60] sm:$0xff]  ;;  %v11617_v45 = vld [vmem:[#allocation2 + $0x48] sm:$0xff] }
 0xb68   :  { %v11565_v1 = vadd.f32 %v3484_v62, %v3483_v38  ;;  %v11620_v38 = vld [vmem:[#allocation2 + $0x40] sm:$0xff]  ;;  %v11623_v62 = vld [vmem:[#allocation2 + $0x28] sm:$0xff] }
 0xb69   :  { %v8842_v2 = vpop.eup %8841  ;;  %14795 = vst [vmem:[#allocation44_spill] sm:$0xff] %v11620_v38  ;;  %14796 = vst [vmem:[#allocation56_spill] sm:$0xff] %v11623_v62 }
 0xb6a   :  { %v3480_v6 = vadd.f32 1.0, %v8842_v2  ;;  %8843 = vtanh.f32 %v11565_v1  ;;  %v11626_v2 = vld [vmem:[#allocation2 + $0x20] sm:$0xff] }
 0xb6b   :  { %14797 = vst [vmem:[#allocation57_spill] sm:$0xff] %v11626_v2 }
 0xb6c   :  { %8845 = vrcp.f32 %v3480_v6  ;;  %v11629_v6 = vld [vmem:[#allocation2 + $0x8] sm:$0xff] }
 0xb6d   :  { %14798 = vst [vmem:[#allocation59_spill] sm:$0xff] %v11629_v6 }
 0xb77   :  { %v8844_v19 = vpop.eup %8843 }
 0xb79   :  { %v8846_v58 = vpop.eup %8845 }
 0xb7a   :  { %v11568_v22 = vmul.f32 %v8846_v58, %v8844_v19  ;;  %v11632_v19 = vld [vmem:[#allocation2] sm:$0xff]  ;;  %v11640_v58 = vld [vmem:[%s14526_s6 + $0x78] sm:$0xff] }
 0xb7b   :  { %14799 = vst [vmem:[#allocation61_spill] sm:$0xff] %v11632_v19  ;;  %14800 = vst [vmem:[#allocation64_spill] sm:$0xff] %v11640_v58 }
 0xb7c   :  { %8408 = vmatmul.mubr.f32.vlgmr.msra.gmra.mxu1 %v11568_v22 }
 0xb7d   :  { %3838 = vmatpush1.msra.mxu1 %v11326_v20  ;;  %3901 = vmatprep.mubr.f32.mxu1 %v14525_v52 }
 0xb7e   :  { %3839 = vmatprep.subr.mxu1 %v11330_v51 }
 0xb7f   :  { %3840 = vmatpush1.msra.mxu1 %v11333_v18 }
 0xb80   :  { %3841 = vmatprep.subr.mxu1 %v11336_v24 }
 0xb81   :  { %3842 = vmatpush1.msra.mxu1 %v11339_v21 }
 0xb82   :  { %3843 = vmatprep.subr.mxu1 %v11342_v17 }
 0xb83   :  { %3844 = vmatpush1.msra.mxu1 %v11345_v30 }
 0xb84   :  { %3845 = vmatprep.subr.mxu1 %v11348_v33 }
 0xb85   :  { %3846 = vmatpush1.msra.mxu1 %v11351_v13 }
 0xb86   :  { %3847 = vmatprep.subr.mxu1 %v11354_v8 }
 0xb87   :  { %3848 = vmatpush1.msra.mxu1 %v11357_v16 }
 0xb88   :  { %3849 = vmatprep.subr.mxu1 %v11360_v11 }
 0xb89   :  { %3850 = vmatpush1.msra.mxu1 %v11363_v36 }
 0xb8a   :  { %3851 = vmatprep.subr.mxu1 %v11366_v14 }
 0xb8b   :  { %3852 = vmatpush1.msra.mxu1 %v11369_v44 }
 0xb8c   :  { %3853 = vmatprep.subr.mxu1 %v11587_v43 }
 0xb8d   :  { %3854 = vmatpush1.msra.mxu1 %v11590_v59 }
 0xb8e   :  { %3855 = vmatprep.subr.mxu1 %v11593_v29 }
 0xb8f   :  { %3856 = vmatpush1.msra.mxu1 %v11596_v63 }
 0xb90   :  { %3857 = vmatprep.subr.mxu1 %v11599_v35 }
 0xb91   :  { %3858 = vmatpush1.msra.mxu1 %v11602_v26 }
 0xb92   :  { %3859 = vmatprep.subr.mxu1 %v11605_v47 }
 0xb93   :  { %3860 = vmatpush1.msra.mxu1 %v11608_v4 }
 0xb94   :  { %3861 = vmatprep.subr.mxu1 %v11611_v55 }
 0xb95   :  { %3862 = vmatpush1.msra.mxu1 %v11614_v23 }
 0xb96   :  { %3863 = vmatprep.subr.mxu1 %v11617_v45 }
 0xb97   :  { %3864 = vmatpush1.msra.mxu1 %v11620_v38 }
 0xb98   :  { %3865 = vmatprep.subr.mxu1 %v11623_v62 }
 0xb99   :  { %3866 = vmatpush1.msra.mxu1 %v11626_v2 }
 0xb9a   :  { %3867 = vmatprep.subr.mxu1 %v11629_v6  ;;  %v11656_v6 = vld [vmem:[%s14526_s6 + $0x68] sm:$0xff] }
 0xb9b   :  { %3868 = vmatpush1.msra.mxu1 %v11632_v19  ;;  %v11649_v19 = vld [vmem:[%s14526_s6 + $0x70] sm:$0xff]  ;;  %14802 = vst [vmem:[#allocation16_spill] sm:$0xff] %v11656_v6 }
 0xb9c   :  { %3902 = vmatmul.mubr.f32.vlgmr.msra.gmra.mxu1 %v11568_v22  ;;  %8445 = vmatprep.subr.mxu1 %v14525_v52  ;;  %14801 = vst [vmem:[#allocation66_spill] sm:$0xff] %v11649_v19 }
 0xb9d   :  { %8446 = vmatpush3.msra.mxu1 %v11640_v58  ;;  %8477 = vmatprep.mubr.msk.f32.mxu1 %vm9420_vm1, %v14525_v52  ;;  %v11663_v58 = vld [vmem:[%s14526_s6 + $0x60] sm:$0xff] }
 0xb9e   :  { %8447 = vmatprep.subr.mxu1 %v14525_v52  ;;  %14803 = vst [vmem:[#allocation17_spill] sm:$0xff] %v11663_v58 }
 0xb9f   :  { %8448 = vmatpush3.msra.mxu1 %v11649_v19  ;;  %v11670_v19 = vld [vmem:[%s14526_s6 + $0x58] sm:$0xff] }
 0xba0   :  { %8449 = vmatprep.subr.mxu1 %v14525_v52  ;;  %14804 = vst [vmem:[#allocation18_spill] sm:$0xff] %v11670_v19 }
 0xba1   :  { %8450 = vmatpush3.msra.mxu1 %v11656_v6  ;;  %v11677_v6 = vld [vmem:[%s14526_s6 + $0x50] sm:$0xff] }
 0xba2   :  { %8451 = vmatprep.subr.mxu1 %v14525_v52  ;;  %14805 = vst [vmem:[#allocation19_spill] sm:$0xff] %v11677_v6 }
 0xba3   :  { %8452 = vmatpush3.msra.mxu1 %v11663_v58  ;;  %v11684_v58 = vld [vmem:[%s14526_s6 + $0x48] sm:$0xff] }
 0xba4   :  { %8453 = vmatprep.subr.mxu1 %v14525_v52  ;;  %14806 = vst [vmem:[#allocation20_spill] sm:$0xff] %v11684_v58 }
 0xba5   :  { %8454 = vmatpush3.msra.mxu1 %v11670_v19  ;;  %v11691_v19 = vld [vmem:[%s14526_s6 + $0x40] sm:$0xff] }
 0xba6   :  { %8455 = vmatprep.subr.mxu1 %v14525_v52  ;;  %14807 = vst [vmem:[#allocation21_spill] sm:$0xff] %v11691_v19 }
 0xba7   :  { %8456 = vmatpush3.msra.mxu1 %v11677_v6  ;;  %v11698_v6 = vld [vmem:[%s14526_s6 + $0x38] sm:$0xff] }
 0xba8   :  { %8457 = vmatprep.subr.mxu1 %v14525_v52  ;;  %14808 = vst [vmem:[#allocation22_spill] sm:$0xff] %v11698_v6 }
 0xba9   :  { %8458 = vmatpush3.msra.mxu1 %v11684_v58  ;;  %v11705_v58 = vld [vmem:[%s14526_s6 + $0x30] sm:$0xff] }
 0xbaa   :  { %8459 = vmatprep.subr.mxu1 %v14525_v52  ;;  %14809 = vst [vmem:[#allocation23_spill] sm:$0xff] %v11705_v58 }
 0xbab   :  { %8460 = vmatpush3.msra.mxu1 %v11691_v19  ;;  %v11712_v19 = vld [vmem:[%s14526_s6 + $0x28] sm:$0xff] }
 0xbac   :  { %8461 = vmatprep.subr.mxu1 %v14525_v52  ;;  %14810 = vst [vmem:[#allocation24_spill] sm:$0xff] %v11712_v19 }
 0xbad   :  { %8462 = vmatpush3.msra.mxu1 %v11698_v6  ;;  %v11719_v6 = vld [vmem:[%s14526_s6 + $0x20] sm:$0xff] }
 0xbae   :  { %8463 = vmatprep.subr.mxu1 %v14525_v52  ;;  %14811 = vst [vmem:[#allocation25_spill] sm:$0xff] %v11719_v6 }
 0xbaf   :  { %8464 = vmatpush3.msra.mxu1 %v11705_v58  ;;  %v11726_v58 = vld [vmem:[%s14526_s6 + $0x18] sm:$0xff] }
 0xbb0   :  { %8465 = vmatprep.subr.mxu1 %v14525_v52  ;;  %14812 = vst [vmem:[#allocation26_spill] sm:$0xff] %v11726_v58 }
 0xbb1   :  { %8466 = vmatpush3.msra.mxu1 %v11712_v19  ;;  %v11733_v19 = vld [vmem:[%s14526_s6 + $0x10] sm:$0xff] }
 0xbb2   :  { %8467 = vmatprep.subr.mxu1 %v14525_v52  ;;  %14813 = vst [vmem:[#allocation27_spill] sm:$0xff] %v11733_v19 }
 0xbb3   :  { %8468 = vmatpush3.msra.mxu1 %v11719_v6  ;;  %v11740_v6 = vld [vmem:[%s14526_s6 + $0x8] sm:$0xff] }
 0xbb4   :  { %8469 = vmatprep.subr.mxu1 %v14525_v52 }
 0xbb5   :  { %8470 = vmatpush3.msra.mxu1 %v11726_v58  ;;  %v11747_v58 = vld [vmem:[%s14526_s6] sm:$0xff] }
 0xbb6   :  { %8471 = vmatprep.subr.mxu1 %v14525_v52 }
 0xbb7   :  { %8472 = vmatpush3.msra.mxu1 %v11733_v19 }
 0xbb8   :  { %8473 = vmatprep.subr.mxu1 %v14525_v52 }
 0xbb9   :  { %8474 = vmatpush3.msra.mxu1 %v11740_v6 }
 0xbba   :  { %8475 = vmatprep.subr.mxu1 %v14525_v52 }
 0xbbb   :  { %8476 = vmatpush3.msra.mxu1 %v11747_v58 }
 0xbbc   :  { %4356 = vmatprep.subr.mxu1 %v11423_v5  ;;  %v14815_v5 = vld [vmem:[#allocation41_spill] sm:$0xff] }
 0xc3c   :  { %v3554_v19 = vpop.f32.mrf.mxu1 }
 0xc3d   :  { %v3555_v2 = vadd.f32 %v11192_v25, %v3554_v19  ;;  %v14814_v25 = vld [vmem:[#allocation40_spill] sm:$0xff]  ;;  %v11800_v19 = vld [vmem:[%s14539_s2 + $0x70] sm:$0xff] }
 0xc3e   :  { %v8409_v62 = vpop.f32.mrf.mxu1  ;;  %14819 = vst [vmem:[#allocation30_spill] sm:$0xff] %v11800_v19 }
 0xc3f   :  { %8847 = vtanh.f32 %v3555_v2  ;;  %v11783_v62 = vld [vmem:[#allocation2 + $0x10] sm:$0xff]  ;;  %v11791_v2 = vld [vmem:[%s14539_s2 + $0x78] sm:$0xff] }
 0xc40   :  { %14817 = vst [vmem:[#allocation28_spill] sm:$0xff] %v11783_v62  ;;  %14818 = vst [vmem:[#allocation29_spill] sm:$0xff] %v11791_v2 }
 0xc4c   :  { %v8848_v38 = vpop.eup %8847 }
 0xc4d   :  { %8443 = vmatmul.mubr.f32.vlgmr.msra.gmra.mxu0 %v8848_v38  ;;  %v14816_v38 = vld [vmem:[#allocation42_spill] sm:$0xff] }
 0xc4e   :  { %3909 = vmatpush1.msra.mxu0 %v11427_v42  ;;  %3972 = vmatprep.mubr.f32.mxu0 %v14525_v52 }
 0xc4f   :  { %3910 = vmatprep.subr.mxu0 %v11431_v46 }
 0xc50   :  { %3911 = vmatpush1.msra.mxu0 %v11434_v37 }
 0xc51   :  { %3912 = vmatprep.subr.mxu0 %v11437_v40 }
 0xc52   :  { %3913 = vmatpush1.msra.mxu0 %v11440_v0 }
 0xc53   :  { %3914 = vmatprep.subr.mxu0 %v11443_v31 }
 0xc54   :  { %3915 = vmatpush1.msra.mxu0 %v11446_v3 }
 0xc55   :  { %3916 = vmatprep.subr.mxu0 %v11449_v56 }
 0xc56   :  { %3917 = vmatpush1.msra.mxu0 %v11452_v12 }
 0xc57   :  { %3918 = vmatprep.subr.mxu0 %v11455_v61 }
 0xc58   :  { %3919 = vmatpush1.msra.mxu0 %v11458_v39 }
 0xc59   :  { %3920 = vmatprep.subr.mxu0 %v11461_v7 }
 0xc5a   :  { %3921 = vmatpush1.msra.mxu0 %v11464_v27 }
 0xc5b   :  { %3922 = vmatprep.subr.mxu0 %v11467_v9 }
 0xc5c   :  { %3923 = vmatpush1.msra.mxu0 %v11470_v60 }
 0xc5d   :  { %3924 = vmatprep.subr.mxu0 %v11473_v57 }
 0xc5e   :  { %3925 = vmatpush1.msra.mxu0 %v11476_v48 }
 0xc5f   :  { %3926 = vmatprep.subr.mxu0 %v11479_v41 }
 0xc60   :  { %3927 = vmatpush1.msra.mxu0 %v11482_v54 }
 0xc61   :  { %3928 = vmatprep.subr.mxu0 %v11485_v10 }
 0xc62   :  { %3929 = vmatpush1.msra.mxu0 %v11488_v34  ;;  %v14838_v34 = vld [vmem:[#allocation81_spill] sm:$0xff] }
 0xc63   :  { %3930 = vmatprep.subr.mxu0 %v11491_v53 }
 0xc64   :  { %3931 = vmatpush1.msra.mxu0 %v11494_v49 }
 0xc65   :  { %3932 = vmatprep.subr.mxu0 %v11497_v15 }
 0xc66   :  { %3933 = vmatpush1.msra.mxu0 %v11500_v32 }
 0xc67   :  { %3934 = vmatprep.subr.mxu0 %v11503_v50 }
 0xc68   :  { %3935 = vmatpush1.msra.mxu0 %v11506_v28  ;;  %v14835_v28 = vld [vmem:[#allocation14_spill] sm:$0xff] }
 0xc69   :  { %3936 = vmatprep.subr.mxu0 %v14814_v25  ;;  %v3903_v25 = vpop.f32.mrf.mxu1 }
 0xc6a   :  { %3937 = vmatpush1.msra.mxu0 %v14815_v5  ;;  %v14830_v5 = vld [vmem:[#allocation49_spill] sm:$0xff] }
 0xc6b   :  { %3938 = vmatprep.subr.mxu0 %v14816_v38  ;;  %v14829_v38 = vld [vmem:[#allocation48_spill] sm:$0xff] }
 0xc6c   :  { %3939 = vmatpush1.msra.mxu0 %v11783_v62  ;;  %v14827_v62 = vld [vmem:[#allocation46_spill] sm:$0xff] }
 0xc6d   :  { %3973 = vmatmul.mubr.f32.vlgmr.msra.gmra.mxu0 %v11568_v22  ;;  %8480 = vmatprep.subr.mxu0 %v14525_v52  ;;  %v11807_v22 = vld [vmem:[%s14539_s2 + $0x68] sm:$0xff] }
 0xc6e   :  { %8481 = vmatpush3.msra.mxu0 %v11791_v2  ;;  %8512 = vmatprep.mubr.msk.f32.mxu0 %vm9420_vm1, %v14525_v52  ;;  %14820 = vst [vmem:[#allocation68_spill] sm:$0xff] %v11807_v22  ;;  %v11814_v2 = vld [vmem:[%s14539_s2 + $0x60] sm:$0xff] }
 0xc6f   :  { %8482 = vmatprep.subr.mxu0 %v14525_v52  ;;  %14821 = vst [vmem:[#allocation71_spill] sm:$0xff] %v11814_v2 }
 0xc70   :  { %8483 = vmatpush3.msra.mxu0 %v11800_v19  ;;  %v11821_v19 = vld [vmem:[%s14539_s2 + $0x58] sm:$0xff] }
 0xc71   :  { %8484 = vmatprep.subr.mxu0 %v14525_v52  ;;  %14822 = vst [vmem:[#allocation55_spill] sm:$0xff] %v11821_v19 }
 0xc72   :  { %8485 = vmatpush3.msra.mxu0 %v11807_v22  ;;  %v11828_v22 = vld [vmem:[%s14539_s2 + $0x50] sm:$0xff] }
 0xc73   :  { %8486 = vmatprep.subr.mxu0 %v14525_v52  ;;  %14823 = vst [vmem:[#allocation53_spill] sm:$0xff] %v11828_v22 }
 0xc74   :  { %8487 = vmatpush3.msra.mxu0 %v11814_v2  ;;  %v11835_v2 = vld [vmem:[%s14539_s2 + $0x48] sm:$0xff] }
 0xc75   :  { %8488 = vmatprep.subr.mxu0 %v14525_v52  ;;  %14824 = vst [vmem:[#allocation54_spill] sm:$0xff] %v11835_v2 }
 0xc76   :  { %8489 = vmatpush3.msra.mxu0 %v11821_v19  ;;  %v11842_v19 = vld [vmem:[%s14539_s2 + $0x40] sm:$0xff] }
 0xc77   :  { %8490 = vmatprep.subr.mxu0 %v14525_v52  ;;  %14825 = vst [vmem:[#allocation58_spill] sm:$0xff] %v11842_v19 }
 0xc78   :  { %8491 = vmatpush3.msra.mxu0 %v11828_v22  ;;  %v14826_v22 = vld [vmem:[#allocation45_spill] sm:$0xff] }
 0xc79   :  { %8492 = vmatprep.subr.mxu0 %v14525_v52 }
 0xc7a   :  { %8493 = vmatpush3.msra.mxu0 %v11835_v2  ;;  %v14828_v2 = vld [vmem:[#allocation47_spill] sm:$0xff] }
 0xc7b   :  { %8494 = vmatprep.subr.mxu0 %v14525_v52 }
 0xc7c   :  { %8495 = vmatpush3.msra.mxu0 %v11842_v19  ;;  %v14831_v19 = vld [vmem:[#allocation50_spill] sm:$0xff] }
 0xc7d   :  { %8496 = vmatprep.subr.mxu0 %v14525_v52 }
 0xc7e   :  { %8497 = vmatpush3.msra.mxu0 %v14826_v22  ;;  %v14832_v22 = vld [vmem:[#allocation12_spill] sm:$0xff] }
 0xc7f   :  { %8498 = vmatprep.subr.mxu0 %v14525_v52 }
 0xc80   :  { %8499 = vmatpush3.msra.mxu0 %v14827_v62  ;;  %v14833_v62 = vld [vmem:[#allocation89_spill] sm:$0xff] }
 0xc81   :  { %8500 = vmatprep.subr.mxu0 %v14525_v52 }
 0xc82   :  { %8501 = vmatpush3.msra.mxu0 %v14828_v2  ;;  %v14834_v2 = vld [vmem:[#allocation13_spill] sm:$0xff] }
 0xc83   :  { %8502 = vmatprep.subr.mxu0 %v14525_v52 }
 0xc84   :  { %8503 = vmatpush3.msra.mxu0 %v14829_v38 }
 0xc85   :  { %8504 = vmatprep.subr.mxu0 %v14525_v52 }
 0xc86   :  { %8505 = vmatpush3.msra.mxu0 %v14830_v5  ;;  %v3905_v5 = vpop.f32.mrf.mxu1 }
 0xc87   :  { %8506 = vmatprep.subr.mxu0 %v14525_v52 }
 0xc88   :  { %8507 = vmatpush3.msra.mxu0 %v14831_v19  ;;  %v14837_v19 = vld [vmem:[#allocation83_spill] sm:$0xff] }
 0xc89   :  { %8508 = vmatprep.subr.mxu0 %v14525_v52  ;;  %v3980_v49 = vadd.f32 %v3905_v5, %v14837_v19 }
 0xc8a   :  { %8509 = vmatpush3.msra.mxu0 %v14832_v22  ;;  %v3979_v22 = vadd.f32 %v3903_v25, %v14838_v34  ;;  %v14840_v34 = vld [vmem:[#allocation84_spill] sm:$0xff] }
 0xc8b   :  { %8510 = vmatprep.subr.mxu0 %v14525_v52  ;;  %v7610_v10 = vmul.f32 -1.442695, %v3980_v49 }
 0xc8c   :  { %8511 = vmatpush3.msra.mxu0 %v14833_v62  ;;  %v7609_v54 = vmul.f32 -1.442695, %v3979_v22 }
 0xc8d   :  { %4427 = vmatprep.subr.mxu0 %v14834_v2 }
 0xd0d   :  { %v3625_v38 = vpop.f32.mrf.mxu0 }
 0xd0e   :  { %v11863_v50 = vadd.f32 %v14835_v28, %v3625_v38 }
 0xd0f   :  { %v8444_v32 = vpop.f32.mrf.mxu0 }
 0xd10   :  { %14836 = vst [vmem:[#allocation63_spill] sm:$0xff] %v11863_v50  ;;  %v3629_v15 = vmul.f32 0.5, %v11863_v50  ;;  %v14839_v50 = vld [vmem:[#allocation82_spill] sm:$0xff] }
 0xd12   :  { %v3630_v53 = vmul.f32 1.442695, %v3629_v15 }
 0xd14   :  { %8849 = vpow2.f32 %v3630_v53 }
 0xd15   :  { %8851 = vpow2.f32 %v7610_v10 }
 0xd16   :  { %8853 = vpow2.f32 %v7609_v54 }
 0xd21   :  { %v8850_v62 = vpop.eup %8849 }
 0xd22   :  { %3633 = vrot.lane.b32.xlu1 %v8850_v62, %s9421_s8  ;;  %v8852_v2 = vpop.eup %8851 }
 0xd23   :  { %v8854_v28 = vpop.eup %8853  ;;  %v3992_v38 = vadd.f32 1.0, %v8852_v2 }
 0xd24   :  { %v3986_v41 = vadd.f32 1.0, %v8854_v28  ;;  %v14881_v28 = vld [vmem:[#allocation54_spill] sm:$0xff] }
 0xd25   :  { %8855 = vrcp.f32 %v3992_v38  ;;  %v14882_v38 = vld [vmem:[#allocation58_spill] sm:$0xff] }
 0xd26   :  { %8857 = vrcp.f32 %v3986_v41 }
 0xd2d   :  { %v3974_v32 = vpop.f32.mrf.mxu0 }
 0xd2e   :  { %v3981_v48 = vadd.f32 %v3974_v32, %v14839_v50  ;;  %v9254_v32 = vld [vmem:[%s14539_s2 + $0x38] sm:$0xff] }
 0xd2f   :  { %v3976_v15 = vpop.f32.mrf.mxu0 }
 0xd30   :  { %8859 = vtanh.f32 %v3981_v48  ;;  %v3982_v53 = vadd.f32 %v3976_v15, %v14840_v34  ;;  %v9255_v15 = vld [vmem:[%s14539_s2 + $0x30] sm:$0xff]  ;;  %v9256_v34 = vld [vmem:[%s14539_s2 + $0x28] sm:$0xff] }
 0xd32   :  { %v7611_v49 = vmul.f32 -1.442695, %v3982_v53  ;;  %v8856_v10 = vpop.eup %8855  ;;  %v9257_v53 = vld [vmem:[%s14539_s2 + $0x20] sm:$0xff] }
 0xd33   :  { %v8858_v54 = vpop.eup %8857  ;;  %v4002_v5 = vmul.f32 %v8856_v10, %v11565_v1  ;;  %v14856_v1 = vld [vmem:[#allocation24_spill] sm:$0xff]  ;;  %v9259_v10 = vld [vmem:[%s14539_s2 + $0x10] sm:$0xff] }
 0xd34   :  { %8861 = vpow2.f32 %v7611_v49  ;;  %v9258_v49 = vld [vmem:[%s14539_s2 + $0x18] sm:$0xff] }
 0xd3d   :  { %v8860_v25 = vpop.eup %8859 }
 0xd3e   :  { %v4003_v19 = vmul.f32 %v8860_v25, %v8858_v54  ;;  %v9260_v54 = vld [vmem:[%s14539_s2 + $0x8] sm:$0xff]  ;;  %v9261_v25 = vld [vmem:[%s14539_s2] sm:$0xff] }
 0xd40   :  { %v11872_v22 = vadd.f32 %v4003_v19, %v4002_v5 }
 0xd41   :  { %v8862_v62 = vpop.eup %8861 }
 0xd42   :  { %v3999_v2 = vadd.f32 1.0, %v8862_v62  ;;  %8863 = vtanh.f32 %v11872_v22  ;;  %v12037_v62 = vld [vmem:[%s14630_s28] ss:$0 sm:$0xff] }
 0xd44   :  { %8865 = vrcp.f32 %v3999_v2 }
 0xd4f   :  { %v8864_v41 = vpop.eup %8863 }
 0xd51   :  { %v8866_v50 = vpop.eup %8865 }
 0xd52   :  { %v11875_v48 = vmul.f32 %v8866_v50, %v8864_v41 }
 0xd54   :  { %8478 = vmatmul.mubr.f32.vlgmr.msra.gmra.mxu1 %v11875_v48 }
 0xd55   :  { %4357 = vmatpush1.msra.mxu1 %v11326_v20  ;;  %4420 = vmatprep.mubr.f32.mxu1 %v14525_v52  ;;  %v14841_v20 = vld [vmem:[#allocation44_spill] sm:$0xff] }
 0xd56   :  { %4358 = vmatprep.subr.mxu1 %v11330_v51  ;;  %v14842_v51 = vld [vmem:[#allocation56_spill] sm:$0xff] }
 0xd57   :  { %4359 = vmatpush1.msra.mxu1 %v11333_v18  ;;  %v14843_v18 = vld [vmem:[#allocation57_spill] sm:$0xff] }
 0xd58   :  { %4360 = vmatprep.subr.mxu1 %v11336_v24  ;;  %v14844_v24 = vld [vmem:[#allocation59_spill] sm:$0xff] }
 0xd59   :  { %4361 = vmatpush1.msra.mxu1 %v11339_v21  ;;  %v14845_v21 = vld [vmem:[#allocation61_spill] sm:$0xff] }
 0xd5a   :  { %4362 = vmatprep.subr.mxu1 %v11342_v17  ;;  %v14846_v17 = vld [vmem:[#allocation64_spill] sm:$0xff] }
 0xd5b   :  { %4363 = vmatpush1.msra.mxu1 %v11345_v30  ;;  %v14847_v30 = vld [vmem:[#allocation66_spill] sm:$0xff] }
 0xd5c   :  { %4364 = vmatprep.subr.mxu1 %v11348_v33  ;;  %v14848_v33 = vld [vmem:[#allocation16_spill] sm:$0xff] }
 0xd5d   :  { %4365 = vmatpush1.msra.mxu1 %v11351_v13  ;;  %v14849_v13 = vld [vmem:[#allocation17_spill] sm:$0xff] }
 0xd5e   :  { %4366 = vmatprep.subr.mxu1 %v11354_v8  ;;  %v14850_v8 = vld [vmem:[#allocation18_spill] sm:$0xff] }
 0xd5f   :  { %4367 = vmatpush1.msra.mxu1 %v11357_v16  ;;  %v14851_v16 = vld [vmem:[#allocation19_spill] sm:$0xff] }
 0xd60   :  { %4368 = vmatprep.subr.mxu1 %v11360_v11  ;;  %v14852_v11 = vld [vmem:[#allocation20_spill] sm:$0xff] }
 0xd61   :  { %4369 = vmatpush1.msra.mxu1 %v11363_v36  ;;  %v14853_v36 = vld [vmem:[#allocation21_spill] sm:$0xff] }
 0xd62   :  { %4370 = vmatprep.subr.mxu1 %v11366_v14  ;;  %v14854_v14 = vld [vmem:[#allocation22_spill] sm:$0xff] }
 0xd63   :  { %4371 = vmatpush1.msra.mxu1 %v11369_v44  ;;  %v14855_v44 = vld [vmem:[#allocation23_spill] sm:$0xff] }
 0xd64   :  { %4372 = vmatprep.subr.mxu1 %v11587_v43  ;;  %v14857_v43 = vld [vmem:[#allocation25_spill] sm:$0xff] }
 0xd65   :  { %4373 = vmatpush1.msra.mxu1 %v11590_v59  ;;  %v14858_v59 = vld [vmem:[#allocation26_spill] sm:$0xff] }
 0xd66   :  { %4374 = vmatprep.subr.mxu1 %v11593_v29  ;;  %v14859_v29 = vld [vmem:[#allocation27_spill] sm:$0xff] }
 0xd67   :  { %4375 = vmatpush1.msra.mxu1 %v11596_v63 }
 0xd68   :  { %4376 = vmatprep.subr.mxu1 %v11599_v35  ;;  %v11948_v35 = vld [vmem:[%s14589_s3] ss:$0 sm:$0xff] }
 0xd69   :  { %4377 = vmatpush1.msra.mxu1 %v11602_v26 }
 0xd6a   :  { %4378 = vmatprep.subr.mxu1 %v11605_v47 }
 0xd6b   :  { %4379 = vmatpush1.msra.mxu1 %v11608_v4 }
 0xd6c   :  { %4380 = vmatprep.subr.mxu1 %v11611_v55  ;;  %v14876_v55 = vld [vmem:[#allocation30_spill] sm:$0xff] }
 0xd6d   :  { %4381 = vmatpush1.msra.mxu1 %v11614_v23  ;;  %v14877_v23 = vld [vmem:[#allocation68_spill] sm:$0xff] }
 0xd6e   :  { %4382 = vmatprep.subr.mxu1 %v11617_v45  ;;  %v14878_v45 = vld [vmem:[#allocation71_spill] sm:$0xff] }
 0xd6f   :  { %4383 = vmatpush1.msra.mxu1 %v14841_v20  ;;  %v14883_v20 = vld [vmem:[#allocation87_spill] sm:$0xff] }
 0xd70   :  { %4384 = vmatprep.subr.mxu1 %v14842_v51 }
 0xd71   :  { %4385 = vmatpush1.msra.mxu1 %v14843_v18 }
 0xd72   :  { %4386 = vmatprep.subr.mxu1 %v14844_v24  ;;  %v14884_v24 = vld [vmem:[#allocation85_spill] sm:$0xff] }
 0xd73   :  { %4387 = vmatpush1.msra.mxu1 %v14845_v21 }
 0xd74   :  { %4421 = vmatmul.mubr.f32.vlgmr.msra.gmra.mxu1 %v11875_v48  ;;  %8515 = vmatprep.subr.mxu1 %v14525_v52 }
 0xd75   :  { %8516 = vmatpush3.msra.mxu1 %v14846_v17  ;;  %8547 = vmatprep.mubr.msk.f32.mxu1 %vm9420_vm1, %v14525_v52 }
 0xd76   :  { %8517 = vmatprep.subr.mxu1 %v14525_v52 }
 0xd77   :  { %8518 = vmatpush3.msra.mxu1 %v14847_v30 }
 0xd78   :  { %8519 = vmatprep.subr.mxu1 %v14525_v52 }
 0xd79   :  { %8520 = vmatpush3.msra.mxu1 %v14848_v33 }
 0xd7a   :  { %8521 = vmatprep.subr.mxu1 %v14525_v52 }
 0xd7b   :  { %8522 = vmatpush3.msra.mxu1 %v14849_v13 }
 0xd7c   :  { %8523 = vmatprep.subr.mxu1 %v14525_v52 }
 0xd7d   :  { %8524 = vmatpush3.msra.mxu1 %v14850_v8 }
 0xd7e   :  { %8525 = vmatprep.subr.mxu1 %v14525_v52 }
 0xd7f   :  { %8526 = vmatpush3.msra.mxu1 %v14851_v16 }
 0xd80   :  { %8527 = vmatprep.subr.mxu1 %v14525_v52 }
 0xd81   :  { %8528 = vmatpush3.msra.mxu1 %v14852_v11 }
 0xd82   :  { %8529 = vmatprep.subr.mxu1 %v14525_v52 }
 0xd83   :  { %8530 = vmatpush3.msra.mxu1 %v14853_v36 }
 0xd84   :  { %8531 = vmatprep.subr.mxu1 %v14525_v52 }
 0xd85   :  { %8532 = vmatpush3.msra.mxu1 %v14854_v14  ;;  %v14885_v14 = vld [vmem:[#allocation86_spill] sm:$0xff] }
 0xd86   :  { %8533 = vmatprep.subr.mxu1 %v14525_v52 }
 0xd87   :  { %8534 = vmatpush3.msra.mxu1 %v14855_v44 }
 0xd88   :  { %8535 = vmatprep.subr.mxu1 %v14525_v52 }
 0xd89   :  { %8536 = vmatpush3.msra.mxu1 %v14856_v1 }
 0xd8a   :  { %8537 = vmatprep.subr.mxu1 %v14525_v52 }
 0xd8b   :  { %8538 = vmatpush3.msra.mxu1 %v14857_v43  ;;  %v14886_v43 = vld [vmem:[#allocation88_spill] sm:$0xff] }
 0xd8c   :  { %8539 = vmatprep.subr.mxu1 %v14525_v52 }
 0xd8d   :  { %8540 = vmatpush3.msra.mxu1 %v14858_v59 }
 0xd8e   :  { %8541 = vmatprep.subr.mxu1 %v14525_v52 }
 0xd8f   :  { %8542 = vmatpush3.msra.mxu1 %v14859_v29 }
 0xd90   :  { %8543 = vmatprep.subr.mxu1 %v14525_v52 }
 0xd91   :  { %8544 = vmatpush3.msra.mxu1 %v11740_v6  ;;  %v14879_v6 = vld [vmem:[#allocation55_spill] sm:$0xff] }
 0xd92   :  { %8545 = vmatprep.subr.mxu1 %v14525_v52 }
 0xd93   :  { %8546 = vmatpush3.msra.mxu1 %v11747_v58  ;;  %v14880_v58 = vld [vmem:[#allocation53_spill] sm:$0xff] }
 0xe14   :  { %v4073_v63 = vpop.f32.mrf.mxu1 }
 0xe15   :  { %v4074_v26 = vadd.f32 %v11948_v35, %v4073_v63 }
 0xe16   :  { %v8479_v47 = vpop.f32.mrf.mxu1 }
 0xe17   :  { %8867 = vtanh.f32 %v4074_v26 }
 0xe24   :  { %v8868_v4 = vpop.eup %8867 }
 0xe25   :  { %8513 = vmatmul.mubr.f32.vlgmr.msra.gmra.mxu0 %v8868_v4 }
 0xe26   :  { %4428 = vmatpush1.msra.mxu0 %v11427_v42  ;;  %4491 = vmatprep.mubr.f32.mxu0 %v14525_v52  ;;  %v14860_v42 = vld [vmem:[#allocation67_spill] sm:$0xff] }
 0xe27   :  { %4429 = vmatprep.subr.mxu0 %v11431_v46  ;;  %v14861_v46 = vld [vmem:[#allocation69_spill] sm:$0xff] }
 0xe28   :  { %4430 = vmatpush1.msra.mxu0 %v11434_v37  ;;  %v14862_v37 = vld [vmem:[#allocation72_spill] sm:$0xff] }
 0xe29   :  { %4431 = vmatprep.subr.mxu0 %v11437_v40  ;;  %v14863_v40 = vld [vmem:[#allocation32_spill] sm:$0xff] }
 0xe2a   :  { %4432 = vmatpush1.msra.mxu0 %v11440_v0  ;;  %v14864_v0 = vld [vmem:[#allocation33_spill] sm:$0xff] }
 0xe2b   :  { %4433 = vmatprep.subr.mxu0 %v11443_v31  ;;  %v14865_v31 = vld [vmem:[#allocation34_spill] sm:$0xff] }
 0xe2c   :  { %4434 = vmatpush1.msra.mxu0 %v11446_v3  ;;  %v14866_v3 = vld [vmem:[#allocation35_spill] sm:$0xff] }
 0xe2d   :  { %4435 = vmatprep.subr.mxu0 %v11449_v56  ;;  %v14867_v56 = vld [vmem:[#allocation36_spill] sm:$0xff] }
 0xe2e   :  { %4436 = vmatpush1.msra.mxu0 %v11452_v12  ;;  %v14868_v12 = vld [vmem:[#allocation37_spill] sm:$0xff] }
 0xe2f   :  { %4437 = vmatprep.subr.mxu0 %v11455_v61  ;;  %v14869_v61 = vld [vmem:[#allocation38_spill] sm:$0xff] }
 0xe30   :  { %4438 = vmatpush1.msra.mxu0 %v11458_v39  ;;  %v14870_v39 = vld [vmem:[#allocation39_spill] sm:$0xff] }
 0xe31   :  { %4439 = vmatprep.subr.mxu0 %v11461_v7  ;;  %v14871_v7 = vld [vmem:[#allocation40_spill] sm:$0xff] }
 0xe32   :  { %4440 = vmatpush1.msra.mxu0 %v11464_v27  ;;  %v14872_v27 = vld [vmem:[#allocation41_spill] sm:$0xff] }
 0xe33   :  { %4441 = vmatprep.subr.mxu0 %v11467_v9  ;;  %v14873_v9 = vld [vmem:[#allocation42_spill] sm:$0xff] }
 0xe34   :  { %4442 = vmatpush1.msra.mxu0 %v11470_v60  ;;  %v14874_v60 = vld [vmem:[#allocation28_spill] sm:$0xff]  ;;  %v4422_v5 = vpop.f32.mrf.mxu1 }
 0xe35   :  { %4443 = vmatprep.subr.mxu0 %v11473_v57  ;;  %v14875_v57 = vld [vmem:[#allocation29_spill] sm:$0xff]  ;;  %v4498_v21 = vadd.f32 %v4422_v5, %v14884_v24  ;;  %v14891_v24 = vld [vmem:[#allocation52_spill] sm:$0xff] }
 0xe36   :  { %4444 = vmatpush1.msra.mxu0 %v14860_v42  ;;  %v4424_v41 = vpop.f32.mrf.mxu1 }
 0xe37   :  { %4445 = vmatprep.subr.mxu0 %v14861_v46  ;;  %v4499_v51 = vadd.f32 %v4424_v41, %v14883_v20  ;;  %v7612_v30 = vmul.f32 -1.442695, %v4498_v21 }
 0xe38   :  { %4446 = vmatpush1.msra.mxu0 %v14862_v37 }
 0xe39   :  { %4447 = vmatprep.subr.mxu0 %v14863_v40  ;;  %v7613_v17 = vmul.f32 -1.442695, %v4499_v51 }
 0xe3a   :  { %4448 = vmatpush1.msra.mxu0 %v14864_v0 }
 0xe3b   :  { %4449 = vmatprep.subr.mxu0 %v14865_v31 }
 0xe3c   :  { %4450 = vmatpush1.msra.mxu0 %v14866_v3 }
 0xe3d   :  { %4451 = vmatprep.subr.mxu0 %v14867_v56 }
 0xe3e   :  { %4452 = vmatpush1.msra.mxu0 %v14868_v12 }
 0xe3f   :  { %4453 = vmatprep.subr.mxu0 %v14869_v61 }
 0xe40   :  { %4454 = vmatpush1.msra.mxu0 %v14870_v39 }
 0xe41   :  { %4455 = vmatprep.subr.mxu0 %v14871_v7  ;;  %v5085_v7 = vld [vmem:[%s14061_s14] sm:$0xff] }
 0xe42   :  { %4456 = vmatpush1.msra.mxu0 %v14872_v27  ;;  %v4931_v27 = vld [vmem:[%s14887_s17] sm:$0xff] }
 0xe43   :  { %4457 = vmatprep.subr.mxu0 %v14873_v9  ;;  %v4933_v9 = vld [vmem:[%s14887_s17 + $0x10] sm:$0xff] }
 0xe44   :  { %4458 = vmatpush1.msra.mxu0 %v14874_v60  ;;  %v4934_v60 = vld [vmem:[%s14887_s17 + $0x18] sm:$0xff] }
 0xe45   :  { %4492 = vmatmul.mubr.f32.vlgmr.msra.gmra.mxu0 %v11875_v48  ;;  %8550 = vmatprep.subr.mxu0 %v14525_v52 }
 0xe46   :  { %8551 = vmatpush3.msra.mxu0 %v14875_v57  ;;  %8582 = vmatprep.mubr.msk.f32.mxu0 %vm9420_vm1, %v14525_v52  ;;  %v4935_v57 = vld [vmem:[%s14887_s17 + $0x20] sm:$0xff] }
 0xe47   :  { %8552 = vmatprep.subr.mxu0 %v14525_v52 }
 0xe48   :  { %8553 = vmatpush3.msra.mxu0 %v14876_v55  ;;  %v9422_v55 = vmov 1966171168  }
 0xe49   :  { %8554 = vmatprep.subr.mxu0 %v14525_v52 }
 0xe4a   :  { %8555 = vmatpush3.msra.mxu0 %v14877_v23  ;;  %v1047_v23 = vunpack.c.l.s4 %v9422_v55 }
 0xe4b   :  { %8556 = vmatprep.subr.mxu0 %v14525_v52 }
 0xe4c   :  { %8557 = vmatpush3.msra.mxu0 %v14878_v45  ;;  %v1048_v45 = vunpack.c.0.s8 %v1047_v23 }
 0xe4d   :  { %8558 = vmatprep.subr.mxu0 %v14525_v52 }
 0xe4e   :  { %8559 = vmatpush3.msra.mxu0 %v14879_v6  ;;  %v14888_v6 = vld [vmem:[#allocation51_spill] sm:$0xff] }
 0xe4f   :  { %8560 = vmatprep.subr.mxu0 %v14525_v52  ;;  %vm1043_vm2 = vcmp.eq.s32.totalorder %v14888_v6, 0  ;;  %vm1562_vm3 = vcmp.eq.s32.totalorder %v14888_v6, 1  ;;  %vm2081_vm4 = vcmp.eq.s32.totalorder %v14888_v6, 2  ;;  %vm2600_vm5 = vcmp.eq.s32.totalorder %v14888_v6, 3 }
 0xe50   :  { %8561 = vmatpush3.msra.mxu0 %v14880_v58  ;;  %v12077_v58 = vsub.s32 %v1048_v45, %v14888_v6  ;;  %vm3119_vm6 = vcmp.eq.s32.totalorder %v14888_v6, 4  ;;  %vm3638_vm7 = vcmp.eq.s32.totalorder %v14888_v6, 5  ;;  %vm4157_vm8 = vcmp.eq.s32.totalorder %v14888_v6, 6 }
 0xe51   :  { %8562 = vmatprep.subr.mxu0 %v14525_v52  ;;  %vm4676_vm9 = vcmp.eq.s32.totalorder %v14888_v6, 7  ;;  %v13043_v6 = vld [vmem:[#allocation7 + $0x30] sm:$0xff] }
 0xe52   :  { %8563 = vmatpush3.msra.mxu0 %v14881_v28  ;;  %v14889_v28 = vld [vmem:[#allocation15_spill] sm:$0xff]  ;;  %14946 = vst [vmem:[#allocation35_spill] sm:$0xff] %v13043_v6 }
 0xe53   :  { %8564 = vmatprep.subr.mxu0 %v14525_v52 }
 0xe54   :  { %8565 = vmatpush3.msra.mxu0 %v14882_v38  ;;  %v1045_v38 = vcombine.high %v14889_v28, %v14889_v28 }
 0xe55   :  { %8566 = vmatprep.subr.mxu0 %v14525_v52 }
 0xe56   :  { %8567 = vmatpush3.msra.mxu0 %v9254_v32  ;;  %v1052_v32 = vrot.slane %v14889_v28, %v12077_v58 }
 0xe57   :  { %8568 = vmatprep.subr.mxu0 %v14525_v52 }
 0xe58   :  { %8569 = vmatpush3.msra.mxu0 %v9255_v15  ;;  %v1059_v15 = vrot.slane %v1045_v38, %v12077_v58 }
 0xe59   :  { %8570 = vmatprep.subr.mxu0 %v14525_v52 }
 0xe5a   :  { %8571 = vmatpush3.msra.mxu0 %v9256_v34  ;;  %v1060_v34 = vcombine.high %v1052_v32, %v1052_v32 }
 0xe5b   :  { %8572 = vmatprep.subr.mxu0 %v14525_v52 }
 0xe5c   :  { %8573 = vmatpush3.msra.mxu0 %v9257_v53  ;;  %v1068_v53 = vrot.slane %v1052_v32, %v12077_v58 }
 0xe5d   :  { %8574 = vmatprep.subr.mxu0 %v14525_v52 }
 0xe5e   :  { %8575 = vmatpush3.msra.mxu0 %v9258_v49  ;;  %v14890_v49 = vld [vmem:[#allocation31_spill] sm:$0xff]  ;;  %v1090_v41 = vcombine.high %v1068_v53, %v1068_v53  ;;  %v1099_v21 = vrot.slane %v1068_v53, %v14891_v24 }
 0xe5f   :  { %8576 = vmatprep.subr.mxu0 %v14525_v52  ;;  %v1571_v5 = vrot.slane %v14890_v49, %v12077_v58 }
 0xe60   :  { %8577 = vmatpush3.msra.mxu0 %v9259_v10  ;;  %v1564_v10 = vcombine.high %v14890_v49, %v14890_v49 }
 0xe61   :  { %8578 = vmatprep.subr.mxu0 %v14525_v52  ;;  %v1579_v51 = vcombine.high %v1571_v5, %v1571_v5 }
 0xe62   :  { %8579 = vmatpush3.msra.mxu0 %v9260_v54  ;;  %v1061_v54 = vcombine.high %v1059_v15, %v1059_v15 }
 0xe63   :  { %8580 = vmatprep.subr.mxu0 %v14525_v52 }
 0xe64   :  { %8581 = vmatpush3.msra.mxu0 %v9261_v25  ;;  %v1075_v25 = vrot.slane %v1059_v15, %v12077_v58 }
 0xe66   :  { %v1091_v20 = vcombine.high %v1075_v25, %v1075_v25 }
 0xee5   :  { %v4144_v19 = vpop.f32.mrf.mxu0 }
 0xee6   :  { %v12040_v2 = vadd.f32 %v12037_v62, %v4144_v19  ;;  %v1082_v19 = vrot.slane %v1060_v34, %v12077_v58 }
 0xee7   :  { %v8514_v50 = vpop.f32.mrf.mxu0 }
 0xee8   :  { %v4148_v48 = vmul.f32 0.5, %v12040_v2  ;;  %v1578_v50 = vrot.slane %v1564_v10, %v12077_v58 }
 0xeea   :  { %v4149_v18 = vmul.f32 1.442695, %v4148_v48  ;;  %v1089_v48 = vrot.slane %v1061_v54, %v12077_v58 }
 0xeec   :  { %8869 = vpow2.f32 %v4149_v18  ;;  %v1092_v18 = vcombine.high %v1082_v19, %v1082_v19 }
 0xeed   :  { %8871 = vpow2.f32 %v7613_v17  ;;  %v1103_v17 = vrot.slane %v1082_v19, %v14891_v24 }
 0xeee   :  { %8873 = vpow2.f32 %v7612_v30  ;;  %v1587_v30 = vrot.slane %v1571_v5, %v12077_v58 }
 0xef9   :  { %v8870_v33 = vpop.eup %8869 }
 0xefa   :  { %4152 = vrot.lane.b32.xlu0 %v8870_v33, %s9421_s8  ;;  %v8872_v13 = vpop.eup %8871  ;;  %v1107_v33 = vrot.slane %v1090_v41, %v14891_v24 }
 0xefb   :  { %v8874_v8 = vpop.eup %8873  ;;  %v4511_v16 = vadd.f32 1.0, %v8872_v13  ;;  %v1580_v13 = vcombine.high %v1578_v50, %v1578_v50 }
 0xefc   :  { %v4505_v11 = vadd.f32 1.0, %v8874_v8  ;;  %v1594_v8 = vrot.slane %v1578_v50, %v12077_v58 }
 0xefd   :  { %8875 = vrcp.f32 %v4511_v16  ;;  %v14892_v16 = vld [vmem:[#allocation65_spill] sm:$0xff] }
 0xefe   :  { %8877 = vrcp.f32 %v4505_v11  ;;  %v2083_v11 = vcombine.high %v14892_v16, %v14892_v16 }
 0xf05   :  { %v4493_v36 = vpop.f32.mrf.mxu0 }
 0xf06   :  { %v4500_v44 = vadd.f32 %v4493_v36, %v14885_v14  ;;  %v1093_v36 = vcombine.high %v1089_v48, %v1089_v48  ;;  %v1115_v14 = vrot.slane %v1075_v25, %v14891_v24 }
 0xf07   :  { %v4495_v1 = vpop.f32.mrf.mxu0 }
 0xf08   :  { %8879 = vtanh.f32 %v4500_v44  ;;  %v4501_v59 = vadd.f32 %v4495_v1, %v14886_v43  ;;  %v1123_v44 = vrot.slane %v1091_v20, %v14891_v24  ;;  %v1601_v1 = vrot.slane %v1579_v51, %v12077_v58 }
 0xf09   :  { %v1111_v43 = vrot.slane %v1092_v18, %v14891_v24 }
 0xf0a   :  { %v7614_v29 = vmul.f32 -1.442695, %v4501_v59  ;;  %v8876_v63 = vpop.eup %8875  ;;  %v2090_v59 = vrot.slane %v14892_v16, %v12077_v58 }
 0xf0b   :  { %v8878_v26 = vpop.eup %8877  ;;  %v4521_v4 = vmul.f32 %v8876_v63, %v11872_v22  ;;  %v5086_v22 = vld [vmem:[%s14061_s14 + $0x8] sm:$0xff]  ;;  %v1136_v63 = vsel %vm1043_vm2, %v1099_v21, 0.0 }
 0xf0c   :  { %8881 = vpow2.f32 %v7614_v29  ;;  %8601 = vmatprep.subr.mxu0 %v5086_v22  ;;  %v1119_v29 = vrot.slane %v1089_v48, %v14891_v24 }
 0xf0e   :  { %v1141_v38 = vsel %vm1043_vm2, %v1119_v29, 0.0 }
 0xf15   :  { %v8880_v47 = vpop.eup %8879 }
 0xf16   :  { %v4522_v42 = vmul.f32 %v8880_v47, %v8878_v26  ;;  %v1137_v26 = vsel %vm1043_vm2, %v1103_v17, 0.0  ;;  %v1609_v47 = vcombine.high %v1587_v30, %v1587_v30 }
 0xf18   :  { %v4523_v46 = vadd.f32 %v4522_v42, %v4521_v4  ;;  %v1138_v4 = vsel %vm1043_vm2, %v1107_v33, 0.0  ;;  %v1608_v42 = vrot.slane %v1580_v13, %v12077_v58 }
 0xf19   :  { %v8882_v37 = vpop.eup %8881 }
 0xf1a   :  { %v4518_v40 = vadd.f32 1.0, %v8882_v37  ;;  %8883 = vtanh.f32 %v4523_v46  ;;  %v1610_v46 = vcombine.high %v1594_v8, %v1594_v8  ;;  %v2097_v37 = vrot.slane %v2083_v11, %v12077_v58 }
 0xf1b   :  { %v1638_v54 = vrot.slane %v1608_v42, %v14891_v24 }
 0xf1c   :  { %8885 = vrcp.f32 %v4518_v40  ;;  %v1127_v40 = vrot.slane %v1093_v36, %v14891_v24  ;;  %v2099_v55 = vcombine.high %v2097_v37, %v2097_v37  ;;  %v2113_v15 = vrot.slane %v2097_v37, %v12077_v58 }
 0xf1e   :  { %v1143_v32 = vsel %vm1043_vm2, %v1127_v40, 0.0  ;;  %v2127_v50 = vrot.slane %v2099_v55, %v12077_v58  ;;  %v2153_v11 = vrot.slane %v2113_v15, %v14891_v24 }
 0xf27   :  { %v8884_v0 = vpop.eup %8883 }
 0xf29   :  { %v8886_v31 = vpop.eup %8885 }
 0xf2a   :  { %v4525_v3 = vmul.f32 %v8886_v31, %v8884_v0  ;;  %v1140_v0 = vsel %vm1043_vm2, %v1115_v14, 0.0  ;;  %v1611_v31 = vcombine.high %v1601_v1, %v1601_v1 }
 0xf2c   :  { %8548 = vmatmul.mubr.f32.vlgmr.msra.gmra.mxu1 %v4525_v3  ;;  %v1142_v3 = vsel %vm1043_vm2, %v1123_v44, 0.0  ;;  %v1630_v23 = vrot.slane %v1611_v31, %v14891_v24  ;;  %v2131_v44 = vcombine.high %v2127_v50, %v2127_v50 }
 0xfec   :  { %v4592_v56 = vpop.f32.mrf.mxu1 }
 0xfed   :  { %v4593_v12 = vadd.f32 %v11948_v35, %v4592_v56  ;;  %v4932_v35 = vld [vmem:[%s14887_s17 + $0x8] sm:$0xff]  ;;  %v1618_v56 = vrot.slane %v1587_v30, %v14891_v24  ;;  %v2129_v30 = vcombine.high %v2113_v15, %v2113_v15 }
 0xfee   :  { %v8549_v61 = vpop.f32.mrf.mxu1 }
 0xfef   :  { %8887 = vtanh.f32 %v4593_v12  ;;  %v2098_v12 = vcombine.high %v2090_v59, %v2090_v59  ;;  %v2106_v61 = vrot.slane %v2090_v59, %v12077_v58  ;;  %v1655_v10 = vsel %vm1562_vm3, %v1618_v56, %v1136_v63 }
 0xff0   :  { %v1660_v59 = vsel %vm1562_vm3, %v1638_v54, %v1141_v38  ;;  %v2161_v37 = vrot.slane %v2129_v30, %v14891_v24 }
 0xff1   :  { %v2120_v34 = vrot.slane %v2098_v12, %v12077_v58  ;;  %v2128_v53 = vcombine.high %v2106_v61, %v2106_v61  ;;  %v2137_v51 = vrot.slane %v2106_v61, %v14891_v24 }
 0xff3   :  { %v2130_v33 = vcombine.high %v2120_v34, %v2120_v34  ;;  %v2145_v13 = vrot.slane %v2128_v53, %v14891_v24 }
 0xffc   :  { %v8888_v39 = vpop.eup %8887 }
 0xffd   :  { %8583 = vmatmul.mubr.f32.vlgmr.msra.gmra.mxu0 %v8888_v39  ;;  %v1139_v39 = vsel %vm1043_vm2, %v1111_v43, 0.0 }
 0xffe   :  { %8605 = vmatprep.mubr.msk.f32.mxu0 %vm153_vm0, %v4931_v27  ;;  %8602 = vmatpush3.msra.mxu0 %v5086_v22  ;;  %v1626_v22 = vrot.slane %v1609_v47, %v14891_v24  ;;  %v14893_v27 = vld [vmem:[#allocation70_spill] sm:$0xff]  ;;  %v1658_v17 = vsel %vm1562_vm3, %v1630_v23, %v1139_v39  ;;  %v2165_v39 = vrot.slane %v2131_v44, %v14891_v24 }
 0xfff   :  { %8603 = vmatprep.subr.mxu0 %v5085_v7  ;;  %v2609_v45 = vrot.slane %v14893_v27, %v12077_v58  ;;  %v4159_v44 = vcombine.high %v12040_v2, %v12040_v2 }
0x1000   :  { %8604 = vmatpush3.msra.mxu0 %v5085_v7  ;;  %v1634_v7 = vrot.slane %v1594_v8, %v14891_v24  ;;  %v1657_v5 = vsel %vm1562_vm3, %v1626_v22, %v1138_v4  ;;  %v2141_v8 = vrot.slane %v2120_v34, %v14891_v24  ;;  %v2174_v4 = vsel %vm2081_vm4, %v2137_v51, %v1655_v10 }
0x1001   :  { %8606 = vmatmul.mubr.msk.f32.vlgmr.msra.gmra.mxu0 %vm153_vm0, %v4932_v35  ;;  %v2602_v35 = vcombine.high %v14893_v27, %v14893_v27  ;;  %v2617_v18 = vcombine.high %v2609_v45, %v2609_v45  ;;  %v2625_v21 = vrot.slane %v2609_v45, %v12077_v58  ;;  %v2176_v40 = vsel %vm2081_vm4, %v2145_v13, %v1657_v5 }
0x1002   :  { %8608 = vmatprep.mubr.msk.f32.mxu0 %vm153_vm0, %v4933_v9  ;;  %v1612_v9 = vcombine.high %v1608_v42, %v1608_v42  ;;  %v1659_v19 = vsel %vm1562_vm3, %v1634_v7, %v1140_v0  ;;  %v2149_v42 = vrot.slane %v2130_v33, %v14891_v24 }
0x1003   :  { %v2616_v25 = vrot.slane %v2602_v35, %v12077_v58  ;;  %v2639_v63 = vrot.slane %v2617_v18, %v12077_v58  ;;  %v2656_v12 = vrot.slane %v2625_v21, %v14891_v24 }
0x1004   :  { %v1646_v41 = vrot.slane %v1612_v9, %v14891_v24  ;;  %v2177_v34 = vsel %vm2081_vm4, %v2149_v42, %v1658_v17 }
0x1005   :  { %8609 = vmatmul.mubr.msk.f32.gmra.mxu0 %vm153_vm0, %v4934_v60  ;;  %v1622_v60 = vrot.slane %v1601_v1, %v14891_v24  ;;  %v2618_v36 = vcombine.high %v2616_v25, %v2616_v25  ;;  %v2632_v14 = vrot.slane %v2616_v25, %v12077_v58  ;;  %v14894_v1 = vld [vmem:[#allocation43_spill] sm:$0xff]  ;;  %v2649_v22 = vcombine.high %v2639_v63, %v2639_v63 }
0x1006   :  { %8611 = vmatprep.mubr.msk.f32.mxu0 %vm153_vm0, %v4935_v57  ;;  %v1642_v57 = vrot.slane %v1610_v46, %v14891_v24  ;;  %v3121_v43 = vcombine.high %v14894_v1, %v14894_v1  ;;  %v1662_v29 = vsel %vm1562_vm3, %v1646_v41, %v1143_v32  ;;  %v3128_v47 = vrot.slane %v14894_v1, %v12077_v58 }
0x1007   :  { %v1656_v20 = vsel %vm1562_vm3, %v1622_v60, %v1137_v26  ;;  %v2647_v26 = vcombine.high %v2625_v21, %v2625_v21  ;;  %v2157_v46 = vrot.slane %v2127_v50, %v14891_v24  ;;  %v2646_v0 = vrot.slane %v2618_v36, %v12077_v58 }
0x1008   :  { %v1661_v48 = vsel %vm1562_vm3, %v1642_v57, %v1142_v3  ;;  %v2648_v31 = vcombine.high %v2632_v14, %v2632_v14  ;;  %v2178_v3 = vsel %vm2081_vm4, %v2153_v11, %v1659_v19  ;;  %v2175_v56 = vsel %vm2081_vm4, %v2141_v8, %v1656_v20  ;;  %v14895_v57 = vld [vmem:[#allocation63_spill] sm:$0xff] }
0x1009   :  { %v3135_v61 = vrot.slane %v3121_v43, %v12077_v58  ;;  %v2660_v7 = vrot.slane %v2639_v63, %v14891_v24  ;;  %v2664_v35 = vrot.slane %v2647_v26, %v14891_v24  ;;  %v3136_v9 = vcombine.high %v3128_v47, %v3128_v47 }
0x100a   :  { %v3144_v60 = vrot.slane %v3128_v47, %v12077_v58  ;;  %v3640_v55 = vcombine.high %v14895_v57, %v14895_v57  ;;  %v3647_v23 = vrot.slane %v14895_v57, %v12077_v58  ;;  %v2180_v45 = vsel %vm2081_vm4, %v2161_v37, %v1661_v48 }
0x100b   :  { %v2650_v38 = vcombine.high %v2646_v0, %v2646_v0  ;;  %v2672_v32 = vrot.slane %v2632_v14, %v14891_v24  ;;  %v2680_v15 = vrot.slane %v2648_v31, %v14891_v24  ;;  %v3151_v53 = vrot.slane %v3135_v61, %v12077_v58 }
0x100c   :  { %v2693_v10 = vsel %vm2600_vm5, %v2656_v12, %v2174_v4  ;;  %v2179_v54 = vsel %vm2081_vm4, %v2157_v46, %v1660_v59  ;;  %v2181_v25 = vsel %vm2081_vm4, %v2165_v39, %v1662_v29  ;;  %v3158_v5 = vrot.slane %v3136_v9, %v12077_v58 }
0x100d   :  { %v2695_v19 = vsel %vm2600_vm5, %v2664_v35, %v2176_v40  ;;  %v2694_v41 = vsel %vm2600_vm5, %v2660_v7, %v2175_v56  ;;  %v2668_v50 = vrot.slane %v2649_v22, %v14891_v24  ;;  %v3137_v48 = vcombine.high %v3135_v61, %v3135_v61 }
0x100e   :  { %v3166_v20 = vcombine.high %v3144_v60, %v3144_v60  ;;  %v3654_v51 = vrot.slane %v3640_v55, %v12077_v58  ;;  %v3655_v18 = vcombine.high %v3647_v23, %v3647_v23  ;;  %v2697_v21 = vsel %vm2600_vm5, %v2672_v32, %v2178_v3 }
0x100f   :  { %v2699_v17 = vsel %vm2600_vm5, %v2680_v15, %v2180_v45  ;;  %v2676_v30 = vrot.slane %v2646_v0, %v14891_v24  ;;  %v2684_v33 = vrot.slane %v2650_v38, %v14891_v24  ;;  %v3167_v13 = vcombine.high %v3151_v53, %v3151_v53 }
0x1010   :  { %v3175_v8 = vrot.slane %v3144_v60, %v14891_v24  ;;  %v3191_v11 = vrot.slane %v3151_v53, %v14891_v24  ;;  %v3168_v36 = vcombine.high %v3158_v5, %v3158_v5  ;;  %v3663_v14 = vrot.slane %v3647_v23, %v12077_v58 }
0x1011   :  { %v4166_v43 = vrot.slane %v12040_v2, %v12077_v58  ;;  %v3165_v59 = vrot.slane %v3137_v48, %v12077_v58  ;;  %v3670_v29 = vrot.slane %v3654_v51, %v12077_v58  ;;  %v3677_v63 = vrot.slane %v3655_v18, %v12077_v58 }
0x1012   :  { %v3183_v26 = vrot.slane %v3166_v20, %v14891_v24  ;;  %v3656_v47 = vcombine.high %v3654_v51, %v3654_v51  ;;  %v3179_v4 = vrot.slane %v3158_v5, %v14891_v24  ;;  %v2696_v42 = vsel %vm2600_vm5, %v2668_v50, %v2177_v34 }
0x1013   :  { %v2698_v46 = vsel %vm2600_vm5, %v2676_v30, %v2179_v54  ;;  %v3212_v37 = vsel %vm3119_vm6, %v3175_v8, %v2693_v10  ;;  %v3216_v40 = vsel %vm3119_vm6, %v3191_v11, %v2697_v21  ;;  %v3199_v0 = vrot.slane %v3167_v13, %v14891_v24 }
0x1014   :  { %v12246_v31 = vsel %vm2600_vm5, %v2684_v33, %v2181_v25  ;;  %v3685_v3 = vcombine.high %v3663_v14, %v3663_v14  ;;  %v4173_v56 = vrot.slane %v4159_v44, %v12077_v58  ;;  %v4182_v12 = vrot.slane %v4166_v43, %v12077_v58 }
0x1015   :  { %v3187_v61 = vrot.slane %v3168_v36, %v14891_v24  ;;  %v3214_v39 = vsel %vm3119_vm6, %v3183_v26, %v2695_v19  ;;  %v3686_v22 = vcombine.high %v3670_v29, %v3670_v29  ;;  %v3687_v7 = vcombine.high %v3677_v63, %v3677_v63 }
0x1016   :  { %v3195_v35 = vrot.slane %v3165_v59, %v14891_v24  ;;  %v4174_v9 = vcombine.high %v4166_v43, %v4166_v43  ;;  %v3213_v60 = vsel %vm3119_vm6, %v3179_v4, %v2694_v41  ;;  %v3684_v55 = vrot.slane %v3656_v47, %v12077_v58  ;;  %v4936_v41 = vld [vmem:[%s14887_s17 + $0x28] sm:$0xff] }
0x1017   :  { %v3169_v23 = vcombine.high %v3165_v59, %v3165_v59  ;;  %v3694_v45 = vrot.slane %v3663_v14, %v14891_v24  ;;  %v3710_v38 = vrot.slane %v3670_v29, %v14891_v24  ;;  %v3218_v32 = vsel %vm3119_vm6, %v3199_v0, %v2699_v17  ;;  %8612 = vmatmul.mubr.msk.f32.gmra.mxu0 %vm153_vm0, %v4936_v41  ;;  %v4937_v59 = vld [vmem:[%s14887_s17 + $0x30] sm:$0xff] }
0x1018   :  { %v3698_v15 = vrot.slane %v3677_v63, %v14891_v24  ;;  %v3702_v34 = vrot.slane %v3685_v3, %v14891_v24  ;;  %v4204_v53 = vcombine.high %v4182_v12, %v4182_v12  ;;  %v4189_v10 = vrot.slane %v4173_v56, %v12077_v58  ;;  %8614 = vmatprep.mubr.msk.f32.mxu0 %vm153_vm0, %v4937_v59 }
0x1019   :  { %v3718_v54 = vrot.slane %v3686_v22, %v14891_v24  ;;  %v3215_v25 = vsel %vm3119_vm6, %v3187_v61, %v2696_v42  ;;  %v3706_v5 = vrot.slane %v3687_v7, %v14891_v24  ;;  %v3217_v19 = vsel %vm3119_vm6, %v3195_v35, %v2698_v46  ;;  %v4938_v7 = vld [vmem:[%s14887_s17 + $0x38] sm:$0xff] }
0x101a   :  { %v4196_v50 = vrot.slane %v4174_v9, %v12077_v58  ;;  %v3714_v48 = vrot.slane %v3684_v55, %v14891_v24  ;;  %v4175_v20 = vcombine.high %v4173_v56, %v4173_v56  ;;  %v12277_v51 = vrot.slane %v3169_v23, %v14891_v24 }
0x101b   :  { %v3731_v18 = vsel %vm3638_vm7, %v3694_v45, %v3212_v37  ;;  %v3735_v21 = vsel %vm3638_vm7, %v3710_v38, %v3216_v40  ;;  %v3732_v17 = vsel %vm3638_vm7, %v3698_v15, %v3213_v60  ;;  %v3688_v30 = vcombine.high %v3684_v55, %v3684_v55  ;;  %8615 = vmatmul.mubr.msk.f32.gmra.mxu0 %vm153_vm0, %v4938_v7  ;;  %v5337_v7 = vld [vmem:[#allocation6 + $0x150] sm:$0xff] }
0x101c   :  { %v4213_v13 = vrot.slane %v4182_v12, %v14891_v24  ;;  %v3733_v8 = vsel %vm3638_vm7, %v3702_v34, %v3214_v39  ;;  %v4221_v11 = vrot.slane %v4204_v53, %v14891_v24  ;;  %v4229_v36 = vrot.slane %v4189_v10, %v14891_v24  ;;  %5536 = vmatprep.mubr.f32.mxu0 %v14525_v52 }
0x101d   :  { %v3737_v44 = vsel %vm3638_vm7, %v3718_v54, %v3218_v32  ;;  %v3734_v43 = vsel %vm3638_vm7, %v3706_v5, %v3215_v25  ;;  %v4205_v63 = vcombine.high %v4189_v10, %v4189_v10  ;;  %v4217_v26 = vrot.slane %v4196_v50, %v14891_v24 }
0x101e   :  { %v4203_v47 = vrot.slane %v4175_v20, %v12077_v58  ;;  %v3722_v37 = vrot.slane %v3688_v30, %v14891_v24  ;;  %v4250_v40 = vsel %vm4157_vm8, %v4213_v13, %v3731_v18  ;;  %v4252_v0 = vsel %vm4157_vm8, %v4221_v11, %v3733_v8 }
0x101f   :  { %v4254_v3 = vsel %vm4157_vm8, %v4229_v36, %v3735_v21  ;;  %v4206_v56 = vcombine.high %v4196_v50, %v4196_v50  ;;  %v4237_v35 = vrot.slane %v4205_v63, %v14891_v24  ;;  %v4251_v9 = vsel %vm4157_vm8, %v4217_v26, %v3732_v17  ;;  %v4940_v26 = vld [vmem:[%s14059_s12 + $0x8] sm:$0xff] }
0x1020   :  { %v4207_v60 = vcombine.high %v4203_v47, %v4203_v47  ;;  %v4233_v15 = vrot.slane %v4203_v47, %v14891_v24  ;;  %8585 = vmatprep.subr.mxu1 %v4940_v26 }
0x1021   :  { %v4225_v32 = vrot.slane %v4206_v56, %v14891_v24  ;;  %v4256_v5 = vsel %vm4157_vm8, %v4237_v35, %v3737_v44  ;;  %v3219_v44 = vsel %vm3119_vm6, %v12277_v51, %v12246_v31  ;;  %8586 = vmatpush3.msra.mxu1 %v4940_v26  ;;  %v5346_v56 = vld [vmem:[#allocation6 + $0x198] sm:$0xff] }
0x1022   :  { %v4241_v21 = vrot.slane %v4207_v60, %v14891_v24  ;;  %v5334_v35 = vld [vmem:[#allocation6 + $0x138] sm:$0xff] }
0x1023   :  { %v4253_v11 = vsel %vm4157_vm8, %v4225_v32, %v3734_v43  ;;  %v5330_v60 = vld [vmem:[#allocation6 + $0x118] sm:$0xff]  ;;  %v5321_v32 = vld [vmem:[#allocation6 + $0xd0] sm:$0xff] }
0x10bd   :  { %v4663_v33 = vpop.f32.mrf.mxu0 }
0x10be   :  { %v12292_v14 = vadd.f32 %v12037_v62, %v4663_v33  ;;  %v3736_v62 = vsel %vm3638_vm7, %v3714_v48, %v3217_v19 }
0x10bf   :  { %v8584_v29 = vpop.f32.mrf.mxu0  ;;  %v4255_v36 = vsel %vm4157_vm8, %v4233_v15, %v3736_v62  ;;  %v4939_v62 = vld [vmem:[%s14059_s12] sm:$0xff]  ;;  %v5318_v15 = vld [vmem:[#allocation6 + $0xb8] sm:$0xff] }
0x10c0   :  { %v4667_v4 = vmul.f32 0.5, %v12292_v14  ;;  %v4678_v42 = vcombine.high %v12292_v14, %v12292_v14  ;;  %v4685_v46 = vrot.slane %v12292_v14, %v12077_v58  ;;  %v3738_v29 = vsel %vm3638_vm7, %v3722_v37, %v3219_v44  ;;  %8587 = vmatprep.subr.mxu1 %v4939_v62  ;;  %v5354_v37 = vld [vmem:[#allocation6 + $0x1d8] sm:$0xff] }
0x10c1   :  { %v4257_v31 = vsel %vm4157_vm8, %v4241_v21, %v3738_v29  ;;  %8588 = vmatpush3.msra.mxu1 %v4939_v62  ;;  %v5297_v21 = vld [vmem:[#allocation6 + $0x10] sm:$0xff] }
0x10c2   :  { %v4668_v12 = vmul.f32 1.442695, %v4667_v4  ;;  %v4701_v61 = vrot.slane %v4685_v46, %v12077_v58  ;;  %v4692_v39 = vrot.slane %v4678_v42, %v12077_v58  ;;  %v4693_v22 = vcombine.high %v4685_v46, %v4685_v46  ;;  %v5356_v4 = vld [vmem:[#allocation6 + $0x1e8] sm:$0xff]  ;;  %v5358_v42 = vld [vmem:[#allocation6 + $0x1f8] sm:$0xff]  ;;  %v5357_v46 = vld [vmem:[#allocation6 + $0x1f0] sm:$0xff] }
0x10c3   :  { %5359 = vmatprep.subr.mxu1 %v5356_v4  ;;  %5472 = vmatprep.subr.mxu0 %v5358_v42 }
0x10c4   :  { %8889 = vpow2.f32 %v4668_v12  ;;  %v4732_v55 = vrot.slane %v4701_v61, %v14891_v24  ;;  %v4723_v23 = vcombine.high %v4701_v61, %v4701_v61  ;;  %v4708_v45 = vrot.slane %v4692_v39, %v12077_v58  ;;  %5473 = vmatpush1.msra.mxu0 %v5357_v46  ;;  %v5345_v12 = vld [vmem:[#allocation6 + $0x190] sm:$0xff]  ;;  %v5342_v61 = vld [vmem:[#allocation6 + $0x178] sm:$0xff] }
0x10c5   :  { %v4715_v38 = vrot.slane %v4693_v22, %v12077_v58  ;;  %v4694_v34 = vcombine.high %v4692_v39, %v4692_v39  ;;  %5474 = vmatprep.subr.mxu0 %v5354_v37  ;;  %v5341_v39 = vld [vmem:[#allocation6 + $0x170] sm:$0xff]  ;;  %v5338_v22 = vld [vmem:[#allocation6 + $0x158] sm:$0xff] }
0x10c6   :  { %v4769_v53 = vsel %vm4676_vm9, %v4732_v55, %v4250_v40  ;;  %v4740_v10 = vrot.slane %v4723_v23, %v14891_v24  ;;  %v4748_v54 = vrot.slane %v4708_v45, %v14891_v24  ;;  %v4724_v25 = vcombine.high %v4708_v45, %v4708_v45  ;;  %v5353_v40 = vld [vmem:[#allocation6 + $0x1d0] sm:$0xff]  ;;  %v5326_v23 = vld [vmem:[#allocation6 + $0xf8] sm:$0xff] }
0x10c7   :  { %4891 = vrot.lane.b32.xlu0 %v4769_v53, %s9421_s8  ;;  %4875 = vst.msk [vmem:[%s14072_s25] sm:$0xff] %vm153_vm0, %v4769_v53  ;;  %v4736_v19 = vrot.slane %v4715_v38, %v14891_v24  ;;  %v4725_v41 = vcombine.high %v4715_v38, %v4715_v38  ;;  %v4722_v50 = vrot.slane %v4694_v34, %v12077_v58  ;;  %v5329_v55 = vld [vmem:[#allocation6 + $0x110] sm:$0xff]  ;;  %v5322_v38 = vld [vmem:[#allocation6 + $0xd8] sm:$0xff] }
0x10c8   :  { %v4771_v48 = vsel %vm4676_vm9, %v4740_v10, %v4252_v0  ;;  %v4773_v20 = vsel %vm4676_vm9, %v4748_v54, %v4254_v3  ;;  %v4756_v18 = vrot.slane %v4724_v25, %v14891_v24  ;;  %v5350_v0 = vld [vmem:[#allocation6 + $0x1b8] sm:$0xff]  ;;  %v5349_v3 = vld [vmem:[#allocation6 + $0x1b0] sm:$0xff]  ;;  %5475 = vmatpush1.msra.mxu0 %v5353_v40 }
0x10c9   :  { %4877 = vst.msk [vmem:[%s14072_s25 + $0x10] sm:$0xff] %vm153_vm0, %v4771_v48  ;;  %4879 = vst.msk [vmem:[%s14072_s25 + $0x20] sm:$0xff] %vm153_vm0, %v4773_v20  ;;  %v4770_v17 = vsel %vm4676_vm9, %v4736_v19, %v4251_v9  ;;  %v4744_v30 = vrot.slane %v4725_v41, %v14891_v24  ;;  %v4752_v33 = vrot.slane %v4722_v50, %v14891_v24  ;;  %5476 = vmatprep.subr.mxu0 %v5350_v0  ;;  %v5333_v9 = vld [vmem:[#allocation6 + $0x130] sm:$0xff]  ;;  %v5314_v53 = vld [vmem:[#allocation6 + $0x98] sm:$0xff] }
0x10ca   :  { %v4726_v13 = vcombine.high %v4722_v50, %v4722_v50  ;;  %v4775_v8 = vsel %vm4676_vm9, %v4756_v18, %v4256_v5  ;;  %4876 = vst.msk [vmem:[%s14072_s25 + $0x8] sm:$0xff] %vm153_vm0, %v4770_v17  ;;  %5477 = vmatpush1.msra.mxu0 %v5349_v3  ;;  %v5325_v45 = vld [vmem:[#allocation6 + $0xf0] sm:$0xff]  ;;  %v5310_v54 = vld [vmem:[#allocation6 + $0x78] sm:$0xff] }
0x10cb   :  { %4895 = vrot.lane.b32.xlu0 %v4771_v48, %s9421_s8  ;;  %4881 = vst.msk [vmem:[%s14072_s25 + $0x30] sm:$0xff] %vm153_vm0, %v4775_v8  ;;  %v4772_v59 = vsel %vm4676_vm9, %v4744_v30, %v4253_v11  ;;  %v4774_v43 = vsel %vm4676_vm9, %v4752_v33, %v4255_v36  ;;  %5478 = vmatprep.subr.mxu0 %v5346_v56  ;;  %v5317_v34 = vld [vmem:[#allocation6 + $0xb0] sm:$0xff]  ;;  %v5306_v5 = vld [vmem:[#allocation6 + $0x58] sm:$0xff] }
0x10cc   :  { %v4760_v63 = vrot.slane %v4726_v13, %v14891_v24  ;;  %4878 = vst.msk [vmem:[%s14072_s25 + $0x18] sm:$0xff] %vm153_vm0, %v4772_v59  ;;  %4880 = vst.msk [vmem:[%s14072_s25 + $0x28] sm:$0xff] %vm153_vm0, %v4774_v43  ;;  %5479 = vmatpush1.msra.mxu0 %v5345_v12  ;;  %v5313_v10 = vld [vmem:[#allocation6 + $0x90] sm:$0xff]  ;;  %v5302_v41 = vld [vmem:[#allocation6 + $0x38] sm:$0xff] }
0x10cd   :  { %5480 = vmatprep.subr.mxu0 %v5342_v61  ;;  %v5309_v25 = vld [vmem:[#allocation6 + $0x70] sm:$0xff]  ;;  %v5298_v18 = vld [vmem:[#allocation6 + $0x18] sm:$0xff] }
0x10ce   :  { %v4776_v51 = vsel %vm4676_vm9, %v4760_v63, %v4257_v31  ;;  %5481 = vmatpush1.msra.mxu0 %v5341_v39  ;;  %v5305_v19 = vld [vmem:[#allocation6 + $0x50] sm:$0xff]  ;;  %v5294_v11 = vld [vmem:[#allocation4 + $0x1f8] sm:$0xff]  ;;  %v2077_v63 = vpop.permute.xlu1 %2076 }
0x10cf   :  { %4882 = vst.msk [vmem:[%s14072_s25 + $0x38] sm:$0xff] %vm153_vm0, %v4776_v51  ;;  %4899 = vrot.lane.b32.xlu0 %v4773_v20, %s9421_s8  ;;  %5482 = vmatprep.subr.mxu0 %v5338_v22  ;;  %v5301_v50 = vld [vmem:[#allocation6 + $0x30] sm:$0xff]  ;;  %v1039_v20 = vpop.permute.xlu0 %1038 }
0x10d0   :  { %5483 = vmatpush1.msra.mxu0 %v5337_v7 }
0x10d1   :  { %v8890_v47 = vpop.eup %8889  ;;  %5484 = vmatprep.subr.mxu0 %v5334_v35 }
0x10d2   :  { %4671 = vrot.lane.b32.xlu1 %v8890_v47, %s9421_s8  ;;  %5485 = vmatpush1.msra.mxu0 %v5333_v9  ;;  %v2596_v12 = vpop.permute.xlu1 %2595 }
0x10d3   :  { %4903 = vrot.lane.b32.xlu0 %v4775_v8, %s9421_s8  ;;  %5486 = vmatprep.subr.mxu0 %v5330_v60  ;;  %v1558_v33 = vpop.permute.xlu0 %1557 }
0x10d4   :  { %5487 = vmatpush1.msra.mxu0 %v5329_v55 }
0x10d5   :  { %5488 = vmatprep.subr.mxu0 %v5326_v23 }
0x10d6   :  { %4893 = vrot.lane.b32.xlu1 %v4770_v17, %s9421_s8  ;;  %5489 = vmatpush1.msra.mxu0 %v5325_v45 }
0x10d7   :  { %5490 = vmatprep.subr.mxu0 %v5322_v38 }
0x10d8   :  { %5491 = vmatpush1.msra.mxu0 %v5321_v32 }
0x10d9   :  { %5492 = vmatprep.subr.mxu0 %v5318_v15 }
0x10da   :  { %4897 = vrot.lane.b32.xlu1 %v4772_v59, %s9421_s8  ;;  %5493 = vmatpush1.msra.mxu0 %v5317_v34 }
0x10db   :  { %5494 = vmatprep.subr.mxu0 %v5314_v53 }
0x10dc   :  { %5495 = vmatpush1.msra.mxu0 %v5313_v10 }
0x10dd   :  { %5496 = vmatprep.subr.mxu0 %v5310_v54 }
0x10de   :  { %4901 = vrot.lane.b32.xlu1 %v4774_v43, %s9421_s8  ;;  %5497 = vmatpush1.msra.mxu0 %v5309_v25 }
0x10df   :  { %5498 = vmatprep.subr.mxu0 %v5306_v5 }
0x10e0   :  { %5499 = vmatpush1.msra.mxu0 %v5305_v19 }
0x10e1   :  { %5500 = vmatprep.subr.mxu0 %v5302_v41 }
0x10e2   :  { %4905 = vrot.lane.b32.xlu1 %v4776_v51, %s9421_s8  ;;  %s14896_s8 = sld [smem:[#allocation93_spill]]  ;;  %5501 = vmatpush1.msra.mxu0 %v5301_v50 }
0x10e3   :  { %5502 = vmatprep.subr.mxu0 %v5298_v18 }
0x10e4   :  { %5503 = vmatpush1.msra.mxu0 %v5297_v21 }
0x10e5   :  { %5698 = vmatprep.subr.mxu0 %v5294_v11  ;;  %v3115_v11 = vpop.permute.xlu0 %3114 }
0x10e8   :  { %v701_v48 = vld [vmem:[%s14896_s8] sm:$0xff]  ;;  %v702_v30 = vld [vmem:[%s14896_s8 + $0x8] sm:$0xff]  ;;  %v703_v29 = vld [vmem:[%s14896_s8 + $0x10] sm:$0xff] }
0x10e9   :  { %v1041_v17 = vmul.f32 %v1039_v20, %v701_v48  ;;  %v1560_v8 = vmul.f32 %v1558_v33, %v702_v30  ;;  %v2079_v26 = vmul.f32 %v2077_v63, %v703_v29  ;;  %v704_v56 = vld [vmem:[%s14896_s8 + $0x18] sm:$0xff] }
0x10ea   :  { %v2598_v55 = vmul.f32 %v2596_v12, %v704_v56 }
0x10eb   :  { %v1042_v13 = vadd.f32 %v1041_v17, %v14889_v28  ;;  %v1561_v59 = vadd.f32 %v1560_v8, %v14890_v49  ;;  %v2080_v46 = vadd.f32 %v2079_v26, %v14892_v16 }
0x10ec   :  { %v2599_v48 = vadd.f32 %v2598_v55, %v14893_v27  ;;  %v705_v27 = vld [vmem:[%s14896_s8 + $0x20] sm:$0xff] }
0x10ed   :  { %v1145_v36 = vcombine.high %v1042_v13, %v1042_v13  ;;  %v1152_v44 = vrot.slane %v1042_v13, %v12077_v58  ;;  %v1664_v51 = vcombine.high %v1561_v59, %v1561_v59  ;;  %v1671_v4 = vrot.slane %v1561_v59, %v12077_v58 }
0x10ee   :  { %v2183_v35 = vcombine.high %v2080_v46, %v2080_v46  ;;  %v2190_v32 = vrot.slane %v2080_v46, %v12077_v58  ;;  %v2709_v46 = vrot.slane %v2599_v48, %v12077_v58 }
0x10ef   :  { %v1159_v43 = vrot.slane %v1145_v36, %v12077_v58  ;;  %v1160_v31 = vcombine.high %v1152_v44, %v1152_v44  ;;  %v1168_v28 = vrot.slane %v1152_v44, %v12077_v58  ;;  %v1678_v49 = vrot.slane %v1664_v51, %v12077_v58 }
0x10f0   :  { %v1679_v3 = vcombine.high %v1671_v4, %v1671_v4  ;;  %v1687_v60 = vrot.slane %v1671_v4, %v12077_v58  ;;  %v2197_v5 = vrot.slane %v2183_v35, %v12077_v58  ;;  %v2198_v17 = vcombine.high %v2190_v32, %v2190_v32 }
0x10f1   :  { %v1161_v62 = vcombine.high %v1159_v43, %v1159_v43  ;;  %v1182_v47 = vrot.slane %v1160_v31, %v12077_v58  ;;  %v1175_v42 = vrot.slane %v1159_v43, %v12077_v58  ;;  %v1190_v40 = vcombine.high %v1168_v28, %v1168_v28 }
0x10f2   :  { %v1680_v39 = vcombine.high %v1678_v49, %v1678_v49  ;;  %v1197_v22 = vrot.slane %v1168_v28, %v14891_v24  ;;  %v1701_v38 = vrot.slane %v1679_v3, %v12077_v58  ;;  %v1694_v53 = vrot.slane %v1678_v49, %v12077_v58 }
0x10f3   :  { %v1189_v37 = vrot.slane %v1161_v62, %v12077_v58  ;;  %v1192_v0 = vcombine.high %v1182_v47, %v1182_v47  ;;  %v1191_v61 = vcombine.high %v1175_v42, %v1175_v42  ;;  %v1201_v7 = vrot.slane %v1182_v47, %v14891_v24 }
0x10f4   :  { %v1205_v16 = vrot.slane %v1190_v40, %v14891_v24  ;;  %v1213_v45 = vrot.slane %v1175_v42, %v14891_v24  ;;  %v1708_v10 = vrot.slane %v1680_v39, %v12077_v58  ;;  %v1234_v54 = vsel %vm1043_vm2, %v1197_v22, 0.0 }
0x10f5   :  { %v1193_v9 = vcombine.high %v1189_v37, %v1189_v37  ;;  %v1209_v23 = vrot.slane %v1192_v0, %v14891_v24  ;;  %v1217_v15 = vrot.slane %v1189_v37, %v14891_v24  ;;  %v1221_v34 = vrot.slane %v1191_v61, %v14891_v24 }
0x10f6   :  { %v1235_v25 = vsel %vm1043_vm2, %v1201_v7, 0.0  ;;  %v1236_v41 = vsel %vm1043_vm2, %v1205_v16, 0.0  ;;  %v1709_v50 = vcombine.high %v1687_v60, %v1687_v60  ;;  %v1238_v18 = vsel %vm1043_vm2, %v1213_v45, 0.0  ;;  %v8607_v16 = vpop.f32.mrf.mxu0 }
0x10f7   :  { %v1225_v19 = vrot.slane %v1193_v9, %v14891_v24  ;;  %v1237_v20 = vsel %vm1043_vm2, %v1209_v23, 0.0  ;;  %v1711_v21 = vcombine.high %v1701_v38, %v1701_v38  ;;  %v1239_v30 = vsel %vm1043_vm2, %v1217_v15, 0.0 }
0x10f8   :  { %v1240_v33 = vsel %vm1043_vm2, %v1221_v34, 0.0  ;;  %v1710_v13 = vcombine.high %v1694_v53, %v1694_v53  ;;  %v1712_v8 = vcombine.high %v1708_v10, %v1708_v10  ;;  %v1716_v36 = vrot.slane %v1687_v60, %v14891_v24  ;;  %v12509_v60 = vld [vmem:[%s14062_s15] ss:$0 sm:$0xff] }
0x10f9   :  { %v1720_v44 = vrot.slane %v1701_v38, %v14891_v24  ;;  %v2199_v59 = vcombine.high %v2197_v5, %v2197_v5  ;;  %v2206_v43 = vrot.slane %v2190_v32, %v12077_v58  ;;  %v1241_v29 = vsel %vm1043_vm2, %v1225_v19, 0.0 }
0x10fa   :  { %v1724_v63 = vrot.slane %v1709_v50, %v14891_v24  ;;  %v1732_v31 = vrot.slane %v1694_v53, %v14891_v24  ;;  %v2702_v51 = vcombine.high %v2599_v48, %v2599_v48  ;;  %v1728_v26 = vrot.slane %v1711_v21, %v14891_v24  ;;  %v706_v53 = vld [vmem:[%s14896_s8 + $0x28] sm:$0xff] }
0x10fb   :  { %v1736_v62 = vrot.slane %v1708_v10, %v14891_v24  ;;  %v2220_v28 = vrot.slane %v2198_v17, %v12077_v58  ;;  %v3117_v47 = vmul.f32 %v3115_v11, %v705_v27  ;;  %v1740_v4 = vrot.slane %v1710_v13, %v14891_v24  ;;  %v3634_v10 = vpop.permute.xlu1 %3633 }
0x10fc   :  { %v1744_v42 = vrot.slane %v1712_v8, %v14891_v24  ;;  %v2213_v49 = vrot.slane %v2197_v5, %v12077_v58  ;;  %v1753_v37 = vsel %vm1562_vm3, %v1716_v36, %v1234_v54  ;;  %v1754_v40 = vsel %vm1562_vm3, %v1720_v44, %v1235_v25  ;;  %v5184_v54 = vpop.f32.mrf.mxu0 }
0x10fd   :  { %v2227_v0 = vrot.slane %v2199_v59, %v12077_v58  ;;  %v2228_v3 = vcombine.high %v2206_v43, %v2206_v43  ;;  %v1755_v56 = vsel %vm1562_vm3, %v1724_v63, %v1236_v41  ;;  %v1757_v12 = vsel %vm1562_vm3, %v1732_v31, %v1238_v18 }
0x10fe   :  { %v2235_v61 = vrot.slane %v2206_v43, %v14891_v24  ;;  %v2716_v39 = vrot.slane %v2702_v51, %v12077_v58  ;;  %v2230_v22 = vcombine.high %v2220_v28, %v2220_v28  ;;  %v3118_v7 = vadd.f32 %v3117_v47, %v14894_v1  ;;  %v8610_v21 = vpop.f32.mrf.mxu0 }
0x10ff   :  { %v1756_v35 = vsel %vm1562_vm3, %v1728_v26, %v1237_v20  ;;  %v1758_v9 = vsel %vm1562_vm3, %v1736_v62, %v1239_v30  ;;  %v2229_v55 = vcombine.high %v2213_v49, %v2213_v49  ;;  %v2717_v23 = vcombine.high %v2709_v46, %v2709_v46 }
0x1100   :  { %v1759_v45 = vsel %vm1562_vm3, %v1740_v4, %v1240_v33  ;;  %v1760_v1 = vsel %vm1562_vm3, %v1744_v42, %v1241_v29  ;;  %v2231_v38 = vcombine.high %v2227_v0, %v2227_v0  ;;  %v2239_v32 = vrot.slane %v2220_v28, %v14891_v24  ;;  %v5194_v36 = vpop.f32.mrf.mxu0 }
0x1101   :  { %v2243_v15 = vrot.slane %v2228_v3, %v14891_v24  ;;  %v2251_v34 = vrot.slane %v2213_v49, %v14891_v24  ;;  %v2272_v25 = vsel %vm2081_vm4, %v2235_v61, %v1753_v37  ;;  %v2718_v5 = vcombine.high %v2716_v39, %v2716_v39  ;;  %v707_v49 = vld [vmem:[%s14896_s8 + $0x30] sm:$0xff] }
0x1102   :  { %v5190_v19 = vadd.f32 %v8607_v16, %v12509_v60  ;;  %v5185_v41 = vadd.f32 %v12509_v60, %v5184_v54  ;;  %v2247_v50 = vrot.slane %v2230_v22, %v14891_v24  ;;  %v2255_v48 = vrot.slane %v2227_v0, %v14891_v24 }
0x1103   :  { %v2725_v20 = vrot.slane %v2709_v46, %v12077_v58  ;;  %v3221_v18 = vcombine.high %v3118_v7, %v3118_v7  ;;  %v2259_v17 = vrot.slane %v2229_v55, %v14891_v24  ;;  %v2739_v30 = vrot.slane %v2717_v23, %v12077_v58  ;;  %v4153_v46 = vpop.permute.xlu0 %4152 }
0x1104   :  { %v3636_v33 = vmul.f32 %v3634_v10, %v706_v53  ;;  %8891 = vtanh.f32 %v5185_v41  ;;  %v2263_v13 = vrot.slane %v2231_v38, %v14891_v24  ;;  %v2273_v8 = vsel %vm2081_vm4, %v2239_v32, %v1754_v40  ;;  %v5293_v41 = vld [vmem:[#allocation4 + $0x1f0] sm:$0xff] }
0x1105   :  { %v2732_v27 = vrot.slane %v2716_v39, %v12077_v58  ;;  %v3228_v11 = vrot.slane %v3118_v7, %v12077_v58  ;;  %v2746_v44 = vrot.slane %v2718_v5, %v12077_v58  ;;  %v2274_v59 = vsel %vm2081_vm4, %v2243_v15, %v1755_v56 }
0x1106   :  { %8893 = vtanh.f32 %v5190_v19  ;;  %v5195_v43 = vadd.f32 %v12509_v60, %v5194_v36  ;;  %v2747_v29 = vcombine.high %v2725_v20, %v2725_v20  ;;  %v3235_v63 = vrot.slane %v3221_v18, %v12077_v58 }
0x1107   :  { %v2275_v31 = vsel %vm2081_vm4, %v2247_v50, %v1756_v35  ;;  %v2276_v51 = vsel %vm2081_vm4, %v2251_v34, %v1757_v12  ;;  %v2749_v26 = vcombine.high %v2739_v30, %v2739_v30  ;;  %v2754_v62 = vrot.slane %v2725_v20, %v14891_v24 }
0x1108   :  { %v3637_v28 = vadd.f32 %v3636_v33, %v14895_v57  ;;  %v2277_v47 = vsel %vm2081_vm4, %v2255_v48, %v1758_v9  ;;  %v2748_v4 = vcombine.high %v2732_v27, %v2732_v27  ;;  %v3236_v42 = vcombine.high %v3228_v11, %v3228_v11 }
0x1109   :  { %v2278_v37 = vsel %vm2081_vm4, %v2259_v17, %v1759_v45  ;;  %v2279_v40 = vsel %vm2081_vm4, %v2263_v13, %v1760_v1  ;;  %v2750_v0 = vcombine.high %v2746_v44, %v2746_v44  ;;  %v3244_v3 = vrot.slane %v3228_v11, %v12077_v58 }
0x110a   :  { %v5200_v57 = vadd.f32 %v8610_v21, %v12509_v60  ;;  %8895 = vtanh.f32 %v5195_v43  ;;  %v2758_v56 = vrot.slane %v2739_v30, %v14891_v24  ;;  %v2762_v12 = vrot.slane %v2747_v29, %v14891_v24  ;;  %v5290_v30 = vld [vmem:[#allocation4 + $0x1d8] sm:$0xff] }
0x110b   :  { %v2770_v61 = vrot.slane %v2732_v27, %v14891_v24  ;;  %v3237_v39 = vcombine.high %v3235_v63, %v3235_v63  ;;  %v2766_v22 = vrot.slane %v2749_v26, %v14891_v24  ;;  %v3747_v7 = vrot.slane %v3637_v28, %v12077_v58  ;;  %v5289_v27 = vld [vmem:[#allocation4 + $0x1d0] sm:$0xff]  ;;  %v5286_v43 = vld [vmem:[#allocation4 + $0x1b8] sm:$0xff] }
0x110c   :  { %v4155_v35 = vmul.f32 %v4153_v46, %v707_v49  ;;  %v2791_v9 = vsel %vm2600_vm5, %v2754_v62, %v2272_v25  ;;  %v2774_v16 = vrot.slane %v2746_v44, %v14891_v24  ;;  %v3251_v55 = vrot.slane %v3235_v63, %v12077_v58  ;;  %v5285_v26 = vld [vmem:[#allocation4 + $0x1b0] sm:$0xff]  ;;  %v5282_v49 = vld [vmem:[#allocation4 + $0x198] sm:$0xff] }
0x110d   :  { %v3258_v23 = vrot.slane %v3236_v42, %v12077_v58  ;;  %v3740_v45 = vcombine.high %v3637_v28, %v3637_v28  ;;  %v2778_v1 = vrot.slane %v2748_v4, %v14891_v24  ;;  %v2782_v38 = vrot.slane %v2750_v0, %v14891_v24  ;;  %v5281_v0 = vld [vmem:[#allocation4 + $0x190] sm:$0xff] }
0x110e   :  { %v3266_v32 = vcombine.high %v3244_v3, %v3244_v3  ;;  %8897 = vtanh.f32 %v5200_v57  ;;  %v12570_v15 = vrot.slane %v3237_v39, %v12077_v58  ;;  %v2792_v34 = vsel %vm2600_vm5, %v2758_v56, %v2273_v8 }
0x110f   :  { %v2793_v53 = vsel %vm2600_vm5, %v2762_v12, %v2274_v59  ;;  %v2795_v10 = vsel %vm2600_vm5, %v2770_v61, %v2276_v51  ;;  %v3273_v54 = vrot.slane %v3244_v3, %v14891_v24  ;;  %v3755_v25 = vcombine.high %v3747_v7, %v3747_v7  ;;  %v5278_v61 = vld [vmem:[#allocation4 + $0x178] sm:$0xff] }
0x1110   :  { %v4156_v5 = vadd.f32 %v4155_v35, %v12040_v2  ;;  %v2794_v19 = vsel %vm2600_vm5, %v2766_v22, %v2275_v31  ;;  %v3267_v48 = vcombine.high %v3251_v55, %v3251_v55  ;;  %v3268_v20 = vcombine.high %v3258_v23, %v3258_v23 }
0x1111   :  { %v12582_v50 = vpop.eup %8891  ;;  %v3754_v18 = vrot.slane %v3740_v45, %v12077_v58  ;;  %v2796_v17 = vsel %vm2600_vm5, %v2774_v16, %v2277_v47  ;;  %v3277_v33 = vrot.slane %v3258_v23, %v14891_v24  ;;  %v3281_v13 = vrot.slane %v3266_v32, %v14891_v24 }
0x1112   :  { %v2797_v2 = vsel %vm2600_vm5, %v2778_v1, %v2278_v37  ;;  %v2798_v8 = vsel %vm2600_vm5, %v2782_v38, %v2279_v40  ;;  %5537 = vmatmul.mubr.f32.vlgmr.msra.gmra.mxu0 %v12582_v50  ;;  %v3269_v36 = vcombine.high %v12570_v15, %v12570_v15  ;;  %v3289_v44 = vrot.slane %v3251_v55, %v14891_v24  ;;  %v5274_v38 = vld [vmem:[#allocation4 + $0x158] sm:$0xff] }
0x1113   :  { %v12598_v11 = vpop.eup %8893  ;;  %v12604_v59 = vrot.slane %v3747_v7, %v12077_v58  ;;  %5542 = vmatprep.mubr.f32.mxu0 %v14525_v52  ;;  %5699 = vmatpush1.msra.mxu0 %v5293_v41  ;;  %v12608_v29 = vrot.slane %v3755_v25, %v12077_v58  ;;  %v4259_v63 = vcombine.high %v4156_v5, %v4156_v5  ;;  %v5270_v41 = vld [vmem:[#allocation4 + $0x138] sm:$0xff] }
0x1114   :  { %v4266_v31 = vrot.slane %v4156_v5, %v12077_v58  ;;  %v3310_v51 = vsel %vm3119_vm6, %v3273_v54, %v2791_v9  ;;  %5700 = vmatprep.subr.mxu0 %v5290_v30  ;;  %v3285_v62 = vrot.slane %v3268_v20, %v14891_v24  ;;  %v3293_v28 = vrot.slane %v12570_v15, %v14891_v24  ;;  %v5277_v9 = vld [vmem:[#allocation4 + $0x170] sm:$0xff] }
0x1115   :  { %v3297_v47 = vrot.slane %v3267_v48, %v14891_v24  ;;  %v3756_v4 = vcombine.high %v3754_v18, %v3754_v18  ;;  %5701 = vmatpush1.msra.mxu0 %v5289_v27  ;;  %v12618_v46 = vrot.slane %v3754_v18, %v12077_v58  ;;  %v3311_v37 = vsel %vm3119_vm6, %v3277_v33, %v2792_v34  ;;  %v708_v34 = vld [vmem:[%s14896_s8 + $0x38] sm:$0xff] }
0x1116   :  { %v3312_v40 = vsel %vm3119_vm6, %v3281_v13, %v2793_v53  ;;  %5543 = vmatmul.mubr.f32.gmra.mxu0 %v12598_v11  ;;  %5702 = vmatprep.subr.mxu0 %v5286_v43  ;;  %v3301_v57 = vrot.slane %v3269_v36, %v14891_v24  ;;  %v3785_v56 = vcombine.high %v12604_v59, %v12604_v59 }
0x1117   :  { %v12629_v3 = vpop.eup %8895  ;;  %v3314_v12 = vsel %vm3119_vm6, %v3289_v44, %v2795_v10  ;;  %5548 = vmatprep.mubr.f32.mxu0 %v14525_v52  ;;  %5703 = vmatpush1.msra.mxu0 %v5285_v26  ;;  %v3787_v39 = vcombine.high %v12608_v29, %v12608_v29  ;;  %v3792_v22 = vrot.slane %v12604_v59, %v14891_v24  ;;  %v5273_v10 = vld [vmem:[#allocation4 + $0x150] sm:$0xff] }
0x1118   :  { %v4273_v7 = vrot.slane %v4259_v63, %v12077_v58  ;;  %v4274_v35 = vcombine.high %v4266_v31, %v4266_v31  ;;  %5704 = vmatprep.subr.mxu0 %v5282_v49  ;;  %v3784_v16 = vrot.slane %v3756_v4, %v12077_v58  ;;  %v3796_v55 = vrot.slane %v12608_v29, %v14891_v24 }
0x1119   :  { %v3313_v45 = vsel %vm3119_vm6, %v3285_v62, %v2794_v19  ;;  %v3315_v1 = vsel %vm3119_vm6, %v3293_v28, %v2796_v17  ;;  %5705 = vmatpush1.msra.mxu0 %v5281_v0  ;;  %v3786_v32 = vcombine.high %v12618_v46, %v12618_v46  ;;  %v4282_v15 = vrot.slane %v4266_v31, %v12077_v58 }
0x111a   :  { %v3316_v53 = vsel %vm3119_vm6, %v3297_v47, %v2797_v2  ;;  %5549 = vmatmul.mubr.f32.gmra.mxu0 %v12629_v3  ;;  %5706 = vmatprep.subr.mxu0 %v5278_v61  ;;  %v3800_v25 = vrot.slane %v3785_v56, %v14891_v24  ;;  %v3808_v5 = vrot.slane %v12618_v46, %v14891_v24 }
0x111b   :  { %v12662_v54 = vpop.eup %8897  ;;  %v12669_v19 = vsel %vm3119_vm6, %v3301_v57, %v2798_v8  ;;  %5554 = vmatprep.mubr.f32.mxu0 %v14525_v52  ;;  %5707 = vmatpush1.msra.mxu0 %v5277_v9  ;;  %v4275_v48 = vcombine.high %v4273_v7, %v4273_v7  ;;  %v4296_v20 = vrot.slane %v4274_v35, %v12077_v58 }
0x111c   :  { %v3804_v17 = vrot.slane %v3787_v39, %v14891_v24  ;;  %5708 = vmatprep.subr.mxu0 %v5274_v38  ;;  %v3788_v30 = vcombine.high %v3784_v16, %v3784_v16  ;;  %v3830_v2 = vsel %vm3638_vm7, %v3796_v55, %v3311_v37  ;;  %v3812_v8 = vrot.slane %v3784_v16, %v14891_v24 }
0x111d   :  { %5709 = vmatpush1.msra.mxu0 %v5273_v10  ;;  %v4289_v27 = vrot.slane %v4273_v7, %v12077_v58  ;;  %v4304_v36 = vcombine.high %v4282_v15, %v4282_v15  ;;  %v3816_v44 = vrot.slane %v3786_v32, %v14891_v24  ;;  %v4311_v59 = vrot.slane %v4282_v15, %v14891_v24 }
0x111e   :  { %5555 = vmatmul.mubr.f32.gmra.mxu0 %v12662_v54  ;;  %5710 = vmatprep.subr.mxu0 %v5270_v41  ;;  %v3831_v29 = vsel %vm3638_vm7, %v3800_v25, %v3312_v40  ;;  %v3833_v63 = vsel %vm3638_vm7, %v3808_v5, %v3314_v12  ;;  %v12694_v31 = vrot.slane %v4275_v48, %v12077_v58 }
0x111f   :  { %5560 = vmatprep.mubr.f32.mxu0 %v14525_v52  ;;  %v4315_v26 = vrot.slane %v4296_v20, %v14891_v24  ;;  %v3832_v28 = vsel %vm3638_vm7, %v3804_v17, %v3313_v45  ;;  %v3834_v4 = vsel %vm3638_vm7, %v3812_v8, %v3315_v1  ;;  %v4305_v49 = vcombine.high %v4289_v27, %v4289_v27 }
0x1120   :  { %v4319_v46 = vrot.slane %v4304_v36, %v14891_v24  ;;  %v4327_v37 = vrot.slane %v4289_v27, %v14891_v24  ;;  %v3835_v40 = vsel %vm3638_vm7, %v3816_v44, %v3316_v53  ;;  %v4331_v7 = vrot.slane %v12694_v31, %v14891_v24  ;;  %v5351_v36 = vld [vmem:[#allocation6 + $0x1c0] sm:$0xff] }
0x1121   :  { %v4349_v39 = vsel %vm4157_vm8, %v4315_v26, %v3830_v2  ;;  %v4307_v35 = vcombine.high %v12694_v31, %v12694_v31  ;;  %v4335_v32 = vrot.slane %v4305_v49, %v14891_v24  ;;  %v5339_v49 = vld [vmem:[#allocation6 + $0x160] sm:$0xff] }
0x1122   :  { %v4350_v1 = vsel %vm4157_vm8, %v4319_v46, %v3831_v29  ;;  %v4352_v38 = vsel %vm4157_vm8, %v4327_v37, %v3833_v63  ;;  %v5348_v29 = vld [vmem:[#allocation6 + $0x1a8] sm:$0xff]  ;;  %v5335_v37 = vld [vmem:[#allocation6 + $0x140] sm:$0xff] }
0x1123   :  { %v5336_v46 = vld [vmem:[#allocation6 + $0x148] sm:$0xff] }
0x1139   :  { %v4892_v21 = vpop.permute.xlu0 %4891 }
0x113a   :  { %4915 = vst.msk [vmem:[%s14073_s26] sm:$0xff] %vm153_vm0, %v4892_v21  ;;  %v3829_v21 = vsel %vm3638_vm7, %v3792_v22, %v3310_v51  ;;  %v4306_v51 = vcombine.high %v4296_v20, %v4296_v20  ;;  %v4339_v20 = vrot.slane %v4307_v35, %v14891_v24  ;;  %v5315_v35 = vld [vmem:[#allocation6 + $0xa0] sm:$0xff] }
0x113b   :  { %v4348_v12 = vsel %vm4157_vm8, %v4311_v59, %v3829_v21  ;;  %v4353_v59 = vsel %vm4157_vm8, %v4331_v7, %v3834_v4  ;;  %v5343_v4 = vld [vmem:[#allocation6 + $0x180] sm:$0xff]  ;;  %v5316_v7 = vld [vmem:[#allocation6 + $0xa8] sm:$0xff] }
0x113c   :  { %v4323_v22 = vrot.slane %v4306_v51, %v14891_v24 }
0x113d   :  { %v4896_v42 = vpop.permute.xlu0 %4895 }
0x113e   :  { %4917 = vst.msk [vmem:[%s14073_s26 + $0x10] sm:$0xff] %vm153_vm0, %v4896_v42  ;;  %v3820_v42 = vrot.slane %v3788_v30, %v14891_v24 }
0x1140   :  { %v3836_v26 = vsel %vm3638_vm7, %v3820_v42, %v12669_v19  ;;  %v5340_v42 = vld [vmem:[#allocation6 + $0x168] sm:$0xff] }
0x1141   :  { %v4900_v23 = vpop.permute.xlu0 %4899  ;;  %v4355_v19 = vsel %vm4157_vm8, %v4339_v20, %v3836_v26  ;;  %v5280_v20 = vld [vmem:[#allocation4 + $0x188] sm:$0xff] }
0x1142   :  { %4919 = vst.msk [vmem:[%s14073_s26 + $0x20] sm:$0xff] %vm153_vm0, %v4900_v23  ;;  %v5260_v26 = vld [vmem:[#allocation4 + $0xe8] sm:$0xff] }
0x1144   :  { %v4672_v18 = vpop.permute.xlu1 %4671 }
0x1145   :  { %v4674_v33 = vmul.f32 %v4672_v18, %v708_v34  ;;  %v4904_v13 = vpop.permute.xlu0 %4903  ;;  %v5355_v18 = vld [vmem:[#allocation6 + $0x1e0] sm:$0xff] }
0x1146   :  { %4921 = vst.msk [vmem:[%s14073_s26 + $0x30] sm:$0xff] %vm153_vm0, %v4904_v13  ;;  %v4351_v13 = vsel %vm4157_vm8, %v4323_v22, %v3832_v28  ;;  %v5347_v28 = vld [vmem:[#allocation6 + $0x1a0] sm:$0xff] }
0x1147   :  { %v4675_v43 = vadd.f32 %v4674_v33, %v12292_v14  ;;  %v5352_v33 = vld [vmem:[#allocation6 + $0x1c8] sm:$0xff]  ;;  %v5319_v22 = vld [vmem:[#allocation6 + $0xc0] sm:$0xff] }
0x1148   :  { %v4894_v62 = vpop.permute.xlu1 %4893 }
0x1149   :  { %v4778_v47 = vcombine.high %v4675_v43, %v4675_v43  ;;  %v4785_v14 = vrot.slane %v4675_v43, %v12077_v58  ;;  %4916 = vst.msk [vmem:[%s14073_s26 + $0x8] sm:$0xff] %vm153_vm0, %v4894_v62  ;;  %v4354_v43 = vsel %vm4157_vm8, %v4335_v32, %v3835_v40  ;;  %v5332_v40 = vld [vmem:[#allocation6 + $0x128] sm:$0xff]  ;;  %v5299_v32 = vld [vmem:[#allocation6 + $0x20] sm:$0xff] }
0x114b   :  { %v4792_v0 = vrot.slane %v4778_v47, %v12077_v58  ;;  %v4793_v57 = vcombine.high %v4785_v14, %v4785_v14  ;;  %v4801_v56 = vrot.slane %v4785_v14, %v12077_v58  ;;  %v5344_v47 = vld [vmem:[#allocation6 + $0x188] sm:$0xff] }
0x114c   :  { %v4898_v61 = vpop.permute.xlu1 %4897 }
0x114d   :  { %v4794_v9 = vcombine.high %v4792_v0, %v4792_v0  ;;  %v4808_v16 = vrot.slane %v4792_v0, %v12077_v58  ;;  %v4815_v55 = vrot.slane %v4793_v57, %v12077_v58  ;;  %v4823_v23 = vcombine.high %v4801_v56, %v4801_v56  ;;  %4918 = vst.msk [vmem:[%s14073_s26 + $0x18] sm:$0xff] %vm153_vm0, %v4898_v61  ;;  %v5331_v0 = vld [vmem:[#allocation6 + $0x120] sm:$0xff]  ;;  %v5328_v57 = vld [vmem:[#allocation6 + $0x108] sm:$0xff] }
0x114e   :  { %v4830_v45 = vrot.slane %v4801_v56, %v14891_v24  ;;  %v5327_v56 = vld [vmem:[#allocation6 + $0x100] sm:$0xff] }
0x114f   :  { %v4834_v15 = vrot.slane %v4815_v55, %v14891_v24  ;;  %v4838_v34 = vrot.slane %v4823_v23, %v14891_v24  ;;  %v4825_v53 = vcombine.high %v4815_v55, %v4815_v55  ;;  %v4846_v10 = vrot.slane %v4808_v16, %v14891_v24  ;;  %v5323_v61 = vld [vmem:[#allocation6 + $0xe0] sm:$0xff]  ;;  %v5308_v55 = vld [vmem:[#allocation6 + $0x68] sm:$0xff] }
0x1150   :  { %v4867_v25 = vsel %vm4676_vm9, %v4830_v45, %v4348_v12  ;;  %v4902_v5 = vpop.permute.xlu1 %4901  ;;  %v4822_v41 = vrot.slane %v4794_v9, %v12077_v58  ;;  %v4824_v48 = vcombine.high %v4808_v16, %v4808_v16  ;;  %v5324_v12 = vld [vmem:[#allocation6 + $0xe8] sm:$0xff]  ;;  %v5311_v16 = vld [vmem:[#allocation6 + $0x80] sm:$0xff] }
0x1151   :  { %4923 = vst.msk [vmem:[%s14074_s27] sm:$0xff] %vm153_vm0, %v4867_v25  ;;  %8589 = vmatprep.mubr.msk.f32.mxu1 %vm153_vm0, %v4867_v25  ;;  %4920 = vst.msk [vmem:[%s14073_s26 + $0x28] sm:$0xff] %vm153_vm0, %v4902_v5  ;;  %v4868_v21 = vsel %vm4676_vm9, %v4834_v15, %v4349_v39  ;;  %v4869_v58 = vsel %vm4676_vm9, %v4838_v34, %v4350_v1  ;;  %v4842_v17 = vrot.slane %v4825_v53, %v14891_v24  ;;  %v5320_v39 = vld [vmem:[#allocation6 + $0xc8] sm:$0xff]  ;;  %v5307_v23 = vld [vmem:[#allocation6 + $0x60] sm:$0xff] }
0x1152   :  { %v4871_v30 = vsel %vm4676_vm9, %v4846_v10, %v4352_v38  ;;  %4924 = vst.msk [vmem:[%s14074_s27 + $0x8] sm:$0xff] %vm153_vm0, %v4868_v21  ;;  %8590 = vmatmul.mubr.msk.f32.vlgmr.msra.gmra.mxu1 %vm153_vm0, %v4868_v21  ;;  %4925 = vst.msk [vmem:[%s14074_s27 + $0x10] sm:$0xff] %vm153_vm0, %v4869_v58  ;;  %v4850_v2 = vrot.slane %v4822_v41, %v14891_v24  ;;  %v4854_v8 = vrot.slane %v4824_v48, %v14891_v24  ;;  %v5312_v9 = vld [vmem:[#allocation6 + $0x88] sm:$0xff]  ;;  %v5303_v1 = vld [vmem:[#allocation6 + $0x40] sm:$0xff] }
0x1153   :  { %4927 = vst.msk [vmem:[%s14074_s27 + $0x20] sm:$0xff] %vm153_vm0, %v4871_v30  ;;  %v4826_v27 = vcombine.high %v4822_v41, %v4822_v41  ;;  %8592 = vmatprep.mubr.msk.f32.mxu1 %vm153_vm0, %v4869_v58  ;;  %v4870_v44 = vsel %vm4676_vm9, %v4842_v17, %v4351_v13  ;;  %5360 = vmatpush1.msra.mxu1 %v5355_v18  ;;  %v5304_v45 = vld [vmem:[#allocation6 + $0x48] sm:$0xff]  ;;  %v5295_v34 = vld [vmem:[#allocation6] sm:$0xff] }
0x1154   :  { %v4906_v63 = vpop.permute.xlu1 %4905  ;;  %4926 = vst.msk [vmem:[%s14074_s27 + $0x18] sm:$0xff] %vm153_vm0, %v4870_v44  ;;  %v4872_v31 = vsel %vm4676_vm9, %v4850_v2, %v4353_v59  ;;  %v4873_v51 = vsel %vm4676_vm9, %v4854_v8, %v4354_v43  ;;  %5361 = vmatprep.subr.mxu1 %v5352_v33  ;;  %v5300_v38 = vld [vmem:[#allocation6 + $0x28] sm:$0xff]  ;;  %v5291_v10 = vld [vmem:[#allocation4 + $0x1e0] sm:$0xff] }
0x1155   :  { %v4858_v62 = vrot.slane %v4826_v27, %v14891_v24  ;;  %4922 = vst.msk [vmem:[%s14073_s26 + $0x38] sm:$0xff] %vm153_vm0, %v4906_v63  ;;  %4928 = vst.msk [vmem:[%s14074_s27 + $0x28] sm:$0xff] %vm153_vm0, %v4872_v31  ;;  %5362 = vmatpush1.msra.mxu1 %v5351_v36  ;;  %v5296_v15 = vld [vmem:[#allocation6 + $0x8] sm:$0xff]  ;;  %v5287_v5 = vld [vmem:[#allocation4 + $0x1c0] sm:$0xff] }
0x1156   :  { %4929 = vst.msk [vmem:[%s14074_s27 + $0x30] sm:$0xff] %vm153_vm0, %v4873_v51  ;;  %8593 = vmatmul.mubr.msk.f32.gmra.mxu1 %vm153_vm0, %v4870_v44  ;;  %5363 = vmatprep.subr.mxu1 %v5348_v29  ;;  %v5292_v53 = vld [vmem:[#allocation4 + $0x1e8] sm:$0xff]  ;;  %v5283_v48 = vld [vmem:[#allocation4 + $0x1a0] sm:$0xff]  ;;  %v5266_v63 = vld [vmem:[#allocation4 + $0x118] sm:$0xff] }
0x1157   :  { %v4874_v14 = vsel %vm4676_vm9, %v4858_v62, %v4355_v19  ;;  %8595 = vmatprep.mubr.msk.f32.mxu1 %vm153_vm0, %v4871_v30  ;;  %5364 = vmatpush1.msra.mxu1 %v5347_v28  ;;  %v5288_v25 = vld [vmem:[#allocation4 + $0x1c8] sm:$0xff]  ;;  %v5279_v18 = vld [vmem:[#allocation4 + $0x180] sm:$0xff]  ;;  %v8613_v30 = vpop.f32.mrf.mxu0  ;;  %v5262_v62 = vld [vmem:[#allocation4 + $0xf8] sm:$0xff] }
0x1158   :  { %4930 = vst.msk [vmem:[%s14074_s27 + $0x38] sm:$0xff] %vm153_vm0, %v4874_v14  ;;  %5365 = vmatprep.subr.mxu1 %v5344_v47  ;;  %v5284_v41 = vld [vmem:[#allocation4 + $0x1a8] sm:$0xff]  ;;  %v5271_v17 = vld [vmem:[#allocation4 + $0x140] sm:$0xff]  ;;  %v5210_v2 = vadd.f32 %v8613_v30, %v12509_v60  ;;  %v5261_v19 = vld [vmem:[#allocation4 + $0xf0] sm:$0xff] }
0x1159   :  { %5366 = vmatpush1.msra.mxu1 %v5343_v4  ;;  %v5276_v21 = vld [vmem:[#allocation4 + $0x168] sm:$0xff]  ;;  %v5204_v13 = vpop.f32.mrf.mxu0  ;;  %v5259_v28 = vld [vmem:[#allocation4 + $0xe0] sm:$0xff] }
0x115a   :  { %8596 = vmatmul.mubr.msk.f32.gmra.mxu1 %vm153_vm0, %v4872_v31  ;;  %5367 = vmatprep.subr.mxu1 %v5340_v42  ;;  %v5272_v58 = vld [vmem:[#allocation4 + $0x148] sm:$0xff]  ;;  %v5205_v8 = vadd.f32 %v12509_v60, %v5204_v13  ;;  %v5263_v31 = vld [vmem:[#allocation4 + $0x100] sm:$0xff] }
0x115b   :  { %8598 = vmatprep.mubr.msk.f32.mxu1 %vm153_vm0, %v4873_v51  ;;  %5368 = vmatpush1.msra.mxu1 %v5339_v49  ;;  %v5268_v33 = vld [vmem:[#allocation4 + $0x128] sm:$0xff]  ;;  %v5255_v4 = vld [vmem:[#allocation4 + $0xc0] sm:$0xff]  ;;  %v5257_v49 = vld [vmem:[#allocation4 + $0xd0] sm:$0xff] }
0x115c   :  { %5369 = vmatprep.subr.mxu1 %v5336_v46  ;;  %8899 = vtanh.f32 %v5205_v8  ;;  %v5264_v29 = vld [vmem:[#allocation4 + $0x108] sm:$0xff]  ;;  %v13045_v24 = vld [vmem:[#allocation7] sm:$0xff] }
0x115d   :  { %5370 = vmatpush1.msra.mxu1 %v5335_v37  ;;  %8901 = vtanh.f32 %v5210_v2  ;;  %v5256_v47 = vld [vmem:[#allocation4 + $0xc8] sm:$0xff]  ;;  %v5251_v37 = vld [vmem:[#allocation4 + $0xa0] sm:$0xff]  ;;  %14947 = vst [vmem:[#allocation36_spill] sm:$0xff] %v13045_v24 }
0x115e   :  { %8599 = vmatmul.mubr.msk.f32.gmra.mxu1 %vm153_vm0, %v4874_v14  ;;  %5371 = vmatprep.subr.mxu1 %v5332_v40  ;;  %v5258_v14 = vld [vmem:[#allocation4 + $0xd8] sm:$0xff]  ;;  %v5252_v42 = vld [vmem:[#allocation4 + $0xa8] sm:$0xff] }
0x115f   :  { %5372 = vmatpush1.msra.mxu1 %v5331_v0  ;;  %5423 = vmatprep.mubr.f32.mxu1 %v14525_v52  ;;  %v5254_v40 = vld [vmem:[#allocation4 + $0xb8] sm:$0xff]  ;;  %v5248_v0 = vld [vmem:[#allocation4 + $0x88] sm:$0xff] }
0x1160   :  { %5373 = vmatprep.subr.mxu1 %v5328_v57  ;;  %v5253_v57 = vld [vmem:[#allocation4 + $0xb0] sm:$0xff]  ;;  %v12858_v8 = vld [vmem:[#allocation7 + $0x1c8] sm:$0xff] }
0x1161   :  { %5374 = vmatpush1.msra.mxu1 %v5327_v56  ;;  %v5247_v56 = vld [vmem:[#allocation4 + $0x80] sm:$0xff] }
0x1162   :  { %5375 = vmatprep.subr.mxu1 %v5324_v12  ;;  %v5250_v12 = vld [vmem:[#allocation4 + $0x98] sm:$0xff] }
0x1163   :  { %5376 = vmatpush1.msra.mxu1 %v5323_v61  ;;  %v5244_v61 = vld [vmem:[#allocation4 + $0x68] sm:$0xff] }
0x1164   :  { %5377 = vmatprep.subr.mxu1 %v5320_v39  ;;  %v5249_v39 = vld [vmem:[#allocation4 + $0x90] sm:$0xff] }
0x1165   :  { %5378 = vmatpush1.msra.mxu1 %v5319_v22  ;;  %v5243_v22 = vld [vmem:[#allocation4 + $0x60] sm:$0xff] }
0x1166   :  { %5379 = vmatprep.subr.mxu1 %v5316_v7  ;;  %v5246_v7 = vld [vmem:[#allocation4 + $0x78] sm:$0xff] }
0x1167   :  { %5380 = vmatpush1.msra.mxu1 %v5315_v35  ;;  %v5240_v35 = vld [vmem:[#allocation4 + $0x48] sm:$0xff] }
0x1168   :  { %5381 = vmatprep.subr.mxu1 %v5312_v9  ;;  %v5245_v9 = vld [vmem:[#allocation4 + $0x70] sm:$0xff] }
0x1169   :  { %5382 = vmatpush1.msra.mxu1 %v5311_v16  ;;  %v8900_v59 = vpop.eup %8899  ;;  %v5239_v16 = vld [vmem:[#allocation4 + $0x40] sm:$0xff] }
0x116a   :  { %5383 = vmatprep.subr.mxu1 %v5308_v55  ;;  %5561 = vmatmul.mubr.f32.gmra.mxu0 %v8900_v59  ;;  %v8902_v43 = vpop.eup %8901  ;;  %v5242_v55 = vld [vmem:[#allocation4 + $0x58] sm:$0xff] }
0x116b   :  { %5384 = vmatpush1.msra.mxu1 %v5307_v23  ;;  %5566 = vmatprep.mubr.f32.mxu0 %v14525_v52  ;;  %v5236_v23 = vld [vmem:[#allocation4 + $0x28] sm:$0xff] }
0x116c   :  { %5385 = vmatprep.subr.mxu1 %v5304_v45  ;;  %v5241_v45 = vld [vmem:[#allocation4 + $0x50] sm:$0xff] }
0x116d   :  { %5386 = vmatpush1.msra.mxu1 %v5303_v1  ;;  %v5235_v1 = vld [vmem:[#allocation4 + $0x20] sm:$0xff] }
0x116e   :  { %5387 = vmatprep.subr.mxu1 %v5300_v38  ;;  %5567 = vmatmul.mubr.f32.gmra.mxu0 %v8902_v43  ;;  %v5238_v38 = vld [vmem:[#allocation4 + $0x38] sm:$0xff] }
0x116f   :  { %5388 = vmatpush1.msra.mxu1 %v5299_v32  ;;  %5572 = vmatprep.mubr.f32.mxu0 %v14525_v52  ;;  %v5232_v32 = vld [vmem:[#allocation4 + $0x8] sm:$0xff] }
0x1170   :  { %5389 = vmatprep.subr.mxu1 %v5296_v15  ;;  %v5237_v15 = vld [vmem:[#allocation4 + $0x30] sm:$0xff] }
0x1171   :  { %5390 = vmatpush1.msra.mxu1 %v5295_v34  ;;  %v5231_v34 = vld [vmem:[#allocation4] sm:$0xff] }
0x1172   :  { %5424 = vmatmul.mubr.f32.vlgmr.msra.gmra.mxu1 %v12582_v50  ;;  %5585 = vmatprep.subr.mxu1 %v5292_v53  ;;  %v5275_v50 = vld [vmem:[#allocation4 + $0x160] sm:$0xff]  ;;  %v5234_v53 = vld [vmem:[#allocation4 + $0x18] sm:$0xff] }
0x1173   :  { %5429 = vmatprep.mubr.f32.mxu1 %v14525_v52  ;;  %5586 = vmatpush1.msra.mxu1 %v5291_v10  ;;  %v5233_v10 = vld [vmem:[#allocation4 + $0x10] sm:$0xff] }
0x1174   :  { %5587 = vmatprep.subr.mxu1 %v5288_v25  ;;  %v12837_v25 = vld [vmem:[#allocation7 + $0x1e8] sm:$0xff] }
0x1175   :  { %5588 = vmatpush1.msra.mxu1 %v5287_v5  ;;  %14897 = vst [vmem:[#allocation60_spill] sm:$0xff] %v12837_v25  ;;  %v12839_v5 = vld [vmem:[#allocation7 + $0x1f8] sm:$0xff] }
0x1176   :  { %5430 = vmatmul.mubr.f32.gmra.mxu1 %v12598_v11  ;;  %5589 = vmatprep.subr.mxu1 %v5284_v41  ;;  %v5267_v11 = vld [vmem:[#allocation4 + $0x120] sm:$0xff]  ;;  %14898 = vst [vmem:[#allocation62_spill] sm:$0xff] %v12839_v5 }
0x1177   :  { %5435 = vmatprep.mubr.f32.mxu1 %v14525_v52  ;;  %5590 = vmatpush1.msra.mxu1 %v5283_v48  ;;  %v12848_v48 = vld [vmem:[%s14060_s13] ss:$0 sm:$0xff] }
0x1178   :  { %5591 = vmatprep.subr.mxu1 %v5280_v20 }
0x1179   :  { %5592 = vmatpush1.msra.mxu1 %v5279_v18 }
0x117a   :  { %5436 = vmatmul.mubr.f32.gmra.mxu1 %v12629_v3  ;;  %5593 = vmatprep.subr.mxu1 %v5276_v21  ;;  %v8616_v3 = vpop.f32.mrf.mxu0 }
0x117b   :  { %5441 = vmatprep.mubr.f32.mxu1 %v14525_v52  ;;  %5594 = vmatpush1.msra.mxu1 %v5275_v50  ;;  %v5220_v44 = vadd.f32 %v8616_v3, %v12509_v60  ;;  %v12860_v3 = vld [vmem:[#allocation7 + $0x1d8] sm:$0xff] }
0x117c   :  { %5595 = vmatprep.subr.mxu1 %v5272_v58  ;;  %v5214_v27 = vpop.f32.mrf.mxu0 }
0x117d   :  { %5596 = vmatpush1.msra.mxu1 %v5271_v17  ;;  %v5215_v36 = vadd.f32 %v12509_v60, %v5214_v27  ;;  %v5265_v60 = vld [vmem:[#allocation4 + $0x110] sm:$0xff]  ;;  %v12862_v27 = vld [vmem:[#allocation7 + $0x1c0] sm:$0xff] }
0x117e   :  { %5442 = vmatmul.mubr.f32.gmra.mxu1 %v12662_v54  ;;  %5597 = vmatprep.subr.mxu1 %v5268_v33  ;;  %v5269_v54 = vld [vmem:[#allocation4 + $0x130] sm:$0xff]  ;;  %v12853_v33 = vld [vmem:[#allocation7 + $0x1e0] sm:$0xff] }
0x117f   :  { %5447 = vmatprep.mubr.f32.mxu1 %v14525_v52  ;;  %5598 = vmatpush1.msra.mxu1 %v5267_v11  ;;  %8903 = vtanh.f32 %v5215_v36  ;;  %v12855_v11 = vld [vmem:[#allocation7 + $0x1f0] sm:$0xff]  ;;  %v12866_v36 = vld [vmem:[#allocation7 + $0x1a8] sm:$0xff] }
0x1180   :  { %8905 = vtanh.f32 %v5220_v44  ;;  %5711 = vmatpush1.msra.mxu0 %v5269_v54  ;;  %5599 = vmatprep.subr.mxu1 %v5264_v29  ;;  %v12878_v29 = vld [vmem:[#allocation7 + $0x1b8] sm:$0xff] }
0x1181   :  { %5712 = vmatprep.subr.mxu0 %v5266_v63  ;;  %5600 = vmatpush1.msra.mxu1 %v5263_v31  ;;  %v12880_v63 = vld [vmem:[#allocation7 + $0x188] sm:$0xff] }
0x1182   :  { %5448 = vmatmul.mubr.f32.gmra.mxu1 %v8900_v59  ;;  %5601 = vmatprep.subr.mxu1 %v5260_v26  ;;  %v12870_v59 = vld [vmem:[#allocation7 + $0x1d0] sm:$0xff]  ;;  %v12889_v26 = vld [vmem:[#allocation7 + $0x198] sm:$0xff] }
0x1183   :  { %5453 = vmatprep.mubr.f32.mxu1 %v14525_v52  ;;  %5713 = vmatpush1.msra.mxu0 %v5265_v60  ;;  %v12884_v60 = vld [vmem:[#allocation7 + $0x1b0] sm:$0xff]  ;;  %14900 = vst [vmem:[#allocation73_spill] sm:$0xff] %v12889_v26 }
0x1184   :  { %5602 = vmatpush1.msra.mxu1 %v5259_v28  ;;  %5714 = vmatprep.subr.mxu0 %v5262_v62  ;;  %v12893_v62 = vld [vmem:[#allocation7 + $0x168] sm:$0xff]  ;;  %v12897_v28 = vld [vmem:[#allocation7 + $0x190] sm:$0xff] }
0x1185   :  { %5603 = vmatprep.subr.mxu1 %v5256_v47  ;;  %5715 = vmatpush1.msra.mxu0 %v5261_v19  ;;  %14901 = vst [vmem:[#allocation74_spill] sm:$0xff] %v12893_v62  ;;  %14902 = vst [vmem:[#allocation76_spill] sm:$0xff] %v12897_v28  ;;  %v12901_v19 = vld [vmem:[#allocation7 + $0x160] sm:$0xff] }
0x1186   :  { %5454 = vmatmul.mubr.f32.gmra.mxu1 %v8902_v43  ;;  %5716 = vmatprep.subr.mxu0 %v5258_v14  ;;  %v12874_v43 = vld [vmem:[#allocation7 + $0x1a0] sm:$0xff]  ;;  %14903 = vst [vmem:[#allocation79_spill] sm:$0xff] %v12901_v19 }
0x1187   :  { %5459 = vmatprep.mubr.f32.mxu1 %v14525_v52  ;;  %5604 = vmatpush1.msra.mxu1 %v5255_v4  ;;  %v12905_v4 = vld [vmem:[#allocation7 + $0x178] sm:$0xff] }
0x1188   :  { %5605 = vmatprep.subr.mxu1 %v5252_v42  ;;  %5717 = vmatpush1.msra.mxu0 %v5257_v49  ;;  %14904 = vst [vmem:[#allocation77_spill] sm:$0xff] %v12905_v4  ;;  %v12907_v42 = vld [vmem:[#allocation7 + $0x148] sm:$0xff] }
0x1189   :  { %5606 = vmatpush1.msra.mxu1 %v5251_v37  ;;  %5718 = vmatprep.subr.mxu0 %v5254_v40  ;;  %14905 = vst [vmem:[#allocation78_spill] sm:$0xff] %v12907_v42  ;;  %v12913_v37 = vld [vmem:[#allocation7 + $0x140] sm:$0xff]  ;;  %v12916_v40 = vld [vmem:[#allocation7 + $0x158] sm:$0xff] }
0x118a   :  { %5607 = vmatprep.subr.mxu1 %v5248_v0  ;;  %5719 = vmatpush1.msra.mxu0 %v5253_v57  ;;  %14907 = vst [vmem:[#allocation45_spill] sm:$0xff] %v12913_v37  ;;  %14908 = vst [vmem:[#allocation46_spill] sm:$0xff] %v12916_v40  ;;  %v12920_v0 = vld [vmem:[#allocation7 + $0x128] sm:$0xff] }
0x118b   :  { %5608 = vmatpush1.msra.mxu1 %v5247_v56  ;;  %5720 = vmatprep.subr.mxu0 %v5250_v12  ;;  %14909 = vst [vmem:[#allocation47_spill] sm:$0xff] %v12920_v0  ;;  %v12924_v56 = vld [vmem:[#allocation7 + $0x150] sm:$0xff]  ;;  %v12928_v12 = vld [vmem:[#allocation7 + $0x120] sm:$0xff] }
0x118c   :  { %v8904_v51 = vpop.eup %8903  ;;  %5609 = vmatprep.subr.mxu1 %v5244_v61  ;;  %5721 = vmatpush1.msra.mxu0 %v5249_v39  ;;  %14910 = vst [vmem:[#allocation48_spill] sm:$0xff] %v12924_v56  ;;  %14911 = vst [vmem:[#allocation49_spill] sm:$0xff] %v12928_v12  ;;  %v12932_v39 = vld [vmem:[#allocation7 + $0x138] sm:$0xff] }
0x118d   :  { %5460 = vmatmul.mubr.f32.gmra.mxu1 %v8904_v51  ;;  %5573 = vmatmul.mubr.f32.gmra.mxu0 %v8904_v51  ;;  %v8906_v46 = vpop.eup %8905  ;;  %v12886_v51 = vld [vmem:[#allocation7 + $0x180] sm:$0xff]  ;;  %14912 = vst [vmem:[#allocation50_spill] sm:$0xff] %v12932_v39 }
0x118e   :  { %5465 = vmatprep.mubr.f32.mxu1 %v14525_v52  ;;  %5578 = vmatprep.mubr.f32.mxu0 %v14525_v52  ;;  %14899 = vst [vmem:[#allocation75_spill] sm:$0xff] %v12886_v51 }
0x118f   :  { %5610 = vmatpush1.msra.mxu1 %v5243_v22  ;;  %5722 = vmatprep.subr.mxu0 %v5246_v7  ;;  %v12934_v22 = vld [vmem:[#allocation7 + $0x108] sm:$0xff] }
0x1190   :  { %5611 = vmatprep.subr.mxu1 %v5240_v35  ;;  %5723 = vmatpush1.msra.mxu0 %v5245_v9  ;;  %14913 = vst [vmem:[#allocation12_spill] sm:$0xff] %v12934_v22  ;;  %v12938_v35 = vld [vmem:[#allocation7 + $0x130] sm:$0xff]  ;;  %v12940_v9 = vld [vmem:[#allocation7 + $0x100] sm:$0xff] }
0x1191   :  { %5466 = vmatmul.mubr.f32.gmra.mxu1 %v8906_v46  ;;  %5579 = vmatmul.mubr.f32.gmra.mxu0 %v8906_v46  ;;  %v12911_v46 = vld [vmem:[#allocation7 + $0x170] sm:$0xff]  ;;  %14914 = vst [vmem:[#allocation89_spill] sm:$0xff] %v12938_v35  ;;  %14915 = vst [vmem:[#allocation13_spill] sm:$0xff] %v12940_v9 }
0x1192   :  { %5612 = vmatpush1.msra.mxu1 %v5239_v16  ;;  %5724 = vmatprep.subr.mxu0 %v5242_v55  ;;  %14906 = vst [vmem:[#allocation80_spill] sm:$0xff] %v12911_v46  ;;  %v12943_v16 = vld [vmem:[#allocation7 + $0x118] sm:$0xff]  ;;  %v12947_v55 = vld [vmem:[#allocation7 + $0xe8] sm:$0xff] }
0x1193   :  { %5613 = vmatprep.subr.mxu1 %v5236_v23  ;;  %5725 = vmatpush1.msra.mxu0 %v5241_v45  ;;  %14916 = vst [vmem:[#allocation14_spill] sm:$0xff] %v12943_v16  ;;  %14917 = vst [vmem:[#allocation83_spill] sm:$0xff] %v12947_v55  ;;  %v12951_v23 = vld [vmem:[#allocation7 + $0x110] sm:$0xff]  ;;  %v12955_v45 = vld [vmem:[#allocation7 + $0xe0] sm:$0xff] }
0x1194   :  { %5614 = vmatpush1.msra.mxu1 %v5235_v1  ;;  %5726 = vmatprep.subr.mxu0 %v5238_v38  ;;  %14918 = vst [vmem:[#allocation81_spill] sm:$0xff] %v12951_v23  ;;  %14919 = vst [vmem:[#allocation82_spill] sm:$0xff] %v12955_v45  ;;  %v12959_v38 = vld [vmem:[#allocation7 + $0xf8] sm:$0xff] }
0x1195   :  { %5615 = vmatprep.subr.mxu1 %v5232_v32  ;;  %5727 = vmatpush1.msra.mxu0 %v5237_v15  ;;  %14920 = vst [vmem:[#allocation84_spill] sm:$0xff] %v12959_v38  ;;  %v12961_v32 = vld [vmem:[#allocation7 + $0xc8] sm:$0xff] }
0x1196   :  { %5616 = vmatpush1.msra.mxu1 %v5231_v34  ;;  %5728 = vmatprep.subr.mxu0 %v5234_v53  ;;  %14921 = vst [vmem:[#allocation44_spill] sm:$0xff] %v12961_v32  ;;  %v12965_v34 = vld [vmem:[#allocation7 + $0xf0] sm:$0xff]  ;;  %v12967_v53 = vld [vmem:[#allocation7 + $0xc0] sm:$0xff] }
0x1197   :  { %5649 = vmatprep.mubr.f32.mxu1 %v14525_v52  ;;  %5729 = vmatpush1.msra.mxu0 %v5233_v10  ;;  %14922 = vst [vmem:[#allocation56_spill] sm:$0xff] %v12965_v34  ;;  %14923 = vst [vmem:[#allocation57_spill] sm:$0xff] %v12967_v53  ;;  %v12970_v10 = vld [vmem:[#allocation7 + $0xd8] sm:$0xff] }
0x1198   :  { %5762 = vmatprep.mubr.f32.mxu0 %v14525_v52  ;;  %5929 = vmatprep.subr.mxu1 %v12837_v25  ;;  %14924 = vst [vmem:[#allocation59_spill] sm:$0xff] %v12970_v10 }
0x1199   :  { %6000 = vmatprep.subr.mxu0 %v12839_v5 }
0x1212   :  { %v8591_v41 = vpop.f32.mrf.mxu1 }
0x1213   :  { %v5044_v50 = vadd.f32 %v8591_v41, %v12848_v48  ;;  %v12974_v41 = vld [vmem:[#allocation7 + $0xa8] sm:$0xff] }
0x1214   :  { %v5038_v20 = vpop.f32.mrf.mxu1  ;;  %14925 = vst [vmem:[#allocation61_spill] sm:$0xff] %v12974_v41 }
0x1215   :  { %v5039_v18 = vadd.f32 %v12848_v48, %v5038_v20  ;;  %v12982_v20 = vld [vmem:[#allocation7 + $0xa0] sm:$0xff] }
0x1216   :  { %v8594_v21 = vpop.f32.mrf.mxu1  ;;  %14927 = vst [vmem:[#allocation66_spill] sm:$0xff] %v12982_v20 }
0x1217   :  { %8907 = vtanh.f32 %v5039_v18  ;;  %v5054_v2 = vadd.f32 %v8594_v21, %v12848_v48  ;;  %v12986_v21 = vld [vmem:[#allocation7 + $0xb8] sm:$0xff] }
0x1218   :  { %v5048_v58 = vpop.f32.mrf.mxu1  ;;  %8909 = vtanh.f32 %v5044_v50  ;;  %14928 = vst [vmem:[#allocation16_spill] sm:$0xff] %v12986_v21  ;;  %v12988_v50 = vld [vmem:[#allocation7 + $0x88] sm:$0xff] }
0x1219   :  { %v5049_v17 = vadd.f32 %v12848_v48, %v5048_v58  ;;  %14929 = vst [vmem:[#allocation17_spill] sm:$0xff] %v12988_v50  ;;  %v12991_v58 = vld [vmem:[#allocation7 + $0xb0] sm:$0xff] }
0x121a   :  { %v8597_v30 = vpop.f32.mrf.mxu1  ;;  %14930 = vst [vmem:[#allocation18_spill] sm:$0xff] %v12991_v58 }
0x121b   :  { %8911 = vtanh.f32 %v5049_v17  ;;  %v5064_v49 = vadd.f32 %v8597_v30, %v12848_v48  ;;  %v12993_v17 = vld [vmem:[#allocation7 + $0x80] sm:$0xff]  ;;  %v12996_v30 = vld [vmem:[#allocation7 + $0x98] sm:$0xff] }
0x121c   :  { %v5058_v44 = vpop.f32.mrf.mxu1  ;;  %8913 = vtanh.f32 %v5054_v2  ;;  %14931 = vst [vmem:[#allocation19_spill] sm:$0xff] %v12993_v17  ;;  %14932 = vst [vmem:[#allocation20_spill] sm:$0xff] %v12996_v30  ;;  %v13004_v2 = vld [vmem:[#allocation7 + $0x90] sm:$0xff] }
0x121d   :  { %v5059_v31 = vadd.f32 %v12848_v48, %v5058_v44  ;;  %14934 = vst [vmem:[#allocation22_spill] sm:$0xff] %v13004_v2  ;;  %v13008_v44 = vld [vmem:[#allocation7 + $0x60] sm:$0xff] }
0x121e   :  { %v8600_v14 = vpop.f32.mrf.mxu1  ;;  %14935 = vst [vmem:[#allocation23_spill] sm:$0xff] %v13008_v44 }
0x121f   :  { %8915 = vtanh.f32 %v5059_v31  ;;  %v5074_v15 = vadd.f32 %v8600_v14, %v12848_v48  ;;  %v13012_v31 = vld [vmem:[#allocation7 + $0x78] sm:$0xff]  ;;  %v13017_v14 = vld [vmem:[#allocation7 + $0x70] sm:$0xff] }
0x1220   :  { %v5068_v57 = vpop.f32.mrf.mxu1  ;;  %8917 = vtanh.f32 %v5064_v49  ;;  %14936 = vst [vmem:[#allocation24_spill] sm:$0xff] %v13012_v31  ;;  %14938 = vst [vmem:[#allocation26_spill] sm:$0xff] %v13017_v14  ;;  %v13019_v49 = vld [vmem:[#allocation7 + $0x40] sm:$0xff] }
0x1221   :  { %v5069_v7 = vadd.f32 %v12848_v48, %v5068_v57  ;;  %v12978_v48 = vld [vmem:[#allocation7 + $0xd0] sm:$0xff]  ;;  %14939 = vst [vmem:[#allocation27_spill] sm:$0xff] %v13019_v49  ;;  %v13022_v57 = vld [vmem:[#allocation7 + $0x58] sm:$0xff] }
0x1222   :  { %14926 = vst [vmem:[#allocation64_spill] sm:$0xff] %v12978_v48  ;;  %14940 = vst [vmem:[#allocation67_spill] sm:$0xff] %v13022_v57 }
0x1223   :  { %8919 = vtanh.f32 %v5069_v7  ;;  %v13030_v7 = vld [vmem:[#allocation7 + $0x50] sm:$0xff] }
0x1224   :  { %v8908_v13 = vpop.eup %8907  ;;  %8921 = vtanh.f32 %v5074_v15  ;;  %14942 = vst [vmem:[#allocation72_spill] sm:$0xff] %v13030_v7 }
0x1225   :  { %5650 = vmatmul.mubr.f32.vlgmr.msra.gmra.mxu1 %v8908_v13  ;;  %5763 = vmatmul.mubr.f32.vlgmr.msra.gmra.mxu0 %v8908_v13  ;;  %v8910_v54 = vpop.eup %8909  ;;  %v13000_v13 = vld [vmem:[#allocation7 + $0x68] sm:$0xff] }
0x1226   :  { %5930 = vmatpush1.msra.mxu1 %v12853_v33  ;;  %6001 = vmatpush1.msra.mxu0 %v12855_v11  ;;  %14933 = vst [vmem:[#allocation21_spill] sm:$0xff] %v13000_v13 }
0x1227   :  { %5931 = vmatprep.subr.mxu1 %v12858_v8  ;;  %6002 = vmatprep.subr.mxu0 %v12860_v3 }
0x1228   :  { %5932 = vmatpush1.msra.mxu1 %v12862_v27  ;;  %5655 = vmatprep.mubr.f32.mxu1 %v14525_v52  ;;  %v8912_v47 = vpop.eup %8911 }
0x1229   :  { %5768 = vmatprep.mubr.f32.mxu0 %v14525_v52  ;;  %5933 = vmatprep.subr.mxu1 %v12866_v36  ;;  %v8914_v61 = vpop.eup %8913 }
0x122a   :  { %6003 = vmatpush1.msra.mxu0 %v12870_v59  ;;  %5656 = vmatmul.mubr.f32.gmra.mxu1 %v8910_v54 }
0x122b   :  { %5769 = vmatmul.mubr.f32.gmra.mxu0 %v8910_v54  ;;  %5934 = vmatpush1.msra.mxu1 %v12874_v43 }
0x122c   :  { %6004 = vmatprep.subr.mxu0 %v12878_v29  ;;  %5935 = vmatprep.subr.mxu1 %v12880_v63  ;;  %v8916_v1 = vpop.eup %8915 }
0x122d   :  { %6005 = vmatpush1.msra.mxu0 %v12884_v60  ;;  %5936 = vmatpush1.msra.mxu1 %v12886_v51  ;;  %v8918_v18 = vpop.eup %8917 }
0x122e   :  { %6006 = vmatprep.subr.mxu0 %v12889_v26  ;;  %5661 = vmatprep.mubr.f32.mxu1 %v14525_v52 }
0x122f   :  { %5774 = vmatprep.mubr.f32.mxu0 %v14525_v52  ;;  %5937 = vmatprep.subr.mxu1 %v12893_v62 }
0x1230   :  { %6007 = vmatpush1.msra.mxu0 %v12897_v28  ;;  %5662 = vmatmul.mubr.f32.gmra.mxu1 %v8912_v47  ;;  %v8920_v54 = vpop.eup %8919 }
0x1231   :  { %5775 = vmatmul.mubr.f32.gmra.mxu0 %v8912_v47  ;;  %5938 = vmatpush1.msra.mxu1 %v12901_v19  ;;  %v13014_v47 = vld [vmem:[#allocation7 + $0x48] sm:$0xff]  ;;  %v8922_v15 = vpop.eup %8921 }
0x1232   :  { %6008 = vmatprep.subr.mxu0 %v12905_v4  ;;  %5939 = vmatprep.subr.mxu1 %v12907_v42  ;;  %14937 = vst [vmem:[#allocation25_spill] sm:$0xff] %v13014_v47 }
0x1233   :  { %6009 = vmatpush1.msra.mxu0 %v12911_v46  ;;  %5940 = vmatpush1.msra.mxu1 %v12913_v37 }
0x1234   :  { %6010 = vmatprep.subr.mxu0 %v12916_v40  ;;  %5667 = vmatprep.mubr.f32.mxu1 %v14525_v52 }
0x1235   :  { %5780 = vmatprep.mubr.f32.mxu0 %v14525_v52  ;;  %5941 = vmatprep.subr.mxu1 %v12920_v0 }
0x1236   :  { %6011 = vmatpush1.msra.mxu0 %v12924_v56  ;;  %5668 = vmatmul.mubr.f32.gmra.mxu1 %v8914_v61 }
0x1237   :  { %5781 = vmatmul.mubr.f32.gmra.mxu0 %v8914_v61  ;;  %5942 = vmatpush1.msra.mxu1 %v12928_v12  ;;  %v13026_v61 = vld [vmem:[#allocation7 + $0x28] sm:$0xff] }
0x1238   :  { %6012 = vmatprep.subr.mxu0 %v12932_v39  ;;  %5943 = vmatprep.subr.mxu1 %v12934_v22  ;;  %14941 = vst [vmem:[#allocation69_spill] sm:$0xff] %v13026_v61 }
0x1239   :  { %6013 = vmatpush1.msra.mxu0 %v12938_v35  ;;  %5944 = vmatpush1.msra.mxu1 %v12940_v9 }
0x123a   :  { %6014 = vmatprep.subr.mxu0 %v12943_v16  ;;  %5673 = vmatprep.mubr.f32.mxu1 %v14525_v52 }
0x123b   :  { %5786 = vmatprep.mubr.f32.mxu0 %v14525_v52  ;;  %5945 = vmatprep.subr.mxu1 %v12947_v55 }
0x123c   :  { %6015 = vmatpush1.msra.mxu0 %v12951_v23  ;;  %5674 = vmatmul.mubr.f32.gmra.mxu1 %v8916_v1 }
0x123d   :  { %5787 = vmatmul.mubr.f32.gmra.mxu0 %v8916_v1  ;;  %5946 = vmatpush1.msra.mxu1 %v12955_v45  ;;  %v13034_v1 = vld [vmem:[#allocation7 + $0x20] sm:$0xff] }
0x123e   :  { %6016 = vmatprep.subr.mxu0 %v12959_v38  ;;  %5947 = vmatprep.subr.mxu1 %v12961_v32  ;;  %14943 = vst [vmem:[#allocation32_spill] sm:$0xff] %v13034_v1 }
0x123f   :  { %6017 = vmatpush1.msra.mxu0 %v12965_v34  ;;  %5948 = vmatpush1.msra.mxu1 %v12967_v53 }
0x1240   :  { %6018 = vmatprep.subr.mxu0 %v12970_v10  ;;  %5679 = vmatprep.mubr.f32.mxu1 %v14525_v52 }
0x1241   :  { %5792 = vmatprep.mubr.f32.mxu0 %v14525_v52  ;;  %5949 = vmatprep.subr.mxu1 %v12974_v41 }
0x1242   :  { %6019 = vmatpush1.msra.mxu0 %v12978_v48  ;;  %5680 = vmatmul.mubr.f32.gmra.mxu1 %v8918_v18 }
0x1243   :  { %5793 = vmatmul.mubr.f32.gmra.mxu0 %v8918_v18  ;;  %5950 = vmatpush1.msra.mxu1 %v12982_v20  ;;  %v13038_v18 = vld [vmem:[#allocation7 + $0x38] sm:$0xff] }
0x1244   :  { %6020 = vmatprep.subr.mxu0 %v12986_v21  ;;  %5951 = vmatprep.subr.mxu1 %v12988_v50  ;;  %14944 = vst [vmem:[#allocation33_spill] sm:$0xff] %v13038_v18 }
0x1245   :  { %6021 = vmatpush1.msra.mxu0 %v12991_v58  ;;  %5952 = vmatpush1.msra.mxu1 %v12993_v17 }
0x1246   :  { %6022 = vmatprep.subr.mxu0 %v12996_v30  ;;  %5685 = vmatprep.mubr.f32.mxu1 %v14525_v52 }
0x1247   :  { %5798 = vmatprep.mubr.f32.mxu0 %v14525_v52  ;;  %5953 = vmatprep.subr.mxu1 %v13000_v13 }
0x1248   :  { %6023 = vmatpush1.msra.mxu0 %v13004_v2  ;;  %5686 = vmatmul.mubr.f32.gmra.mxu1 %v8920_v54 }
0x1249   :  { %5799 = vmatmul.mubr.f32.gmra.mxu0 %v8920_v54  ;;  %5954 = vmatpush1.msra.mxu1 %v13008_v44  ;;  %v13040_v54 = vld [vmem:[#allocation7 + $0x8] sm:$0xff] }
0x124a   :  { %6024 = vmatprep.subr.mxu0 %v13012_v31  ;;  %5955 = vmatprep.subr.mxu1 %v13014_v47  ;;  %14945 = vst [vmem:[#allocation34_spill] sm:$0xff] %v13040_v54 }
0x124b   :  { %6025 = vmatpush1.msra.mxu0 %v13017_v14  ;;  %5956 = vmatpush1.msra.mxu1 %v13019_v49  ;;  %v13048_v49 = vld [vmem:[#allocation7 + $0x18] sm:$0xff] }
0x124c   :  { %6026 = vmatprep.subr.mxu0 %v13022_v57  ;;  %5691 = vmatprep.mubr.f32.mxu1 %v14525_v52  ;;  %14948 = vst [vmem:[#allocation37_spill] sm:$0xff] %v13048_v49 }
0x124d   :  { %5804 = vmatprep.mubr.f32.mxu0 %v14525_v52  ;;  %5957 = vmatprep.subr.mxu1 %v13026_v61  ;;  %v13052_v61 = vld [vmem:[#allocation7 + $0x10] sm:$0xff] }
0x124e   :  { %6027 = vmatpush1.msra.mxu0 %v13030_v7  ;;  %5692 = vmatmul.mubr.f32.gmra.mxu1 %v8922_v15  ;;  %14949 = vst [vmem:[#allocation38_spill] sm:$0xff] %v13052_v61 }
0x124f   :  { %5805 = vmatmul.mubr.f32.gmra.mxu0 %v8922_v15  ;;  %5958 = vmatpush1.msra.mxu1 %v13034_v1  ;;  %v14950_v15 = vld [vmem:[#allocation27_spill] sm:$0xff] }
0x1250   :  { %6028 = vmatprep.subr.mxu0 %v13038_v18  ;;  %5959 = vmatprep.subr.mxu1 %v13040_v54 }
0x1251   :  { %6029 = vmatpush1.msra.mxu0 %v13043_v6  ;;  %5960 = vmatpush1.msra.mxu1 %v13045_v24 }
0x1252   :  { %6030 = vmatprep.subr.mxu0 %v13048_v49  ;;  %5993 = vmatprep.mubr.f32.mxu1 %v14525_v52 }
0x1253   :  { %6031 = vmatpush1.msra.mxu0 %v13052_v61  ;;  %6064 = vmatprep.mubr.f32.mxu0 %v14525_v52 }
0x1254   :  { %5994 = vmatmul.mubr.f32.vlgmr.msra.gmra.mxu1 %v14525_v52  ;;  %6065 = vmatmul.mubr.f32.vlgmr.msra.gmra.mxu0 %v14525_v52 }
0x1255   :  { %6099 = vmatprep.subr.mxu1 %v12837_v25  ;;  %6170 = vmatprep.subr.mxu0 %v12839_v5 }
0x1256   :  { %6100 = vmatpush1.msra.mxu1 %v12853_v33  ;;  %6171 = vmatpush1.msra.mxu0 %v12855_v11 }
0x1257   :  { %6101 = vmatprep.subr.mxu1 %v12858_v8  ;;  %6172 = vmatprep.subr.mxu0 %v12860_v3 }
0x1258   :  { %6102 = vmatpush1.msra.mxu1 %v12862_v27  ;;  %6173 = vmatpush1.msra.mxu0 %v12870_v59 }
0x1259   :  { %6103 = vmatprep.subr.mxu1 %v12866_v36  ;;  %6174 = vmatprep.subr.mxu0 %v12878_v29 }
0x125a   :  { %6104 = vmatpush1.msra.mxu1 %v12874_v43  ;;  %6175 = vmatpush1.msra.mxu0 %v12884_v60 }
0x125b   :  { %6105 = vmatprep.subr.mxu1 %v12880_v63  ;;  %6176 = vmatprep.subr.mxu0 %v12889_v26 }
0x125c   :  { %6106 = vmatpush1.msra.mxu1 %v12886_v51  ;;  %6177 = vmatpush1.msra.mxu0 %v12897_v28 }
0x125d   :  { %6107 = vmatprep.subr.mxu1 %v12893_v62  ;;  %6178 = vmatprep.subr.mxu0 %v12905_v4 }
0x125e   :  { %6108 = vmatpush1.msra.mxu1 %v12901_v19  ;;  %6179 = vmatpush1.msra.mxu0 %v12911_v46 }
0x125f   :  { %6109 = vmatprep.subr.mxu1 %v12907_v42  ;;  %6180 = vmatprep.subr.mxu0 %v12916_v40  ;;  %v14953_v40 = vld [vmem:[#allocation51_spill] sm:$0xff] }
0x1260   :  { %6110 = vmatpush1.msra.mxu1 %v12913_v37  ;;  %6181 = vmatpush1.msra.mxu0 %v12924_v56  ;;  %v14954_v42 = vsub.s32 2, %v14953_v40  ;;  %v14955_v62 = vsub.s32 1, %v14953_v40 }
0x1261   :  { %6111 = vmatprep.subr.mxu1 %v12920_v0  ;;  %6182 = vmatprep.subr.mxu0 %v12932_v39  ;;  %v14952_v39 = vld [vmem:[#allocation52_spill] sm:$0xff] }
0x1262   :  { %6112 = vmatpush1.msra.mxu1 %v12928_v12  ;;  %6183 = vmatpush1.msra.mxu0 %v12938_v35 }
0x1263   :  { %6113 = vmatprep.subr.mxu1 %v12934_v22  ;;  %6184 = vmatprep.subr.mxu0 %v12943_v16  ;;  %v5811_v16 = vld [vmem:[%s14066_s19] sm:$0xf] }
0x1264   :  { %6114 = vmatpush1.msra.mxu1 %v12940_v9  ;;  %6185 = vmatpush1.msra.mxu0 %v12951_v23  ;;  %v13180_v0 = vrot.slane %v5811_v16, %v14952_v39  ;;  %v13184_v46 = vrot.slane %v5811_v16, %v14954_v42  ;;  %v13188_v28 = vrot.slane %v5811_v16, %v14955_v62 }
0x1265   :  { %6115 = vmatprep.subr.mxu1 %v12947_v55  ;;  %6186 = vmatprep.subr.mxu0 %v12959_v38 }
0x1266   :  { %6116 = vmatpush1.msra.mxu1 %v12955_v45  ;;  %6187 = vmatpush1.msra.mxu0 %v12965_v34 }
0x1267   :  { %6117 = vmatprep.subr.mxu1 %v12961_v32  ;;  %6188 = vmatprep.subr.mxu0 %v12970_v10 }
0x1268   :  { %6118 = vmatpush1.msra.mxu1 %v12967_v53  ;;  %6189 = vmatpush1.msra.mxu0 %v12978_v48 }
0x1269   :  { %6119 = vmatprep.subr.mxu1 %v12974_v41  ;;  %6190 = vmatprep.subr.mxu0 %v12986_v21 }
0x126a   :  { %6120 = vmatpush1.msra.mxu1 %v12982_v20  ;;  %6191 = vmatpush1.msra.mxu0 %v12991_v58 }
0x126b   :  { %6121 = vmatprep.subr.mxu1 %v12988_v50  ;;  %6192 = vmatprep.subr.mxu0 %v12996_v30  ;;  %v14951_v30 = vld [vmem:[#allocation69_spill] sm:$0xff] }
0x126c   :  { %6122 = vmatpush1.msra.mxu1 %v12993_v17  ;;  %6193 = vmatpush1.msra.mxu0 %v13004_v2 }
0x126d   :  { %6123 = vmatprep.subr.mxu1 %v13000_v13  ;;  %6194 = vmatprep.subr.mxu0 %v13012_v31 }
0x126e   :  { %6124 = vmatpush1.msra.mxu1 %v13008_v44  ;;  %6195 = vmatpush1.msra.mxu0 %v13017_v14 }
0x126f   :  { %6125 = vmatprep.subr.mxu1 %v13014_v47  ;;  %6196 = vmatprep.subr.mxu0 %v13022_v57 }
0x1270   :  { %6126 = vmatpush1.msra.mxu1 %v14950_v15  ;;  %6197 = vmatpush1.msra.mxu0 %v13030_v7 }
0x1271   :  { %6127 = vmatprep.subr.mxu1 %v14951_v30  ;;  %6198 = vmatprep.subr.mxu0 %v13038_v18  ;;  %v13130_v18 = vpop.f32.mrf.mxu1 }
0x1272   :  { %6128 = vmatpush1.msra.mxu1 %v13034_v1  ;;  %6199 = vmatpush1.msra.mxu0 %v13043_v6  ;;  %v13132_v1 = vpop.f32.mrf.mxu0 }
0x1273   :  { %6129 = vmatprep.subr.mxu1 %v13040_v54  ;;  %6200 = vmatprep.subr.mxu0 %v13048_v49  ;;  %v13134_v6 = vpop.f32.mrf.mxu1 }
0x1274   :  { %6130 = vmatpush1.msra.mxu1 %v13045_v24  ;;  %6163 = vmatprep.mubr.f32.mxu1 %v14525_v52  ;;  %v13136_v54 = vpop.f32.mrf.mxu0 }
0x1275   :  { %6201 = vmatpush1.msra.mxu0 %v13052_v61  ;;  %6234 = vmatprep.mubr.f32.mxu0 %v14525_v52  ;;  %v5431_v49 = vpop.f32.mrf.mxu1 }
0x1276   :  { %6269 = vmatprep.subr.mxu1 %v12837_v25  ;;  %6340 = vmatprep.subr.mxu0 %v12839_v5  ;;  %v5544_v24 = vpop.f32.mrf.mxu0 }
0x1277   :  { %v5433_v30 = vpop.f32.mrf.mxu1 }
0x1278   :  { %v5546_v7 = vpop.f32.mrf.mxu0 }
0x1279   :  { %v5437_v15 = vpop.f32.mrf.mxu1 }
0x127a   :  { %v5550_v61 = vpop.f32.mrf.mxu0 }
0x127b   :  { %v5439_v57 = vpop.f32.mrf.mxu1 }
0x127c   :  { %v5552_v52 = vpop.f32.mrf.mxu0 }
0x127d   :  { %v5443_v47 = vpop.f32.mrf.mxu1 }
0x127e   :  { %v5556_v25 = vpop.f32.mrf.mxu0 }
0x127f   :  { %v5445_v14 = vpop.f32.mrf.mxu1 }
0x1280   :  { %v5558_v5 = vpop.f32.mrf.mxu0 }
0x1281   :  { %v5449_v44 = vpop.f32.mrf.mxu1 }
0x1282   :  { %v13138_v31 = vpop.f32.mrf.mxu0 }
0x1283   :  { %v13140_v13 = vpop.f32.mrf.mxu1 }
0x1284   :  { %v13142_v2 = vpop.f32.mrf.mxu0 }
0x1285   :  { %v13144_v17 = vpop.f32.mrf.mxu1 }
0x1286   :  { %v13146_v50 = vpop.f32.mrf.mxu0 }
0x1287   :  { %v13148_v58 = vpop.f32.mrf.mxu1 }
0x1288   :  { %v13150_v20 = vpop.f32.mrf.mxu0 }
0x1289   :  { %v13152_v21 = vpop.f32.mrf.mxu1 }
0x128a   :  { %v13154_v41 = vpop.f32.mrf.mxu0 }
0x128b   :  { %v13156_v48 = vpop.f32.mrf.mxu1 }
0x128c   :  { %v13158_v53 = vpop.f32.mrf.mxu0 }
0x128d   :  { %v13160_v10 = vpop.f32.mrf.mxu1 }
0x128e   :  { %v13162_v32 = vpop.f32.mrf.mxu0 }
0x128f   :  { %v13164_v34 = vpop.f32.mrf.mxu1 }
0x1290   :  { %v13166_v45 = vpop.f32.mrf.mxu0 }
0x12e5   :  { %v13168_v38 = vpop.f32.mrf.mxu1  ;;  %v13170_v55 = vpop.f32.mrf.mxu0 }
0x12e7   :  { %v13172_v23 = vpop.f32.mrf.mxu1  ;;  %v13174_v9 = vpop.f32.mrf.mxu0 }
0x12ea   :  { %v5657_v22 = vpop.f32.mrf.mxu1 }
0x12eb   :  { %v5658_v35 = vadd.f32 %v5657_v22, %v5431_v49  ;;  %v5770_v12 = vpop.f32.mrf.mxu0  ;;  %v14957_v49 = vsub.s32 3, %v14953_v40 }
0x12ec   :  { %v5771_v56 = vadd.f32 %v5770_v12, %v5544_v24  ;;  %v5659_v37 = vpop.f32.mrf.mxu1 }
0x12ed   :  { %v5660_v19 = vadd.f32 %v5659_v37, %v5433_v30  ;;  %v5772_v4 = vpop.f32.mrf.mxu0  ;;  %v13191_v51 = vadd.f32 %v13180_v0, %v5658_v35  ;;  %v13195_v39 = vrot.slane %v5811_v16, %v14957_v49 }
0x12ee   :  { %v5773_v22 = vadd.f32 %v5772_v4, %v5546_v7  ;;  %v13198_v24 = vadd.f32 %v13184_v46, %v5771_v56 }
0x12ef   :  { %14956 = vst [vmem:[#allocation39_spill] sm:$0xff] %v13191_v51  ;;  %v13201_v42 = vadd.f32 %v13188_v28, %v5660_v19 }
0x12f0   :  { %v5663_v37 = vpop.f32.mrf.mxu1  ;;  %v13204_v12 = vadd.f32 %v13195_v39, %v5773_v22 }
0x12f1   :  { %v5664_v62 = vadd.f32 %v5663_v37, %v5437_v15  ;;  %v5776_v30 = vpop.f32.mrf.mxu0 }
0x12f2   :  { %v5777_v26 = vadd.f32 %v5776_v30, %v5550_v61  ;;  %v5665_v35 = vpop.f32.mrf.mxu1 }
0x12f3   :  { %v5666_v51 = vadd.f32 %v5665_v35, %v5439_v57  ;;  %v5778_v4 = vpop.f32.mrf.mxu0  ;;  %v13207_v40 = vadd.f32 %v13180_v0, %v5664_v62 }
0x12f4   :  { %v5779_v16 = vadd.f32 %v5778_v4, %v5552_v52  ;;  %v13210_v56 = vadd.f32 %v13184_v46, %v5777_v26 }
0x12f5   :  { %14958 = vst [vmem:[#allocation40_spill] sm:$0xff] %v13207_v40  ;;  %v13213_v19 = vadd.f32 %v13188_v28, %v5666_v51 }
0x12f6   :  { %14959 = vst [vmem:[#allocation41_spill] sm:$0xff] %v13210_v56  ;;  %v5669_v7 = vpop.f32.mrf.mxu1  ;;  %v13216_v22 = vadd.f32 %v13195_v39, %v5779_v16  ;;  %v15034_v56 = vld [vmem:[#allocation38_spill] sm:$0xff] }
0x12f7   :  { %14960 = vst [vmem:[#allocation42_spill] sm:$0xff] %v13213_v19  ;;  %v5670_v15 = vadd.f32 %v5669_v7, %v5443_v47  ;;  %v5782_v49 = vpop.f32.mrf.mxu0  ;;  %v15036_v19 = vld [vmem:[#allocation62_spill] sm:$0xff] }
0x12f8   :  { %14961 = vst [vmem:[#allocation28_spill] sm:$0xff] %v13216_v22  ;;  %v5783_v61 = vadd.f32 %v5782_v49, %v5556_v25  ;;  %v5671_v37 = vpop.f32.mrf.mxu1  ;;  %v15035_v22 = vld [vmem:[#allocation60_spill] sm:$0xff] }
0x12f9   :  { %v5672_v57 = vadd.f32 %v5671_v37, %v5445_v14  ;;  %v5784_v30 = vpop.f32.mrf.mxu0  ;;  %v13219_v62 = vadd.f32 %v13180_v0, %v5670_v15 }
0x12fa   :  { %v5785_v52 = vadd.f32 %v5784_v30, %v5558_v5  ;;  %v13222_v26 = vadd.f32 %v13184_v46, %v5783_v61 }
0x12fb   :  { %14962 = vst [vmem:[#allocation29_spill] sm:$0xff] %v13219_v62  ;;  %v13225_v51 = vadd.f32 %v13188_v28, %v5672_v57  ;;  %v15033_v62 = vmov 0.0  }
0x12fc   :  { %14963 = vst [vmem:[#allocation30_spill] sm:$0xff] %v13222_v26  ;;  %v5675_v35 = vpop.f32.mrf.mxu1  ;;  %v13228_v4 = vadd.f32 %v13195_v39, %v5785_v52  ;;  %v15030_v26 = vld [vmem:[#allocation34_spill] sm:$0xff] }
0x12fd   :  { %14964 = vst [vmem:[#allocation68_spill] sm:$0xff] %v13225_v51  ;;  %v5676_v47 = vadd.f32 %v5675_v35, %v5449_v44  ;;  %v5788_v16 = vpop.f32.mrf.mxu0  ;;  %v15032_v51 = vld [vmem:[#allocation36_spill] sm:$0xff] }
0x12fe   :  { %14965 = vst [vmem:[#allocation71_spill] sm:$0xff] %v13228_v4  ;;  %v5789_v25 = vadd.f32 %v5788_v16, %v13138_v31  ;;  %v5677_v14 = vpop.f32.mrf.mxu1  ;;  %v15031_v4 = vld [vmem:[#allocation37_spill] sm:$0xff] }
0x12ff   :  { %v5678_v7 = vadd.f32 %v5677_v14, %v13140_v13  ;;  %v5790_v15 = vpop.f32.mrf.mxu0  ;;  %v13233_v5 = vadd.f32 %v13180_v0, %v5676_v47 }
0x1300   :  { %v5791_v49 = vadd.f32 %v5790_v15, %v13142_v2  ;;  %v13237_v61 = vadd.f32 %v13184_v46, %v5789_v25 }
0x1301   :  { %14966 = vst [vmem:[#allocation55_spill] sm:$0xff] %v13233_v5  ;;  %v13240_v37 = vadd.f32 %v13188_v28, %v5678_v7  ;;  %v15029_v5 = vld [vmem:[#allocation35_spill] sm:$0xff] }
0x1302   :  { %14967 = vst [vmem:[#allocation53_spill] sm:$0xff] %v13237_v61  ;;  %v5681_v57 = vpop.f32.mrf.mxu1  ;;  %v13243_v44 = vadd.f32 %v13195_v39, %v5791_v49  ;;  %v15026_v61 = vld [vmem:[#allocation69_spill] sm:$0xff] }
0x1303   :  { %14968 = vst [vmem:[#allocation54_spill] sm:$0xff] %v13240_v37  ;;  %v5682_v31 = vadd.f32 %v5681_v57, %v13144_v17  ;;  %v5794_v30 = vpop.f32.mrf.mxu0  ;;  %v15028_v37 = vld [vmem:[#allocation32_spill] sm:$0xff] }
0x1304   :  { %14969 = vst [vmem:[#allocation58_spill] sm:$0xff] %v13243_v44  ;;  %v5795_v13 = vadd.f32 %v5794_v30, %v13146_v50  ;;  %v5683_v52 = vpop.f32.mrf.mxu1  ;;  %v15027_v44 = vld [vmem:[#allocation33_spill] sm:$0xff] }
0x1305   :  { %v5684_v35 = vadd.f32 %v5683_v52, %v13148_v58  ;;  %v5796_v47 = vpop.f32.mrf.mxu0  ;;  %v13249_v2 = vadd.f32 %v13180_v0, %v5682_v31 }
0x1306   :  { %v5797_v16 = vadd.f32 %v5796_v47, %v13150_v20  ;;  %v13253_v25 = vadd.f32 %v13184_v46, %v5795_v13 }
0x1307   :  { %14970 = vst [vmem:[#allocation87_spill] sm:$0xff] %v13249_v2  ;;  %v13256_v14 = vadd.f32 %v13188_v28, %v5684_v35  ;;  %v15025_v2 = vld [vmem:[#allocation72_spill] sm:$0xff] }
0x1308   :  { %14971 = vst [vmem:[#allocation85_spill] sm:$0xff] %v13253_v25  ;;  %v5687_v7 = vpop.f32.mrf.mxu1  ;;  %v13259_v17 = vadd.f32 %v13195_v39, %v5797_v16  ;;  %v15022_v25 = vld [vmem:[#allocation25_spill] sm:$0xff] }
0x1309   :  { %14972 = vst [vmem:[#allocation86_spill] sm:$0xff] %v13256_v14  ;;  %v5688_v50 = vadd.f32 %v5687_v7, %v13152_v21  ;;  %v5800_v15 = vpop.f32.mrf.mxu0  ;;  %v15024_v14 = vld [vmem:[#allocation27_spill] sm:$0xff] }
0x130a   :  { %14973 = vst [vmem:[#allocation88_spill] sm:$0xff] %v13259_v17  ;;  %v5801_v58 = vadd.f32 %v5800_v15, %v13154_v41  ;;  %v5689_v49 = vpop.f32.mrf.mxu1  ;;  %v5652_v41 = vadd.f32 %v13168_v38, %v13130_v18  ;;  %v15023_v17 = vld [vmem:[#allocation67_spill] sm:$0xff] }
0x130b   :  { %v5690_v57 = vadd.f32 %v5689_v49, %v13156_v48  ;;  %v5802_v31 = vpop.f32.mrf.mxu0  ;;  %v13265_v20 = vadd.f32 %v13180_v0, %v5688_v50 }
0x130c   :  { %v5803_v30 = vadd.f32 %v5802_v31, %v13158_v53  ;;  %v13269_v13 = vadd.f32 %v13184_v46, %v5801_v58  ;;  %v5654_v53 = vadd.f32 %v13172_v23, %v13134_v6  ;;  %v5833_v38 = vadd.f32 %v13180_v0, %v5652_v41 }
0x130d   :  { %14974 = vst [vmem:[#allocation15_spill] sm:$0xff] %v13265_v20  ;;  %v13272_v52 = vadd.f32 %v13188_v28, %v5690_v57  ;;  %v15021_v20 = vld [vmem:[#allocation26_spill] sm:$0xff] }
0x130e   :  { %14975 = vst [vmem:[#allocation31_spill] sm:$0xff] %v13269_v13  ;;  %v5693_v35 = vpop.f32.mrf.mxu1  ;;  %v13275_v21 = vadd.f32 %v13195_v39, %v5803_v30  ;;  %v5834_v23 = vadd.f32 %v13188_v28, %v5654_v53  ;;  %v15018_v13 = vld [vmem:[#allocation21_spill] sm:$0xff] }
0x130f   :  { %14976 = vst [vmem:[#allocation65_spill] sm:$0xff] %v13272_v52  ;;  %v5694_v48 = vadd.f32 %v5693_v35, %v13160_v10  ;;  %v5806_v47 = vpop.f32.mrf.mxu0  ;;  %v15020_v52 = vld [vmem:[#allocation23_spill] sm:$0xff] }
0x1310   :  { %14977 = vst [vmem:[#allocation70_spill] sm:$0xff] %v13275_v21  ;;  %v5807_v16 = vadd.f32 %v5806_v47, %v13162_v32  ;;  %v5695_v7 = vpop.f32.mrf.mxu1  ;;  %v5765_v47 = vadd.f32 %v13170_v55, %v13132_v1  ;;  %v15019_v21 = vld [vmem:[#allocation24_spill] sm:$0xff] }
0x1311   :  { %v5696_v50 = vadd.f32 %v5695_v7, %v13164_v34  ;;  %v5808_v15 = vpop.f32.mrf.mxu0  ;;  %v13285_v58 = vadd.f32 %v13180_v0, %v5694_v48  ;;  %v5767_v48 = vadd.f32 %v13174_v9, %v13136_v54 }
0x1312   :  { %v5809_v49 = vadd.f32 %v5808_v15, %v13166_v45  ;;  %v13289_v57 = vadd.f32 %v13184_v46, %v5807_v16  ;;  %v5835_v7 = vadd.f32 %v13184_v46, %v5765_v47  ;;  %v14995_v47 = vld [vmem:[#allocation50_spill] sm:$0xff] }
0x1313   :  { %14978 = vst [vmem:[#allocation43_spill] sm:$0xff] %v13285_v58  ;;  %v13293_v10 = vadd.f32 %v13188_v28, %v5696_v50  ;;  %v5836_v41 = vadd.f32 %v13195_v39, %v5767_v48  ;;  %v14992_v48 = vld [vmem:[#allocation45_spill] sm:$0xff]  ;;  %v15016_v58 = vld [vmem:[#allocation19_spill] sm:$0xff] }
0x1314   :  { %14979 = vst [vmem:[#allocation63_spill] sm:$0xff] %v13289_v57  ;;  %v5995_v32 = vpop.f32.mrf.mxu1  ;;  %v13296_v18 = vadd.f32 %v13195_v39, %v5809_v49  ;;  %v6066_v45 = vpop.f32.mrf.mxu0  ;;  %v15013_v57 = vld [vmem:[#allocation18_spill] sm:$0xff] }
0x1315   :  { %14980 = vst [vmem:[#allocation52_spill] sm:$0xff] %v13293_v10  ;;  %v6071_v6 = vadd.f32 %v5995_v32, %v5833_v38  ;;  %v6073_v50 = vadd.f32 %v6066_v45, %v5835_v7  ;;  %v14990_v45 = vld [vmem:[#allocation78_spill] sm:$0xff]  ;;  %v14997_v7 = vld [vmem:[#allocation89_spill] sm:$0xff]  ;;  %v15015_v10 = vld [vmem:[#allocation20_spill] sm:$0xff] }
0x1316   :  { %14981 = vst [vmem:[#allocation51_spill] sm:$0xff] %v13296_v18  ;;  %v5997_v34 = vpop.f32.mrf.mxu1  ;;  %v6068_v0 = vpop.f32.mrf.mxu0  ;;  %v15014_v18 = vld [vmem:[#allocation17_spill] sm:$0xff] }
0x1317   :  { %v7633_v31 = vmul.f32 -1.442695, %v6071_v6  ;;  %v6072_v30 = vadd.f32 %v5997_v34, %v5834_v23  ;;  %v6074_v16 = vadd.f32 %v6068_v0, %v5836_v41  ;;  %v14993_v0 = vld [vmem:[#allocation48_spill] sm:$0xff]  ;;  %v14994_v41 = vld [vmem:[#allocation47_spill] sm:$0xff] }
0x1319   :  { %8923 = vpow2.f32 %v7633_v31  ;;  %v7634_v35 = vmul.f32 -1.442695, %v6072_v30  ;;  %v7635_v28 = vmul.f32 -1.442695, %v6074_v16  ;;  %v14988_v30 = vld [vmem:[#allocation79_spill] sm:$0xff]  ;;  %v14996_v16 = vld [vmem:[#allocation49_spill] sm:$0xff] }
0x131b   :  { %8925 = vpow2.f32 %v7634_v35  ;;  %v14991_v35 = vld [vmem:[#allocation46_spill] sm:$0xff] }
0x131c   :  { %8927 = vpow2.f32 %v7635_v28  ;;  %v14998_v28 = vld [vmem:[#allocation12_spill] sm:$0xff] }
0x1326   :  { %v8924_v53 = vpop.eup %8923 }
0x1327   :  { %v6078_v15 = vadd.f32 1.0, %v8924_v53  ;;  %v14999_v53 = vld [vmem:[#allocation14_spill] sm:$0xff] }
0x1328   :  { %v8926_v49 = vpop.eup %8925 }
0x1329   :  { %8929 = vrcp.f32 %v6078_v15  ;;  %v6084_v38 = vadd.f32 1.0, %v8926_v49  ;;  %v8928_v9 = vpop.eup %8927  ;;  %v15001_v15 = vld [vmem:[#allocation81_spill] sm:$0xff]  ;;  %v15002_v49 = vld [vmem:[#allocation83_spill] sm:$0xff] }
0x132a   :  { %8931 = vtanh.f32 %v6073_v50  ;;  %v6091_v6 = vadd.f32 1.0, %v8928_v9  ;;  %v15000_v50 = vld [vmem:[#allocation13_spill] sm:$0xff]  ;;  %v15004_v9 = vld [vmem:[#allocation82_spill] sm:$0xff] }
0x132b   :  { %8933 = vrcp.f32 %v6084_v38  ;;  %v15003_v38 = vld [vmem:[#allocation84_spill] sm:$0xff] }
0x132c   :  { %8935 = vrcp.f32 %v6091_v6  ;;  %v15008_v6 = vld [vmem:[#allocation57_spill] sm:$0xff] }
0x1336   :  { %v8930_v54 = vpop.eup %8929 }
0x1337   :  { %v8932_v32 = vpop.eup %8931 }
0x1338   :  { %v8934_v39 = vpop.eup %8933  ;;  %v6095_v55 = vmul.f32 %v8932_v32, %v8930_v54  ;;  %v15005_v54 = vld [vmem:[#allocation56_spill] sm:$0xff] }
0x1339   :  { %v6094_v23 = vmul.f32 0.0, %v8934_v39  ;;  %v8936_v46 = vpop.eup %8935  ;;  %v15006_v32 = vld [vmem:[#allocation44_spill] sm:$0xff]  ;;  %v15007_v39 = vld [vmem:[#allocation59_spill] sm:$0xff] }
0x133b   :  { %v13305_v1 = vadd.f32 %v6095_v55, %v6094_v23  ;;  %v15009_v23 = vld [vmem:[#allocation64_spill] sm:$0xff]  ;;  %v15010_v55 = vld [vmem:[#allocation61_spill] sm:$0xff] }
0x133d   :  { %8937 = vtanh.f32 %v13305_v1 }
0x134a   :  { %v8938_v34 = vpop.eup %8937 }
0x134b   :  { %v13308_v31 = vmul.f32 %v8938_v34, %v8936_v46  ;;  %v15011_v46 = vld [vmem:[#allocation16_spill] sm:$0xff]  ;;  %v15012_v34 = vld [vmem:[#allocation66_spill] sm:$0xff] }
0x134d   :  { %14982 = vst [vmem:[#allocation90_spill] sm:$0xff] %v13308_v31  ;;  %6164 = vmatmul.mubr.f32.vlgmr.msra.gmra.mxu1 %v13308_v31  ;;  %6235 = vmatmul.mubr.f32.vlgmr.msra.gmra.mxu0 %v13308_v31  ;;  %v15017_v31 = vld [vmem:[#allocation22_spill] sm:$0xff] }
0x134e   :  { %6270 = vmatpush1.msra.mxu1 %v12853_v33  ;;  %6341 = vmatpush1.msra.mxu0 %v12855_v11  ;;  %v14983_v33 = vld [vmem:[#allocation73_spill] sm:$0xff]  ;;  %v14984_v11 = vld [vmem:[#allocation75_spill] sm:$0xff] }
0x134f   :  { %6271 = vmatprep.subr.mxu1 %v12858_v8  ;;  %6342 = vmatprep.subr.mxu0 %v12860_v3  ;;  %v14985_v8 = vld [vmem:[#allocation76_spill] sm:$0xff]  ;;  %v14986_v3 = vld [vmem:[#allocation74_spill] sm:$0xff] }
0x1350   :  { %6272 = vmatpush1.msra.mxu1 %v12862_v27  ;;  %6343 = vmatpush1.msra.mxu0 %v12870_v59  ;;  %v14987_v27 = vld [vmem:[#allocation77_spill] sm:$0xff] }
0x1351   :  { %6273 = vmatprep.subr.mxu1 %v12866_v36  ;;  %6344 = vmatprep.subr.mxu0 %v12878_v29  ;;  %v14989_v36 = vld [vmem:[#allocation80_spill] sm:$0xff] }
0x1352   :  { %6274 = vmatpush1.msra.mxu1 %v12874_v43  ;;  %6345 = vmatpush1.msra.mxu0 %v12884_v60 }
0x1353   :  { %6275 = vmatprep.subr.mxu1 %v12880_v63  ;;  %6346 = vmatprep.subr.mxu0 %v14983_v33 }
0x1354   :  { %6276 = vmatpush1.msra.mxu1 %v14984_v11  ;;  %6347 = vmatpush1.msra.mxu0 %v14985_v8 }
0x1355   :  { %6277 = vmatprep.subr.mxu1 %v14986_v3  ;;  %6348 = vmatprep.subr.mxu0 %v14987_v27 }
0x1356   :  { %6278 = vmatpush1.msra.mxu1 %v14988_v30  ;;  %6349 = vmatpush1.msra.mxu0 %v14989_v36 }
0x1357   :  { %6279 = vmatprep.subr.mxu1 %v14990_v45  ;;  %6350 = vmatprep.subr.mxu0 %v14991_v35 }
0x1358   :  { %6280 = vmatpush1.msra.mxu1 %v14992_v48  ;;  %6351 = vmatpush1.msra.mxu0 %v14993_v0 }
0x1359   :  { %6281 = vmatprep.subr.mxu1 %v14994_v41  ;;  %6352 = vmatprep.subr.mxu0 %v14995_v47 }
0x135a   :  { %6282 = vmatpush1.msra.mxu1 %v14996_v16  ;;  %6353 = vmatpush1.msra.mxu0 %v14997_v7 }
0x135b   :  { %6283 = vmatprep.subr.mxu1 %v14998_v28  ;;  %6354 = vmatprep.subr.mxu0 %v14999_v53 }
0x135c   :  { %6284 = vmatpush1.msra.mxu1 %v15000_v50  ;;  %6355 = vmatpush1.msra.mxu0 %v15001_v15 }
0x135d   :  { %6285 = vmatprep.subr.mxu1 %v15002_v49  ;;  %6356 = vmatprep.subr.mxu0 %v15003_v38 }
0x135e   :  { %6286 = vmatpush1.msra.mxu1 %v15004_v9  ;;  %6357 = vmatpush1.msra.mxu0 %v15005_v54 }
0x135f   :  { %6287 = vmatprep.subr.mxu1 %v15006_v32  ;;  %6358 = vmatprep.subr.mxu0 %v15007_v39 }
0x1360   :  { %6288 = vmatpush1.msra.mxu1 %v15008_v6  ;;  %6359 = vmatpush1.msra.mxu0 %v15009_v23 }
0x1361   :  { %6289 = vmatprep.subr.mxu1 %v15010_v55  ;;  %6360 = vmatprep.subr.mxu0 %v15011_v46 }
0x1362   :  { %6290 = vmatpush1.msra.mxu1 %v15012_v34  ;;  %6361 = vmatpush1.msra.mxu0 %v15013_v57 }
0x1363   :  { %6291 = vmatprep.subr.mxu1 %v15014_v18  ;;  %6362 = vmatprep.subr.mxu0 %v15015_v10 }
0x1364   :  { %6292 = vmatpush1.msra.mxu1 %v15016_v58  ;;  %6363 = vmatpush1.msra.mxu0 %v15017_v31 }
0x1365   :  { %6293 = vmatprep.subr.mxu1 %v15018_v13  ;;  %6364 = vmatprep.subr.mxu0 %v15019_v21 }
0x1366   :  { %6294 = vmatpush1.msra.mxu1 %v15020_v52  ;;  %6365 = vmatpush1.msra.mxu0 %v15021_v20 }
0x1367   :  { %6295 = vmatprep.subr.mxu1 %v15022_v25  ;;  %6366 = vmatprep.subr.mxu0 %v15023_v17 }
0x1368   :  { %6296 = vmatpush1.msra.mxu1 %v15024_v14  ;;  %6367 = vmatpush1.msra.mxu0 %v15025_v2 }
0x1369   :  { %6297 = vmatprep.subr.mxu1 %v15026_v61  ;;  %6368 = vmatprep.subr.mxu0 %v15027_v44 }
0x136a   :  { %6298 = vmatpush1.msra.mxu1 %v15028_v37  ;;  %6369 = vmatpush1.msra.mxu0 %v15029_v5  ;;  %v15037_v37 = vld [vmem:[#allocation39_spill] sm:$0xff] }
0x136b   :  { %6299 = vmatprep.subr.mxu1 %v15030_v26  ;;  %6370 = vmatprep.subr.mxu0 %v15031_v4 }
0x136c   :  { %6300 = vmatpush1.msra.mxu1 %v15032_v51  ;;  %6333 = vmatprep.mubr.f32.mxu1 %v15033_v62 }
0x136d   :  { %6371 = vmatpush1.msra.mxu0 %v15034_v56  ;;  %6404 = vmatprep.mubr.f32.mxu0 %v15033_v62 }
0x136e   :  { %6439 = vmatprep.subr.mxu1 %v15035_v22  ;;  %6510 = vmatprep.subr.mxu0 %v15036_v19 }
0x140d   :  { %v6165_v40 = vpop.f32.mrf.mxu1  ;;  %v6236_v4 = vpop.f32.mrf.mxu0 }
0x140e   :  { %v6241_v44 = vadd.f32 %v6165_v40, %v15037_v37  ;;  %v6243_v62 = vadd.f32 %v6236_v4, %v13198_v24  ;;  %v13390_v4 = vld [vmem:[#allocation7 + $0x1e0] sm:$0xff] }
0x140f   :  { %v6167_v5 = vpop.f32.mrf.mxu1  ;;  %v6238_v2 = vpop.f32.mrf.mxu0 }
0x1410   :  { %v7636_v61 = vmul.f32 -1.442695, %v6241_v44  ;;  %v6242_v26 = vadd.f32 %v6167_v5, %v13201_v42  ;;  %v6244_v56 = vadd.f32 %v6238_v2, %v13204_v12  ;;  %v13393_v2 = vld [vmem:[#allocation7 + $0x1f0] sm:$0xff] }
0x1412   :  { %8939 = vpow2.f32 %v7636_v61  ;;  %v7637_v51 = vmul.f32 -1.442695, %v6242_v26  ;;  %v7638_v14 = vmul.f32 -1.442695, %v6244_v56 }
0x1414   :  { %8941 = vpow2.f32 %v7637_v51 }
0x1415   :  { %8943 = vtanh.f32 %v6243_v62 }
0x1416   :  { %8945 = vpow2.f32 %v7638_v14  ;;  %v13396_v14 = vld [vmem:[#allocation7 + $0x1c8] sm:$0xff] }
0x141f   :  { %v8940_v22 = vpop.eup %8939 }
0x1420   :  { %v6248_v17 = vadd.f32 1.0, %v8940_v22  ;;  %v13406_v22 = vld [vmem:[#allocation7 + $0x1a8] sm:$0xff] }
0x1421   :  { %v8942_v19 = vpop.eup %8941 }
0x1422   :  { %8947 = vrcp.f32 %v6248_v17  ;;  %v6254_v40 = vadd.f32 1.0, %v8942_v19  ;;  %v8944_v37 = vpop.eup %8943  ;;  %v13399_v17 = vld [vmem:[#allocation7 + $0x1d8] sm:$0xff] }
0x1423   :  { %v8946_v42 = vpop.eup %8945  ;;  %v13493_v19 = vld [vmem:[#allocation7 + $0x1b8] sm:$0xff] }
0x1424   :  { %8949 = vrcp.f32 %v6254_v40  ;;  %v6261_v51 = vadd.f32 1.0, %v8946_v42  ;;  %v13496_v40 = vld [vmem:[#allocation7 + $0x1a0] sm:$0xff]  ;;  %v13502_v42 = vld [vmem:[#allocation7 + $0x188] sm:$0xff] }
0x1426   :  { %8951 = vrcp.f32 %v6261_v51  ;;  %v13514_v51 = vld [vmem:[#allocation7 + $0x168] sm:$0xff] }
0x142f   :  { %v8948_v5 = vpop.eup %8947 }
0x1430   :  { %v6265_v61 = vmul.f32 %v8948_v5, %v8944_v37  ;;  %v13499_v37 = vld [vmem:[#allocation7 + $0x1b0] sm:$0xff]  ;;  %v13505_v5 = vld [vmem:[#allocation7 + $0x198] sm:$0xff] }
0x1431   :  { %v8950_v26 = vpop.eup %8949 }
0x1432   :  { %v6264_v44 = vmul.f32 %v8950_v26, %v13305_v1  ;;  %v13402_v1 = vld [vmem:[#allocation7 + $0x1c0] sm:$0xff]  ;;  %v13511_v26 = vld [vmem:[#allocation7 + $0x190] sm:$0xff] }
0x1433   :  { %v8952_v24 = vpop.eup %8951 }
0x1434   :  { %v13383_v12 = vadd.f32 %v6265_v61, %v6264_v44  ;;  %v13508_v61 = vld [vmem:[#allocation7 + $0x180] sm:$0xff]  ;;  %v13517_v44 = vld [vmem:[#allocation7 + $0x178] sm:$0xff] }
0x1436   :  { %8953 = vtanh.f32 %v13383_v12 }
0x1443   :  { %v8954_v56 = vpop.eup %8953 }
0x1444   :  { %v13386_v62 = vmul.f32 %v8954_v56, %v8952_v24  ;;  %v13523_v24 = vld [vmem:[#allocation7 + $0x170] sm:$0xff]  ;;  %v13526_v56 = vld [vmem:[#allocation7 + $0x148] sm:$0xff] }
0x1446   :  { %15038 = vst [vmem:[#allocation73_spill] sm:$0xff] %v13386_v62  ;;  %6334 = vmatmul.mubr.f32.vlgmr.msra.gmra.mxu1 %v13386_v62  ;;  %6405 = vmatmul.mubr.f32.vlgmr.msra.gmra.mxu0 %v13386_v62  ;;  %v13649_v62 = vld [vmem:[#allocation7 + $0x18] sm:$0xff] }
0x1447   :  { %6440 = vmatpush1.msra.mxu1 %v13390_v4  ;;  %6511 = vmatpush1.msra.mxu0 %v13393_v2  ;;  %15072 = vst [vmem:[#allocation81_spill] sm:$0xff] %v13649_v62 }
0x1448   :  { %6441 = vmatprep.subr.mxu1 %v13396_v14  ;;  %6512 = vmatprep.subr.mxu0 %v13399_v17 }
0x1449   :  { %6442 = vmatpush1.msra.mxu1 %v13402_v1  ;;  %6513 = vmatpush1.msra.mxu0 %v12870_v59  ;;  %v15039_v59 = vld [vmem:[#allocation67_spill] sm:$0xff] }
0x144a   :  { %6443 = vmatprep.subr.mxu1 %v13406_v22  ;;  %6514 = vmatprep.subr.mxu0 %v12878_v29  ;;  %v15041_v29 = vld [vmem:[#allocation72_spill] sm:$0xff] }
0x144b   :  { %6444 = vmatpush1.msra.mxu1 %v12874_v43  ;;  %6515 = vmatpush1.msra.mxu0 %v12884_v60  ;;  %v15040_v43 = vld [vmem:[#allocation27_spill] sm:$0xff]  ;;  %v15043_v60 = vld [vmem:[#allocation33_spill] sm:$0xff] }
0x144c   :  { %6445 = vmatprep.subr.mxu1 %v12880_v63  ;;  %6516 = vmatprep.subr.mxu0 %v14983_v33  ;;  %v15042_v63 = vld [vmem:[#allocation69_spill] sm:$0xff]  ;;  %v15053_v33 = vld [vmem:[#allocation40_spill] sm:$0xff] }
0x144d   :  { %6446 = vmatpush1.msra.mxu1 %v14984_v11  ;;  %6517 = vmatpush1.msra.mxu0 %v14985_v8 }
0x144e   :  { %6447 = vmatprep.subr.mxu1 %v14986_v3  ;;  %6518 = vmatprep.subr.mxu0 %v14987_v27  ;;  %v15054_v27 = vld [vmem:[#allocation42_spill] sm:$0xff] }
0x144f   :  { %6448 = vmatpush1.msra.mxu1 %v14988_v30  ;;  %6519 = vmatpush1.msra.mxu0 %v14989_v36 }
0x1450   :  { %6449 = vmatprep.subr.mxu1 %v14990_v45  ;;  %6520 = vmatprep.subr.mxu0 %v14991_v35 }
0x1451   :  { %6450 = vmatpush1.msra.mxu1 %v14992_v48  ;;  %6521 = vmatpush1.msra.mxu0 %v14993_v0  ;;  %v15055_v48 = vld [vmem:[#allocation28_spill] sm:$0xff] }
0x1452   :  { %6451 = vmatprep.subr.mxu1 %v14994_v41  ;;  %6522 = vmatprep.subr.mxu0 %v14995_v47  ;;  %v15056_v41 = vld [vmem:[#allocation41_spill] sm:$0xff] }
0x1453   :  { %6452 = vmatpush1.msra.mxu1 %v14996_v16  ;;  %6523 = vmatpush1.msra.mxu0 %v14997_v7 }
0x1454   :  { %6453 = vmatprep.subr.mxu1 %v14998_v28  ;;  %6524 = vmatprep.subr.mxu0 %v14999_v53 }
0x1455   :  { %6454 = vmatpush1.msra.mxu1 %v15000_v50  ;;  %6525 = vmatpush1.msra.mxu0 %v15001_v15 }
0x1456   :  { %6455 = vmatprep.subr.mxu1 %v15002_v49  ;;  %6526 = vmatprep.subr.mxu0 %v15003_v38 }
0x1457   :  { %6456 = vmatpush1.msra.mxu1 %v15004_v9  ;;  %6527 = vmatpush1.msra.mxu0 %v15005_v54 }
0x1458   :  { %6457 = vmatprep.subr.mxu1 %v15006_v32  ;;  %6528 = vmatprep.subr.mxu0 %v15007_v39 }
0x1459   :  { %6458 = vmatpush1.msra.mxu1 %v15008_v6  ;;  %6529 = vmatpush1.msra.mxu0 %v15009_v23 }
0x145a   :  { %6459 = vmatprep.subr.mxu1 %v15010_v55  ;;  %6530 = vmatprep.subr.mxu0 %v15011_v46 }
0x145b   :  { %6460 = vmatpush1.msra.mxu1 %v15012_v34  ;;  %6531 = vmatpush1.msra.mxu0 %v15013_v57  ;;  %v15050_v57 = vld [vmem:[#allocation38_spill] sm:$0xff] }
0x145c   :  { %6461 = vmatprep.subr.mxu1 %v15014_v18  ;;  %6532 = vmatprep.subr.mxu0 %v15015_v10  ;;  %v13466_v10 = vld [vmem:[#allocation7 + $0x1e8] sm:$0xff]  ;;  %v13469_v18 = vld [vmem:[#allocation7 + $0x1f8] sm:$0xff]  ;;  %v13489_v34 = vld [vmem:[#allocation7 + $0x1d0] sm:$0xff] }
0x145d   :  { %6462 = vmatpush1.msra.mxu1 %v15016_v58  ;;  %6533 = vmatpush1.msra.mxu0 %v15017_v31  ;;  %v15044_v58 = vld [vmem:[#allocation32_spill] sm:$0xff]  ;;  %15051 = vst [vmem:[#allocation75_spill] sm:$0xff] %v13466_v10  ;;  %15052 = vst [vmem:[#allocation76_spill] sm:$0xff] %v13469_v18 }
0x145e   :  { %6463 = vmatprep.subr.mxu1 %v15018_v13  ;;  %6534 = vmatprep.subr.mxu0 %v15019_v21  ;;  %v15045_v13 = vld [vmem:[#allocation35_spill] sm:$0xff]  ;;  %v15046_v21 = vld [vmem:[#allocation34_spill] sm:$0xff] }
0x145f   :  { %6464 = vmatpush1.msra.mxu1 %v15020_v52  ;;  %6535 = vmatpush1.msra.mxu0 %v15021_v20  ;;  %v15047_v52 = vld [vmem:[#allocation37_spill] sm:$0xff]  ;;  %v15048_v20 = vld [vmem:[#allocation36_spill] sm:$0xff] }
0x1460   :  { %6465 = vmatprep.subr.mxu1 %v15022_v25  ;;  %6536 = vmatprep.subr.mxu0 %v15039_v59  ;;  %v15049_v25 = vmov 0.0   ;;  %v13529_v59 = vld [vmem:[#allocation7 + $0x158] sm:$0xff] }
0x1461   :  { %6466 = vmatpush1.msra.mxu1 %v15040_v43  ;;  %6537 = vmatpush1.msra.mxu0 %v15041_v29  ;;  %v13532_v43 = vld [vmem:[#allocation7 + $0x140] sm:$0xff]  ;;  %v13535_v29 = vld [vmem:[#allocation7 + $0x150] sm:$0xff] }
0x1462   :  { %6467 = vmatprep.subr.mxu1 %v15042_v63  ;;  %6538 = vmatprep.subr.mxu0 %v15043_v60  ;;  %v13538_v63 = vld [vmem:[#allocation7 + $0x128] sm:$0xff]  ;;  %v13541_v60 = vld [vmem:[#allocation7 + $0x138] sm:$0xff] }
0x1463   :  { %6468 = vmatpush1.msra.mxu1 %v15044_v58  ;;  %6539 = vmatpush1.msra.mxu0 %v15045_v13  ;;  %v13544_v58 = vld [vmem:[#allocation7 + $0x120] sm:$0xff]  ;;  %v13547_v13 = vld [vmem:[#allocation7 + $0x130] sm:$0xff] }
0x1464   :  { %6469 = vmatprep.subr.mxu1 %v15046_v21  ;;  %6540 = vmatprep.subr.mxu0 %v15047_v52  ;;  %v13550_v21 = vld [vmem:[#allocation7 + $0x108] sm:$0xff]  ;;  %v13553_v52 = vld [vmem:[#allocation7 + $0x118] sm:$0xff] }
0x1465   :  { %6470 = vmatpush1.msra.mxu1 %v15048_v20  ;;  %6503 = vmatprep.mubr.f32.mxu1 %v15049_v25  ;;  %v13556_v20 = vld [vmem:[#allocation7 + $0x100] sm:$0xff] }
0x1466   :  { %6541 = vmatpush1.msra.mxu0 %v15050_v57  ;;  %6574 = vmatprep.mubr.f32.mxu0 %v15049_v25  ;;  %v13559_v57 = vld [vmem:[#allocation7 + $0x110] sm:$0xff] }
0x1467   :  { %6609 = vmatprep.subr.mxu1 %v13466_v10  ;;  %6680 = vmatprep.subr.mxu0 %v13469_v18 }
0x1506   :  { %v6335_v31 = vpop.f32.mrf.mxu1  ;;  %v6406_v36 = vpop.f32.mrf.mxu0 }
0x1507   :  { %v6411_v11 = vadd.f32 %v6335_v31, %v15053_v33  ;;  %v6413_v47 = vadd.f32 %v6406_v36, %v15056_v41  ;;  %v13562_v31 = vld [vmem:[#allocation7 + $0xe8] sm:$0xff]  ;;  %v13565_v33 = vld [vmem:[#allocation7 + $0xf8] sm:$0xff]  ;;  %v13583_v36 = vld [vmem:[#allocation7 + $0xd0] sm:$0xff] }
0x1508   :  { %v6337_v8 = vpop.f32.mrf.mxu1  ;;  %v6408_v35 = vpop.f32.mrf.mxu0  ;;  %v13598_v41 = vld [vmem:[#allocation7 + $0x88] sm:$0xff] }
0x1509   :  { %v7639_v3 = vmul.f32 -1.442695, %v6411_v11  ;;  %v6412_v30 = vadd.f32 %v6337_v8, %v15054_v27  ;;  %v6414_v0 = vadd.f32 %v6408_v35, %v15055_v48  ;;  %v13568_v11 = vld [vmem:[#allocation7 + $0xe0] sm:$0xff]  ;;  %v13571_v8 = vld [vmem:[#allocation7 + $0xf0] sm:$0xff]  ;;  %v13577_v27 = vld [vmem:[#allocation7 + $0xd8] sm:$0xff] }
0x150a   :  { %v13589_v35 = vld [vmem:[#allocation7 + $0xb8] sm:$0xff]  ;;  %v13592_v48 = vld [vmem:[#allocation7 + $0xa0] sm:$0xff] }
0x150b   :  { %8955 = vpow2.f32 %v7639_v3  ;;  %v7640_v45 = vmul.f32 -1.442695, %v6412_v30  ;;  %v7641_v16 = vmul.f32 -1.442695, %v6414_v0  ;;  %v13574_v3 = vld [vmem:[#allocation7 + $0xc8] sm:$0xff]  ;;  %v13580_v30 = vld [vmem:[#allocation7 + $0xc0] sm:$0xff] }
0x150c   :  { %v13595_v0 = vld [vmem:[#allocation7 + $0xb0] sm:$0xff] }
0x150d   :  { %8957 = vpow2.f32 %v7640_v45  ;;  %v13586_v45 = vld [vmem:[#allocation7 + $0xa8] sm:$0xff] }
0x150e   :  { %8959 = vtanh.f32 %v6413_v47  ;;  %v13601_v47 = vld [vmem:[#allocation7 + $0x98] sm:$0xff] }
0x150f   :  { %8961 = vpow2.f32 %v7641_v16  ;;  %v13604_v16 = vld [vmem:[#allocation7 + $0x80] sm:$0xff] }
0x1518   :  { %v8956_v7 = vpop.eup %8955 }
0x1519   :  { %v6418_v28 = vadd.f32 1.0, %v8956_v7  ;;  %v13607_v7 = vld [vmem:[#allocation7 + $0x90] sm:$0xff] }
0x151a   :  { %v8958_v53 = vpop.eup %8957  ;;  %15058 = vst [vmem:[#allocation77_spill] sm:$0xff] %v13607_v7 }
0x151b   :  { %8963 = vrcp.f32 %v6418_v28  ;;  %v6424_v50 = vadd.f32 1.0, %v8958_v53  ;;  %v8960_v15 = vpop.eup %8959  ;;  %v13610_v28 = vld [vmem:[#allocation7 + $0x68] sm:$0xff]  ;;  %v13613_v53 = vld [vmem:[#allocation7 + $0x78] sm:$0xff] }
0x151c   :  { %v8962_v49 = vpop.eup %8961  ;;  %15059 = vst [vmem:[#allocation79_spill] sm:$0xff] %v13610_v28  ;;  %15060 = vst [vmem:[#allocation80_spill] sm:$0xff] %v13613_v53 }
0x151d   :  { %8965 = vrcp.f32 %v6424_v50  ;;  %v6431_v32 = vadd.f32 1.0, %v8962_v49  ;;  %v13616_v50 = vld [vmem:[#allocation7 + $0x60] sm:$0xff]  ;;  %v13622_v49 = vld [vmem:[#allocation7 + $0x48] sm:$0xff] }
0x151e   :  { %15061 = vst [vmem:[#allocation78_spill] sm:$0xff] %v13616_v50  ;;  %15063 = vst [vmem:[#allocation45_spill] sm:$0xff] %v13622_v49 }
0x151f   :  { %8967 = vrcp.f32 %v6431_v32  ;;  %v13634_v32 = vld [vmem:[#allocation7 + $0x28] sm:$0xff] }
0x1520   :  { %15067 = vst [vmem:[#allocation49_spill] sm:$0xff] %v13634_v32 }
0x1528   :  { %v8964_v38 = vpop.eup %8963 }
0x1529   :  { %v6435_v9 = vmul.f32 %v8964_v38, %v8960_v15  ;;  %v13619_v15 = vld [vmem:[#allocation7 + $0x70] sm:$0xff]  ;;  %v13625_v38 = vld [vmem:[#allocation7 + $0x58] sm:$0xff] }
0x152a   :  { %v8966_v54 = vpop.eup %8965  ;;  %15062 = vst [vmem:[#allocation46_spill] sm:$0xff] %v13619_v15  ;;  %15064 = vst [vmem:[#allocation48_spill] sm:$0xff] %v13625_v38 }
0x152b   :  { %v6434_v39 = vmul.f32 %v8966_v54, %v13383_v12  ;;  %v13520_v12 = vld [vmem:[#allocation7 + $0x160] sm:$0xff]  ;;  %v13631_v54 = vld [vmem:[#allocation7 + $0x50] sm:$0xff] }
0x152c   :  { %v8968_v23 = vpop.eup %8967  ;;  %15066 = vst [vmem:[#allocation50_spill] sm:$0xff] %v13631_v54 }
0x152d   :  { %v13477_v6 = vadd.f32 %v6435_v9, %v6434_v39  ;;  %v13628_v9 = vld [vmem:[#allocation7 + $0x40] sm:$0xff]  ;;  %v13637_v39 = vld [vmem:[#allocation7 + $0x38] sm:$0xff] }
0x152e   :  { %15065 = vst [vmem:[#allocation47_spill] sm:$0xff] %v13628_v9  ;;  %15068 = vst [vmem:[#allocation89_spill] sm:$0xff] %v13637_v39 }
0x152f   :  { %8969 = vtanh.f32 %v13477_v6 }
0x153c   :  { %v8970_v55 = vpop.eup %8969 }
0x153d   :  { %v13480_v46 = vmul.f32 %v8970_v55, %v8968_v23  ;;  %v13640_v23 = vld [vmem:[#allocation7 + $0x20] sm:$0xff]  ;;  %v13643_v55 = vld [vmem:[#allocation7 + $0x30] sm:$0xff] }
0x153e   :  { %15069 = vst [vmem:[#allocation12_spill] sm:$0xff] %v13640_v23  ;;  %15070 = vst [vmem:[#allocation14_spill] sm:$0xff] %v13643_v55 }
0x153f   :  { %15057 = vst [vmem:[#allocation74_spill] sm:$0xff] %v13480_v46  ;;  %6504 = vmatmul.mubr.f32.vlgmr.msra.gmra.mxu1 %v13480_v46  ;;  %6575 = vmatmul.mubr.f32.vlgmr.msra.gmra.mxu0 %v13480_v46  ;;  %v13646_v46 = vld [vmem:[#allocation7 + $0x8] sm:$0xff] }
0x1540   :  { %6610 = vmatpush1.msra.mxu1 %v13390_v4  ;;  %6681 = vmatpush1.msra.mxu0 %v13393_v2  ;;  %15071 = vst [vmem:[#allocation13_spill] sm:$0xff] %v13646_v46 }
0x1541   :  { %6611 = vmatprep.subr.mxu1 %v13396_v14  ;;  %6682 = vmatprep.subr.mxu0 %v13399_v17 }
0x1542   :  { %6612 = vmatpush1.msra.mxu1 %v13402_v1  ;;  %6683 = vmatpush1.msra.mxu0 %v13489_v34 }
0x1543   :  { %6613 = vmatprep.subr.mxu1 %v13406_v22  ;;  %6684 = vmatprep.subr.mxu0 %v13493_v19 }
0x1544   :  { %6614 = vmatpush1.msra.mxu1 %v13496_v40  ;;  %6685 = vmatpush1.msra.mxu0 %v13499_v37 }
0x1545   :  { %6615 = vmatprep.subr.mxu1 %v13502_v42  ;;  %6686 = vmatprep.subr.mxu0 %v13505_v5 }
0x1546   :  { %6616 = vmatpush1.msra.mxu1 %v13508_v61  ;;  %6687 = vmatpush1.msra.mxu0 %v13511_v26 }
0x1547   :  { %6617 = vmatprep.subr.mxu1 %v13514_v51  ;;  %6688 = vmatprep.subr.mxu0 %v13517_v44 }
0x1548   :  { %6618 = vmatpush1.msra.mxu1 %v13520_v12  ;;  %6689 = vmatpush1.msra.mxu0 %v13523_v24 }
0x1549   :  { %6619 = vmatprep.subr.mxu1 %v13526_v56  ;;  %6690 = vmatprep.subr.mxu0 %v13529_v59 }
0x154a   :  { %6620 = vmatpush1.msra.mxu1 %v13532_v43  ;;  %6691 = vmatpush1.msra.mxu0 %v13535_v29 }
0x154b   :  { %6621 = vmatprep.subr.mxu1 %v13538_v63  ;;  %6692 = vmatprep.subr.mxu0 %v13541_v60 }
0x154c   :  { %6622 = vmatpush1.msra.mxu1 %v13544_v58  ;;  %6693 = vmatpush1.msra.mxu0 %v13547_v13 }
0x154d   :  { %6623 = vmatprep.subr.mxu1 %v13550_v21  ;;  %6694 = vmatprep.subr.mxu0 %v13553_v52 }
0x154e   :  { %6624 = vmatpush1.msra.mxu1 %v13556_v20  ;;  %6695 = vmatpush1.msra.mxu0 %v13559_v57 }
0x154f   :  { %6625 = vmatprep.subr.mxu1 %v13562_v31  ;;  %6696 = vmatprep.subr.mxu0 %v13565_v33 }
0x1550   :  { %6626 = vmatpush1.msra.mxu1 %v13568_v11  ;;  %6697 = vmatpush1.msra.mxu0 %v13571_v8 }
0x1551   :  { %6627 = vmatprep.subr.mxu1 %v13574_v3  ;;  %6698 = vmatprep.subr.mxu0 %v13577_v27 }
0x1552   :  { %6628 = vmatpush1.msra.mxu1 %v13580_v30  ;;  %6699 = vmatpush1.msra.mxu0 %v13583_v36 }
0x1553   :  { %6629 = vmatprep.subr.mxu1 %v13586_v45  ;;  %6700 = vmatprep.subr.mxu0 %v13589_v35 }
0x1554   :  { %6630 = vmatpush1.msra.mxu1 %v13592_v48  ;;  %6701 = vmatpush1.msra.mxu0 %v13595_v0 }
0x1555   :  { %6631 = vmatprep.subr.mxu1 %v13598_v41  ;;  %6702 = vmatprep.subr.mxu0 %v13601_v47 }
0x1556   :  { %6632 = vmatpush1.msra.mxu1 %v13604_v16  ;;  %6703 = vmatpush1.msra.mxu0 %v13607_v7 }
0x1557   :  { %6633 = vmatprep.subr.mxu1 %v13610_v28  ;;  %6704 = vmatprep.subr.mxu0 %v13613_v53  ;;  %v15078_v53 = vld [vmem:[#allocation30_spill] sm:$0xff] }
0x1558   :  { %6634 = vmatpush1.msra.mxu1 %v13616_v50  ;;  %6705 = vmatpush1.msra.mxu0 %v13619_v15  ;;  %v15077_v50 = vld [vmem:[#allocation71_spill] sm:$0xff] }
0x1559   :  { %6635 = vmatprep.subr.mxu1 %v13622_v49  ;;  %6706 = vmatprep.subr.mxu0 %v13625_v38 }
0x155a   :  { %6636 = vmatpush1.msra.mxu1 %v13628_v9  ;;  %6707 = vmatpush1.msra.mxu0 %v13631_v54  ;;  %v15076_v9 = vld [vmem:[#allocation68_spill] sm:$0xff] }
0x155b   :  { %6637 = vmatprep.subr.mxu1 %v13634_v32  ;;  %6708 = vmatprep.subr.mxu0 %v13637_v39  ;;  %v13652_v32 = vld [vmem:[#allocation7] sm:$0xff]  ;;  %v13656_v39 = vld [vmem:[#allocation7 + $0x10] sm:$0xff] }
0x155c   :  { %6638 = vmatpush1.msra.mxu1 %v13640_v23  ;;  %6709 = vmatpush1.msra.mxu0 %v13643_v55  ;;  %15073 = vst [vmem:[#allocation83_spill] sm:$0xff] %v13652_v32  ;;  %15074 = vst [vmem:[#allocation84_spill] sm:$0xff] %v13656_v39  ;;  %v15075_v55 = vld [vmem:[#allocation29_spill] sm:$0xff] }
0x155d   :  { %6639 = vmatprep.subr.mxu1 %v13646_v46  ;;  %6710 = vmatprep.subr.mxu0 %v13649_v62 }
0x155e   :  { %6640 = vmatpush1.msra.mxu1 %v13652_v32  ;;  %6673 = vmatprep.mubr.f32.mxu1 %v15049_v25 }
0x155f   :  { %6711 = vmatpush1.msra.mxu0 %v13656_v39  ;;  %6744 = vmatprep.mubr.f32.mxu0 %v15049_v25 }
0x1560   :  { %6779 = vmatprep.subr.mxu1 %v13466_v10  ;;  %6850 = vmatprep.subr.mxu0 %v13469_v18 }
0x15ff   :  { %v6505_v46 = vpop.f32.mrf.mxu1  ;;  %v6576_v32 = vpop.f32.mrf.mxu0 }
0x1600   :  { %v6581_v23 = vadd.f32 %v6505_v46, %v15075_v55  ;;  %v6583_v25 = vadd.f32 %v6576_v32, %v15078_v53  ;;  %v15085_v32 = vld [vmem:[#allocation45_spill] sm:$0xff] }
0x1601   :  { %v6507_v62 = vpop.f32.mrf.mxu1  ;;  %v6578_v15 = vpop.f32.mrf.mxu0 }
0x1602   :  { %v7642_v54 = vmul.f32 -1.442695, %v6581_v23  ;;  %v6582_v38 = vadd.f32 %v6507_v62, %v15076_v9  ;;  %v6584_v39 = vadd.f32 %v6578_v15, %v15077_v50  ;;  %v15084_v15 = vld [vmem:[#allocation46_spill] sm:$0xff] }
0x1604   :  { %8971 = vpow2.f32 %v7642_v54  ;;  %v7643_v49 = vmul.f32 -1.442695, %v6582_v38  ;;  %v7644_v28 = vmul.f32 -1.442695, %v6584_v39  ;;  %v15086_v39 = vld [vmem:[#allocation48_spill] sm:$0xff] }
0x1606   :  { %8973 = vpow2.f32 %v7643_v49 }
0x1607   :  { %8975 = vtanh.f32 %v6583_v25 }
0x1608   :  { %8977 = vpow2.f32 %v7644_v28  ;;  %v15083_v28 = vld [vmem:[#allocation78_spill] sm:$0xff] }
0x1611   :  { %v8972_v10 = vpop.eup %8971 }
0x1612   :  { %v6588_v7 = vadd.f32 1.0, %v8972_v10 }
0x1613   :  { %v8974_v18 = vpop.eup %8973 }
0x1614   :  { %8979 = vrcp.f32 %v6588_v7  ;;  %v6594_v46 = vadd.f32 1.0, %v8974_v18  ;;  %v8976_v23 = vpop.eup %8975  ;;  %v15080_v18 = vld [vmem:[#allocation77_spill] sm:$0xff]  ;;  %v15082_v7 = vld [vmem:[#allocation80_spill] sm:$0xff] }
0x1615   :  { %v8978_v62 = vpop.eup %8977 }
0x1616   :  { %8981 = vrcp.f32 %v6594_v46  ;;  %v6601_v49 = vadd.f32 1.0, %v8978_v62  ;;  %v15087_v46 = vld [vmem:[#allocation47_spill] sm:$0xff]  ;;  %v15089_v62 = vld [vmem:[#allocation49_spill] sm:$0xff] }
0x1618   :  { %8983 = vrcp.f32 %v6601_v49  ;;  %v15093_v49 = vld [vmem:[#allocation13_spill] sm:$0xff] }
0x1621   :  { %v8980_v9 = vpop.eup %8979 }
0x1622   :  { %v6605_v54 = vmul.f32 %v8980_v9, %v8976_v23  ;;  %v15088_v23 = vld [vmem:[#allocation50_spill] sm:$0xff]  ;;  %v15090_v9 = vld [vmem:[#allocation89_spill] sm:$0xff] }
0x1623   :  { %v8982_v38 = vpop.eup %8981 }
0x1624   :  { %v6604_v55 = vmul.f32 %v8982_v38, %v13477_v6  ;;  %v15081_v6 = vld [vmem:[#allocation79_spill] sm:$0xff]  ;;  %v15092_v38 = vld [vmem:[#allocation14_spill] sm:$0xff] }
0x1625   :  { %v8984_v10 = vpop.eup %8983 }
0x1626   :  { %v13667_v50 = vadd.f32 %v6605_v54, %v6604_v55  ;;  %v15091_v54 = vld [vmem:[#allocation12_spill] sm:$0xff]  ;;  %v15094_v55 = vld [vmem:[#allocation81_spill] sm:$0xff] }
0x1628   :  { %8985 = vtanh.f32 %v13667_v50 }
0x1635   :  { %v8986_v25 = vpop.eup %8985 }
0x1636   :  { %v13670_v53 = vmul.f32 %v8986_v25, %v8984_v10  ;;  %v15095_v10 = vld [vmem:[#allocation83_spill] sm:$0xff]  ;;  %v15096_v25 = vmov 0.0  }
0x1638   :  { %15079 = vst [vmem:[#allocation82_spill] sm:$0xff] %v13670_v53  ;;  %6674 = vmatmul.mubr.f32.vlgmr.msra.gmra.mxu1 %v13670_v53  ;;  %6745 = vmatmul.mubr.f32.vlgmr.msra.gmra.mxu0 %v13670_v53  ;;  %v15097_v53 = vld [vmem:[#allocation84_spill] sm:$0xff] }
0x1639   :  { %6780 = vmatpush1.msra.mxu1 %v13390_v4  ;;  %6851 = vmatpush1.msra.mxu0 %v13393_v2 }
0x163a   :  { %6781 = vmatprep.subr.mxu1 %v13396_v14  ;;  %6852 = vmatprep.subr.mxu0 %v13399_v17 }
0x163b   :  { %6782 = vmatpush1.msra.mxu1 %v13402_v1  ;;  %6853 = vmatpush1.msra.mxu0 %v13489_v34 }
0x163c   :  { %6783 = vmatprep.subr.mxu1 %v13406_v22  ;;  %6854 = vmatprep.subr.mxu0 %v13493_v19 }
0x163d   :  { %6784 = vmatpush1.msra.mxu1 %v13496_v40  ;;  %6855 = vmatpush1.msra.mxu0 %v13499_v37 }
0x163e   :  { %6785 = vmatprep.subr.mxu1 %v13502_v42  ;;  %6856 = vmatprep.subr.mxu0 %v13505_v5 }
0x163f   :  { %6786 = vmatpush1.msra.mxu1 %v13508_v61  ;;  %6857 = vmatpush1.msra.mxu0 %v13511_v26 }
0x1640   :  { %6787 = vmatprep.subr.mxu1 %v13514_v51  ;;  %6858 = vmatprep.subr.mxu0 %v13517_v44 }
0x1641   :  { %6788 = vmatpush1.msra.mxu1 %v13520_v12  ;;  %6859 = vmatpush1.msra.mxu0 %v13523_v24 }
0x1642   :  { %6789 = vmatprep.subr.mxu1 %v13526_v56  ;;  %6860 = vmatprep.subr.mxu0 %v13529_v59 }
0x1643   :  { %6790 = vmatpush1.msra.mxu1 %v13532_v43  ;;  %6861 = vmatpush1.msra.mxu0 %v13535_v29 }
0x1644   :  { %6791 = vmatprep.subr.mxu1 %v13538_v63  ;;  %6862 = vmatprep.subr.mxu0 %v13541_v60 }
0x1645   :  { %6792 = vmatpush1.msra.mxu1 %v13544_v58  ;;  %6863 = vmatpush1.msra.mxu0 %v13547_v13 }
0x1646   :  { %6793 = vmatprep.subr.mxu1 %v13550_v21  ;;  %6864 = vmatprep.subr.mxu0 %v13553_v52 }
0x1647   :  { %6794 = vmatpush1.msra.mxu1 %v13556_v20  ;;  %6865 = vmatpush1.msra.mxu0 %v13559_v57 }
0x1648   :  { %6795 = vmatprep.subr.mxu1 %v13562_v31  ;;  %6866 = vmatprep.subr.mxu0 %v13565_v33 }
0x1649   :  { %6796 = vmatpush1.msra.mxu1 %v13568_v11  ;;  %6867 = vmatpush1.msra.mxu0 %v13571_v8 }
0x164a   :  { %6797 = vmatprep.subr.mxu1 %v13574_v3  ;;  %6868 = vmatprep.subr.mxu0 %v13577_v27 }
0x164b   :  { %6798 = vmatpush1.msra.mxu1 %v13580_v30  ;;  %6869 = vmatpush1.msra.mxu0 %v13583_v36 }
0x164c   :  { %6799 = vmatprep.subr.mxu1 %v13586_v45  ;;  %6870 = vmatprep.subr.mxu0 %v13589_v35 }
0x164d   :  { %6800 = vmatpush1.msra.mxu1 %v13592_v48  ;;  %6871 = vmatpush1.msra.mxu0 %v13595_v0 }
0x164e   :  { %6801 = vmatprep.subr.mxu1 %v13598_v41  ;;  %6872 = vmatprep.subr.mxu0 %v13601_v47 }
0x164f   :  { %6802 = vmatpush1.msra.mxu1 %v13604_v16  ;;  %6873 = vmatpush1.msra.mxu0 %v15080_v18 }
0x1650   :  { %6803 = vmatprep.subr.mxu1 %v15081_v6  ;;  %6874 = vmatprep.subr.mxu0 %v15082_v7  ;;  %v15103_v7 = vld [vmem:[#allocation53_spill] sm:$0xff] }
0x1651   :  { %6804 = vmatpush1.msra.mxu1 %v15083_v28  ;;  %6875 = vmatpush1.msra.mxu0 %v15084_v15  ;;  %v15102_v28 = vld [vmem:[#allocation58_spill] sm:$0xff] }
0x1652   :  { %6805 = vmatprep.subr.mxu1 %v15085_v32  ;;  %6876 = vmatprep.subr.mxu0 %v15086_v39 }
0x1653   :  { %6806 = vmatpush1.msra.mxu1 %v15087_v46  ;;  %6877 = vmatpush1.msra.mxu0 %v15088_v23  ;;  %v15098_v23 = vld [vmem:[#allocation75_spill] sm:$0xff] }
0x1654   :  { %6807 = vmatprep.subr.mxu1 %v15089_v62  ;;  %6878 = vmatprep.subr.mxu0 %v15090_v9  ;;  %v15099_v62 = vld [vmem:[#allocation76_spill] sm:$0xff] }
0x1655   :  { %6808 = vmatpush1.msra.mxu1 %v15091_v54  ;;  %6879 = vmatpush1.msra.mxu0 %v15092_v38  ;;  %v15100_v54 = vld [vmem:[#allocation55_spill] sm:$0xff] }
0x1656   :  { %6809 = vmatprep.subr.mxu1 %v15093_v49  ;;  %6880 = vmatprep.subr.mxu0 %v15094_v55  ;;  %v15101_v49 = vld [vmem:[#allocation54_spill] sm:$0xff] }
0x1657   :  { %6810 = vmatpush1.msra.mxu1 %v15095_v10  ;;  %6843 = vmatprep.mubr.f32.mxu1 %v15096_v25 }
0x1658   :  { %6881 = vmatpush1.msra.mxu0 %v15097_v53  ;;  %6914 = vmatprep.mubr.f32.mxu0 %v15096_v25 }
0x1659   :  { %6949 = vmatprep.subr.mxu1 %v15098_v23  ;;  %7020 = vmatprep.subr.mxu0 %v15099_v62 }
0x16f8   :  { %v6675_v9 = vpop.f32.mrf.mxu1  ;;  %v6746_v55 = vpop.f32.mrf.mxu0 }
0x16f9   :  { %v6751_v46 = vadd.f32 %v6675_v9, %v15100_v54  ;;  %v6753_v25 = vadd.f32 %v6746_v55, %v15103_v7  ;;  %v15110_v55 = vld [vmem:[#allocation45_spill] sm:$0xff] }
0x16fa   :  { %v6677_v38 = vpop.f32.mrf.mxu1  ;;  %v6748_v15 = vpop.f32.mrf.mxu0 }
0x16fb   :  { %v7645_v39 = vmul.f32 -1.442695, %v6751_v46  ;;  %v6752_v32 = vadd.f32 %v6677_v38, %v15101_v49  ;;  %v6754_v53 = vadd.f32 %v6748_v15, %v15102_v28 }
0x16fd   :  { %8987 = vpow2.f32 %v7645_v39  ;;  %v7646_v10 = vmul.f32 -1.442695, %v6752_v32  ;;  %v7647_v6 = vmul.f32 -1.442695, %v6754_v53 }
0x16ff   :  { %8989 = vpow2.f32 %v7646_v10 }
0x1700   :  { %8991 = vtanh.f32 %v6753_v25  ;;  %v15111_v25 = vld [vmem:[#allocation48_spill] sm:$0xff] }
0x1701   :  { %8993 = vpow2.f32 %v7647_v6  ;;  %v15107_v6 = vld [vmem:[#allocation80_spill] sm:$0xff] }
0x170a   :  { %v8988_v23 = vpop.eup %8987 }
0x170b   :  { %v6758_v18 = vadd.f32 1.0, %v8988_v23  ;;  %v15108_v23 = vld [vmem:[#allocation78_spill] sm:$0xff] }
0x170c   :  { %v8990_v62 = vpop.eup %8989 }
0x170d   :  { %8995 = vrcp.f32 %v6758_v18  ;;  %v6764_v9 = vadd.f32 1.0, %v8990_v62  ;;  %v8992_v46 = vpop.eup %8991  ;;  %v15106_v18 = vld [vmem:[#allocation79_spill] sm:$0xff]  ;;  %v15109_v62 = vld [vmem:[#allocation46_spill] sm:$0xff] }
0x170e   :  { %v8994_v54 = vpop.eup %8993 }
0x170f   :  { %8997 = vrcp.f32 %v6764_v9  ;;  %v6771_v49 = vadd.f32 1.0, %v8994_v54  ;;  %v15112_v9 = vld [vmem:[#allocation47_spill] sm:$0xff]  ;;  %v15114_v54 = vld [vmem:[#allocation49_spill] sm:$0xff] }
0x1711   :  { %8999 = vrcp.f32 %v6771_v49  ;;  %v15118_v49 = vld [vmem:[#allocation13_spill] sm:$0xff] }
0x171a   :  { %v8996_v39 = vpop.eup %8995 }
0x171b   :  { %v6775_v38 = vmul.f32 %v8996_v39, %v8992_v46  ;;  %v15113_v46 = vld [vmem:[#allocation50_spill] sm:$0xff]  ;;  %v15115_v39 = vld [vmem:[#allocation89_spill] sm:$0xff] }
0x171c   :  { %v8998_v32 = vpop.eup %8997 }
0x171d   :  { %v6774_v10 = vmul.f32 %v8998_v32, %v13667_v50  ;;  %v15105_v50 = vld [vmem:[#allocation77_spill] sm:$0xff]  ;;  %v15117_v32 = vld [vmem:[#allocation14_spill] sm:$0xff] }
0x171e   :  { %v9000_v53 = vpop.eup %8999 }
0x171f   :  { %v13745_v28 = vadd.f32 %v6775_v38, %v6774_v10  ;;  %v15116_v38 = vld [vmem:[#allocation12_spill] sm:$0xff]  ;;  %v15119_v10 = vld [vmem:[#allocation81_spill] sm:$0xff] }
0x1721   :  { %9001 = vtanh.f32 %v13745_v28 }
0x172e   :  { %v9002_v7 = vpop.eup %9001 }
0x172f   :  { %v13748_v15 = vmul.f32 %v9002_v7, %v9000_v53  ;;  %v15120_v53 = vld [vmem:[#allocation83_spill] sm:$0xff]  ;;  %v15121_v7 = vmov 0.0  }
0x1731   :  { %15104 = vst [vmem:[#allocation56_spill] sm:$0xff] %v13748_v15  ;;  %6844 = vmatmul.mubr.f32.vlgmr.msra.gmra.mxu1 %v13748_v15  ;;  %6915 = vmatmul.mubr.f32.vlgmr.msra.gmra.mxu0 %v13748_v15  ;;  %v15122_v15 = vld [vmem:[#allocation84_spill] sm:$0xff] }
0x1732   :  { %6950 = vmatpush1.msra.mxu1 %v13390_v4  ;;  %7021 = vmatpush1.msra.mxu0 %v13393_v2 }
0x1733   :  { %6951 = vmatprep.subr.mxu1 %v13396_v14  ;;  %7022 = vmatprep.subr.mxu0 %v13399_v17 }
0x1734   :  { %6952 = vmatpush1.msra.mxu1 %v13402_v1  ;;  %7023 = vmatpush1.msra.mxu0 %v13489_v34 }
0x1735   :  { %6953 = vmatprep.subr.mxu1 %v13406_v22  ;;  %7024 = vmatprep.subr.mxu0 %v13493_v19 }
0x1736   :  { %6954 = vmatpush1.msra.mxu1 %v13496_v40  ;;  %7025 = vmatpush1.msra.mxu0 %v13499_v37 }
0x1737   :  { %6955 = vmatprep.subr.mxu1 %v13502_v42  ;;  %7026 = vmatprep.subr.mxu0 %v13505_v5 }
0x1738   :  { %6956 = vmatpush1.msra.mxu1 %v13508_v61  ;;  %7027 = vmatpush1.msra.mxu0 %v13511_v26 }
0x1739   :  { %6957 = vmatprep.subr.mxu1 %v13514_v51  ;;  %7028 = vmatprep.subr.mxu0 %v13517_v44 }
0x173a   :  { %6958 = vmatpush1.msra.mxu1 %v13520_v12  ;;  %7029 = vmatpush1.msra.mxu0 %v13523_v24 }
0x173b   :  { %6959 = vmatprep.subr.mxu1 %v13526_v56  ;;  %7030 = vmatprep.subr.mxu0 %v13529_v59 }
0x173c   :  { %6960 = vmatpush1.msra.mxu1 %v13532_v43  ;;  %7031 = vmatpush1.msra.mxu0 %v13535_v29 }
0x173d   :  { %6961 = vmatprep.subr.mxu1 %v13538_v63  ;;  %7032 = vmatprep.subr.mxu0 %v13541_v60 }
0x173e   :  { %6962 = vmatpush1.msra.mxu1 %v13544_v58  ;;  %7033 = vmatpush1.msra.mxu0 %v13547_v13 }
0x173f   :  { %6963 = vmatprep.subr.mxu1 %v13550_v21  ;;  %7034 = vmatprep.subr.mxu0 %v13553_v52 }
0x1740   :  { %6964 = vmatpush1.msra.mxu1 %v13556_v20  ;;  %7035 = vmatpush1.msra.mxu0 %v13559_v57 }
0x1741   :  { %6965 = vmatprep.subr.mxu1 %v13562_v31  ;;  %7036 = vmatprep.subr.mxu0 %v13565_v33 }
0x1742   :  { %6966 = vmatpush1.msra.mxu1 %v13568_v11  ;;  %7037 = vmatpush1.msra.mxu0 %v13571_v8 }
0x1743   :  { %6967 = vmatprep.subr.mxu1 %v13574_v3  ;;  %7038 = vmatprep.subr.mxu0 %v13577_v27 }
0x1744   :  { %6968 = vmatpush1.msra.mxu1 %v13580_v30  ;;  %7039 = vmatpush1.msra.mxu0 %v13583_v36 }
0x1745   :  { %6969 = vmatprep.subr.mxu1 %v13586_v45  ;;  %7040 = vmatprep.subr.mxu0 %v13589_v35 }
0x1746   :  { %6970 = vmatpush1.msra.mxu1 %v13592_v48  ;;  %7041 = vmatpush1.msra.mxu0 %v13595_v0 }
0x1747   :  { %6971 = vmatprep.subr.mxu1 %v13598_v41  ;;  %7042 = vmatprep.subr.mxu0 %v13601_v47 }
0x1748   :  { %6972 = vmatpush1.msra.mxu1 %v13604_v16  ;;  %7043 = vmatpush1.msra.mxu0 %v15105_v50 }
0x1749   :  { %6973 = vmatprep.subr.mxu1 %v15106_v18  ;;  %7044 = vmatprep.subr.mxu0 %v15107_v6  ;;  %v15128_v6 = vld [vmem:[#allocation85_spill] sm:$0xff] }
0x174a   :  { %6974 = vmatpush1.msra.mxu1 %v15108_v23  ;;  %7045 = vmatpush1.msra.mxu0 %v15109_v62  ;;  %v15127_v23 = vld [vmem:[#allocation88_spill] sm:$0xff] }
0x174b   :  { %6975 = vmatprep.subr.mxu1 %v15110_v55  ;;  %7046 = vmatprep.subr.mxu0 %v15111_v25 }
0x174c   :  { %6976 = vmatpush1.msra.mxu1 %v15112_v9  ;;  %7047 = vmatpush1.msra.mxu0 %v15113_v46  ;;  %v15123_v46 = vld [vmem:[#allocation75_spill] sm:$0xff] }
0x174d   :  { %6977 = vmatprep.subr.mxu1 %v15114_v54  ;;  %7048 = vmatprep.subr.mxu0 %v15115_v39  ;;  %v15124_v54 = vld [vmem:[#allocation76_spill] sm:$0xff] }
0x174e   :  { %6978 = vmatpush1.msra.mxu1 %v15116_v38  ;;  %7049 = vmatpush1.msra.mxu0 %v15117_v32  ;;  %v15125_v38 = vld [vmem:[#allocation87_spill] sm:$0xff] }
0x174f   :  { %6979 = vmatprep.subr.mxu1 %v15118_v49  ;;  %7050 = vmatprep.subr.mxu0 %v15119_v10  ;;  %v15126_v49 = vld [vmem:[#allocation86_spill] sm:$0xff] }
0x1750   :  { %6980 = vmatpush1.msra.mxu1 %v15120_v53  ;;  %7013 = vmatprep.mubr.f32.mxu1 %v15121_v7 }
0x1751   :  { %7051 = vmatpush1.msra.mxu0 %v15122_v15  ;;  %7084 = vmatprep.mubr.f32.mxu0 %v15121_v7 }
0x1752   :  { %7119 = vmatprep.subr.mxu1 %v15123_v46  ;;  %7190 = vmatprep.subr.mxu0 %v15124_v54 }
0x17f1   :  { %v6845_v39 = vpop.f32.mrf.mxu1  ;;  %v6916_v10 = vpop.f32.mrf.mxu0 }
0x17f2   :  { %v6921_v9 = vadd.f32 %v6845_v39, %v15125_v38  ;;  %v6923_v7 = vadd.f32 %v6916_v10, %v15128_v6 }
0x17f3   :  { %v6847_v32 = vpop.f32.mrf.mxu1  ;;  %v6918_v62 = vpop.f32.mrf.mxu0 }
0x17f4   :  { %v7648_v25 = vmul.f32 -1.442695, %v6921_v9  ;;  %v6922_v55 = vadd.f32 %v6847_v32, %v15126_v49  ;;  %v6924_v15 = vadd.f32 %v6918_v62, %v15127_v23 }
0x17f6   :  { %9003 = vpow2.f32 %v7648_v25  ;;  %v7649_v53 = vmul.f32 -1.442695, %v6922_v55  ;;  %v7650_v18 = vmul.f32 -1.442695, %v6924_v15 }
0x17f8   :  { %9005 = vpow2.f32 %v7649_v53 }
0x17f9   :  { %9007 = vtanh.f32 %v6923_v7  ;;  %v7303_v7 = vld [vmem:[%s14067_s20 + $0x70] sm:$0xff] }
0x17fa   :  { %9009 = vpow2.f32 %v7650_v18 }
0x1803   :  { %v9004_v46 = vpop.eup %9003 }
0x1804   :  { %v6928_v50 = vadd.f32 1.0, %v9004_v46  ;;  %v15151_v46 = vld [vmem:[#allocation90_spill] sm:$0xff] }
0x1805   :  { %v9006_v54 = vpop.eup %9005 }
0x1806   :  { %9011 = vrcp.f32 %v6928_v50  ;;  %v6934_v39 = vadd.f32 1.0, %v9006_v54  ;;  %v9008_v9 = vpop.eup %9007  ;;  %v7302_v54 = vld [vmem:[%s14067_s20 + $0x68] sm:$0xff] }
0x1807   :  { %v9010_v38 = vpop.eup %9009 }
0x1808   :  { %9013 = vrcp.f32 %v6934_v39  ;;  %v6941_v49 = vadd.f32 1.0, %v9010_v38  ;;  %v7301_v39 = vld [vmem:[%s14067_s20 + $0x60] sm:$0xff]  ;;  %v7299_v38 = vld [vmem:[%s14067_s20 + $0x50] sm:$0xff] }
0x180a   :  { %9015 = vrcp.f32 %v6941_v49  ;;  %v7295_v49 = vld [vmem:[%s14067_s20 + $0x30] sm:$0xff] }
0x1813   :  { %v9012_v25 = vpop.eup %9011 }
0x1814   :  { %v6945_v32 = vmul.f32 %v9012_v25, %v9008_v9  ;;  %v7300_v9 = vld [vmem:[%s14067_s20 + $0x58] sm:$0xff]  ;;  %v7298_v25 = vld [vmem:[%s14067_s20 + $0x48] sm:$0xff] }
0x1815   :  { %v9014_v55 = vpop.eup %9013 }
0x1816   :  { %v6944_v53 = vmul.f32 %v9014_v55, %v13745_v28  ;;  %v7296_v55 = vld [vmem:[%s14067_s20 + $0x38] sm:$0xff] }
0x1817   :  { %v9016_v15 = vpop.eup %9015 }
0x1818   :  { %v13823_v23 = vadd.f32 %v6945_v32, %v6944_v53  ;;  %v7297_v32 = vld [vmem:[%s14067_s20 + $0x40] sm:$0xff]  ;;  %v7294_v53 = vld [vmem:[%s14067_s20 + $0x28] sm:$0xff] }
0x181a   :  { %9017 = vtanh.f32 %v13823_v23 }
0x1827   :  { %v9018_v6 = vpop.eup %9017 }
0x1828   :  { %v13826_v62 = vmul.f32 %v9018_v6, %v9016_v15  ;;  %v7292_v15 = vld [vmem:[%s14067_s20 + $0x18] sm:$0xff]  ;;  %v7291_v6 = vld [vmem:[%s14067_s20 + $0x10] sm:$0xff] }
0x182a   :  { %7014 = vmatmul.mubr.f32.vlgmr.msra.gmra.mxu1 %v13826_v62  ;;  %7085 = vmatmul.mubr.f32.vlgmr.msra.gmra.mxu0 %v13826_v62 }
0x182b   :  { %7120 = vmatpush1.msra.mxu1 %v13390_v4  ;;  %7191 = vmatpush1.msra.mxu0 %v13393_v2  ;;  %v15129_v4 = vld [vmem:[#allocation77_spill] sm:$0xff]  ;;  %v15130_v2 = vld [vmem:[#allocation79_spill] sm:$0xff] }
0x182c   :  { %7121 = vmatprep.subr.mxu1 %v13396_v14  ;;  %7192 = vmatprep.subr.mxu0 %v13399_v17  ;;  %v15131_v14 = vld [vmem:[#allocation80_spill] sm:$0xff]  ;;  %v15132_v17 = vld [vmem:[#allocation78_spill] sm:$0xff] }
0x182d   :  { %7122 = vmatpush1.msra.mxu1 %v13402_v1  ;;  %7193 = vmatpush1.msra.mxu0 %v13489_v34  ;;  %v15133_v1 = vld [vmem:[#allocation46_spill] sm:$0xff]  ;;  %v15135_v34 = vld [vmem:[#allocation48_spill] sm:$0xff] }
0x182e   :  { %7123 = vmatprep.subr.mxu1 %v13406_v22  ;;  %7194 = vmatprep.subr.mxu0 %v13493_v19  ;;  %v15134_v22 = vld [vmem:[#allocation45_spill] sm:$0xff]  ;;  %v15136_v19 = vld [vmem:[#allocation47_spill] sm:$0xff] }
0x182f   :  { %7124 = vmatpush1.msra.mxu1 %v13496_v40  ;;  %7195 = vmatpush1.msra.mxu0 %v13499_v37  ;;  %v15137_v40 = vld [vmem:[#allocation50_spill] sm:$0xff]  ;;  %v15138_v37 = vld [vmem:[#allocation49_spill] sm:$0xff] }
0x1830   :  { %7125 = vmatprep.subr.mxu1 %v13502_v42  ;;  %7196 = vmatprep.subr.mxu0 %v13505_v5  ;;  %v15139_v42 = vld [vmem:[#allocation89_spill] sm:$0xff]  ;;  %v15140_v5 = vld [vmem:[#allocation12_spill] sm:$0xff] }
0x1831   :  { %7126 = vmatpush1.msra.mxu1 %v13508_v61  ;;  %7197 = vmatpush1.msra.mxu0 %v13511_v26  ;;  %v15141_v61 = vld [vmem:[#allocation14_spill] sm:$0xff]  ;;  %v15142_v26 = vld [vmem:[#allocation13_spill] sm:$0xff] }
0x1832   :  { %7127 = vmatprep.subr.mxu1 %v13514_v51  ;;  %7198 = vmatprep.subr.mxu0 %v13517_v44  ;;  %v15143_v51 = vld [vmem:[#allocation81_spill] sm:$0xff]  ;;  %v15144_v44 = vld [vmem:[#allocation83_spill] sm:$0xff] }
0x1833   :  { %7128 = vmatpush1.msra.mxu1 %v13520_v12  ;;  %7199 = vmatpush1.msra.mxu0 %v13523_v24  ;;  %v15145_v12 = vmov 0.0   ;;  %v15146_v24 = vld [vmem:[#allocation84_spill] sm:$0xff] }
0x1834   :  { %7129 = vmatprep.subr.mxu1 %v13526_v56  ;;  %7200 = vmatprep.subr.mxu0 %v13529_v59  ;;  %v7304_v56 = vld [vmem:[%s14067_s20 + $0x78] sm:$0xff] }
0x1835   :  { %7130 = vmatpush1.msra.mxu1 %v13532_v43  ;;  %7201 = vmatpush1.msra.mxu0 %v13535_v29  ;;  %v15147_v43 = vld [vmem:[#allocation15_spill] sm:$0xff] }
0x1836   :  { %7131 = vmatprep.subr.mxu1 %v13538_v63  ;;  %7202 = vmatprep.subr.mxu0 %v13541_v60 }
0x1837   :  { %7132 = vmatpush1.msra.mxu1 %v13544_v58  ;;  %7203 = vmatpush1.msra.mxu0 %v13547_v13  ;;  %v15148_v58 = vld [vmem:[#allocation65_spill] sm:$0xff] }
0x1838   :  { %7133 = vmatprep.subr.mxu1 %v13550_v21  ;;  %7204 = vmatprep.subr.mxu0 %v13553_v52 }
0x1839   :  { %7134 = vmatpush1.msra.mxu1 %v13556_v20  ;;  %7205 = vmatpush1.msra.mxu0 %v13559_v57  ;;  %v15149_v57 = vld [vmem:[#allocation70_spill] sm:$0xff] }
0x183a   :  { %7135 = vmatprep.subr.mxu1 %v13562_v31  ;;  %7206 = vmatprep.subr.mxu0 %v13565_v33  ;;  %v15150_v33 = vld [vmem:[#allocation31_spill] sm:$0xff] }
0x183b   :  { %7136 = vmatpush1.msra.mxu1 %v13568_v11  ;;  %7207 = vmatpush1.msra.mxu0 %v13571_v8 }
0x183c   :  { %7137 = vmatprep.subr.mxu1 %v13574_v3  ;;  %7208 = vmatprep.subr.mxu0 %v13577_v27 }
0x183d   :  { %7138 = vmatpush1.msra.mxu1 %v13580_v30  ;;  %7209 = vmatpush1.msra.mxu0 %v13583_v36 }
0x183e   :  { %7139 = vmatprep.subr.mxu1 %v13586_v45  ;;  %7210 = vmatprep.subr.mxu0 %v13589_v35 }
0x183f   :  { %7140 = vmatpush1.msra.mxu1 %v13592_v48  ;;  %7211 = vmatpush1.msra.mxu0 %v13595_v0 }
0x1840   :  { %7141 = vmatprep.subr.mxu1 %v13598_v41  ;;  %7212 = vmatprep.subr.mxu0 %v13601_v47 }
0x1841   :  { %7142 = vmatpush1.msra.mxu1 %v13604_v16  ;;  %7213 = vmatpush1.msra.mxu0 %v15129_v4  ;;  %v7290_v4 = vld [vmem:[%s14067_s20 + $0x8] sm:$0xff] }
0x1842   :  { %7143 = vmatprep.subr.mxu1 %v15130_v2  ;;  %7214 = vmatprep.subr.mxu0 %v15131_v14  ;;  %v7289_v2 = vld [vmem:[%s14067_s20] sm:$0xff]  ;;  %v15152_v14 = vld [vmem:[#allocation73_spill] sm:$0xff] }
0x1843   :  { %7144 = vmatpush1.msra.mxu1 %v15132_v17  ;;  %7215 = vmatpush1.msra.mxu0 %v15133_v1  ;;  %v15153_v17 = vld [vmem:[#allocation74_spill] sm:$0xff] }
0x1844   :  { %7145 = vmatprep.subr.mxu1 %v15134_v22  ;;  %7216 = vmatprep.subr.mxu0 %v15135_v34  ;;  %v15154_v1 = vld [vmem:[#allocation82_spill] sm:$0xff]  ;;  %v15155_v22 = vld [vmem:[#allocation56_spill] sm:$0xff]  ;;  %v7440_v34 = vld [vmem:[%s14069_s22 + $0x78] sm:$0xff] }
0x1845   :  { %7146 = vmatpush1.msra.mxu1 %v15136_v19  ;;  %7217 = vmatpush1.msra.mxu0 %v15137_v40  ;;  %v7439_v19 = vld [vmem:[%s14069_s22 + $0x70] sm:$0xff]  ;;  %v7438_v40 = vld [vmem:[%s14069_s22 + $0x68] sm:$0xff] }
0x1846   :  { %7147 = vmatprep.subr.mxu1 %v15138_v37  ;;  %7218 = vmatprep.subr.mxu0 %v15139_v42  ;;  %v7436_v37 = vld [vmem:[%s14069_s22 + $0x58] sm:$0xff]  ;;  %v7435_v42 = vld [vmem:[%s14069_s22 + $0x50] sm:$0xff] }
0x1847   :  { %7148 = vmatpush1.msra.mxu1 %v15140_v5  ;;  %7219 = vmatpush1.msra.mxu0 %v15141_v61  ;;  %v7434_v5 = vld [vmem:[%s14069_s22 + $0x48] sm:$0xff]  ;;  %v7433_v61 = vld [vmem:[%s14069_s22 + $0x40] sm:$0xff] }
0x1848   :  { %7149 = vmatprep.subr.mxu1 %v15142_v26  ;;  %7220 = vmatprep.subr.mxu0 %v15143_v51  ;;  %v7432_v26 = vld [vmem:[%s14069_s22 + $0x38] sm:$0xff]  ;;  %v7431_v51 = vld [vmem:[%s14069_s22 + $0x30] sm:$0xff] }
0x1849   :  { %7150 = vmatpush1.msra.mxu1 %v15144_v44  ;;  %7183 = vmatprep.mubr.f32.mxu1 %v15145_v12  ;;  %v7430_v44 = vld [vmem:[%s14069_s22 + $0x28] sm:$0xff] }
0x184a   :  { %7221 = vmatpush1.msra.mxu0 %v15146_v24  ;;  %7254 = vmatprep.mubr.f32.mxu0 %v15145_v12  ;;  %v7429_v12 = vld [vmem:[%s14069_s22 + $0x20] sm:$0xff]  ;;  %v7428_v24 = vld [vmem:[%s14069_s22 + $0x18] sm:$0xff] }
0x184b   :  { %8617 = vmatprep.subr.mxu1 %v7304_v56  ;;  %8661 = vmatprep.subr.mxu0 %v7440_v34 }
0x18ea   :  { %v7015_v59 = vpop.f32.mrf.mxu1  ;;  %v7086_v21 = vpop.f32.mrf.mxu0 }
0x18eb   :  { %v7091_v29 = vadd.f32 %v7015_v59, %v15147_v43  ;;  %v7093_v11 = vadd.f32 %v7086_v21, %v15150_v33  ;;  %v7426_v59 = vld [vmem:[%s14069_s22 + $0x8] sm:$0xff]  ;;  %v7425_v43 = vld [vmem:[%s14069_s22] sm:$0xff]  ;;  %v15158_v33 = vld [vmem:[#allocation51_spill] sm:$0xff] }
0x18ec   :  { %v7017_v63 = vpop.f32.mrf.mxu1  ;;  %v7088_v20 = vpop.f32.mrf.mxu0  ;;  %v15157_v21 = vld [vmem:[#allocation52_spill] sm:$0xff] }
0x18ed   :  { %v7651_v60 = vmul.f32 -1.442695, %v7091_v29  ;;  %v7092_v13 = vadd.f32 %v7017_v63, %v15148_v58  ;;  %v7094_v31 = vadd.f32 %v7088_v20, %v15149_v57  ;;  %v15156_v63 = vld [vmem:[#allocation43_spill] sm:$0xff] }
0x18ef   :  { %9019 = vpow2.f32 %v7651_v60  ;;  %v7652_v52 = vmul.f32 -1.442695, %v7092_v13  ;;  %v7653_v8 = vmul.f32 -1.442695, %v7094_v31 }
0x18f1   :  { %9021 = vpow2.f32 %v7652_v52 }
0x18f2   :  { %9023 = vtanh.f32 %v7093_v11 }
0x18f3   :  { %9025 = vpow2.f32 %v7653_v8 }
0x18fc   :  { %v9020_v3 = vpop.eup %9019 }
0x18fd   :  { %v7098_v27 = vadd.f32 1.0, %v9020_v3  ;;  %v15159_v3 = vld [vmem:[#allocation63_spill] sm:$0xff] }
0x18fe   :  { %v9022_v30 = vpop.eup %9021 }
0x18ff   :  { %9027 = vrcp.f32 %v7098_v27  ;;  %v7104_v36 = vadd.f32 1.0, %v9022_v30  ;;  %v9024_v45 = vpop.eup %9023 }
0x1900   :  { %v9026_v35 = vpop.eup %9025 }
0x1901   :  { %9029 = vrcp.f32 %v7104_v36  ;;  %v7111_v47 = vadd.f32 1.0, %v9026_v35 }
0x1903   :  { %9031 = vrcp.f32 %v7111_v47 }
0x190c   :  { %v9028_v48 = vpop.eup %9027 }
0x190d   :  { %v7115_v0 = vmul.f32 %v9028_v48, %v9024_v45  ;;  %v7657_v48 = vld [vmem:[%s14068_s21] ss:$0 sm:$0xff] }
0x190e   :  { %v9030_v41 = vpop.eup %9029 }
0x190f   :  { %v7114_v16 = vmul.f32 %v9030_v41, %v13823_v23  ;;  %v7293_v23 = vld [vmem:[%s14067_s20 + $0x20] sm:$0xff] }
0x1910   :  { %v9032_v50 = vpop.eup %9031 }
0x1911   :  { %v13902_v28 = vadd.f32 %v7115_v0, %v7114_v16 }
0x1913   :  { %9033 = vtanh.f32 %v13902_v28 }
0x1920   :  { %v9034_v18 = vpop.eup %9033 }
0x1921   :  { %v7118_v10 = vmul.f32 %v9034_v18, %v9032_v50 }
0x1923   :  { %7184 = vmatmul.mubr.f32.vlgmr.msra.gmra.mxu1 %v7118_v10  ;;  %7255 = vmatmul.mubr.f32.vlgmr.msra.gmra.mxu0 %v7118_v10 }
0x1924   :  { %8618 = vmatpush3.msra.mxu1 %v7304_v56  ;;  %8649 = vmatprep.mubr.f32.mxu1 %v15151_v46  ;;  %v7427_v56 = vld [vmem:[%s14069_s22 + $0x10] sm:$0xff] }
0x1925   :  { %8619 = vmatprep.subr.mxu1 %v7303_v7  ;;  %8662 = vmatpush3.msra.mxu0 %v7440_v34 }
0x1926   :  { %8620 = vmatpush3.msra.mxu1 %v7303_v7  ;;  %8663 = vmatprep.subr.mxu0 %v7439_v19 }
0x1927   :  { %8621 = vmatprep.subr.mxu1 %v7302_v54  ;;  %8664 = vmatpush3.msra.mxu0 %v7439_v19  ;;  %v7658_v19 = vld [vmem:[%s14070_s23] ss:$0 sm:$0xff] }
0x1928   :  { %8622 = vmatpush3.msra.mxu1 %v7302_v54  ;;  %8665 = vmatprep.subr.mxu0 %v7438_v40 }
0x1929   :  { %8623 = vmatprep.subr.mxu1 %v7301_v39  ;;  %8666 = vmatpush3.msra.mxu0 %v7438_v40 }
0x192a   :  { %8624 = vmatpush3.msra.mxu1 %v7301_v39 }
0x192b   :  { %8625 = vmatprep.subr.mxu1 %v7300_v9 }
0x192c   :  { %8626 = vmatpush3.msra.mxu1 %v7300_v9 }
0x192d   :  { %8627 = vmatprep.subr.mxu1 %v7299_v38 }
0x192e   :  { %8628 = vmatpush3.msra.mxu1 %v7299_v38 }
0x192f   :  { %8629 = vmatprep.subr.mxu1 %v7298_v25 }
0x1930   :  { %8630 = vmatpush3.msra.mxu1 %v7298_v25 }
0x1931   :  { %8631 = vmatprep.subr.mxu1 %v7297_v32 }
0x1932   :  { %8632 = vmatpush3.msra.mxu1 %v7297_v32 }
0x1933   :  { %8633 = vmatprep.subr.mxu1 %v7296_v55 }
0x1934   :  { %8634 = vmatpush3.msra.mxu1 %v7296_v55 }
0x1935   :  { %8635 = vmatprep.subr.mxu1 %v7295_v49 }
0x1936   :  { %8636 = vmatpush3.msra.mxu1 %v7295_v49 }
0x1937   :  { %8637 = vmatprep.subr.mxu1 %v7294_v53 }
0x1938   :  { %8638 = vmatpush3.msra.mxu1 %v7294_v53 }
0x1939   :  { %8639 = vmatprep.subr.mxu1 %v7293_v23 }
0x193a   :  { %8640 = vmatpush3.msra.mxu1 %v7293_v23 }
0x193b   :  { %8641 = vmatprep.subr.mxu1 %v7292_v15 }
0x193c   :  { %8642 = vmatpush3.msra.mxu1 %v7292_v15 }
0x193d   :  { %8643 = vmatprep.subr.mxu1 %v7291_v6 }
0x193e   :  { %8644 = vmatpush3.msra.mxu1 %v7291_v6 }
0x193f   :  { %8645 = vmatprep.subr.mxu1 %v7290_v4 }
0x1940   :  { %8646 = vmatpush3.msra.mxu1 %v7290_v4 }
0x1941   :  { %8647 = vmatprep.subr.mxu1 %v7289_v2 }
0x1942   :  { %8648 = vmatpush3.msra.mxu1 %v7289_v2 }
0x1943   :  { %8650 = vmatmul.mubr.f32.vlgmr.msra.gmra.mxu1 %v15152_v14 }
0x1944   :  { %8652 = vmatprep.mubr.f32.mxu1 %v15153_v17 }
0x1947   :  { %8653 = vmatmul.mubr.f32.gmra.mxu1 %v15154_v1 }
0x1948   :  { %8655 = vmatprep.mubr.f32.mxu1 %v15155_v22 }
0x194b   :  { %8656 = vmatmul.mubr.f32.gmra.mxu1 %v13826_v62  ;;  %v7437_v62 = vld [vmem:[%s14069_s22 + $0x60] sm:$0xff] }
0x194c   :  { %8658 = vmatprep.mubr.f32.mxu1 %v7118_v10  ;;  %8667 = vmatprep.subr.mxu0 %v7437_v62 }
0x194d   :  { %8668 = vmatpush3.msra.mxu0 %v7437_v62 }
0x194e   :  { %8669 = vmatprep.subr.mxu0 %v7436_v37 }
0x194f   :  { %8670 = vmatpush3.msra.mxu0 %v7436_v37 }
0x1950   :  { %8671 = vmatprep.subr.mxu0 %v7435_v42 }
0x1951   :  { %8672 = vmatpush3.msra.mxu0 %v7435_v42 }
0x1952   :  { %8673 = vmatprep.subr.mxu0 %v7434_v5 }
0x1953   :  { %8674 = vmatpush3.msra.mxu0 %v7434_v5 }
0x1954   :  { %8675 = vmatprep.subr.mxu0 %v7433_v61 }
0x1955   :  { %8676 = vmatpush3.msra.mxu0 %v7433_v61 }
0x1956   :  { %8677 = vmatprep.subr.mxu0 %v7432_v26 }
0x1957   :  { %8678 = vmatpush3.msra.mxu0 %v7432_v26 }
0x1958   :  { %8679 = vmatprep.subr.mxu0 %v7431_v51 }
0x1959   :  { %8680 = vmatpush3.msra.mxu0 %v7431_v51 }
0x195a   :  { %8681 = vmatprep.subr.mxu0 %v7430_v44 }
0x195b   :  { %8682 = vmatpush3.msra.mxu0 %v7430_v44 }
0x195c   :  { %8683 = vmatprep.subr.mxu0 %v7429_v12 }
0x195d   :  { %8684 = vmatpush3.msra.mxu0 %v7429_v12 }
0x195e   :  { %8685 = vmatprep.subr.mxu0 %v7428_v24 }
0x195f   :  { %8686 = vmatpush3.msra.mxu0 %v7428_v24 }
0x1960   :  { %8687 = vmatprep.subr.mxu0 %v7427_v56 }
0x1961   :  { %8688 = vmatpush3.msra.mxu0 %v7427_v56 }
0x1962   :  { %8689 = vmatprep.subr.mxu0 %v7426_v59 }
0x1963   :  { %8690 = vmatpush3.msra.mxu0 %v7426_v59 }
0x1964   :  { %8691 = vmatprep.subr.mxu0 %v7425_v43 }
0x1965   :  { %8692 = vmatpush3.msra.mxu0 %v7425_v43 }
0x19e3   :  { %v7185_v29 = vpop.f32.mrf.mxu1  ;;  %v7256_v20 = vpop.f32.mrf.mxu0 }
0x19e4   :  { %v7261_v60 = vadd.f32 %v7185_v29, %v15156_v63  ;;  %v7263_v27 = vadd.f32 %v7256_v20, %v15159_v3 }
0x19e5   :  { %v7187_v58 = vpop.f32.mrf.mxu1  ;;  %v7258_v31 = vpop.f32.mrf.mxu0 }
0x19e6   :  { %v7654_v13 = vmul.f32 -1.442695, %v7261_v60  ;;  %v7262_v52 = vadd.f32 %v7187_v58, %v15157_v21  ;;  %v7264_v11 = vadd.f32 %v7258_v31, %v15158_v33 }
0x19e8   :  { %9035 = vpow2.f32 %v7654_v13  ;;  %v7655_v57 = vmul.f32 -1.442695, %v7262_v52  ;;  %v7656_v8 = vmul.f32 -1.442695, %v7264_v11 }
0x19ea   :  { %9037 = vpow2.f32 %v7655_v57 }
0x19eb   :  { %9039 = vpow2.f32 %v7656_v8 }
0x19ec   :  { %9041 = vtanh.f32 %v7263_v27 }
0x19f5   :  { %v9036_v30 = vpop.eup %9035 }
0x19f6   :  { %v7268_v36 = vadd.f32 1.0, %v9036_v30 }
0x19f7   :  { %v9038_v45 = vpop.eup %9037 }
0x19f8   :  { %9043 = vrcp.f32 %v7268_v36  ;;  %v7274_v35 = vadd.f32 1.0, %v9038_v45  ;;  %v9040_v0 = vpop.eup %9039 }
0x19f9   :  { %v9042_v47 = vpop.eup %9041  ;;  %v7281_v7 = vadd.f32 1.0, %v9040_v0 }
0x19fa   :  { %9045 = vrcp.f32 %v7274_v35 }
0x1a03   :  { %v8651_v41 = vpop.f32.mrf.mxu1 }
0x1a04   :  { %v7384_v50 = vadd.f32 %v8651_v41, %v7657_v48 }
0x1a05   :  { %v9044_v16 = vpop.eup %9043  ;;  %v7378_v18 = vpop.f32.mrf.mxu1 }
0x1a06   :  { %v7285_v10 = vmul.f32 %v9044_v16, %v9042_v47  ;;  %v7379_v46 = vadd.f32 %v7657_v48, %v7378_v18 }
0x1a07   :  { %v9046_v54 = vpop.eup %9045  ;;  %v8654_v39 = vpop.f32.mrf.mxu1 }
0x1a08   :  { %v7284_v9 = vmul.f32 %v9046_v54, %v13902_v28  ;;  %9047 = vtanh.f32 %v7379_v46  ;;  %v7394_v38 = vadd.f32 %v8654_v39, %v7657_v48 }
0x1a09   :  { %9049 = vtanh.f32 %v7384_v50  ;;  %v7388_v25 = vpop.f32.mrf.mxu1 }
0x1a0a   :  { %9051 = vrcp.f32 %v7281_v7  ;;  %v7389_v32 = vadd.f32 %v7657_v48, %v7388_v25  ;;  %v7286_v55 = vadd.f32 %v7285_v10, %v7284_v9 }
0x1a0b   :  { %9053 = vtanh.f32 %v7394_v38  ;;  %v8657_v49 = vpop.f32.mrf.mxu1 }
0x1a0c   :  { %9055 = vtanh.f32 %v7389_v32  ;;  %v7404_v53 = vadd.f32 %v8657_v49, %v7657_v48 }
0x1a0d   :  { %v7398_v23 = vpop.f32.mrf.mxu1  ;;  %9057 = vtanh.f32 %v7286_v55 }
0x1a0e   :  { %v7399_v15 = vadd.f32 %v7657_v48, %v7398_v23 }
0x1a10   :  { %9059 = vtanh.f32 %v7399_v15 }
0x1a11   :  { %9061 = vtanh.f32 %v7404_v53 }
0x1a15   :  { %v9048_v6 = vpop.eup %9047 }
0x1a16   :  { %v9050_v4 = vpop.eup %9049  ;;  %8693 = vmatprep.mubr.f32.mxu0 %v9048_v6 }
0x1a17   :  { %v9052_v28 = vpop.eup %9051  ;;  %8694 = vmatmul.mubr.f32.vlgmr.msra.gmra.mxu0 %v9050_v4 }
0x1a18   :  { %v9054_v2 = vpop.eup %9053 }
0x1a19   :  { %v9056_v14 = vpop.eup %9055 }
0x1a1a   :  { %v9058_v17 = vpop.eup %9057  ;;  %8696 = vmatprep.mubr.f32.mxu0 %v9056_v14 }
0x1a1b   :  { %8697 = vmatmul.mubr.f32.gmra.mxu0 %v9054_v2  ;;  %v7288_v1 = vmul.f32 %v9058_v17, %v9052_v28 }
0x1a1d   :  { %v9060_v22 = vpop.eup %9059  ;;  %8659 = vmatmul.mubr.f32.gmra.mxu1 %v7288_v1 }
0x1a1e   :  { %v9062_v34 = vpop.eup %9061  ;;  %8699 = vmatprep.mubr.f32.mxu0 %v9060_v22 }
0x1a1f   :  { %8700 = vmatmul.mubr.f32.gmra.mxu0 %v9062_v34 }
0x1ad7   :  { %v8695_v40 = vpop.f32.mrf.mxu0 }
0x1ad8   :  { %v7520_v62 = vadd.f32 %v8695_v40, %v7658_v19 }
0x1ad9   :  { %v7514_v37 = vpop.f32.mrf.mxu0 }
0x1ada   :  { %7554 = vst.msk [vmem:[%s14071_s24 + $0x8] sm:$0xff] %vm153_vm0, %v7520_v62  ;;  %v7515_v42 = vadd.f32 %v7658_v19, %v7514_v37 }
0x1adb   :  { %v8698_v5 = vpop.f32.mrf.mxu0 }
0x1adc   :  { %7553 = vst.msk [vmem:[%s14071_s24] sm:$0xff] %vm153_vm0, %v7515_v42  ;;  %v7530_v61 = vadd.f32 %v8698_v5, %v7658_v19 }
0x1add   :  { %v8660_v26 = vpop.f32.mrf.mxu1  ;;  %v7524_v51 = vpop.f32.mrf.mxu0 }
0x1ade   :  { %7556 = vst.msk [vmem:[%s14071_s24 + $0x18] sm:$0xff] %vm153_vm0, %v7530_v61  ;;  %v7525_v44 = vadd.f32 %v7658_v19, %v7524_v51  ;;  %v7414_v12 = vadd.f32 %v8660_v26, %v7657_v48 }
0x1adf   :  { %v7408_v24 = vpop.f32.mrf.mxu1  ;;  %v8701_v56 = vpop.f32.mrf.mxu0 }
0x1ae0   :  { %7555 = vst.msk [vmem:[%s14071_s24 + $0x10] sm:$0xff] %vm153_vm0, %v7525_v44  ;;  %v7409_v59 = vadd.f32 %v7657_v48, %v7408_v24  ;;  %v7540_v43 = vadd.f32 %v8701_v56, %v7658_v19 }
0x1ae1   :  { %v7534_v29 = vpop.f32.mrf.mxu0 }
0x1ae2   :  { %9063 = vtanh.f32 %v7409_v59  ;;  %7558 = vst.msk [vmem:[%s14071_s24 + $0x28] sm:$0xff] %vm153_vm0, %v7540_v43  ;;  %v7535_v63 = vadd.f32 %v7658_v19, %v7534_v29 }
0x1ae3   :  { %9065 = vtanh.f32 %v7414_v12 }
0x1ae4   :  { %7557 = vst.msk [vmem:[%s14071_s24 + $0x20] sm:$0xff] %vm153_vm0, %v7535_v63 }
0x1aef   :  { %v9064_v60 = vpop.eup %9063 }
0x1af0   :  { %v9066_v58 = vpop.eup %9065  ;;  %8702 = vmatprep.mubr.f32.mxu0 %v9064_v60 }
0x1af1   :  { %8703 = vmatmul.mubr.f32.gmra.mxu0 %v9066_v58 }
0x1bb1   :  { %v8704_v13 = vpop.f32.mrf.mxu0 }
0x1bb2   :  { %v7550_v21 = vadd.f32 %v8704_v13, %v7658_v19 }
0x1bb3   :  { %v7544_v52 = vpop.f32.mrf.mxu0 }
0x1bb4   :  { %7560 = vst.msk [vmem:[%s14071_s24 + $0x38] sm:$0xff] %vm153_vm0, %v7550_v21  ;;  %v7545_v20 = vadd.f32 %v7658_v19, %v7544_v52 }
0x1bb6   :  { %7559 = vst.msk [vmem:[%s14071_s24 + $0x30] sm:$0xff] %vm153_vm0, %v7545_v20 }
0x1bb7   :  { %7577 = vsyncpa [#allocation3], 1 }
0x1bb8   :  { %7578 = vsyncpa [#allocation5], 1 }
0x1bb9   :  { %7579 = vsyncpa [#allocation8], 1 }

</bundles_post_ra>
